<compile_context>
chip_gen: v6e
topology: v6e:2x2x1
jax: 0.10.0
libtpu: 0.0.40
codegen_flags: <defaults>
</compile_context>

<pallas_src>
import jax
import jax.numpy as jnp
import numpy as np
from jax.experimental import pallas as pl
from jax.experimental.pallas import tpu as pltpu

GP = 128                      # padded width of one gate group (one full vreg)
_GATE_ORDER = (0, 1, 3, 2)    # target [i, f, o, g] from PyTorch's [i, f, g, o]


# --------------------------------------------------------------------------
# One-time host-side weight packing (NOT on the per-call path).
# --------------------------------------------------------------------------
def _pack_gate_cols(w, H, sub):
    """(rows, 4H) -> (rows, 4*GP); gate order [i,f,o,g]; each H-wide gate
    block placed at lanes [sub, sub+H) of its own 128-lane group."""
    rows = w.shape[0]
    out = jnp.zeros((rows, 4 * GP), jnp.float32)
    for gi, si in enumerate(_GATE_ORDER):
        out = out.at[:, gi * GP + sub: gi * GP + sub + H].set(
            w[:, si * H:(si + 1) * H].astype(jnp.float32))
    return out


def _pad_rows(w, row_off, total_rows=GP):
    out = jnp.zeros((total_rows, w.shape[1]), jnp.float32)
    return out.at[row_off:row_off + w.shape[0], :].set(w)


def preprocess_params(params):
    """Pack weights into the padded/fused layouts.  Call once at load time."""
    p1, p2 = params["lstm1"], params["lstm2"]
    H = p1["whh_f"].shape[0]
    pk = {}
    # ---- layer 1 (fwd lanes [0:H), bwd lanes [H:2H) of each gate group) ----
    pk["w1f_in"] = _pack_gate_cols(p1["wih_f"], H, 0)            # (D, 4*GP)
    pk["w1b_in"] = _pack_gate_cols(p1["wih_b"], H, H)
    pk["b1f"] = _pack_gate_cols(p1["b_f"], H, 0)                 # (1, 4*GP)
    pk["b1b"] = _pack_gate_cols(p1["b_b"], H, H)
    pk["w1_hh"] = (_pad_rows(_pack_gate_cols(p1["whh_f"], H, 0), 0)
                   + _pad_rows(_pack_gate_cols(p1["whh_b"], H, H), H))  # block-diag (GP, 4*GP)
    # ---- layer 2, forward chain (outputs in lanes [0:H)) ----
    pk["w2fA"] = _pad_rows(_pack_gate_cols(p2["wih_f"][:H], H, 0), 0)   # fwd-feature rows
    pk["w2fB"] = _pad_rows(_pack_gate_cols(p2["wih_f"][H:], H, 0), H)   # bwd-feature rows
    pk["b2f"] = _pack_gate_cols(p2["b_f"], H, 0)
    pk["w2f_hh"] = _pad_rows(_pack_gate_cols(p2["whh_f"], H, 0), 0)
    # ---- layer 2, backward single step (outputs in lanes [H:2H)) ----
    pk["w2bA"] = _pad_rows(_pack_gate_cols(p2["wih_b"][:H], H, H), 0)
    pk["w2bB"] = _pad_rows(_pack_gate_cols(p2["wih_b"][H:], H, H), H)
    pk["b2b"] = _pack_gate_cols(p2["b_b"], H, H)
    # ---- FC head: pad fc1 rows so `last` (B, GP) feeds it with one dot ----
    pk["fc1_w"] = _pad_rows(params["fc1_w"].astype(jnp.float32), 0)     # (GP, FC)
    pk["fc1_b"] = params["fc1_b"].astype(jnp.float32)
    pk["fc2_w"] = params["fc2_w"].astype(jnp.float32)
    pk["fc2_b"] = params["fc2_b"].astype(jnp.float32)
    return pk


# --------------------------------------------------------------------------
# The fused kernel.
# --------------------------------------------------------------------------
def _decoder_kernel(x_ref,                                        # (B, T, D)
                    w1f_in_ref, b1f_ref, w1b_in_ref, b1b_ref, w1_hh_ref,
                    w2fA_ref, w2fB_ref, b2f_ref, w2f_hh_ref,
                    w2bA_ref, w2bB_ref, b2b_ref,
                    fc1w_ref, fc1b_ref, fc2w_ref, fc2b_ref,
                    out_ref):                                      # (B, C)
    B, T, _ = x_ref.shape
    f32 = jnp.float32

    def lstm_act(gates, c_prev):
        # gate groups (each one full 128-lane vreg): [i, f, o, g]
        sg = jax.nn.sigmoid(gates[:, :3 * GP])          # 1 EUP push
        i = sg[:, 0 * GP:1 * GP]
        f = sg[:, 1 * GP:2 * GP]
        o = sg[:, 2 * GP:3 * GP]
        g = jnp.tanh(gates[:, 3 * GP:4 * GP])           # 1 EUP push
        c = f * c_prev + i * g
        h = o * jnp.tanh(c)                              # 1 EUP push
        return h, c

    zeros = jnp.zeros((B, GP), f32)

    # ---- Layer 1: input projections for every timestep (off the h-chain) ---
    gx1f = [jnp.dot(x_ref[:, t, :].astype(f32), w1f_in_ref[...],
                    preferred_element_type=f32) + b1f_ref[...] for t in range(T)]
    gx1b = [jnp.dot(x_ref[:, t, :].astype(f32), w1b_in_ref[...],
                    preferred_element_type=f32) + b1b_ref[...] for t in range(T)]

    # ---- Layer 1: fused fwd+bwd recurrence (one matmul per step) -----------
    h, c = zeros, zeros
    hs = []
    for t in range(T):
        gates = (gx1f[t] + gx1b[T - 1 - t]
                 + jnp.dot(h, w1_hh_ref[...], preferred_element_type=f32))
        h, c = lstm_act(gates, c)
        hs.append(h)       # lanes [0:H) = fwd@t,  lanes [H:2H) = bwd@(T-1-t)

    # ---- Layer 2: input projections from layer-1 outputs (off the chain) ---
    gA = [jnp.dot(hs[t], w2fA_ref[...], preferred_element_type=f32)
          + b2f_ref[...] for t in range(T)]
    gB = [jnp.dot(hs[t], w2fB_ref[...], preferred_element_type=f32)
          for t in range(T)]

    # ---- Layer 2: forward recurrence (only final hidden state needed) ------
    h2, c2 = zeros, zeros
    for t in range(T):
        gates = (gA[t] + gB[T - 1 - t]
                 + jnp.dot(h2, w2f_hh_ref[...], preferred_element_type=f32))
        h2, c2 = lstm_act(gates, c2)

    # ---- Layer 2: backward output at last timestep = one step from zeros ---
    gates_b = (jnp.dot(hs[T - 1], w2bA_ref[...], preferred_element_type=f32)
               + jnp.dot(hs[0], w2bB_ref[...], preferred_element_type=f32)
               + b2b_ref[...])
    h2b, _ = lstm_act(gates_b, zeros)

    # ---- FC head: fc1 -> relu -> (dropout == identity in eval) -> fc2 ------
    # TODO(synk): F.dropout(p=0.3) acts only in training mode; eval-mode
    # (identity) semantics are implemented here.
    last = h2 + h2b        # fwd in lanes [0:H), bwd in lanes [H:2H); rest 0
    hid = jnp.maximum(
        jnp.dot(last, fc1w_ref[...], preferred_element_type=f32) + fc1b_ref[...],
        0.0)
    out_ref[...] = (jnp.dot(hid, fc2w_ref[...], preferred_element_type=f32)
                    + fc2b_ref[...]).astype(out_ref.dtype)


# --------------------------------------------------------------------------
# Per-call wrapper: just the pallas_call (weights already packed).
# --------------------------------------------------------------------------
def decoder_rnn_forward(x_btd, pk):
    B, T, D = x_btd.shape
    C = pk["fc2_w"].shape[1]
    vmem = pl.BlockSpec(memory_space=pltpu.MemorySpace.VMEM)
    args = (x_btd.astype(jnp.float32),
            pk["w1f_in"], pk["b1f"], pk["w1b_in"], pk["b1b"], pk["w1_hh"],
            pk["w2fA"], pk["w2fB"], pk["b2f"], pk["w2f_hh"],
            pk["w2bA"], pk["w2bB"], pk["b2b"],
            pk["fc1_w"], pk["fc1_b"], pk["fc2_w"], pk["fc2_b"])
    return pl.pallas_call(
        _decoder_kernel,
        out_shape=jax.ShapeDtypeStruct((B, C), jnp.float32),
        in_specs=[vmem] * len(args),
        out_specs=vmem,
    )(*args)


# --------------------------------------------------------------------------
# Pure-JAX reference (full bidirectional scans) for correctness check.
# --------------------------------------------------------------------------
def _lstm_dir_ref(x_tbd, w_ih, w_hh, b, reverse):
    T, B, _ = x_tbd.shape
    H = w_hh.shape[0]
    xs = x_tbd[::-1] if reverse else x_tbd

    def step(carry, x_t):
        h, c = carry
        gates = x_t @ w_ih + h @ w_hh + b
        i, f, g, o = jnp.split(gates, 4, axis=-1)
        i, f, o = jax.nn.sigmoid(i), jax.nn.sigmoid(f), jax.nn.sigmoid(o)
        g = jnp.tanh(g)
        c = f * c + i * g
        h = o * jnp.tanh(c)
        return (h, c), h

    init = (jnp.zeros((B, H), jnp.float32), jnp.zeros((B, H), jnp.float32))
    _, ys = jax.lax.scan(step, init, xs)
    return ys[::-1] if reverse else ys


def decoder_rnn_reference(x_btd, params):
    x_tbd = jnp.transpose(x_btd, (1, 0, 2)).astype(jnp.float32)

    def layer(x, p):
        f = _lstm_dir_ref(x, p["wih_f"], p["whh_f"], p["b_f"], reverse=False)
        b = _lstm_dir_ref(x, p["wih_b"], p["whh_b"], p["b_b"], reverse=True)
        return jnp.concatenate([f, b], axis=-1)

    y2 = layer(layer(x_tbd, params["lstm1"]), params["lstm2"])
    last = y2[-1]
    h = jnp.maximum(last @ params["fc1_w"] + params["fc1_b"], 0.0)
    return h @ params["fc2_w"] + params["fc2_b"]


# --------------------------------------------------------------------------
# Deterministic parameter construction.
# --------------------------------------------------------------------------
def make_params(key, D, H, FC, C):
    def lstm_params(key, in_dim):
        ks = jax.random.split(key, 6)
        s = 0.1
        return {
            "wih_f": s * jax.random.normal(ks[0], (in_dim, 4 * H), jnp.float32),
            "whh_f": s * jax.random.normal(ks[1], (H, 4 * H), jnp.float32),
            "b_f":   s * jax.random.normal(ks[2], (1, 4 * H), jnp.float32),
            "wih_b": s * jax.random.normal(ks[3], (in_dim, 4 * H), jnp.float32),
            "whh_b": s * jax.random.normal(ks[4], (H, 4 * H), jnp.float32),
            "b_b":   s * jax.random.normal(ks[5], (1, 4 * H), jnp.float32),
        }

    k1, k2, k3, k4, k5, k6 = jax.random.split(key, 6)
    return {
        "lstm1": lstm_params(k1, D),
        "lstm2": lstm_params(k2, 2 * H),
        "fc1_w": 0.1 * jax.random.normal(k3, (2 * H, FC), jnp.float32),
        "fc1_b": 0.1 * jax.random.normal(k4, (1, FC), jnp.float32),
        "fc2_w": 0.1 * jax.random.normal(k5, (FC, C), jnp.float32),
        "fc2_b": 0.1 * jax.random.normal(k6, (1, C), jnp.float32),
    }


if __name__ == "__main__":
    # Small shapes consistent with the module's forward:
    # batch=2, seq=8, con_embed_dim=32, h_RNN=32, h_FC_dim=16, num_classes=8
    B, T, D, H, FC, C = 2, 8, 32, 32, 16, 8
    key = jax.random.PRNGKey(0)
    kx, kp = jax.random.split(key)
    x = jax.random.normal(kx, (B, T, D), jnp.float32)   # (batch, seq, feat), batch_first
    params = make_params(kp, D, H, FC, C)

    # One-time weight packing (parameter-load time, not per-call).
    packed = jax.tree_util.tree_map(jax.block_until_ready, preprocess_params(params))

    out = decoder_rnn_forward(x, packed)
    out = jax.block_until_ready(out)

    ref = decoder_rnn_reference(x, params)
    np.testing.assert_allclose(np.asarray(out), np.asarray(ref),
                               rtol=1e-4, atol=1e-4)
    assert out.shape == (B, C)
    print("KERNEL_OK")
</pallas_src>

<mosaic_0001>
module attributes {stable_mosaic.version = 11 : i64} {
  func.func @_decoder_kernel(%arg0: memref<2x8x32xf32, #tpu.memory_space<vmem>>, %arg1: memref<32x512xf32, #tpu.memory_space<vmem>>, %arg2: memref<1x512xf32, #tpu.memory_space<vmem>>, %arg3: memref<32x512xf32, #tpu.memory_space<vmem>>, %arg4: memref<1x512xf32, #tpu.memory_space<vmem>>, %arg5: memref<128x512xf32, #tpu.memory_space<vmem>>, %arg6: memref<128x512xf32, #tpu.memory_space<vmem>>, %arg7: memref<128x512xf32, #tpu.memory_space<vmem>>, %arg8: memref<1x512xf32, #tpu.memory_space<vmem>>, %arg9: memref<128x512xf32, #tpu.memory_space<vmem>>, %arg10: memref<128x512xf32, #tpu.memory_space<vmem>>, %arg11: memref<128x512xf32, #tpu.memory_space<vmem>>, %arg12: memref<1x512xf32, #tpu.memory_space<vmem>>, %arg13: memref<128x16xf32, #tpu.memory_space<vmem>>, %arg14: memref<1x16xf32, #tpu.memory_space<vmem>>, %arg15: memref<16x8xf32, #tpu.memory_space<vmem>>, %arg16: memref<1x8xf32, #tpu.memory_space<vmem>>, %arg17: memref<2x8xf32, #tpu.memory_space<vmem>>) attributes {dimension_semantics = [], scalar_prefetch = 0 : i64, scratch_operands = 0 : i64, tpu.core_type = #tpu.core_type<tc>} {
    %cst = arith.constant 0.000000e+00 : f32
    %0 = vector.broadcast %cst : f32 to vector<2x128xf32>
    %c0 = arith.constant 0 : index
    %c0_0 = arith.constant 0 : index
    %c0_1 = arith.constant 0 : index
    %1 = vector.load %arg0[%c0, %c0_0, %c0_1] : memref<2x8x32xf32, #tpu.memory_space<vmem>>, vector<2x1x32xf32>
    %2 = vector.shape_cast %1 : vector<2x1x32xf32> to vector<2x32xf32>
    %c0_2 = arith.constant 0 : index
    %c0_3 = arith.constant 0 : index
    %3 = vector.load %arg1[%c0_2, %c0_3] : memref<32x512xf32, #tpu.memory_space<vmem>>, vector<32x512xf32>
    %cst_4 = arith.constant dense<0.000000e+00> : vector<2x512xf32>
    %4 = tpu.matmul %2, %3, %cst_4 {dimension_numbers = #tpu.dot_dimension_numbers<[1], [0], [0], [1], [0, 0, 1, 1], [], []>} : vector<2x32xf32>, vector<32x512xf32>, vector<2x512xf32> -> vector<2x512xf32>
    %c0_5 = arith.constant 0 : index
    %c0_6 = arith.constant 0 : index
    %5 = vector.load %arg2[%c0_5, %c0_6] : memref<1x512xf32, #tpu.memory_space<vmem>>, vector<1x512xf32>
    %6 = vector.broadcast %5 : vector<1x512xf32> to vector<2x512xf32>
    %7 = arith.addf %4, %6 : vector<2x512xf32>
    %c0_7 = arith.constant 0 : index
    %c1 = arith.constant 1 : index
    %c0_8 = arith.constant 0 : index
    %8 = vector.load %arg0[%c0_7, %c1, %c0_8] : memref<2x8x32xf32, #tpu.memory_space<vmem>>, vector<2x1x32xf32>
    %9 = vector.shape_cast %8 : vector<2x1x32xf32> to vector<2x32xf32>
    %c0_9 = arith.constant 0 : index
    %c0_10 = arith.constant 0 : index
    %10 = vector.load %arg1[%c0_9, %c0_10] : memref<32x512xf32, #tpu.memory_space<vmem>>, vector<32x512xf32>
    %cst_11 = arith.constant dense<0.000000e+00> : vector<2x512xf32>
    %11 = tpu.matmul %9, %10, %cst_11 {dimension_numbers = #tpu.dot_dimension_numbers<[1], [0], [0], [1], [0, 0, 1, 1], [], []>} : vector<2x32xf32>, vector<32x512xf32>, vector<2x512xf32> -> vector<2x512xf32>
    %c0_12 = arith.constant 0 : index
    %c0_13 = arith.constant 0 : index
    %12 = vector.load %arg2[%c0_12, %c0_13] : memref<1x512xf32, #tpu.memory_space<vmem>>, vector<1x512xf32>
    %13 = vector.broadcast %12 : vector<1x512xf32> to vector<2x512xf32>
    %14 = arith.addf %11, %13 : vector<2x512xf32>
    %c0_14 = arith.constant 0 : index
    %c2 = arith.constant 2 : index
    %c0_15 = arith.constant 0 : index
    %15 = vector.load %arg0[%c0_14, %c2, %c0_15] : memref<2x8x32xf32, #tpu.memory_space<vmem>>, vector<2x1x32xf32>
    %16 = vector.shape_cast %15 : vector<2x1x32xf32> to vector<2x32xf32>
    %c0_16 = arith.constant 0 : index
    %c0_17 = arith.constant 0 : index
    %17 = vector.load %arg1[%c0_16, %c0_17] : memref<32x512xf32, #tpu.memory_space<vmem>>, vector<32x512xf32>
    %cst_18 = arith.constant dense<0.000000e+00> : vector<2x512xf32>
    %18 = tpu.matmul %16, %17, %cst_18 {dimension_numbers = #tpu.dot_dimension_numbers<[1], [0], [0], [1], [0, 0, 1, 1], [], []>} : vector<2x32xf32>, vector<32x512xf32>, vector<2x512xf32> -> vector<2x512xf32>
    %c0_19 = arith.constant 0 : index
    %c0_20 = arith.constant 0 : index
    %19 = vector.load %arg2[%c0_19, %c0_20] : memref<1x512xf32, #tpu.memory_space<vmem>>, vector<1x512xf32>
    %20 = vector.broadcast %19 : vector<1x512xf32> to vector<2x512xf32>
    %21 = arith.addf %18, %20 : vector<2x512xf32>
    %c0_21 = arith.constant 0 : index
    %c3 = arith.constant 3 : index
    %c0_22 = arith.constant 0 : index
    %22 = vector.load %arg0[%c0_21, %c3, %c0_22] : memref<2x8x32xf32, #tpu.memory_space<vmem>>, vector<2x1x32xf32>
    %23 = vector.shape_cast %22 : vector<2x1x32xf32> to vector<2x32xf32>
    %c0_23 = arith.constant 0 : index
    %c0_24 = arith.constant 0 : index
    %24 = vector.load %arg1[%c0_23, %c0_24] : memref<32x512xf32, #tpu.memory_space<vmem>>, vector<32x512xf32>
    %cst_25 = arith.constant dense<0.000000e+00> : vector<2x512xf32>
    %25 = tpu.matmul %23, %24, %cst_25 {dimension_numbers = #tpu.dot_dimension_numbers<[1], [0], [0], [1], [0, 0, 1, 1], [], []>} : vector<2x32xf32>, vector<32x512xf32>, vector<2x512xf32> -> vector<2x512xf32>
    %c0_26 = arith.constant 0 : index
    %c0_27 = arith.constant 0 : index
    %26 = vector.load %arg2[%c0_26, %c0_27] : memref<1x512xf32, #tpu.memory_space<vmem>>, vector<1x512xf32>
    %27 = vector.broadcast %26 : vector<1x512xf32> to vector<2x512xf32>
    %28 = arith.addf %25, %27 : vector<2x512xf32>
    %c0_28 = arith.constant 0 : index
    %c4 = arith.constant 4 : index
    %c0_29 = arith.constant 0 : index
    %29 = vector.load %arg0[%c0_28, %c4, %c0_29] : memref<2x8x32xf32, #tpu.memory_space<vmem>>, vector<2x1x32xf32>
    %30 = vector.shape_cast %29 : vector<2x1x32xf32> to vector<2x32xf32>
    %c0_30 = arith.constant 0 : index
    %c0_31 = arith.constant 0 : index
    %31 = vector.load %arg1[%c0_30, %c0_31] : memref<32x512xf32, #tpu.memory_space<vmem>>, vector<32x512xf32>
    %cst_32 = arith.constant dense<0.000000e+00> : vector<2x512xf32>
    %32 = tpu.matmul %30, %31, %cst_32 {dimension_numbers = #tpu.dot_dimension_numbers<[1], [0], [0], [1], [0, 0, 1, 1], [], []>} : vector<2x32xf32>, vector<32x512xf32>, vector<2x512xf32> -> vector<2x512xf32>
    %c0_33 = arith.constant 0 : index
    %c0_34 = arith.constant 0 : index
    %33 = vector.load %arg2[%c0_33, %c0_34] : memref<1x512xf32, #tpu.memory_space<vmem>>, vector<1x512xf32>
    %34 = vector.broadcast %33 : vector<1x512xf32> to vector<2x512xf32>
    %35 = arith.addf %32, %34 : vector<2x512xf32>
    %c0_35 = arith.constant 0 : index
    %c5 = arith.constant 5 : index
    %c0_36 = arith.constant 0 : index
    %36 = vector.load %arg0[%c0_35, %c5, %c0_36] : memref<2x8x32xf32, #tpu.memory_space<vmem>>, vector<2x1x32xf32>
    %37 = vector.shape_cast %36 : vector<2x1x32xf32> to vector<2x32xf32>
    %c0_37 = arith.constant 0 : index
    %c0_38 = arith.constant 0 : index
    %38 = vector.load %arg1[%c0_37, %c0_38] : memref<32x512xf32, #tpu.memory_space<vmem>>, vector<32x512xf32>
    %cst_39 = arith.constant dense<0.000000e+00> : vector<2x512xf32>
    %39 = tpu.matmul %37, %38, %cst_39 {dimension_numbers = #tpu.dot_dimension_numbers<[1], [0], [0], [1], [0, 0, 1, 1], [], []>} : vector<2x32xf32>, vector<32x512xf32>, vector<2x512xf32> -> vector<2x512xf32>
    %c0_40 = arith.constant 0 : index
    %c0_41 = arith.constant 0 : index
    %40 = vector.load %arg2[%c0_40, %c0_41] : memref<1x512xf32, #tpu.memory_space<vmem>>, vector<1x512xf32>
    %41 = vector.broadcast %40 : vector<1x512xf32> to vector<2x512xf32>
    %42 = arith.addf %39, %41 : vector<2x512xf32>
    %c0_42 = arith.constant 0 : index
    %c6 = arith.constant 6 : index
    %c0_43 = arith.constant 0 : index
    %43 = vector.load %arg0[%c0_42, %c6, %c0_43] : memref<2x8x32xf32, #tpu.memory_space<vmem>>, vector<2x1x32xf32>
    %44 = vector.shape_cast %43 : vector<2x1x32xf32> to vector<2x32xf32>
    %c0_44 = arith.constant 0 : index
    %c0_45 = arith.constant 0 : index
    %45 = vector.load %arg1[%c0_44, %c0_45] : memref<32x512xf32, #tpu.memory_space<vmem>>, vector<32x512xf32>
    %cst_46 = arith.constant dense<0.000000e+00> : vector<2x512xf32>
    %46 = tpu.matmul %44, %45, %cst_46 {dimension_numbers = #tpu.dot_dimension_numbers<[1], [0], [0], [1], [0, 0, 1, 1], [], []>} : vector<2x32xf32>, vector<32x512xf32>, vector<2x512xf32> -> vector<2x512xf32>
    %c0_47 = arith.constant 0 : index
    %c0_48 = arith.constant 0 : index
    %47 = vector.load %arg2[%c0_47, %c0_48] : memref<1x512xf32, #tpu.memory_space<vmem>>, vector<1x512xf32>
    %48 = vector.broadcast %47 : vector<1x512xf32> to vector<2x512xf32>
    %49 = arith.addf %46, %48 : vector<2x512xf32>
    %c0_49 = arith.constant 0 : index
    %c7 = arith.constant 7 : index
    %c0_50 = arith.constant 0 : index
    %50 = vector.load %arg0[%c0_49, %c7, %c0_50] : memref<2x8x32xf32, #tpu.memory_space<vmem>>, vector<2x1x32xf32>
    %51 = vector.shape_cast %50 : vector<2x1x32xf32> to vector<2x32xf32>
    %c0_51 = arith.constant 0 : index
    %c0_52 = arith.constant 0 : index
    %52 = vector.load %arg1[%c0_51, %c0_52] : memref<32x512xf32, #tpu.memory_space<vmem>>, vector<32x512xf32>
    %cst_53 = arith.constant dense<0.000000e+00> : vector<2x512xf32>
    %53 = tpu.matmul %51, %52, %cst_53 {dimension_numbers = #tpu.dot_dimension_numbers<[1], [0], [0], [1], [0, 0, 1, 1], [], []>} : vector<2x32xf32>, vector<32x512xf32>, vector<2x512xf32> -> vector<2x512xf32>
    %c0_54 = arith.constant 0 : index
    %c0_55 = arith.constant 0 : index
    %54 = vector.load %arg2[%c0_54, %c0_55] : memref<1x512xf32, #tpu.memory_space<vmem>>, vector<1x512xf32>
    %55 = vector.broadcast %54 : vector<1x512xf32> to vector<2x512xf32>
    %56 = arith.addf %53, %55 : vector<2x512xf32>
    %c0_56 = arith.constant 0 : index
    %c0_57 = arith.constant 0 : index
    %c0_58 = arith.constant 0 : index
    %57 = vector.load %arg0[%c0_56, %c0_57, %c0_58] : memref<2x8x32xf32, #tpu.memory_space<vmem>>, vector<2x1x32xf32>
    %58 = vector.shape_cast %57 : vector<2x1x32xf32> to vector<2x32xf32>
    %c0_59 = arith.constant 0 : index
    %c0_60 = arith.constant 0 : index
    %59 = vector.load %arg3[%c0_59, %c0_60] : memref<32x512xf32, #tpu.memory_space<vmem>>, vector<32x512xf32>
    %cst_61 = arith.constant dense<0.000000e+00> : vector<2x512xf32>
    %60 = tpu.matmul %58, %59, %cst_61 {dimension_numbers = #tpu.dot_dimension_numbers<[1], [0], [0], [1], [0, 0, 1, 1], [], []>} : vector<2x32xf32>, vector<32x512xf32>, vector<2x512xf32> -> vector<2x512xf32>
    %c0_62 = arith.constant 0 : index
    %c0_63 = arith.constant 0 : index
    %61 = vector.load %arg4[%c0_62, %c0_63] : memref<1x512xf32, #tpu.memory_space<vmem>>, vector<1x512xf32>
    %62 = vector.broadcast %61 : vector<1x512xf32> to vector<2x512xf32>
    %63 = arith.addf %60, %62 : vector<2x512xf32>
    %c0_64 = arith.constant 0 : index
    %c1_65 = arith.constant 1 : index
    %c0_66 = arith.constant 0 : index
    %64 = vector.load %arg0[%c0_64, %c1_65, %c0_66] : memref<2x8x32xf32, #tpu.memory_space<vmem>>, vector<2x1x32xf32>
    %65 = vector.shape_cast %64 : vector<2x1x32xf32> to vector<2x32xf32>
    %c0_67 = arith.constant 0 : index
    %c0_68 = arith.constant 0 : index
    %66 = vector.load %arg3[%c0_67, %c0_68] : memref<32x512xf32, #tpu.memory_space<vmem>>, vector<32x512xf32>
    %cst_69 = arith.constant dense<0.000000e+00> : vector<2x512xf32>
    %67 = tpu.matmul %65, %66, %cst_69 {dimension_numbers = #tpu.dot_dimension_numbers<[1], [0], [0], [1], [0, 0, 1, 1], [], []>} : vector<2x32xf32>, vector<32x512xf32>, vector<2x512xf32> -> vector<2x512xf32>
    %c0_70 = arith.constant 0 : index
    %c0_71 = arith.constant 0 : index
    %68 = vector.load %arg4[%c0_70, %c0_71] : memref<1x512xf32, #tpu.memory_space<vmem>>, vector<1x512xf32>
    %69 = vector.broadcast %68 : vector<1x512xf32> to vector<2x512xf32>
    %70 = arith.addf %67, %69 : vector<2x512xf32>
    %c0_72 = arith.constant 0 : index
    %c2_73 = arith.constant 2 : index
    %c0_74 = arith.constant 0 : index
    %71 = vector.load %arg0[%c0_72, %c2_73, %c0_74] : memref<2x8x32xf32, #tpu.memory_space<vmem>>, vector<2x1x32xf32>
    %72 = vector.shape_cast %71 : vector<2x1x32xf32> to vector<2x32xf32>
    %c0_75 = arith.constant 0 : index
    %c0_76 = arith.constant 0 : index
    %73 = vector.load %arg3[%c0_75, %c0_76] : memref<32x512xf32, #tpu.memory_space<vmem>>, vector<32x512xf32>
    %cst_77 = arith.constant dense<0.000000e+00> : vector<2x512xf32>
    %74 = tpu.matmul %72, %73, %cst_77 {dimension_numbers = #tpu.dot_dimension_numbers<[1], [0], [0], [1], [0, 0, 1, 1], [], []>} : vector<2x32xf32>, vector<32x512xf32>, vector<2x512xf32> -> vector<2x512xf32>
    %c0_78 = arith.constant 0 : index
    %c0_79 = arith.constant 0 : index
    %75 = vector.load %arg4[%c0_78, %c0_79] : memref<1x512xf32, #tpu.memory_space<vmem>>, vector<1x512xf32>
    %76 = vector.broadcast %75 : vector<1x512xf32> to vector<2x512xf32>
    %77 = arith.addf %74, %76 : vector<2x512xf32>
    %c0_80 = arith.constant 0 : index
    %c3_81 = arith.constant 3 : index
    %c0_82 = arith.constant 0 : index
    %78 = vector.load %arg0[%c0_80, %c3_81, %c0_82] : memref<2x8x32xf32, #tpu.memory_space<vmem>>, vector<2x1x32xf32>
    %79 = vector.shape_cast %78 : vector<2x1x32xf32> to vector<2x32xf32>
    %c0_83 = arith.constant 0 : index
    %c0_84 = arith.constant 0 : index
    %80 = vector.load %arg3[%c0_83, %c0_84] : memref<32x512xf32, #tpu.memory_space<vmem>>, vector<32x512xf32>
    %cst_85 = arith.constant dense<0.000000e+00> : vector<2x512xf32>
    %81 = tpu.matmul %79, %80, %cst_85 {dimension_numbers = #tpu.dot_dimension_numbers<[1], [0], [0], [1], [0, 0, 1, 1], [], []>} : vector<2x32xf32>, vector<32x512xf32>, vector<2x512xf32> -> vector<2x512xf32>
    %c0_86 = arith.constant 0 : index
    %c0_87 = arith.constant 0 : index
    %82 = vector.load %arg4[%c0_86, %c0_87] : memref<1x512xf32, #tpu.memory_space<vmem>>, vector<1x512xf32>
    %83 = vector.broadcast %82 : vector<1x512xf32> to vector<2x512xf32>
    %84 = arith.addf %81, %83 : vector<2x512xf32>
    %c0_88 = arith.constant 0 : index
    %c4_89 = arith.constant 4 : index
    %c0_90 = arith.constant 0 : index
    %85 = vector.load %arg0[%c0_88, %c4_89, %c0_90] : memref<2x8x32xf32, #tpu.memory_space<vmem>>, vector<2x1x32xf32>
    %86 = vector.shape_cast %85 : vector<2x1x32xf32> to vector<2x32xf32>
    %c0_91 = arith.constant 0 : index
    %c0_92 = arith.constant 0 : index
    %87 = vector.load %arg3[%c0_91, %c0_92] : memref<32x512xf32, #tpu.memory_space<vmem>>, vector<32x512xf32>
    %cst_93 = arith.constant dense<0.000000e+00> : vector<2x512xf32>
    %88 = tpu.matmul %86, %87, %cst_93 {dimension_numbers = #tpu.dot_dimension_numbers<[1], [0], [0], [1], [0, 0, 1, 1], [], []>} : vector<2x32xf32>, vector<32x512xf32>, vector<2x512xf32> -> vector<2x512xf32>
    %c0_94 = arith.constant 0 : index
    %c0_95 = arith.constant 0 : index
    %89 = vector.load %arg4[%c0_94, %c0_95] : memref<1x512xf32, #tpu.memory_space<vmem>>, vector<1x512xf32>
    %90 = vector.broadcast %89 : vector<1x512xf32> to vector<2x512xf32>
    %91 = arith.addf %88, %90 : vector<2x512xf32>
    %c0_96 = arith.constant 0 : index
    %c5_97 = arith.constant 5 : index
    %c0_98 = arith.constant 0 : index
    %92 = vector.load %arg0[%c0_96, %c5_97, %c0_98] : memref<2x8x32xf32, #tpu.memory_space<vmem>>, vector<2x1x32xf32>
    %93 = vector.shape_cast %92 : vector<2x1x32xf32> to vector<2x32xf32>
    %c0_99 = arith.constant 0 : index
    %c0_100 = arith.constant 0 : index
    %94 = vector.load %arg3[%c0_99, %c0_100] : memref<32x512xf32, #tpu.memory_space<vmem>>, vector<32x512xf32>
    %cst_101 = arith.constant dense<0.000000e+00> : vector<2x512xf32>
    %95 = tpu.matmul %93, %94, %cst_101 {dimension_numbers = #tpu.dot_dimension_numbers<[1], [0], [0], [1], [0, 0, 1, 1], [], []>} : vector<2x32xf32>, vector<32x512xf32>, vector<2x512xf32> -> vector<2x512xf32>
    %c0_102 = arith.constant 0 : index
    %c0_103 = arith.constant 0 : index
    %96 = vector.load %arg4[%c0_102, %c0_103] : memref<1x512xf32, #tpu.memory_space<vmem>>, vector<1x512xf32>
    %97 = vector.broadcast %96 : vector<1x512xf32> to vector<2x512xf32>
    %98 = arith.addf %95, %97 : vector<2x512xf32>
    %c0_104 = arith.constant 0 : index
    %c6_105 = arith.constant 6 : index
    %c0_106 = arith.constant 0 : index
    %99 = vector.load %arg0[%c0_104, %c6_105, %c0_106] : memref<2x8x32xf32, #tpu.memory_space<vmem>>, vector<2x1x32xf32>
    %100 = vector.shape_cast %99 : vector<2x1x32xf32> to vector<2x32xf32>
    %c0_107 = arith.constant 0 : index
    %c0_108 = arith.constant 0 : index
    %101 = vector.load %arg3[%c0_107, %c0_108] : memref<32x512xf32, #tpu.memory_space<vmem>>, vector<32x512xf32>
    %cst_109 = arith.constant dense<0.000000e+00> : vector<2x512xf32>
    %102 = tpu.matmul %100, %101, %cst_109 {dimension_numbers = #tpu.dot_dimension_numbers<[1], [0], [0], [1], [0, 0, 1, 1], [], []>} : vector<2x32xf32>, vector<32x512xf32>, vector<2x512xf32> -> vector<2x512xf32>
    %c0_110 = arith.constant 0 : index
    %c0_111 = arith.constant 0 : index
    %103 = vector.load %arg4[%c0_110, %c0_111] : memref<1x512xf32, #tpu.memory_space<vmem>>, vector<1x512xf32>
    %104 = vector.broadcast %103 : vector<1x512xf32> to vector<2x512xf32>
    %105 = arith.addf %102, %104 : vector<2x512xf32>
    %c0_112 = arith.constant 0 : index
    %c7_113 = arith.constant 7 : index
    %c0_114 = arith.constant 0 : index
    %106 = vector.load %arg0[%c0_112, %c7_113, %c0_114] : memref<2x8x32xf32, #tpu.memory_space<vmem>>, vector<2x1x32xf32>
    %107 = vector.shape_cast %106 : vector<2x1x32xf32> to vector<2x32xf32>
    %c0_115 = arith.constant 0 : index
    %c0_116 = arith.constant 0 : index
    %108 = vector.load %arg3[%c0_115, %c0_116] : memref<32x512xf32, #tpu.memory_space<vmem>>, vector<32x512xf32>
    %cst_117 = arith.constant dense<0.000000e+00> : vector<2x512xf32>
    %109 = tpu.matmul %107, %108, %cst_117 {dimension_numbers = #tpu.dot_dimension_numbers<[1], [0], [0], [1], [0, 0, 1, 1], [], []>} : vector<2x32xf32>, vector<32x512xf32>, vector<2x512xf32> -> vector<2x512xf32>
    %c0_118 = arith.constant 0 : index
    %c0_119 = arith.constant 0 : index
    %110 = vector.load %arg4[%c0_118, %c0_119] : memref<1x512xf32, #tpu.memory_space<vmem>>, vector<1x512xf32>
    %111 = vector.broadcast %110 : vector<1x512xf32> to vector<2x512xf32>
    %112 = arith.addf %109, %111 : vector<2x512xf32>
    %113 = arith.addf %7, %112 : vector<2x512xf32>
    %c0_120 = arith.constant 0 : index
    %c0_121 = arith.constant 0 : index
    %114 = vector.load %arg5[%c0_120, %c0_121] : memref<128x512xf32, #tpu.memory_space<vmem>>, vector<128x512xf32>
    %cst_122 = arith.constant dense<0.000000e+00> : vector<2x512xf32>
    %115 = tpu.matmul %0, %114, %cst_122 {dimension_numbers = #tpu.dot_dimension_numbers<[1], [0], [0], [1], [0, 0, 1, 1], [], []>} : vector<2x128xf32>, vector<128x512xf32>, vector<2x512xf32> -> vector<2x512xf32>
    %116 = arith.addf %113, %115 : vector<2x512xf32>
    %117 = vector.extract_strided_slice %116 {offsets = [0, 0], sizes = [2, 384], strides = [1, 1]} : vector<2x512xf32> to vector<2x384xf32>
    %118 = arith.negf %117 : vector<2x384xf32>
    %119 = math.exp %118 : vector<2x384xf32>
    %cst_123 = arith.constant 1.000000e+00 : f32
    %120 = vector.broadcast %cst_123 : f32 to vector<2x384xf32>
    %121 = arith.addf %120, %119 : vector<2x384xf32>
    %122 = arith.divf %120, %121 : vector<2x384xf32>
    %123 = vector.extract_strided_slice %122 {offsets = [0, 0], sizes = [2, 128], strides = [1, 1]} : vector<2x384xf32> to vector<2x128xf32>
    %124 = vector.extract_strided_slice %122 {offsets = [0, 128], sizes = [2, 128], strides = [1, 1]} : vector<2x384xf32> to vector<2x128xf32>
    %125 = vector.extract_strided_slice %122 {offsets = [0, 256], sizes = [2, 128], strides = [1, 1]} : vector<2x384xf32> to vector<2x128xf32>
    %126 = vector.extract_strided_slice %116 {offsets = [0, 384], sizes = [2, 128], strides = [1, 1]} : vector<2x512xf32> to vector<2x128xf32>
    %127 = math.tanh %126 : vector<2x128xf32>
    %128 = arith.mulf %124, %0 : vector<2x128xf32>
    %129 = arith.mulf %123, %127 : vector<2x128xf32>
    %130 = arith.addf %128, %129 : vector<2x128xf32>
    %131 = math.tanh %130 : vector<2x128xf32>
    %132 = arith.mulf %125, %131 : vector<2x128xf32>
    %133 = arith.addf %14, %105 : vector<2x512xf32>
    %c0_124 = arith.constant 0 : index
    %c0_125 = arith.constant 0 : index
    %134 = vector.load %arg5[%c0_124, %c0_125] : memref<128x512xf32, #tpu.memory_space<vmem>>, vector<128x512xf32>
    %cst_126 = arith.constant dense<0.000000e+00> : vector<2x512xf32>
    %135 = tpu.matmul %132, %134, %cst_126 {dimension_numbers = #tpu.dot_dimension_numbers<[1], [0], [0], [1], [0, 0, 1, 1], [], []>} : vector<2x128xf32>, vector<128x512xf32>, vector<2x512xf32> -> vector<2x512xf32>
    %136 = arith.addf %133, %135 : vector<2x512xf32>
    %137 = vector.extract_strided_slice %136 {offsets = [0, 0], sizes = [2, 384], strides = [1, 1]} : vector<2x512xf32> to vector<2x384xf32>
    %138 = arith.negf %137 : vector<2x384xf32>
    %139 = math.exp %138 : vector<2x384xf32>
    %cst_127 = arith.constant 1.000000e+00 : f32
    %140 = vector.broadcast %cst_127 : f32 to vector<2x384xf32>
    %141 = arith.addf %140, %139 : vector<2x384xf32>
    %142 = arith.divf %140, %141 : vector<2x384xf32>
    %143 = vector.extract_strided_slice %142 {offsets = [0, 0], sizes = [2, 128], strides = [1, 1]} : vector<2x384xf32> to vector<2x128xf32>
    %144 = vector.extract_strided_slice %142 {offsets = [0, 128], sizes = [2, 128], strides = [1, 1]} : vector<2x384xf32> to vector<2x128xf32>
    %145 = vector.extract_strided_slice %142 {offsets = [0, 256], sizes = [2, 128], strides = [1, 1]} : vector<2x384xf32> to vector<2x128xf32>
    %146 = vector.extract_strided_slice %136 {offsets = [0, 384], sizes = [2, 128], strides = [1, 1]} : vector<2x512xf32> to vector<2x128xf32>
    %147 = math.tanh %146 : vector<2x128xf32>
    %148 = arith.mulf %144, %130 : vector<2x128xf32>
    %149 = arith.mulf %143, %147 : vector<2x128xf32>
    %150 = arith.addf %148, %149 : vector<2x128xf32>
    %151 = math.tanh %150 : vector<2x128xf32>
    %152 = arith.mulf %145, %151 : vector<2x128xf32>
    %153 = arith.addf %21, %98 : vector<2x512xf32>
    %c0_128 = arith.constant 0 : index
    %c0_129 = arith.constant 0 : index
    %154 = vector.load %arg5[%c0_128, %c0_129] : memref<128x512xf32, #tpu.memory_space<vmem>>, vector<128x512xf32>
    %cst_130 = arith.constant dense<0.000000e+00> : vector<2x512xf32>
    %155 = tpu.matmul %152, %154, %cst_130 {dimension_numbers = #tpu.dot_dimension_numbers<[1], [0], [0], [1], [0, 0, 1, 1], [], []>} : vector<2x128xf32>, vector<128x512xf32>, vector<2x512xf32> -> vector<2x512xf32>
    %156 = arith.addf %153, %155 : vector<2x512xf32>
    %157 = vector.extract_strided_slice %156 {offsets = [0, 0], sizes = [2, 384], strides = [1, 1]} : vector<2x512xf32> to vector<2x384xf32>
    %158 = arith.negf %157 : vector<2x384xf32>
    %159 = math.exp %158 : vector<2x384xf32>
    %cst_131 = arith.constant 1.000000e+00 : f32
    %160 = vector.broadcast %cst_131 : f32 to vector<2x384xf32>
    %161 = arith.addf %160, %159 : vector<2x384xf32>
    %162 = arith.divf %160, %161 : vector<2x384xf32>
    %163 = vector.extract_strided_slice %162 {offsets = [0, 0], sizes = [2, 128], strides = [1, 1]} : vector<2x384xf32> to vector<2x128xf32>
    %164 = vector.extract_strided_slice %162 {offsets = [0, 128], sizes = [2, 128], strides = [1, 1]} : vector<2x384xf32> to vector<2x128xf32>
    %165 = vector.extract_strided_slice %162 {offsets = [0, 256], sizes = [2, 128], strides = [1, 1]} : vector<2x384xf32> to vector<2x128xf32>
    %166 = vector.extract_strided_slice %156 {offsets = [0, 384], sizes = [2, 128], strides = [1, 1]} : vector<2x512xf32> to vector<2x128xf32>
    %167 = math.tanh %166 : vector<2x128xf32>
    %168 = arith.mulf %164, %150 : vector<2x128xf32>
    %169 = arith.mulf %163, %167 : vector<2x128xf32>
    %170 = arith.addf %168, %169 : vector<2x128xf32>
    %171 = math.tanh %170 : vector<2x128xf32>
    %172 = arith.mulf %165, %171 : vector<2x128xf32>
    %173 = arith.addf %28, %91 : vector<2x512xf32>
    %c0_132 = arith.constant 0 : index
    %c0_133 = arith.constant 0 : index
    %174 = vector.load %arg5[%c0_132, %c0_133] : memref<128x512xf32, #tpu.memory_space<vmem>>, vector<128x512xf32>
    %cst_134 = arith.constant dense<0.000000e+00> : vector<2x512xf32>
    %175 = tpu.matmul %172, %174, %cst_134 {dimension_numbers = #tpu.dot_dimension_numbers<[1], [0], [0], [1], [0, 0, 1, 1], [], []>} : vector<2x128xf32>, vector<128x512xf32>, vector<2x512xf32> -> vector<2x512xf32>
    %176 = arith.addf %173, %175 : vector<2x512xf32>
    %177 = vector.extract_strided_slice %176 {offsets = [0, 0], sizes = [2, 384], strides = [1, 1]} : vector<2x512xf32> to vector<2x384xf32>
    %178 = arith.negf %177 : vector<2x384xf32>
    %179 = math.exp %178 : vector<2x384xf32>
    %cst_135 = arith.constant 1.000000e+00 : f32
    %180 = vector.broadcast %cst_135 : f32 to vector<2x384xf32>
    %181 = arith.addf %180, %179 : vector<2x384xf32>
    %182 = arith.divf %180, %181 : vector<2x384xf32>
    %183 = vector.extract_strided_slice %182 {offsets = [0, 0], sizes = [2, 128], strides = [1, 1]} : vector<2x384xf32> to vector<2x128xf32>
    %184 = vector.extract_strided_slice %182 {offsets = [0, 128], sizes = [2, 128], strides = [1, 1]} : vector<2x384xf32> to vector<2x128xf32>
    %185 = vector.extract_strided_slice %182 {offsets = [0, 256], sizes = [2, 128], strides = [1, 1]} : vector<2x384xf32> to vector<2x128xf32>
    %186 = vector.extract_strided_slice %176 {offsets = [0, 384], sizes = [2, 128], strides = [1, 1]} : vector<2x512xf32> to vector<2x128xf32>
    %187 = math.tanh %186 : vector<2x128xf32>
    %188 = arith.mulf %184, %170 : vector<2x128xf32>
    %189 = arith.mulf %183, %187 : vector<2x128xf32>
    %190 = arith.addf %188, %189 : vector<2x128xf32>
    %191 = math.tanh %190 : vector<2x128xf32>
    %192 = arith.mulf %185, %191 : vector<2x128xf32>
    %193 = arith.addf %35, %84 : vector<2x512xf32>
    %c0_136 = arith.constant 0 : index
    %c0_137 = arith.constant 0 : index
    %194 = vector.load %arg5[%c0_136, %c0_137] : memref<128x512xf32, #tpu.memory_space<vmem>>, vector<128x512xf32>
    %cst_138 = arith.constant dense<0.000000e+00> : vector<2x512xf32>
    %195 = tpu.matmul %192, %194, %cst_138 {dimension_numbers = #tpu.dot_dimension_numbers<[1], [0], [0], [1], [0, 0, 1, 1], [], []>} : vector<2x128xf32>, vector<128x512xf32>, vector<2x512xf32> -> vector<2x512xf32>
    %196 = arith.addf %193, %195 : vector<2x512xf32>
    %197 = vector.extract_strided_slice %196 {offsets = [0, 0], sizes = [2, 384], strides = [1, 1]} : vector<2x512xf32> to vector<2x384xf32>
    %198 = arith.negf %197 : vector<2x384xf32>
    %199 = math.exp %198 : vector<2x384xf32>
    %cst_139 = arith.constant 1.000000e+00 : f32
    %200 = vector.broadcast %cst_139 : f32 to vector<2x384xf32>
    %201 = arith.addf %200, %199 : vector<2x384xf32>
    %202 = arith.divf %200, %201 : vector<2x384xf32>
    %203 = vector.extract_strided_slice %202 {offsets = [0, 0], sizes = [2, 128], strides = [1, 1]} : vector<2x384xf32> to vector<2x128xf32>
    %204 = vector.extract_strided_slice %202 {offsets = [0, 128], sizes = [2, 128], strides = [1, 1]} : vector<2x384xf32> to vector<2x128xf32>
    %205 = vector.extract_strided_slice %202 {offsets = [0, 256], sizes = [2, 128], strides = [1, 1]} : vector<2x384xf32> to vector<2x128xf32>
    %206 = vector.extract_strided_slice %196 {offsets = [0, 384], sizes = [2, 128], strides = [1, 1]} : vector<2x512xf32> to vector<2x128xf32>
    %207 = math.tanh %206 : vector<2x128xf32>
    %208 = arith.mulf %204, %190 : vector<2x128xf32>
    %209 = arith.mulf %203, %207 : vector<2x128xf32>
    %210 = arith.addf %208, %209 : vector<2x128xf32>
    %211 = math.tanh %210 : vector<2x128xf32>
    %212 = arith.mulf %205, %211 : vector<2x128xf32>
    %213 = arith.addf %42, %77 : vector<2x512xf32>
    %c0_140 = arith.constant 0 : index
    %c0_141 = arith.constant 0 : index
    %214 = vector.load %arg5[%c0_140, %c0_141] : memref<128x512xf32, #tpu.memory_space<vmem>>, vector<128x512xf32>
    %cst_142 = arith.constant dense<0.000000e+00> : vector<2x512xf32>
    %215 = tpu.matmul %212, %214, %cst_142 {dimension_numbers = #tpu.dot_dimension_numbers<[1], [0], [0], [1], [0, 0, 1, 1], [], []>} : vector<2x128xf32>, vector<128x512xf32>, vector<2x512xf32> -> vector<2x512xf32>
    %216 = arith.addf %213, %215 : vector<2x512xf32>
    %217 = vector.extract_strided_slice %216 {offsets = [0, 0], sizes = [2, 384], strides = [1, 1]} : vector<2x512xf32> to vector<2x384xf32>
    %218 = arith.negf %217 : vector<2x384xf32>
    %219 = math.exp %218 : vector<2x384xf32>
    %cst_143 = arith.constant 1.000000e+00 : f32
    %220 = vector.broadcast %cst_143 : f32 to vector<2x384xf32>
    %221 = arith.addf %220, %219 : vector<2x384xf32>
    %222 = arith.divf %220, %221 : vector<2x384xf32>
    %223 = vector.extract_strided_slice %222 {offsets = [0, 0], sizes = [2, 128], strides = [1, 1]} : vector<2x384xf32> to vector<2x128xf32>
    %224 = vector.extract_strided_slice %222 {offsets = [0, 128], sizes = [2, 128], strides = [1, 1]} : vector<2x384xf32> to vector<2x128xf32>
    %225 = vector.extract_strided_slice %222 {offsets = [0, 256], sizes = [2, 128], strides = [1, 1]} : vector<2x384xf32> to vector<2x128xf32>
    %226 = vector.extract_strided_slice %216 {offsets = [0, 384], sizes = [2, 128], strides = [1, 1]} : vector<2x512xf32> to vector<2x128xf32>
    %227 = math.tanh %226 : vector<2x128xf32>
    %228 = arith.mulf %224, %210 : vector<2x128xf32>
    %229 = arith.mulf %223, %227 : vector<2x128xf32>
    %230 = arith.addf %228, %229 : vector<2x128xf32>
    %231 = math.tanh %230 : vector<2x128xf32>
    %232 = arith.mulf %225, %231 : vector<2x128xf32>
    %233 = arith.addf %49, %70 : vector<2x512xf32>
    %c0_144 = arith.constant 0 : index
    %c0_145 = arith.constant 0 : index
    %234 = vector.load %arg5[%c0_144, %c0_145] : memref<128x512xf32, #tpu.memory_space<vmem>>, vector<128x512xf32>
    %cst_146 = arith.constant dense<0.000000e+00> : vector<2x512xf32>
    %235 = tpu.matmul %232, %234, %cst_146 {dimension_numbers = #tpu.dot_dimension_numbers<[1], [0], [0], [1], [0, 0, 1, 1], [], []>} : vector<2x128xf32>, vector<128x512xf32>, vector<2x512xf32> -> vector<2x512xf32>
    %236 = arith.addf %233, %235 : vector<2x512xf32>
    %237 = vector.extract_strided_slice %236 {offsets = [0, 0], sizes = [2, 384], strides = [1, 1]} : vector<2x512xf32> to vector<2x384xf32>
    %238 = arith.negf %237 : vector<2x384xf32>
    %239 = math.exp %238 : vector<2x384xf32>
    %cst_147 = arith.constant 1.000000e+00 : f32
    %240 = vector.broadcast %cst_147 : f32 to vector<2x384xf32>
    %241 = arith.addf %240, %239 : vector<2x384xf32>
    %242 = arith.divf %240, %241 : vector<2x384xf32>
    %243 = vector.extract_strided_slice %242 {offsets = [0, 0], sizes = [2, 128], strides = [1, 1]} : vector<2x384xf32> to vector<2x128xf32>
    %244 = vector.extract_strided_slice %242 {offsets = [0, 128], sizes = [2, 128], strides = [1, 1]} : vector<2x384xf32> to vector<2x128xf32>
    %245 = vector.extract_strided_slice %242 {offsets = [0, 256], sizes = [2, 128], strides = [1, 1]} : vector<2x384xf32> to vector<2x128xf32>
    %246 = vector.extract_strided_slice %236 {offsets = [0, 384], sizes = [2, 128], strides = [1, 1]} : vector<2x512xf32> to vector<2x128xf32>
    %247 = math.tanh %246 : vector<2x128xf32>
    %248 = arith.mulf %244, %230 : vector<2x128xf32>
    %249 = arith.mulf %243, %247 : vector<2x128xf32>
    %250 = arith.addf %248, %249 : vector<2x128xf32>
    %251 = math.tanh %250 : vector<2x128xf32>
    %252 = arith.mulf %245, %251 : vector<2x128xf32>
    %253 = arith.addf %56, %63 : vector<2x512xf32>
    %c0_148 = arith.constant 0 : index
    %c0_149 = arith.constant 0 : index
    %254 = vector.load %arg5[%c0_148, %c0_149] : memref<128x512xf32, #tpu.memory_space<vmem>>, vector<128x512xf32>
    %cst_150 = arith.constant dense<0.000000e+00> : vector<2x512xf32>
    %255 = tpu.matmul %252, %254, %cst_150 {dimension_numbers = #tpu.dot_dimension_numbers<[1], [0], [0], [1], [0, 0, 1, 1], [], []>} : vector<2x128xf32>, vector<128x512xf32>, vector<2x512xf32> -> vector<2x512xf32>
    %256 = arith.addf %253, %255 : vector<2x512xf32>
    %257 = vector.extract_strided_slice %256 {offsets = [0, 0], sizes = [2, 384], strides = [1, 1]} : vector<2x512xf32> to vector<2x384xf32>
    %258 = arith.negf %257 : vector<2x384xf32>
    %259 = math.exp %258 : vector<2x384xf32>
    %cst_151 = arith.constant 1.000000e+00 : f32
    %260 = vector.broadcast %cst_151 : f32 to vector<2x384xf32>
    %261 = arith.addf %260, %259 : vector<2x384xf32>
    %262 = arith.divf %260, %261 : vector<2x384xf32>
    %263 = vector.extract_strided_slice %262 {offsets = [0, 0], sizes = [2, 128], strides = [1, 1]} : vector<2x384xf32> to vector<2x128xf32>
    %264 = vector.extract_strided_slice %262 {offsets = [0, 128], sizes = [2, 128], strides = [1, 1]} : vector<2x384xf32> to vector<2x128xf32>
    %265 = vector.extract_strided_slice %262 {offsets = [0, 256], sizes = [2, 128], strides = [1, 1]} : vector<2x384xf32> to vector<2x128xf32>
    %266 = vector.extract_strided_slice %256 {offsets = [0, 384], sizes = [2, 128], strides = [1, 1]} : vector<2x512xf32> to vector<2x128xf32>
    %267 = math.tanh %266 : vector<2x128xf32>
    %268 = arith.mulf %264, %250 : vector<2x128xf32>
    %269 = arith.mulf %263, %267 : vector<2x128xf32>
    %270 = arith.addf %268, %269 : vector<2x128xf32>
    %271 = math.tanh %270 : vector<2x128xf32>
    %272 = arith.mulf %265, %271 : vector<2x128xf32>
    %c0_152 = arith.constant 0 : index
    %c0_153 = arith.constant 0 : index
    %273 = vector.load %arg6[%c0_152, %c0_153] : memref<128x512xf32, #tpu.memory_space<vmem>>, vector<128x512xf32>
    %cst_154 = arith.constant dense<0.000000e+00> : vector<2x512xf32>
    %274 = tpu.matmul %132, %273, %cst_154 {dimension_numbers = #tpu.dot_dimension_numbers<[1], [0], [0], [1], [0, 0, 1, 1], [], []>} : vector<2x128xf32>, vector<128x512xf32>, vector<2x512xf32> -> vector<2x512xf32>
    %c0_155 = arith.constant 0 : index
    %c0_156 = arith.constant 0 : index
    %275 = vector.load %arg8[%c0_155, %c0_156] : memref<1x512xf32, #tpu.memory_space<vmem>>, vector<1x512xf32>
    %276 = vector.broadcast %275 : vector<1x512xf32> to vector<2x512xf32>
    %277 = arith.addf %274, %276 : vector<2x512xf32>
    %c0_157 = arith.constant 0 : index
    %c0_158 = arith.constant 0 : index
    %278 = vector.load %arg6[%c0_157, %c0_158] : memref<128x512xf32, #tpu.memory_space<vmem>>, vector<128x512xf32>
    %cst_159 = arith.constant dense<0.000000e+00> : vector<2x512xf32>
    %279 = tpu.matmul %152, %278, %cst_159 {dimension_numbers = #tpu.dot_dimension_numbers<[1], [0], [0], [1], [0, 0, 1, 1], [], []>} : vector<2x128xf32>, vector<128x512xf32>, vector<2x512xf32> -> vector<2x512xf32>
    %c0_160 = arith.constant 0 : index
    %c0_161 = arith.constant 0 : index
    %280 = vector.load %arg8[%c0_160, %c0_161] : memref<1x512xf32, #tpu.memory_space<vmem>>, vector<1x512xf32>
    %281 = vector.broadcast %280 : vector<1x512xf32> to vector<2x512xf32>
    %282 = arith.addf %279, %281 : vector<2x512xf32>
    %c0_162 = arith.constant 0 : index
    %c0_163 = arith.constant 0 : index
    %283 = vector.load %arg6[%c0_162, %c0_163] : memref<128x512xf32, #tpu.memory_space<vmem>>, vector<128x512xf32>
    %cst_164 = arith.constant dense<0.000000e+00> : vector<2x512xf32>
    %284 = tpu.matmul %172, %283, %cst_164 {dimension_numbers = #tpu.dot_dimension_numbers<[1], [0], [0], [1], [0, 0, 1, 1], [], []>} : vector<2x128xf32>, vector<128x512xf32>, vector<2x512xf32> -> vector<2x512xf32>
    %c0_165 = arith.constant 0 : index
    %c0_166 = arith.constant 0 : index
    %285 = vector.load %arg8[%c0_165, %c0_166] : memref<1x512xf32, #tpu.memory_space<vmem>>, vector<1x512xf32>
    %286 = vector.broadcast %285 : vector<1x512xf32> to vector<2x512xf32>
    %287 = arith.addf %284, %286 : vector<2x512xf32>
    %c0_167 = arith.constant 0 : index
    %c0_168 = arith.constant 0 : index
    %288 = vector.load %arg6[%c0_167, %c0_168] : memref<128x512xf32, #tpu.memory_space<vmem>>, vector<128x512xf32>
    %cst_169 = arith.constant dense<0.000000e+00> : vector<2x512xf32>
    %289 = tpu.matmul %192, %288, %cst_169 {dimension_numbers = #tpu.dot_dimension_numbers<[1], [0], [0], [1], [0, 0, 1, 1], [], []>} : vector<2x128xf32>, vector<128x512xf32>, vector<2x512xf32> -> vector<2x512xf32>
    %c0_170 = arith.constant 0 : index
    %c0_171 = arith.constant 0 : index
    %290 = vector.load %arg8[%c0_170, %c0_171] : memref<1x512xf32, #tpu.memory_space<vmem>>, vector<1x512xf32>
    %291 = vector.broadcast %290 : vector<1x512xf32> to vector<2x512xf32>
    %292 = arith.addf %289, %291 : vector<2x512xf32>
    %c0_172 = arith.constant 0 : index
    %c0_173 = arith.constant 0 : index
    %293 = vector.load %arg6[%c0_172, %c0_173] : memref<128x512xf32, #tpu.memory_space<vmem>>, vector<128x512xf32>
    %cst_174 = arith.constant dense<0.000000e+00> : vector<2x512xf32>
    %294 = tpu.matmul %212, %293, %cst_174 {dimension_numbers = #tpu.dot_dimension_numbers<[1], [0], [0], [1], [0, 0, 1, 1], [], []>} : vector<2x128xf32>, vector<128x512xf32>, vector<2x512xf32> -> vector<2x512xf32>
    %c0_175 = arith.constant 0 : index
    %c0_176 = arith.constant 0 : index
    %295 = vector.load %arg8[%c0_175, %c0_176] : memref<1x512xf32, #tpu.memory_space<vmem>>, vector<1x512xf32>
    %296 = vector.broadcast %295 : vector<1x512xf32> to vector<2x512xf32>
    %297 = arith.addf %294, %296 : vector<2x512xf32>
    %c0_177 = arith.constant 0 : index
    %c0_178 = arith.constant 0 : index
    %298 = vector.load %arg6[%c0_177, %c0_178] : memref<128x512xf32, #tpu.memory_space<vmem>>, vector<128x512xf32>
    %cst_179 = arith.constant dense<0.000000e+00> : vector<2x512xf32>
    %299 = tpu.matmul %232, %298, %cst_179 {dimension_numbers = #tpu.dot_dimension_numbers<[1], [0], [0], [1], [0, 0, 1, 1], [], []>} : vector<2x128xf32>, vector<128x512xf32>, vector<2x512xf32> -> vector<2x512xf32>
    %c0_180 = arith.constant 0 : index
    %c0_181 = arith.constant 0 : index
    %300 = vector.load %arg8[%c0_180, %c0_181] : memref<1x512xf32, #tpu.memory_space<vmem>>, vector<1x512xf32>
    %301 = vector.broadcast %300 : vector<1x512xf32> to vector<2x512xf32>
    %302 = arith.addf %299, %301 : vector<2x512xf32>
    %c0_182 = arith.constant 0 : index
    %c0_183 = arith.constant 0 : index
    %303 = vector.load %arg6[%c0_182, %c0_183] : memref<128x512xf32, #tpu.memory_space<vmem>>, vector<128x512xf32>
    %cst_184 = arith.constant dense<0.000000e+00> : vector<2x512xf32>
    %304 = tpu.matmul %252, %303, %cst_184 {dimension_numbers = #tpu.dot_dimension_numbers<[1], [0], [0], [1], [0, 0, 1, 1], [], []>} : vector<2x128xf32>, vector<128x512xf32>, vector<2x512xf32> -> vector<2x512xf32>
    %c0_185 = arith.constant 0 : index
    %c0_186 = arith.constant 0 : index
    %305 = vector.load %arg8[%c0_185, %c0_186] : memref<1x512xf32, #tpu.memory_space<vmem>>, vector<1x512xf32>
    %306 = vector.broadcast %305 : vector<1x512xf32> to vector<2x512xf32>
    %307 = arith.addf %304, %306 : vector<2x512xf32>
    %c0_187 = arith.constant 0 : index
    %c0_188 = arith.constant 0 : index
    %308 = vector.load %arg6[%c0_187, %c0_188] : memref<128x512xf32, #tpu.memory_space<vmem>>, vector<128x512xf32>
    %cst_189 = arith.constant dense<0.000000e+00> : vector<2x512xf32>
    %309 = tpu.matmul %272, %308, %cst_189 {dimension_numbers = #tpu.dot_dimension_numbers<[1], [0], [0], [1], [0, 0, 1, 1], [], []>} : vector<2x128xf32>, vector<128x512xf32>, vector<2x512xf32> -> vector<2x512xf32>
    %c0_190 = arith.constant 0 : index
    %c0_191 = arith.constant 0 : index
    %310 = vector.load %arg8[%c0_190, %c0_191] : memref<1x512xf32, #tpu.memory_space<vmem>>, vector<1x512xf32>
    %311 = vector.broadcast %310 : vector<1x512xf32> to vector<2x512xf32>
    %312 = arith.addf %309, %311 : vector<2x512xf32>
    %c0_192 = arith.constant 0 : index
    %c0_193 = arith.constant 0 : index
    %313 = vector.load %arg7[%c0_192, %c0_193] : memref<128x512xf32, #tpu.memory_space<vmem>>, vector<128x512xf32>
    %cst_194 = arith.constant dense<0.000000e+00> : vector<2x512xf32>
    %314 = tpu.matmul %132, %313, %cst_194 {dimension_numbers = #tpu.dot_dimension_numbers<[1], [0], [0], [1], [0, 0, 1, 1], [], []>} : vector<2x128xf32>, vector<128x512xf32>, vector<2x512xf32> -> vector<2x512xf32>
    %c0_195 = arith.constant 0 : index
    %c0_196 = arith.constant 0 : index
    %315 = vector.load %arg7[%c0_195, %c0_196] : memref<128x512xf32, #tpu.memory_space<vmem>>, vector<128x512xf32>
    %cst_197 = arith.constant dense<0.000000e+00> : vector<2x512xf32>
    %316 = tpu.matmul %152, %315, %cst_197 {dimension_numbers = #tpu.dot_dimension_numbers<[1], [0], [0], [1], [0, 0, 1, 1], [], []>} : vector<2x128xf32>, vector<128x512xf32>, vector<2x512xf32> -> vector<2x512xf32>
    %c0_198 = arith.constant 0 : index
    %c0_199 = arith.constant 0 : index
    %317 = vector.load %arg7[%c0_198, %c0_199] : memref<128x512xf32, #tpu.memory_space<vmem>>, vector<128x512xf32>
    %cst_200 = arith.constant dense<0.000000e+00> : vector<2x512xf32>
    %318 = tpu.matmul %172, %317, %cst_200 {dimension_numbers = #tpu.dot_dimension_numbers<[1], [0], [0], [1], [0, 0, 1, 1], [], []>} : vector<2x128xf32>, vector<128x512xf32>, vector<2x512xf32> -> vector<2x512xf32>
    %c0_201 = arith.constant 0 : index
    %c0_202 = arith.constant 0 : index
    %319 = vector.load %arg7[%c0_201, %c0_202] : memref<128x512xf32, #tpu.memory_space<vmem>>, vector<128x512xf32>
    %cst_203 = arith.constant dense<0.000000e+00> : vector<2x512xf32>
    %320 = tpu.matmul %192, %319, %cst_203 {dimension_numbers = #tpu.dot_dimension_numbers<[1], [0], [0], [1], [0, 0, 1, 1], [], []>} : vector<2x128xf32>, vector<128x512xf32>, vector<2x512xf32> -> vector<2x512xf32>
    %c0_204 = arith.constant 0 : index
    %c0_205 = arith.constant 0 : index
    %321 = vector.load %arg7[%c0_204, %c0_205] : memref<128x512xf32, #tpu.memory_space<vmem>>, vector<128x512xf32>
    %cst_206 = arith.constant dense<0.000000e+00> : vector<2x512xf32>
    %322 = tpu.matmul %212, %321, %cst_206 {dimension_numbers = #tpu.dot_dimension_numbers<[1], [0], [0], [1], [0, 0, 1, 1], [], []>} : vector<2x128xf32>, vector<128x512xf32>, vector<2x512xf32> -> vector<2x512xf32>
    %c0_207 = arith.constant 0 : index
    %c0_208 = arith.constant 0 : index
    %323 = vector.load %arg7[%c0_207, %c0_208] : memref<128x512xf32, #tpu.memory_space<vmem>>, vector<128x512xf32>
    %cst_209 = arith.constant dense<0.000000e+00> : vector<2x512xf32>
    %324 = tpu.matmul %232, %323, %cst_209 {dimension_numbers = #tpu.dot_dimension_numbers<[1], [0], [0], [1], [0, 0, 1, 1], [], []>} : vector<2x128xf32>, vector<128x512xf32>, vector<2x512xf32> -> vector<2x512xf32>
    %c0_210 = arith.constant 0 : index
    %c0_211 = arith.constant 0 : index
    %325 = vector.load %arg7[%c0_210, %c0_211] : memref<128x512xf32, #tpu.memory_space<vmem>>, vector<128x512xf32>
    %cst_212 = arith.constant dense<0.000000e+00> : vector<2x512xf32>
    %326 = tpu.matmul %252, %325, %cst_212 {dimension_numbers = #tpu.dot_dimension_numbers<[1], [0], [0], [1], [0, 0, 1, 1], [], []>} : vector<2x128xf32>, vector<128x512xf32>, vector<2x512xf32> -> vector<2x512xf32>
    %c0_213 = arith.constant 0 : index
    %c0_214 = arith.constant 0 : index
    %327 = vector.load %arg7[%c0_213, %c0_214] : memref<128x512xf32, #tpu.memory_space<vmem>>, vector<128x512xf32>
    %cst_215 = arith.constant dense<0.000000e+00> : vector<2x512xf32>
    %328 = tpu.matmul %272, %327, %cst_215 {dimension_numbers = #tpu.dot_dimension_numbers<[1], [0], [0], [1], [0, 0, 1, 1], [], []>} : vector<2x128xf32>, vector<128x512xf32>, vector<2x512xf32> -> vector<2x512xf32>
    %329 = arith.addf %277, %328 : vector<2x512xf32>
    %c0_216 = arith.constant 0 : index
    %c0_217 = arith.constant 0 : index
    %330 = vector.load %arg9[%c0_216, %c0_217] : memref<128x512xf32, #tpu.memory_space<vmem>>, vector<128x512xf32>
    %cst_218 = arith.constant dense<0.000000e+00> : vector<2x512xf32>
    %331 = tpu.matmul %0, %330, %cst_218 {dimension_numbers = #tpu.dot_dimension_numbers<[1], [0], [0], [1], [0, 0, 1, 1], [], []>} : vector<2x128xf32>, vector<128x512xf32>, vector<2x512xf32> -> vector<2x512xf32>
    %332 = arith.addf %329, %331 : vector<2x512xf32>
    %333 = vector.extract_strided_slice %332 {offsets = [0, 0], sizes = [2, 384], strides = [1, 1]} : vector<2x512xf32> to vector<2x384xf32>
    %334 = arith.negf %333 : vector<2x384xf32>
    %335 = math.exp %334 : vector<2x384xf32>
    %cst_219 = arith.constant 1.000000e+00 : f32
    %336 = vector.broadcast %cst_219 : f32 to vector<2x384xf32>
    %337 = arith.addf %336, %335 : vector<2x384xf32>
    %338 = arith.divf %336, %337 : vector<2x384xf32>
    %339 = vector.extract_strided_slice %338 {offsets = [0, 0], sizes = [2, 128], strides = [1, 1]} : vector<2x384xf32> to vector<2x128xf32>
    %340 = vector.extract_strided_slice %338 {offsets = [0, 128], sizes = [2, 128], strides = [1, 1]} : vector<2x384xf32> to vector<2x128xf32>
    %341 = vector.extract_strided_slice %338 {offsets = [0, 256], sizes = [2, 128], strides = [1, 1]} : vector<2x384xf32> to vector<2x128xf32>
    %342 = vector.extract_strided_slice %332 {offsets = [0, 384], sizes = [2, 128], strides = [1, 1]} : vector<2x512xf32> to vector<2x128xf32>
    %343 = math.tanh %342 : vector<2x128xf32>
    %344 = arith.mulf %340, %0 : vector<2x128xf32>
    %345 = arith.mulf %339, %343 : vector<2x128xf32>
    %346 = arith.addf %344, %345 : vector<2x128xf32>
    %347 = math.tanh %346 : vector<2x128xf32>
    %348 = arith.mulf %341, %347 : vector<2x128xf32>
    %349 = arith.addf %282, %326 : vector<2x512xf32>
    %c0_220 = arith.constant 0 : index
    %c0_221 = arith.constant 0 : index
    %350 = vector.load %arg9[%c0_220, %c0_221] : memref<128x512xf32, #tpu.memory_space<vmem>>, vector<128x512xf32>
    %cst_222 = arith.constant dense<0.000000e+00> : vector<2x512xf32>
    %351 = tpu.matmul %348, %350, %cst_222 {dimension_numbers = #tpu.dot_dimension_numbers<[1], [0], [0], [1], [0, 0, 1, 1], [], []>} : vector<2x128xf32>, vector<128x512xf32>, vector<2x512xf32> -> vector<2x512xf32>
    %352 = arith.addf %349, %351 : vector<2x512xf32>
    %353 = vector.extract_strided_slice %352 {offsets = [0, 0], sizes = [2, 384], strides = [1, 1]} : vector<2x512xf32> to vector<2x384xf32>
    %354 = arith.negf %353 : vector<2x384xf32>
    %355 = math.exp %354 : vector<2x384xf32>
    %cst_223 = arith.constant 1.000000e+00 : f32
    %356 = vector.broadcast %cst_223 : f32 to vector<2x384xf32>
    %357 = arith.addf %356, %355 : vector<2x384xf32>
    %358 = arith.divf %356, %357 : vector<2x384xf32>
    %359 = vector.extract_strided_slice %358 {offsets = [0, 0], sizes = [2, 128], strides = [1, 1]} : vector<2x384xf32> to vector<2x128xf32>
    %360 = vector.extract_strided_slice %358 {offsets = [0, 128], sizes = [2, 128], strides = [1, 1]} : vector<2x384xf32> to vector<2x128xf32>
    %361 = vector.extract_strided_slice %358 {offsets = [0, 256], sizes = [2, 128], strides = [1, 1]} : vector<2x384xf32> to vector<2x128xf32>
    %362 = vector.extract_strided_slice %352 {offsets = [0, 384], sizes = [2, 128], strides = [1, 1]} : vector<2x512xf32> to vector<2x128xf32>
    %363 = math.tanh %362 : vector<2x128xf32>
    %364 = arith.mulf %360, %346 : vector<2x128xf32>
    %365 = arith.mulf %359, %363 : vector<2x128xf32>
    %366 = arith.addf %364, %365 : vector<2x128xf32>
    %367 = math.tanh %366 : vector<2x128xf32>
    %368 = arith.mulf %361, %367 : vector<2x128xf32>
    %369 = arith.addf %287, %324 : vector<2x512xf32>
    %c0_224 = arith.constant 0 : index
    %c0_225 = arith.constant 0 : index
    %370 = vector.load %arg9[%c0_224, %c0_225] : memref<128x512xf32, #tpu.memory_space<vmem>>, vector<128x512xf32>
    %cst_226 = arith.constant dense<0.000000e+00> : vector<2x512xf32>
    %371 = tpu.matmul %368, %370, %cst_226 {dimension_numbers = #tpu.dot_dimension_numbers<[1], [0], [0], [1], [0, 0, 1, 1], [], []>} : vector<2x128xf32>, vector<128x512xf32>, vector<2x512xf32> -> vector<2x512xf32>
    %372 = arith.addf %369, %371 : vector<2x512xf32>
    %373 = vector.extract_strided_slice %372 {offsets = [0, 0], sizes = [2, 384], strides = [1, 1]} : vector<2x512xf32> to vector<2x384xf32>
    %374 = arith.negf %373 : vector<2x384xf32>
    %375 = math.exp %374 : vector<2x384xf32>
    %cst_227 = arith.constant 1.000000e+00 : f32
    %376 = vector.broadcast %cst_227 : f32 to vector<2x384xf32>
    %377 = arith.addf %376, %375 : vector<2x384xf32>
    %378 = arith.divf %376, %377 : vector<2x384xf32>
    %379 = vector.extract_strided_slice %378 {offsets = [0, 0], sizes = [2, 128], strides = [1, 1]} : vector<2x384xf32> to vector<2x128xf32>
    %380 = vector.extract_strided_slice %378 {offsets = [0, 128], sizes = [2, 128], strides = [1, 1]} : vector<2x384xf32> to vector<2x128xf32>
    %381 = vector.extract_strided_slice %378 {offsets = [0, 256], sizes = [2, 128], strides = [1, 1]} : vector<2x384xf32> to vector<2x128xf32>
    %382 = vector.extract_strided_slice %372 {offsets = [0, 384], sizes = [2, 128], strides = [1, 1]} : vector<2x512xf32> to vector<2x128xf32>
    %383 = math.tanh %382 : vector<2x128xf32>
    %384 = arith.mulf %380, %366 : vector<2x128xf32>
    %385 = arith.mulf %379, %383 : vector<2x128xf32>
    %386 = arith.addf %384, %385 : vector<2x128xf32>
    %387 = math.tanh %386 : vector<2x128xf32>
    %388 = arith.mulf %381, %387 : vector<2x128xf32>
    %389 = arith.addf %292, %322 : vector<2x512xf32>
    %c0_228 = arith.constant 0 : index
    %c0_229 = arith.constant 0 : index
    %390 = vector.load %arg9[%c0_228, %c0_229] : memref<128x512xf32, #tpu.memory_space<vmem>>, vector<128x512xf32>
    %cst_230 = arith.constant dense<0.000000e+00> : vector<2x512xf32>
    %391 = tpu.matmul %388, %390, %cst_230 {dimension_numbers = #tpu.dot_dimension_numbers<[1], [0], [0], [1], [0, 0, 1, 1], [], []>} : vector<2x128xf32>, vector<128x512xf32>, vector<2x512xf32> -> vector<2x512xf32>
    %392 = arith.addf %389, %391 : vector<2x512xf32>
    %393 = vector.extract_strided_slice %392 {offsets = [0, 0], sizes = [2, 384], strides = [1, 1]} : vector<2x512xf32> to vector<2x384xf32>
    %394 = arith.negf %393 : vector<2x384xf32>
    %395 = math.exp %394 : vector<2x384xf32>
    %cst_231 = arith.constant 1.000000e+00 : f32
    %396 = vector.broadcast %cst_231 : f32 to vector<2x384xf32>
    %397 = arith.addf %396, %395 : vector<2x384xf32>
    %398 = arith.divf %396, %397 : vector<2x384xf32>
    %399 = vector.extract_strided_slice %398 {offsets = [0, 0], sizes = [2, 128], strides = [1, 1]} : vector<2x384xf32> to vector<2x128xf32>
    %400 = vector.extract_strided_slice %398 {offsets = [0, 128], sizes = [2, 128], strides = [1, 1]} : vector<2x384xf32> to vector<2x128xf32>
    %401 = vector.extract_strided_slice %398 {offsets = [0, 256], sizes = [2, 128], strides = [1, 1]} : vector<2x384xf32> to vector<2x128xf32>
    %402 = vector.extract_strided_slice %392 {offsets = [0, 384], sizes = [2, 128], strides = [1, 1]} : vector<2x512xf32> to vector<2x128xf32>
    %403 = math.tanh %402 : vector<2x128xf32>
    %404 = arith.mulf %400, %386 : vector<2x128xf32>
    %405 = arith.mulf %399, %403 : vector<2x128xf32>
    %406 = arith.addf %404, %405 : vector<2x128xf32>
    %407 = math.tanh %406 : vector<2x128xf32>
    %408 = arith.mulf %401, %407 : vector<2x128xf32>
    %409 = arith.addf %297, %320 : vector<2x512xf32>
    %c0_232 = arith.constant 0 : index
    %c0_233 = arith.constant 0 : index
    %410 = vector.load %arg9[%c0_232, %c0_233] : memref<128x512xf32, #tpu.memory_space<vmem>>, vector<128x512xf32>
    %cst_234 = arith.constant dense<0.000000e+00> : vector<2x512xf32>
    %411 = tpu.matmul %408, %410, %cst_234 {dimension_numbers = #tpu.dot_dimension_numbers<[1], [0], [0], [1], [0, 0, 1, 1], [], []>} : vector<2x128xf32>, vector<128x512xf32>, vector<2x512xf32> -> vector<2x512xf32>
    %412 = arith.addf %409, %411 : vector<2x512xf32>
    %413 = vector.extract_strided_slice %412 {offsets = [0, 0], sizes = [2, 384], strides = [1, 1]} : vector<2x512xf32> to vector<2x384xf32>
    %414 = arith.negf %413 : vector<2x384xf32>
    %415 = math.exp %414 : vector<2x384xf32>
    %cst_235 = arith.constant 1.000000e+00 : f32
    %416 = vector.broadcast %cst_235 : f32 to vector<2x384xf32>
    %417 = arith.addf %416, %415 : vector<2x384xf32>
    %418 = arith.divf %416, %417 : vector<2x384xf32>
    %419 = vector.extract_strided_slice %418 {offsets = [0, 0], sizes = [2, 128], strides = [1, 1]} : vector<2x384xf32> to vector<2x128xf32>
    %420 = vector.extract_strided_slice %418 {offsets = [0, 128], sizes = [2, 128], strides = [1, 1]} : vector<2x384xf32> to vector<2x128xf32>
    %421 = vector.extract_strided_slice %418 {offsets = [0, 256], sizes = [2, 128], strides = [1, 1]} : vector<2x384xf32> to vector<2x128xf32>
    %422 = vector.extract_strided_slice %412 {offsets = [0, 384], sizes = [2, 128], strides = [1, 1]} : vector<2x512xf32> to vector<2x128xf32>
    %423 = math.tanh %422 : vector<2x128xf32>
    %424 = arith.mulf %420, %406 : vector<2x128xf32>
    %425 = arith.mulf %419, %423 : vector<2x128xf32>
    %426 = arith.addf %424, %425 : vector<2x128xf32>
    %427 = math.tanh %426 : vector<2x128xf32>
    %428 = arith.mulf %421, %427 : vector<2x128xf32>
    %429 = arith.addf %302, %318 : vector<2x512xf32>
    %c0_236 = arith.constant 0 : index
    %c0_237 = arith.constant 0 : index
    %430 = vector.load %arg9[%c0_236, %c0_237] : memref<128x512xf32, #tpu.memory_space<vmem>>, vector<128x512xf32>
    %cst_238 = arith.constant dense<0.000000e+00> : vector<2x512xf32>
    %431 = tpu.matmul %428, %430, %cst_238 {dimension_numbers = #tpu.dot_dimension_numbers<[1], [0], [0], [1], [0, 0, 1, 1], [], []>} : vector<2x128xf32>, vector<128x512xf32>, vector<2x512xf32> -> vector<2x512xf32>
    %432 = arith.addf %429, %431 : vector<2x512xf32>
    %433 = vector.extract_strided_slice %432 {offsets = [0, 0], sizes = [2, 384], strides = [1, 1]} : vector<2x512xf32> to vector<2x384xf32>
    %434 = arith.negf %433 : vector<2x384xf32>
    %435 = math.exp %434 : vector<2x384xf32>
    %cst_239 = arith.constant 1.000000e+00 : f32
    %436 = vector.broadcast %cst_239 : f32 to vector<2x384xf32>
    %437 = arith.addf %436, %435 : vector<2x384xf32>
    %438 = arith.divf %436, %437 : vector<2x384xf32>
    %439 = vector.extract_strided_slice %438 {offsets = [0, 0], sizes = [2, 128], strides = [1, 1]} : vector<2x384xf32> to vector<2x128xf32>
    %440 = vector.extract_strided_slice %438 {offsets = [0, 128], sizes = [2, 128], strides = [1, 1]} : vector<2x384xf32> to vector<2x128xf32>
    %441 = vector.extract_strided_slice %438 {offsets = [0, 256], sizes = [2, 128], strides = [1, 1]} : vector<2x384xf32> to vector<2x128xf32>
    %442 = vector.extract_strided_slice %432 {offsets = [0, 384], sizes = [2, 128], strides = [1, 1]} : vector<2x512xf32> to vector<2x128xf32>
    %443 = math.tanh %442 : vector<2x128xf32>
    %444 = arith.mulf %440, %426 : vector<2x128xf32>
    %445 = arith.mulf %439, %443 : vector<2x128xf32>
    %446 = arith.addf %444, %445 : vector<2x128xf32>
    %447 = math.tanh %446 : vector<2x128xf32>
    %448 = arith.mulf %441, %447 : vector<2x128xf32>
    %449 = arith.addf %307, %316 : vector<2x512xf32>
    %c0_240 = arith.constant 0 : index
    %c0_241 = arith.constant 0 : index
    %450 = vector.load %arg9[%c0_240, %c0_241] : memref<128x512xf32, #tpu.memory_space<vmem>>, vector<128x512xf32>
    %cst_242 = arith.constant dense<0.000000e+00> : vector<2x512xf32>
    %451 = tpu.matmul %448, %450, %cst_242 {dimension_numbers = #tpu.dot_dimension_numbers<[1], [0], [0], [1], [0, 0, 1, 1], [], []>} : vector<2x128xf32>, vector<128x512xf32>, vector<2x512xf32> -> vector<2x512xf32>
    %452 = arith.addf %449, %451 : vector<2x512xf32>
    %453 = vector.extract_strided_slice %452 {offsets = [0, 0], sizes = [2, 384], strides = [1, 1]} : vector<2x512xf32> to vector<2x384xf32>
    %454 = arith.negf %453 : vector<2x384xf32>
    %455 = math.exp %454 : vector<2x384xf32>
    %cst_243 = arith.constant 1.000000e+00 : f32
    %456 = vector.broadcast %cst_243 : f32 to vector<2x384xf32>
    %457 = arith.addf %456, %455 : vector<2x384xf32>
    %458 = arith.divf %456, %457 : vector<2x384xf32>
    %459 = vector.extract_strided_slice %458 {offsets = [0, 0], sizes = [2, 128], strides = [1, 1]} : vector<2x384xf32> to vector<2x128xf32>
    %460 = vector.extract_strided_slice %458 {offsets = [0, 128], sizes = [2, 128], strides = [1, 1]} : vector<2x384xf32> to vector<2x128xf32>
    %461 = vector.extract_strided_slice %458 {offsets = [0, 256], sizes = [2, 128], strides = [1, 1]} : vector<2x384xf32> to vector<2x128xf32>
    %462 = vector.extract_strided_slice %452 {offsets = [0, 384], sizes = [2, 128], strides = [1, 1]} : vector<2x512xf32> to vector<2x128xf32>
    %463 = math.tanh %462 : vector<2x128xf32>
    %464 = arith.mulf %460, %446 : vector<2x128xf32>
    %465 = arith.mulf %459, %463 : vector<2x128xf32>
    %466 = arith.addf %464, %465 : vector<2x128xf32>
    %467 = math.tanh %466 : vector<2x128xf32>
    %468 = arith.mulf %461, %467 : vector<2x128xf32>
    %469 = arith.addf %312, %314 : vector<2x512xf32>
    %c0_244 = arith.constant 0 : index
    %c0_245 = arith.constant 0 : index
    %470 = vector.load %arg9[%c0_244, %c0_245] : memref<128x512xf32, #tpu.memory_space<vmem>>, vector<128x512xf32>
    %cst_246 = arith.constant dense<0.000000e+00> : vector<2x512xf32>
    %471 = tpu.matmul %468, %470, %cst_246 {dimension_numbers = #tpu.dot_dimension_numbers<[1], [0], [0], [1], [0, 0, 1, 1], [], []>} : vector<2x128xf32>, vector<128x512xf32>, vector<2x512xf32> -> vector<2x512xf32>
    %472 = arith.addf %469, %471 : vector<2x512xf32>
    %473 = vector.extract_strided_slice %472 {offsets = [0, 0], sizes = [2, 384], strides = [1, 1]} : vector<2x512xf32> to vector<2x384xf32>
    %474 = arith.negf %473 : vector<2x384xf32>
    %475 = math.exp %474 : vector<2x384xf32>
    %cst_247 = arith.constant 1.000000e+00 : f32
    %476 = vector.broadcast %cst_247 : f32 to vector<2x384xf32>
    %477 = arith.addf %476, %475 : vector<2x384xf32>
    %478 = arith.divf %476, %477 : vector<2x384xf32>
    %479 = vector.extract_strided_slice %478 {offsets = [0, 0], sizes = [2, 128], strides = [1, 1]} : vector<2x384xf32> to vector<2x128xf32>
    %480 = vector.extract_strided_slice %478 {offsets = [0, 128], sizes = [2, 128], strides = [1, 1]} : vector<2x384xf32> to vector<2x128xf32>
    %481 = vector.extract_strided_slice %478 {offsets = [0, 256], sizes = [2, 128], strides = [1, 1]} : vector<2x384xf32> to vector<2x128xf32>
    %482 = vector.extract_strided_slice %472 {offsets = [0, 384], sizes = [2, 128], strides = [1, 1]} : vector<2x512xf32> to vector<2x128xf32>
    %483 = math.tanh %482 : vector<2x128xf32>
    %484 = arith.mulf %480, %466 : vector<2x128xf32>
    %485 = arith.mulf %479, %483 : vector<2x128xf32>
    %486 = arith.addf %484, %485 : vector<2x128xf32>
    %487 = math.tanh %486 : vector<2x128xf32>
    %488 = arith.mulf %481, %487 : vector<2x128xf32>
    %c0_248 = arith.constant 0 : index
    %c0_249 = arith.constant 0 : index
    %489 = vector.load %arg10[%c0_248, %c0_249] : memref<128x512xf32, #tpu.memory_space<vmem>>, vector<128x512xf32>
    %cst_250 = arith.constant dense<0.000000e+00> : vector<2x512xf32>
    %490 = tpu.matmul %272, %489, %cst_250 {dimension_numbers = #tpu.dot_dimension_numbers<[1], [0], [0], [1], [0, 0, 1, 1], [], []>} : vector<2x128xf32>, vector<128x512xf32>, vector<2x512xf32> -> vector<2x512xf32>
    %c0_251 = arith.constant 0 : index
    %c0_252 = arith.constant 0 : index
    %491 = vector.load %arg11[%c0_251, %c0_252] : memref<128x512xf32, #tpu.memory_space<vmem>>, vector<128x512xf32>
    %cst_253 = arith.constant dense<0.000000e+00> : vector<2x512xf32>
    %492 = tpu.matmul %132, %491, %cst_253 {dimension_numbers = #tpu.dot_dimension_numbers<[1], [0], [0], [1], [0, 0, 1, 1], [], []>} : vector<2x128xf32>, vector<128x512xf32>, vector<2x512xf32> -> vector<2x512xf32>
    %493 = arith.addf %490, %492 : vector<2x512xf32>
    %c0_254 = arith.constant 0 : index
    %c0_255 = arith.constant 0 : index
    %494 = vector.load %arg12[%c0_254, %c0_255] : memref<1x512xf32, #tpu.memory_space<vmem>>, vector<1x512xf32>
    %495 = vector.broadcast %494 : vector<1x512xf32> to vector<2x512xf32>
    %496 = arith.addf %493, %495 : vector<2x512xf32>
    %497 = vector.extract_strided_slice %496 {offsets = [0, 0], sizes = [2, 384], strides = [1, 1]} : vector<2x512xf32> to vector<2x384xf32>
    %498 = arith.negf %497 : vector<2x384xf32>
    %499 = math.exp %498 : vector<2x384xf32>
    %cst_256 = arith.constant 1.000000e+00 : f32
    %500 = vector.broadcast %cst_256 : f32 to vector<2x384xf32>
    %501 = arith.addf %500, %499 : vector<2x384xf32>
    %502 = arith.divf %500, %501 : vector<2x384xf32>
    %503 = vector.extract_strided_slice %502 {offsets = [0, 0], sizes = [2, 128], strides = [1, 1]} : vector<2x384xf32> to vector<2x128xf32>
    %504 = vector.extract_strided_slice %502 {offsets = [0, 128], sizes = [2, 128], strides = [1, 1]} : vector<2x384xf32> to vector<2x128xf32>
    %505 = vector.extract_strided_slice %502 {offsets = [0, 256], sizes = [2, 128], strides = [1, 1]} : vector<2x384xf32> to vector<2x128xf32>
    %506 = vector.extract_strided_slice %496 {offsets = [0, 384], sizes = [2, 128], strides = [1, 1]} : vector<2x512xf32> to vector<2x128xf32>
    %507 = math.tanh %506 : vector<2x128xf32>
    %508 = arith.mulf %504, %0 : vector<2x128xf32>
    %509 = arith.mulf %503, %507 : vector<2x128xf32>
    %510 = arith.addf %508, %509 : vector<2x128xf32>
    %511 = math.tanh %510 : vector<2x128xf32>
    %512 = arith.mulf %505, %511 : vector<2x128xf32>
    %513 = arith.addf %488, %512 : vector<2x128xf32>
    %c0_257 = arith.constant 0 : index
    %c0_258 = arith.constant 0 : index
    %514 = vector.load %arg13[%c0_257, %c0_258] : memref<128x16xf32, #tpu.memory_space<vmem>>, vector<128x16xf32>
    %cst_259 = arith.constant dense<0.000000e+00> : vector<2x16xf32>
    %515 = tpu.matmul %513, %514, %cst_259 {dimension_numbers = #tpu.dot_dimension_numbers<[1], [0], [0], [1], [0, 0, 1, 1], [], []>} : vector<2x128xf32>, vector<128x16xf32>, vector<2x16xf32> -> vector<2x16xf32>
    %c0_260 = arith.constant 0 : index
    %c0_261 = arith.constant 0 : index
    %516 = vector.load %arg14[%c0_260, %c0_261] : memref<1x16xf32, #tpu.memory_space<vmem>>, vector<1x16xf32>
    %517 = vector.broadcast %516 : vector<1x16xf32> to vector<2x16xf32>
    %518 = arith.addf %515, %517 : vector<2x16xf32>
    %cst_262 = arith.constant 0.000000e+00 : f32
    %519 = vector.broadcast %cst_262 : f32 to vector<2x16xf32>
    %520 = arith.maximumf %518, %519 : vector<2x16xf32>
    %c0_263 = arith.constant 0 : index
    %c0_264 = arith.constant 0 : index
    %521 = vector.load %arg15[%c0_263, %c0_264] : memref<16x8xf32, #tpu.memory_space<vmem>>, vector<16x8xf32>
    %cst_265 = arith.constant dense<0.000000e+00> : vector<2x8xf32>
    %522 = tpu.matmul %520, %521, %cst_265 {dimension_numbers = #tpu.dot_dimension_numbers<[1], [0], [0], [1], [0, 0, 1, 1], [], []>} : vector<2x16xf32>, vector<16x8xf32>, vector<2x8xf32> -> vector<2x8xf32>
    %c0_266 = arith.constant 0 : index
    %c0_267 = arith.constant 0 : index
    %523 = vector.load %arg16[%c0_266, %c0_267] : memref<1x8xf32, #tpu.memory_space<vmem>>, vector<1x8xf32>
    %524 = vector.broadcast %523 : vector<1x8xf32> to vector<2x8xf32>
    %525 = arith.addf %522, %524 : vector<2x8xf32>
    %c0_268 = arith.constant 0 : index
    %c0_269 = arith.constant 0 : index
    %526 = vector.load %arg17[%c0_268, %c0_269] : memref<2x8xf32, #tpu.memory_space<vmem>>, vector<2x8xf32>
    tpu.vector_store %arg17[%c0_268, %c0_269], %525 {strides = array<i32>} : memref<2x8xf32, #tpu.memory_space<vmem>>, vector<2x8xf32>,
    return
  }
}

</mosaic_0001>

<bundles_post_ra>
// kernel: tpu_custom_call.1
= control target key start
LH: loop header
LB: loop body
LE: loop exit
PB: predicated region body
PF: predicated region fallthrough
CT: control target
= control target key end

     0   :  { %s13549_s0 = inlined_call_operand.vmem [shape: f32[2,8,32], index: 0, kind: input, shape index: {}]   ;;  %s13550_s1 = inlined_call_operand.vmem [shape: f32[32,512], index: 1, kind: input, shape index: {}]   ;;  %s13551_s2 = inlined_call_operand.vmem [shape: f32[1,512], index: 2, kind: input, shape index: {}]   ;;  %s13552_s3 = inlined_call_operand.hbm [shape: f32[32,512], index: 3, kind: input, shape index: {}]   ;;  %s13553_s4 = inlined_call_operand.vmem [shape: f32[1,512], index: 4, kind: input, shape index: {}]   ;;  %s13554_s5 = inlined_call_operand.hbm [shape: f32[128,512], index: 5, kind: input, shape index: {}]   ;;  %s13555_s6 = inlined_call_operand.hbm [shape: f32[128,512], index: 6, kind: input, shape index: {}]   ;;  %s13556_s7 = inlined_call_operand.hbm [shape: f32[128,512], index: 7, kind: input, shape index: {}]   ;;  %s13557_s8 = inlined_call_operand.vmem [shape: f32[1,512], index: 8, kind: input, shape index: {}]   ;;  %s13558_s9 = inlined_call_operand.hbm [shape: f32[128,512], index: 9, kind: input, shape index: {}]   ;;  %s13559_s10 = inlined_call_operand.hbm [shape: f32[128,512], index: 10, kind: input, shape index: {}]   ;;  %s13560_s11 = inlined_call_operand.hbm [shape: f32[128,512], index: 11, kind: input, shape index: {}]   ;;  %s13561_s12 = inlined_call_operand.vmem [shape: f32[1,512], index: 12, kind: input, shape index: {}]   ;;  %s13562_s13 = inlined_call_operand.vmem [shape: f32[128,16], index: 13, kind: input, shape index: {}]   ;;  %s13563_s14 = inlined_call_operand.vmem [shape: f32[1,16], index: 14, kind: input, shape index: {}]   ;;  %s13564_s15 = inlined_call_operand.vmem [shape: f32[16,8], index: 15, kind: input, shape index: {}]   ;;  %s13565_s16 = inlined_call_operand.vmem [shape: f32[1,8], index: 16, kind: input, shape index: {}]   ;;  %s13566_s17 = inlined_call_operand.hbm [shape: f32[2,8], index: 17, kind: output, shape index: {}]  }
   0x1   :  { %13870 = sst [smem:[#allocation98_spill]] %s13549_s0 }
   0x2   :  { %13871 = sst [smem:[#allocation99_spill]] %s13550_s1 }
   0x3   :  { %22 = vsyncpa [#allocation3], 0 }
   0x4   :  { %23 = vsyncpa [#allocation6], 0 }
   0x5   :  { %24 = vsyncpa [#allocation9], 0 }
   0x6   :  { %25 = vsyncpa [#allocation12], 0 }
   0x7   :  { %26 = vsyncpa [#allocation4], 0  ;;  %s9418_s24 = smov [#allocation5]   ;;  %s9419_s26 = smov [#allocation8]  }
   0x8   :  { %s52_s25 = sshll.u32 %s9418_s24, 4  ;;  %s76_s27 = sshll.u32 %s9419_s26, 4  ;;  %s53_s25 = int_to_ptr.vmem [resolvable:$true] %s52_s25  ;;  %s77_s27 = int_to_ptr.vmem [resolvable:$true] %s76_s27 }
   0x9   :  { %s9256_s28 = scalar_lea.vmem %s53_s25, 8192  ;;  %p9261_p1 = scmp.lt.s32.totalorder %s53_s25, %s53_s25 }
   0xa   :  { %p9257_p0 = scmp.ne.s32.totalorder %s53_s25, %s9256_s28  ;;  %p9262_p2 = scmp.lt.s32.totalorder %s9256_s28, %s9256_s28 }
   0xc   :  { %p9263_p3 = por %p9262_p2, %p9261_p1 }
   0xe   :  { %p9264_p4 = pnand %p9263_p3, %p9257_p0 }
  0x10   :  { %9267 = shalt.err (!%p9264_p4)
}
  0x11   :  { %s9420_s29 = smov 512   ;;  %s9421_s0 = smov 32  }
  0x12   :  { %58 = dma.hbm_to_vmem [thread:$0]  %s13554_s5, 8192, %s53_s25, [#allocation6], %s9420_s29, %s9420_s29, %s9421_s0  }
  0x13   :  { %s9276_s19 = scalar_lea.vmem %s77_s27, 8192  ;;  %p9281_p6 = scmp.lt.s32.totalorder %s77_s27, %s77_s27 }
  0x14   :  { %p9277_p5 = scmp.ne.s32.totalorder %s77_s27, %s9276_s19  ;;  %p9282_p7 = scmp.lt.s32.totalorder %s9276_s19, %s9276_s19 }
  0x16   :  { %p9283_p8 = por %p9282_p7, %p9281_p6 }
  0x18   :  { %p9284_p9 = pnand %p9283_p8, %p9277_p5 }
  0x1a   :  { %9287 = shalt.err (!%p9284_p9)
}
  0x1b   :  { %82 = dma.hbm_to_vmem [thread:$0]  %s13556_s7, 8192, %s77_s27, [#allocation9], %s9420_s29, %s9420_s29, %s9421_s0  }
  0x1c   :  { %s9422_s21 = smov [#allocation11]   ;;  %s9423_s23 = smov [#allocation2]  }
  0x1d   :  { %s102_s22 = sshll.u32 %s9422_s21, 4  ;;  %s38_s24 = sshll.u32 %s9423_s23, 4  ;;  %s103_s22 = int_to_ptr.vmem [resolvable:$true] %s102_s22  ;;  %s39_s24 = int_to_ptr.vmem [resolvable:$true] %s38_s24 }
  0x1e   :  { %s9296_s5 = scalar_lea.vmem %s103_s22, 8192  ;;  %p9301_p11 = scmp.lt.s32.totalorder %s103_s22, %s103_s22 }
  0x1f   :  { %p9297_p10 = scmp.ne.s32.totalorder %s103_s22, %s9296_s5  ;;  %p9302_p12 = scmp.lt.s32.totalorder %s9296_s5, %s9296_s5 }
  0x21   :  { %p9303_p13 = por %p9302_p12, %p9301_p11 }
  0x23   :  { %p9304_p0 = pnand %p9303_p13, %p9297_p10 }
  0x25   :  { %9307 = shalt.err (!%p9304_p0)
}
  0x26   :  { %108 = dma.hbm_to_vmem [thread:$0]  %s13559_s10, 8192, %s103_s22, [#allocation12], %s9420_s29, %s9420_s29, %s9421_s0  }
  0x27   :  { %s9316_s7 = scalar_lea.vmem %s39_s24, 2048  ;;  %p9321_p2 = scmp.lt.s32.totalorder %s39_s24, %s39_s24 }
  0x28   :  { %p9317_p1 = scmp.ne.s32.totalorder %s39_s24, %s9316_s7  ;;  %p9322_p3 = scmp.lt.s32.totalorder %s9316_s7, %s9316_s7 }
  0x2a   :  { %p9323_p4 = por %p9322_p3, %p9321_p2 }
  0x2c   :  { %p9324_p5 = pnand %p9323_p4, %p9317_p1 }
  0x2e   :  { %9327 = shalt.err (!%p9324_p5)
}
  0x2f   :  { %44 = dma.hbm_to_vmem [thread:$0]  %s13552_s3, 2048, %s39_s24, [#allocation3], %s9420_s29, %s9420_s29, %s9421_s0  }
  0x30   :  { %s9424_s30 = smov [#allocation7]   ;;  %s9425_s19 = smov [#allocation10]  }
  0x31   :  { %s64_s18 = sshll.u32 %s9424_s30, 4  ;;  %s90_s1 = sshll.u32 %s9425_s19, 4  ;;  %s65_s18 = int_to_ptr.vmem [resolvable:$true] %s64_s18  ;;  %s91_s1 = int_to_ptr.vmem [resolvable:$true] %s90_s1 }
  0x32   :  { %s9336_s10 = scalar_lea.vmem %s65_s18, 8192  ;;  %p9341_p7 = scmp.lt.s32.totalorder %s65_s18, %s65_s18 }
  0x33   :  { %p9337_p6 = scmp.ne.s32.totalorder %s65_s18, %s9336_s10  ;;  %p9342_p8 = scmp.lt.s32.totalorder %s9336_s10, %s9336_s10 }
  0x35   :  { %p9343_p9 = por %p9342_p8, %p9341_p7 }
  0x37   :  { %p9344_p10 = pnand %p9343_p9, %p9337_p6 }
  0x39   :  { %9347 = shalt.err (!%p9344_p10)
}
  0x3a   :  { %70 = dma.hbm_to_vmem [thread:$0]  %s13555_s6, 8192, %s65_s18, [#allocation6], %s9420_s29, %s9420_s29, %s9421_s0  }
  0x3b   :  { %s9356_s3 = scalar_lea.vmem %s91_s1, 8192  ;;  %p9361_p12 = scmp.lt.s32.totalorder %s91_s1, %s91_s1 }
  0x3c   :  { %p9357_p11 = scmp.ne.s32.totalorder %s91_s1, %s9356_s3  ;;  %p9362_p13 = scmp.lt.s32.totalorder %s9356_s3, %s9356_s3 }
  0x3e   :  { %p9363_p0 = por %p9362_p13, %p9361_p12 }
  0x40   :  { %p9364_p1 = pnand %p9363_p0, %p9357_p11 }
  0x42   :  { %9367 = shalt.err (!%p9364_p1)
}
  0x43   :  { %96 = dma.hbm_to_vmem [thread:$0]  %s13558_s9, 8192, %s91_s1, [#allocation9], %s9420_s29, %s9420_s29, %s9421_s0  }
  0x44   :  { %s9426_s24 = smov [#allocation13]  }
  0x45   :  { %s114_s5 = sshll.u32 %s9426_s24, 4  ;;  %s115_s5 = int_to_ptr.vmem [resolvable:$true] %s114_s5 }
  0x46   :  { %s9376_s25 = scalar_lea.vmem %s115_s5, 8192  ;;  %p9381_p3 = scmp.lt.s32.totalorder %s115_s5, %s115_s5 }
  0x47   :  { %p9377_p2 = scmp.ne.s32.totalorder %s115_s5, %s9376_s25  ;;  %p9382_p4 = scmp.lt.s32.totalorder %s9376_s25, %s9376_s25 }
  0x49   :  { %p9383_p5 = por %p9382_p4, %p9381_p3 }
  0x4b   :  { %p9384_p6 = pnand %p9383_p5, %p9377_p2 }
  0x4d   :  { %9387 = shalt.err (!%p9384_p6)
}
  0x4e   :  { %120 = dma.hbm_to_vmem [thread:$0]  %s13560_s11, 8192, %s115_s5, [#allocation12], %s9420_s29, %s9420_s29, %s9421_s0  }
  0x4f   :  { %9408 = dma.done.wait [#allocation3], 2048  }
  0x50   :  { %9409 = vsyncadd [#allocation3], 4294965248 }
  0x51   :  { %9410 = dma.done.wait [#allocation6], 16384  }
  0x52   :  { %9411 = vsyncadd [#allocation6], 4294950912 }
  0x53   :  { %9412 = dma.done.wait [#allocation9], 16384  }
  0x54   :  { %9413 = vsyncadd [#allocation9], 4294950912 }
  0x55   :  { %9414 = dma.done.wait [#allocation12], 16384  }
  0x56   :  { %9415 = vsyncadd [#allocation12], 4294950912  ;;  %v13569_v0 = vmov 0.0   ;;  %s13872_s27 = sld [smem:[#allocation99_spill]]  ;;  %vm195_vm0 = vcmask 1041409   ;;  %vm197_vm1 = vcmask 261120  }
  0x57   :  { %264 = vmatprep.mubr.f32.mxu1 %v13569_v0  ;;  %564 = vmatprep.mubr.f32.mxu0 %v13569_v0  ;;  %s13873_s22 = sld [smem:[#allocation98_spill]]  ;;  %v9837_v48 = vld [vmem:[#allocation2 + $0x68] sm:$0xff]  ;;  %v9847_v50 = vld [vmem:[#allocation2 + $0x60] sm:$0xff]  ;;  %v9942_v57 = vld [vmem:[#allocation2 + $0x78] sm:$0xff]  ;;  %vm9428_vm2 = vmmov 0   ;;  %vm8466_vm3 = vcmask 130048  }
  0x58   :  { %v9851_v51 = vld [vmem:[#allocation2 + $0x48] sm:$0xff]  ;;  %v9856_v52 = vld [vmem:[#allocation2 + $0x40] sm:$0xff]  ;;  %v9948_v58 = vld [vmem:[#allocation2 + $0x70] sm:$0xff]  ;;  %s9429_s26 = smov [#allocation14]   ;;  %vm8540_vm4 = vcmask 58368  }
  0x59   :  { %v9860_v53 = vld [vmem:[#allocation2 + $0x28] sm:$0xff]  ;;  %v9864_v54 = vld [vmem:[#allocation2 + $0x20] sm:$0xff]  ;;  %v9953_v59 = vld [vmem:[#allocation2 + $0x58] sm:$0xff] }
  0x5a   :  { %v9868_v55 = vld [vmem:[#allocation2 + $0x8] sm:$0xff]  ;;  %v9872_v56 = vld [vmem:[#allocation2] sm:$0xff]  ;;  %v9958_v60 = vld [vmem:[#allocation2 + $0x50] sm:$0xff] }
  0x5b   :  { %v9962_v61 = vld [vmem:[#allocation2 + $0x38] sm:$0xff]  ;;  %v9966_v62 = vld [vmem:[#allocation2 + $0x30] sm:$0xff] }
  0x5c   :  { %v9567_v1 = vld [vmem:[%s13872_s27 + $0x68] sm:$0xff]  ;;  %v9572_v2 = vld [vmem:[%s13872_s27 + $0x60] sm:$0xff]  ;;  %v9634_v16 = vld [vmem:[%s13872_s27 + $0x78] sm:$0xff] }
  0x5d   :  { %v9577_v3 = vld [vmem:[%s13872_s27 + $0x48] sm:$0xff]  ;;  %224 = vmatprep.subr.mxu1 %v9567_v1  ;;  %524 = vmatprep.subr.mxu0 %v9567_v1  ;;  %v9584_v4 = vld [vmem:[%s13872_s27 + $0x40] sm:$0xff]  ;;  %v9641_v17 = vld [vmem:[%s13872_s27 + $0x70] sm:$0xff] }
  0x5e   :  { %225 = vmatpush1.msra.mxu1 %v9572_v2  ;;  %525 = vmatpush1.msra.mxu0 %v9572_v2  ;;  %v9591_v5 = vld [vmem:[%s13872_s27 + $0x28] sm:$0xff]  ;;  %v9598_v6 = vld [vmem:[%s13872_s27 + $0x20] sm:$0xff]  ;;  %v9651_v19 = vld [vmem:[%s13872_s27 + $0x58] sm:$0xff] }
  0x5f   :  { %226 = vmatprep.subr.mxu1 %v9577_v3  ;;  %526 = vmatprep.subr.mxu0 %v9577_v3  ;;  %v152_v7 = vld [vmem:[%s13873_s22] sm:$0x1]  ;;  %v153_v8 = vld [vmem:[%s13873_s22 + $0x8] sm:$0x1]  ;;  %v493_v11 = vld [vmem:[%s13873_s22 + $0xa] sm:$0x1] }
  0x60   :  { %227 = vmatpush1.msra.mxu1 %v9584_v4  ;;  %527 = vmatpush1.msra.mxu0 %v9584_v4  ;;  %v9611_v9 = vld [vmem:[%s13872_s27 + $0x8] sm:$0xff]  ;;  %v194_v10 = vrot.slane %v153_v8, 7  ;;  %v9621_v12 = vld [vmem:[%s13872_s27] sm:$0xff]  ;;  %v496_v14 = vrot.slane %v493_v11, 7  ;;  %v9659_v20 = vld [vmem:[%s13872_s27 + $0x50] sm:$0xff] }
  0x61   :  { %228 = vmatprep.subr.mxu1 %v9591_v5  ;;  %528 = vmatprep.subr.mxu0 %v9591_v5  ;;  %v492_v13 = vld [vmem:[%s13873_s22 + $0x2] sm:$0x1]  ;;  %v9666_v21 = vld [vmem:[%s13872_s27 + $0x38] sm:$0xff]  ;;  %v9674_v22 = vld [vmem:[%s13872_s27 + $0x30] sm:$0xff] }
  0x62   :  { %229 = vmatpush1.msra.mxu1 %v9598_v6  ;;  %529 = vmatpush1.msra.mxu0 %v9598_v6  ;;  %v9629_v15 = vsel %vm195_vm0, %v194_v10, %v152_v7  ;;  %v9646_v18 = vsel %vm195_vm0, %v496_v14, %v492_v13  ;;  %v643_v23 = vld [vmem:[%s13873_s22 + $0xb] sm:$0x1]  ;;  %v9684_v24 = vld [vmem:[%s13872_s27 + $0x18] sm:$0xff]  ;;  %v9691_v25 = vld [vmem:[%s13872_s27 + $0x10] sm:$0xff] }
  0x63   :  { %230 = vmatprep.subr.mxu1 %v9611_v9  ;;  %530 = vmatprep.subr.mxu0 %v9611_v9  ;;  %v646_v26 = vrot.slane %v643_v23, 7  ;;  %v642_v27 = vld [vmem:[%s13873_s22 + $0x3] sm:$0x1]  ;;  %v343_v29 = vld [vmem:[%s13873_s22 + $0x9] sm:$0x1]  ;;  %v9970_v63 = vld [vmem:[#allocation2 + $0x18] sm:$0xff] }
  0x64   :  { %231 = vmatpush1.msra.mxu1 %v9621_v12  ;;  %531 = vmatpush1.msra.mxu0 %v9621_v12  ;;  %v346_v30 = vrot.slane %v343_v29, 7  ;;  %v793_v31 = vld [vmem:[%s13873_s22 + $0xc] sm:$0x1]  ;;  %v342_v32 = vld [vmem:[%s13873_s22 + $0x1] sm:$0x1] }
  0x65   :  { %8560 = vmatmul.mubr.msk.f32.vlgmr.msra.gmra.mxu1 %vm197_vm1, %v9629_v15  ;;  %295 = vmatprep.subr.mxu1 %v9634_v16  ;;  %v9708_v28 = vsel %vm195_vm0, %v646_v26, %v642_v27  ;;  %v796_v33 = vrot.slane %v793_v31, 7  ;;  %v792_v35 = vld [vmem:[%s13873_s22 + $0x4] sm:$0x1]  ;;  %v943_v37 = vld [vmem:[%s13873_s22 + $0xd] sm:$0x1] }
  0x66   :  { %674 = vmatprep.subr.mxu0 %v9567_v1  ;;  %296 = vmatpush1.msra.mxu1 %v9641_v17  ;;  %v9735_v34 = vsel %vm195_vm0, %v346_v30, %v342_v32  ;;  %v946_v38 = vrot.slane %v943_v37, 7  ;;  %v942_v39 = vld [vmem:[%s13873_s22 + $0x5] sm:$0x1]  ;;  %v1093_v41 = vld [vmem:[%s13873_s22 + $0xe] sm:$0x1]  ;;  %v10203_v37 = vld [vmem:[#allocation5 + $0x1d0] sm:$0xff] }
  0x67   :  { %8564 = vmatmul.mubr.msk.f32.vlgmr.msra.gmra.mxu0 %vm197_vm1, %v9646_v18  ;;  %297 = vmatprep.subr.mxu1 %v9651_v19  ;;  %v9748_v36 = vsel %vm195_vm0, %v796_v33, %v792_v35  ;;  %v1096_v42 = vrot.slane %v1093_v41, 7  ;;  %v1092_v43 = vld [vmem:[%s13873_s22 + $0x6] sm:$0x1]  ;;  %v1243_v45 = vld [vmem:[%s13873_s22 + $0xf] sm:$0x1]  ;;  %v10195_v35 = vld [vmem:[#allocation5 + $0x1f0] sm:$0xff] }
  0x68   :  { %675 = vmatpush1.msra.mxu0 %v9572_v2  ;;  %298 = vmatpush1.msra.mxu1 %v9659_v20  ;;  %v9779_v40 = vsel %vm195_vm0, %v946_v38, %v942_v39  ;;  %v1246_v46 = vrot.slane %v1243_v45, 7  ;;  %v1242_v47 = vld [vmem:[%s13873_s22 + $0x7] sm:$0x1]  ;;  %v10074_v8 = vld [vmem:[#allocation5 + $0x188] sm:$0xff]  ;;  %v10207_v38 = vld [vmem:[#allocation5 + $0x1b8] sm:$0xff] }
  0x69   :  { %676 = vmatprep.subr.mxu0 %v9577_v3  ;;  %299 = vmatprep.subr.mxu1 %v9666_v21  ;;  %v9810_v44 = vsel %vm195_vm0, %v1096_v42, %v1092_v43  ;;  %v10070_v7 = vld [vmem:[#allocation5 + $0x1a0] sm:$0xff]  ;;  %v10084_v10 = vld [vmem:[#allocation5 + $0x168] sm:$0xff]  ;;  %v10211_v39 = vld [vmem:[#allocation5 + $0x1b0] sm:$0xff] }
  0x6a   :  { %677 = vmatpush1.msra.mxu0 %v9584_v4  ;;  %300 = vmatpush1.msra.mxu1 %v9674_v22  ;;  %v9843_v49 = vsel %vm195_vm0, %v1246_v46, %v1242_v47  ;;  %v10088_v11 = vld [vmem:[#allocation5 + $0x160] sm:$0xff]  ;;  %v10101_v14 = vld [vmem:[#allocation5 + $0x128] sm:$0xff]  ;;  %v10219_v41 = vld [vmem:[#allocation5 + $0x190] sm:$0xff] }
  0x6b   :  { %678 = vmatprep.subr.mxu0 %v9591_v5  ;;  %301 = vmatprep.subr.mxu1 %v9684_v24  ;;  %v10097_v13 = vld [vmem:[#allocation5 + $0x140] sm:$0xff]  ;;  %13876 = vst [vmem:[#allocation22_spill] sm:$0xff] %v10101_v14  ;;  %v10154_v26 = vld [vmem:[#allocation5 + $0x68] sm:$0xff]  ;;  %v10223_v42 = vld [vmem:[#allocation5 + $0x178] sm:$0xff] }
  0x6c   :  { %679 = vmatpush1.msra.mxu0 %v9598_v6  ;;  %302 = vmatpush1.msra.mxu1 %v9691_v25  ;;  %13875 = vst [vmem:[#allocation21_spill] sm:$0xff] %v10097_v13  ;;  %v10140_v23 = vld [vmem:[#allocation5 + $0xa0] sm:$0xff]  ;;  %13888 = vst [vmem:[#allocation34_spill] sm:$0xff] %v10154_v26  ;;  %v10171_v30 = vld [vmem:[#allocation5 + $0x28] sm:$0xff] }
  0x6d   :  { %680 = vmatprep.subr.mxu0 %v9611_v9  ;;  %335 = vmatprep.mubr.f32.mxu1 %v13569_v0  ;;  %13885 = vst [vmem:[#allocation31_spill] sm:$0xff] %v10140_v23  ;;  %v10158_v27 = vld [vmem:[#allocation5 + $0x60] sm:$0xff]  ;;  %13892 = vst [vmem:[#allocation38_spill] sm:$0xff] %v10171_v30  ;;  %v10179_v32 = vld [vmem:[#allocation5 + $0x8] sm:$0xff] }
  0x6e   :  { %681 = vmatpush1.msra.mxu0 %v9621_v12  ;;  %8561 = vmatmul.mubr.msk.f32.vlgmr.msra.gmra.mxu1 %vm197_vm1, %v9629_v15  ;;  %13889 = vst [vmem:[#allocation35_spill] sm:$0xff] %v10158_v27  ;;  %v10167_v29 = vld [vmem:[#allocation5 + $0x40] sm:$0xff]  ;;  %13894 = vst [vmem:[#allocation40_spill] sm:$0xff] %v10179_v32  ;;  %v10227_v43 = vld [vmem:[#allocation5 + $0x170] sm:$0xff] }
  0x6f   :  { %374 = vmatprep.subr.mxu1 %v9567_v1  ;;  %714 = vmatprep.mubr.f32.mxu0 %v13569_v0  ;;  %13891 = vst [vmem:[#allocation37_spill] sm:$0xff] %v10167_v29  ;;  %v10175_v31 = vld [vmem:[#allocation5 + $0x20] sm:$0xff]  ;;  %v10235_v45 = vld [vmem:[#allocation5 + $0x150] sm:$0xff]  ;;  %v10239_v46 = vld [vmem:[#allocation5 + $0x138] sm:$0xff] }
  0x70   :  { %824 = vmatprep.subr.mxu0 %v9567_v1  ;;  %375 = vmatpush1.msra.mxu1 %v9572_v2  ;;  %13893 = vst [vmem:[#allocation39_spill] sm:$0xff] %v10175_v31  ;;  %v10185_v33 = vld [vmem:[#allocation5] sm:$0xff]  ;;  %13898 = vst [vmem:[#allocation44_spill] sm:$0xff] %v10235_v45  ;;  %v10243_v47 = vld [vmem:[#allocation5 + $0x130] sm:$0xff] }
  0x71   :  { %8566 = vmatmul.mubr.msk.f32.vlgmr.msra.gmra.mxu0 %vm197_vm1, %v9708_v28  ;;  %376 = vmatprep.subr.mxu1 %v9577_v3  ;;  %13895 = vst [vmem:[#allocation41_spill] sm:$0xff] %v10185_v33  ;;  %13899 = vst [vmem:[#allocation45_spill] sm:$0xff] %v10239_v46 }
  0x72   :  { %825 = vmatpush1.msra.mxu0 %v9572_v2  ;;  %377 = vmatpush1.msra.mxu1 %v9584_v4  ;;  %13900 = vst [vmem:[#allocation46_spill] sm:$0xff] %v10243_v47 }
  0x73   :  { %826 = vmatprep.subr.mxu0 %v9577_v3  ;;  %378 = vmatprep.subr.mxu1 %v9591_v5 }
  0x74   :  { %827 = vmatpush1.msra.mxu0 %v9584_v4  ;;  %379 = vmatpush1.msra.mxu1 %v9598_v6 }
  0x75   :  { %828 = vmatprep.subr.mxu0 %v9591_v5  ;;  %380 = vmatprep.subr.mxu1 %v9611_v9 }
  0x76   :  { %829 = vmatpush1.msra.mxu0 %v9598_v6  ;;  %381 = vmatpush1.msra.mxu1 %v9621_v12 }
  0x77   :  { %830 = vmatprep.subr.mxu0 %v9611_v9  ;;  %414 = vmatprep.mubr.f32.mxu1 %v13569_v0 }
  0x78   :  { %831 = vmatpush1.msra.mxu0 %v9621_v12  ;;  %8562 = vmatmul.mubr.msk.f32.vlgmr.msra.gmra.mxu1 %vm197_vm1, %v9735_v34 }
  0x79   :  { %445 = vmatprep.subr.mxu1 %v9634_v16  ;;  %864 = vmatprep.mubr.f32.mxu0 %v13569_v0 }
  0x7a   :  { %974 = vmatprep.subr.mxu0 %v9567_v1  ;;  %446 = vmatpush1.msra.mxu1 %v9641_v17 }
  0x7b   :  { %8568 = vmatmul.mubr.msk.f32.vlgmr.msra.gmra.mxu0 %vm197_vm1, %v9748_v36  ;;  %447 = vmatprep.subr.mxu1 %v9651_v19 }
  0x7c   :  { %975 = vmatpush1.msra.mxu0 %v9572_v2  ;;  %448 = vmatpush1.msra.mxu1 %v9659_v20 }
  0x7d   :  { %976 = vmatprep.subr.mxu0 %v9577_v3  ;;  %449 = vmatprep.subr.mxu1 %v9666_v21 }
  0x7e   :  { %977 = vmatpush1.msra.mxu0 %v9584_v4  ;;  %450 = vmatpush1.msra.mxu1 %v9674_v22 }
  0x7f   :  { %978 = vmatprep.subr.mxu0 %v9591_v5  ;;  %451 = vmatprep.subr.mxu1 %v9684_v24 }
  0x80   :  { %979 = vmatpush1.msra.mxu0 %v9598_v6  ;;  %452 = vmatpush1.msra.mxu1 %v9691_v25 }
  0x81   :  { %980 = vmatprep.subr.mxu0 %v9611_v9  ;;  %485 = vmatprep.mubr.f32.mxu1 %v13569_v0 }
  0x82   :  { %981 = vmatpush1.msra.mxu0 %v9621_v12  ;;  %8563 = vmatmul.mubr.msk.f32.vlgmr.msra.gmra.mxu1 %vm197_vm1, %v9735_v34 }
  0x83   :  { %595 = vmatprep.subr.mxu1 %v9634_v16  ;;  %1014 = vmatprep.mubr.f32.mxu0 %v13569_v0 }
  0x84   :  { %1124 = vmatprep.subr.mxu0 %v9567_v1  ;;  %596 = vmatpush1.msra.mxu1 %v9641_v17 }
  0x85   :  { %8570 = vmatmul.mubr.msk.f32.vlgmr.msra.gmra.mxu0 %vm197_vm1, %v9779_v40  ;;  %597 = vmatprep.subr.mxu1 %v9651_v19 }
  0x86   :  { %1125 = vmatpush1.msra.mxu0 %v9572_v2  ;;  %598 = vmatpush1.msra.mxu1 %v9659_v20 }
  0x87   :  { %1126 = vmatprep.subr.mxu0 %v9577_v3  ;;  %599 = vmatprep.subr.mxu1 %v9666_v21 }
  0x88   :  { %1127 = vmatpush1.msra.mxu0 %v9584_v4  ;;  %600 = vmatpush1.msra.mxu1 %v9674_v22 }
  0x89   :  { %1128 = vmatprep.subr.mxu0 %v9591_v5  ;;  %601 = vmatprep.subr.mxu1 %v9684_v24 }
  0x8a   :  { %1129 = vmatpush1.msra.mxu0 %v9598_v6  ;;  %602 = vmatpush1.msra.mxu1 %v9691_v25 }
  0x8b   :  { %1130 = vmatprep.subr.mxu0 %v9611_v9  ;;  %635 = vmatprep.mubr.f32.mxu1 %v13569_v0 }
  0x8c   :  { %1131 = vmatpush1.msra.mxu0 %v9621_v12  ;;  %8565 = vmatmul.mubr.msk.f32.vlgmr.msra.gmra.mxu1 %vm197_vm1, %v9646_v18 }
  0x8d   :  { %745 = vmatprep.subr.mxu1 %v9634_v16  ;;  %1164 = vmatprep.mubr.f32.mxu0 %v13569_v0 }
  0x8e   :  { %1274 = vmatprep.subr.mxu0 %v9567_v1  ;;  %746 = vmatpush1.msra.mxu1 %v9641_v17  ;;  %v9974_v1 = vld [vmem:[#allocation2 + $0x10] sm:$0xff] }
  0x8f   :  { %8572 = vmatmul.mubr.msk.f32.vlgmr.msra.gmra.mxu0 %vm197_vm1, %v9810_v44  ;;  %747 = vmatprep.subr.mxu1 %v9651_v19 }
  0x90   :  { %1275 = vmatpush1.msra.mxu0 %v9572_v2  ;;  %748 = vmatpush1.msra.mxu1 %v9659_v20  ;;  %v10048_v2 = vld [vmem:[#allocation5 + $0x1e8] sm:$0xff] }
  0x91   :  { %1276 = vmatprep.subr.mxu0 %v9577_v3  ;;  %749 = vmatprep.subr.mxu1 %v9666_v21  ;;  %v10052_v3 = vld [vmem:[#allocation5 + $0x1e0] sm:$0xff] }
  0x92   :  { %1277 = vmatpush1.msra.mxu0 %v9584_v4  ;;  %750 = vmatpush1.msra.mxu1 %v9674_v22  ;;  %v10057_v4 = vld [vmem:[#allocation5 + $0x1c8] sm:$0xff] }
  0x93   :  { %1278 = vmatprep.subr.mxu0 %v9591_v5  ;;  %751 = vmatprep.subr.mxu1 %v9684_v24  ;;  %v10062_v5 = vld [vmem:[#allocation5 + $0x1c0] sm:$0xff] }
  0x94   :  { %1279 = vmatpush1.msra.mxu0 %v9598_v6  ;;  %752 = vmatpush1.msra.mxu1 %v9691_v25  ;;  %v10066_v6 = vld [vmem:[#allocation5 + $0x1a8] sm:$0xff] }
  0x95   :  { %1280 = vmatprep.subr.mxu0 %v9611_v9  ;;  %785 = vmatprep.mubr.f32.mxu1 %v13569_v0  ;;  %v10080_v9 = vld [vmem:[#allocation5 + $0x180] sm:$0xff] }
  0x96   :  { %1281 = vmatpush1.msra.mxu0 %v9621_v12  ;;  %8567 = vmatmul.mubr.msk.f32.vlgmr.msra.gmra.mxu1 %vm197_vm1, %v9708_v28  ;;  %v10093_v12 = vld [vmem:[#allocation5 + $0x148] sm:$0xff] }
  0x97   :  { %895 = vmatprep.subr.mxu1 %v9634_v16  ;;  %1314 = vmatprep.mubr.f32.mxu0 %v13569_v0  ;;  %13874 = vst [vmem:[#allocation20_spill] sm:$0xff] %v10093_v12 }
  0x98   :  { %1454 = vmatprep.subr.mxu0 %v9837_v48  ;;  %896 = vmatpush1.msra.mxu1 %v9641_v17 }
  0x99   :  { %8574 = vmatmul.mubr.msk.f32.vlgmr.msra.gmra.mxu0 %vm197_vm1, %v9843_v49  ;;  %897 = vmatprep.subr.mxu1 %v9651_v19 }
  0x9a   :  { %1455 = vmatpush1.msra.mxu0 %v9847_v50  ;;  %898 = vmatpush1.msra.mxu1 %v9659_v20 }
  0x9b   :  { %1456 = vmatprep.subr.mxu0 %v9851_v51  ;;  %899 = vmatprep.subr.mxu1 %v9666_v21 }
  0x9c   :  { %1457 = vmatpush1.msra.mxu0 %v9856_v52  ;;  %900 = vmatpush1.msra.mxu1 %v9674_v22 }
  0x9d   :  { %1458 = vmatprep.subr.mxu0 %v9860_v53  ;;  %901 = vmatprep.subr.mxu1 %v9684_v24 }
  0x9e   :  { %1459 = vmatpush1.msra.mxu0 %v9864_v54  ;;  %902 = vmatpush1.msra.mxu1 %v9691_v25 }
  0x9f   :  { %1460 = vmatprep.subr.mxu0 %v9868_v55  ;;  %935 = vmatprep.mubr.f32.mxu1 %v13569_v0 }
  0xa0   :  { %1461 = vmatpush1.msra.mxu0 %v9872_v56  ;;  %8569 = vmatmul.mubr.msk.f32.vlgmr.msra.gmra.mxu1 %vm197_vm1, %v9748_v36 }
  0xa1   :  { %1045 = vmatprep.subr.mxu1 %v9634_v16  ;;  %1494 = vmatprep.mubr.f32.mxu0 %v13569_v0 }
  0xa2   :  { %1596 = vmatprep.subr.mxu0 %v9837_v48  ;;  %1046 = vmatpush1.msra.mxu1 %v9641_v17 }
  0xa3   :  { %8576 = vmatmul.mubr.msk.f32.vlgmr.msra.gmra.mxu0 %vm197_vm1, %v9629_v15  ;;  %1047 = vmatprep.subr.mxu1 %v9651_v19 }
  0xa4   :  { %1597 = vmatpush1.msra.mxu0 %v9847_v50  ;;  %1048 = vmatpush1.msra.mxu1 %v9659_v20 }
  0xa5   :  { %1598 = vmatprep.subr.mxu0 %v9851_v51  ;;  %1049 = vmatprep.subr.mxu1 %v9666_v21 }
  0xa6   :  { %1599 = vmatpush1.msra.mxu0 %v9856_v52  ;;  %1050 = vmatpush1.msra.mxu1 %v9674_v22 }
  0xa7   :  { %1600 = vmatprep.subr.mxu0 %v9860_v53  ;;  %1051 = vmatprep.subr.mxu1 %v9684_v24 }
  0xa8   :  { %1601 = vmatpush1.msra.mxu0 %v9864_v54  ;;  %1052 = vmatpush1.msra.mxu1 %v9691_v25 }
  0xa9   :  { %1602 = vmatprep.subr.mxu0 %v9868_v55  ;;  %1085 = vmatprep.mubr.f32.mxu1 %v13569_v0 }
  0xaa   :  { %1603 = vmatpush1.msra.mxu0 %v9872_v56  ;;  %1636 = vmatprep.mubr.f32.mxu0 %v13569_v0 }
  0xab   :  { %8571 = vmatmul.mubr.msk.f32.vlgmr.msra.gmra.mxu1 %vm197_vm1, %v9779_v40  ;;  %1195 = vmatprep.subr.mxu1 %v9634_v16 }
  0xac   :  { %8578 = vmatmul.mubr.msk.f32.vlgmr.msra.gmra.mxu0 %vm197_vm1, %v9735_v34  ;;  %1738 = vmatprep.subr.mxu0 %v9837_v48 }
  0xad   :  { %1196 = vmatpush1.msra.mxu1 %v9641_v17  ;;  %1739 = vmatpush1.msra.mxu0 %v9847_v50 }
  0xae   :  { %1197 = vmatprep.subr.mxu1 %v9651_v19  ;;  %1740 = vmatprep.subr.mxu0 %v9851_v51 }
  0xaf   :  { %1198 = vmatpush1.msra.mxu1 %v9659_v20  ;;  %1741 = vmatpush1.msra.mxu0 %v9856_v52 }
  0xb0   :  { %1199 = vmatprep.subr.mxu1 %v9666_v21  ;;  %1742 = vmatprep.subr.mxu0 %v9860_v53 }
  0xb1   :  { %1200 = vmatpush1.msra.mxu1 %v9674_v22  ;;  %1743 = vmatpush1.msra.mxu0 %v9864_v54 }
  0xb2   :  { %1201 = vmatprep.subr.mxu1 %v9684_v24  ;;  %1744 = vmatprep.subr.mxu0 %v9868_v55 }
  0xb3   :  { %1202 = vmatpush1.msra.mxu1 %v9691_v25  ;;  %1235 = vmatprep.mubr.f32.mxu1 %v13569_v0 }
  0xb4   :  { %1745 = vmatpush1.msra.mxu0 %v9872_v56  ;;  %1778 = vmatprep.mubr.f32.mxu0 %v13569_v0 }
  0xb5   :  { %8573 = vmatmul.mubr.msk.f32.vlgmr.msra.gmra.mxu1 %vm197_vm1, %v9810_v44  ;;  %1345 = vmatprep.subr.mxu1 %v9634_v16  ;;  %v10109_v16 = vld [vmem:[#allocation5 + $0x108] sm:$0xff] }
  0xb6   :  { %8580 = vmatmul.mubr.msk.f32.vlgmr.msra.gmra.mxu0 %vm197_vm1, %v9646_v18  ;;  %1880 = vmatprep.subr.mxu0 %v9837_v48  ;;  %13878 = vst [vmem:[#allocation24_spill] sm:$0xff] %v10109_v16 }
  0xb7   :  { %1346 = vmatpush1.msra.mxu1 %v9641_v17  ;;  %1881 = vmatpush1.msra.mxu0 %v9847_v50  ;;  %v10115_v17 = vld [vmem:[#allocation5 + $0x100] sm:$0xff] }
  0xb8   :  { %1347 = vmatprep.subr.mxu1 %v9651_v19  ;;  %1882 = vmatprep.subr.mxu0 %v9851_v51  ;;  %13879 = vst [vmem:[#allocation25_spill] sm:$0xff] %v10115_v17  ;;  %v10123_v19 = vld [vmem:[#allocation5 + $0xe0] sm:$0xff] }
  0xb9   :  { %1348 = vmatpush1.msra.mxu1 %v9659_v20  ;;  %1883 = vmatpush1.msra.mxu0 %v9856_v52  ;;  %13881 = vst [vmem:[#allocation27_spill] sm:$0xff] %v10123_v19  ;;  %v10128_v20 = vld [vmem:[#allocation5 + $0xc8] sm:$0xff] }
  0xba   :  { %1349 = vmatprep.subr.mxu1 %v9666_v21  ;;  %1884 = vmatprep.subr.mxu0 %v9860_v53  ;;  %13882 = vst [vmem:[#allocation28_spill] sm:$0xff] %v10128_v20  ;;  %v10132_v21 = vld [vmem:[#allocation5 + $0xc0] sm:$0xff] }
  0xbb   :  { %1350 = vmatpush1.msra.mxu1 %v9674_v22  ;;  %1885 = vmatpush1.msra.mxu0 %v9864_v54  ;;  %13883 = vst [vmem:[#allocation29_spill] sm:$0xff] %v10132_v21  ;;  %v10136_v22 = vld [vmem:[#allocation5 + $0xa8] sm:$0xff] }
  0xbc   :  { %1351 = vmatprep.subr.mxu1 %v9684_v24  ;;  %1886 = vmatprep.subr.mxu0 %v9868_v55  ;;  %13884 = vst [vmem:[#allocation30_spill] sm:$0xff] %v10136_v22  ;;  %v10144_v24 = vld [vmem:[#allocation5 + $0x88] sm:$0xff] }
  0xbd   :  { %1352 = vmatpush1.msra.mxu1 %v9691_v25  ;;  %1385 = vmatprep.mubr.f32.mxu1 %v13569_v0  ;;  %13886 = vst [vmem:[#allocation32_spill] sm:$0xff] %v10144_v24  ;;  %v10150_v25 = vld [vmem:[#allocation5 + $0x80] sm:$0xff] }
  0xbe   :  { %1887 = vmatpush1.msra.mxu0 %v9872_v56  ;;  %1920 = vmatprep.mubr.f32.mxu0 %v13569_v0  ;;  %13887 = vst [vmem:[#allocation33_spill] sm:$0xff] %v10150_v25 }
  0xbf   :  { %8575 = vmatmul.mubr.msk.f32.vlgmr.msra.gmra.mxu1 %vm197_vm1, %v9843_v49  ;;  %1525 = vmatprep.subr.mxu1 %v9942_v57 }
  0xc0   :  { %8582 = vmatmul.mubr.msk.f32.vlgmr.msra.gmra.mxu0 %vm197_vm1, %v9708_v28  ;;  %2022 = vmatprep.subr.mxu0 %v9837_v48 }
  0xc1   :  { %1526 = vmatpush1.msra.mxu1 %v9948_v58  ;;  %2023 = vmatpush1.msra.mxu0 %v9847_v50 }
  0xc2   :  { %1527 = vmatprep.subr.mxu1 %v9953_v59  ;;  %2024 = vmatprep.subr.mxu0 %v9851_v51 }
  0xc3   :  { %1528 = vmatpush1.msra.mxu1 %v9958_v60  ;;  %2025 = vmatpush1.msra.mxu0 %v9856_v52 }
  0xc4   :  { %1529 = vmatprep.subr.mxu1 %v9962_v61  ;;  %2026 = vmatprep.subr.mxu0 %v9860_v53 }
  0xc5   :  { %1530 = vmatpush1.msra.mxu1 %v9966_v62  ;;  %2027 = vmatpush1.msra.mxu0 %v9864_v54 }
  0xc6   :  { %1531 = vmatprep.subr.mxu1 %v9970_v63  ;;  %2028 = vmatprep.subr.mxu0 %v9868_v55 }
  0xc7   :  { %1532 = vmatpush1.msra.mxu1 %v9974_v1  ;;  %1565 = vmatprep.mubr.f32.mxu1 %v13569_v0 }
  0xc8   :  { %2029 = vmatpush1.msra.mxu0 %v9872_v56  ;;  %2062 = vmatprep.mubr.f32.mxu0 %v13569_v0 }
  0xc9   :  { %8577 = vmatmul.mubr.msk.f32.vlgmr.msra.gmra.mxu1 %vm197_vm1, %v9629_v15  ;;  %1667 = vmatprep.subr.mxu1 %v9942_v57  ;;  %v10105_v15 = vld [vmem:[#allocation5 + $0x120] sm:$0xff] }
  0xca   :  { %8584 = vmatmul.mubr.msk.f32.vlgmr.msra.gmra.mxu0 %vm197_vm1, %v9748_v36  ;;  %2164 = vmatprep.subr.mxu0 %v9837_v48  ;;  %13877 = vst [vmem:[#allocation23_spill] sm:$0xff] %v10105_v15 }
  0xcb   :  { %1668 = vmatpush1.msra.mxu1 %v9948_v58  ;;  %2165 = vmatpush1.msra.mxu0 %v9847_v50 }
  0xcc   :  { %1669 = vmatprep.subr.mxu1 %v9953_v59  ;;  %2166 = vmatprep.subr.mxu0 %v9851_v51 }
  0xcd   :  { %1670 = vmatpush1.msra.mxu1 %v9958_v60  ;;  %2167 = vmatpush1.msra.mxu0 %v9856_v52 }
  0xce   :  { %1671 = vmatprep.subr.mxu1 %v9962_v61  ;;  %2168 = vmatprep.subr.mxu0 %v9860_v53 }
  0xcf   :  { %1672 = vmatpush1.msra.mxu1 %v9966_v62  ;;  %2169 = vmatpush1.msra.mxu0 %v9864_v54 }
  0xd0   :  { %1673 = vmatprep.subr.mxu1 %v9970_v63  ;;  %2170 = vmatprep.subr.mxu0 %v9868_v55 }
  0xd1   :  { %1674 = vmatpush1.msra.mxu1 %v9974_v1  ;;  %1707 = vmatprep.mubr.f32.mxu1 %v13569_v0 }
  0xd2   :  { %2171 = vmatpush1.msra.mxu0 %v9872_v56  ;;  %2204 = vmatprep.mubr.f32.mxu0 %v13569_v0 }
  0xd3   :  { %8579 = vmatmul.mubr.msk.f32.vlgmr.msra.gmra.mxu1 %vm197_vm1, %v9735_v34  ;;  %1809 = vmatprep.subr.mxu1 %v9942_v57  ;;  %v10191_v34 = vld [vmem:[#allocation5 + $0x1f8] sm:$0xff] }
  0xd4   :  { %8586 = vmatmul.mubr.msk.f32.vlgmr.msra.gmra.mxu0 %vm197_vm1, %v9779_v40  ;;  %2306 = vmatprep.subr.mxu0 %v9837_v48  ;;  %13896 = vst [vmem:[#allocation42_spill] sm:$0xff] %v10191_v34 }
  0xd5   :  { %1810 = vmatpush1.msra.mxu1 %v9948_v58  ;;  %2307 = vmatpush1.msra.mxu0 %v9847_v50 }
  0xd6   :  { %1811 = vmatprep.subr.mxu1 %v9953_v59  ;;  %2308 = vmatprep.subr.mxu0 %v9851_v51 }
  0xd7   :  { %1812 = vmatpush1.msra.mxu1 %v9958_v60  ;;  %2309 = vmatpush1.msra.mxu0 %v9856_v52 }
  0xd8   :  { %1813 = vmatprep.subr.mxu1 %v9962_v61  ;;  %2310 = vmatprep.subr.mxu0 %v9860_v53 }
  0xd9   :  { %1814 = vmatpush1.msra.mxu1 %v9966_v62  ;;  %2311 = vmatpush1.msra.mxu0 %v9864_v54 }
  0xda   :  { %1815 = vmatprep.subr.mxu1 %v9970_v63  ;;  %2312 = vmatprep.subr.mxu0 %v9868_v55 }
  0xdb   :  { %1816 = vmatpush1.msra.mxu1 %v9974_v1  ;;  %1849 = vmatprep.mubr.f32.mxu1 %v13569_v0 }
  0xdc   :  { %2313 = vmatpush1.msra.mxu0 %v9872_v56  ;;  %2346 = vmatprep.mubr.f32.mxu0 %v13569_v0 }
  0xdd   :  { %8581 = vmatmul.mubr.msk.f32.vlgmr.msra.gmra.mxu1 %vm197_vm1, %v9646_v18  ;;  %1951 = vmatprep.subr.mxu1 %v9942_v57  ;;  %v10119_v18 = vld [vmem:[#allocation5 + $0xe8] sm:$0xff] }
  0xde   :  { %8588 = vmatmul.mubr.msk.f32.vlgmr.msra.gmra.mxu0 %vm197_vm1, %v9810_v44  ;;  %2448 = vmatprep.subr.mxu0 %v9837_v48  ;;  %13880 = vst [vmem:[#allocation26_spill] sm:$0xff] %v10119_v18  ;;  %v10247_v48 = vld [vmem:[#allocation5 + $0x118] sm:$0xff] }
  0xdf   :  { %1952 = vmatpush1.msra.mxu1 %v9948_v58  ;;  %2449 = vmatpush1.msra.mxu0 %v9847_v50  ;;  %13901 = vst [vmem:[#allocation47_spill] sm:$0xff] %v10247_v48  ;;  %v10255_v50 = vld [vmem:[#allocation5 + $0xf8] sm:$0xff] }
  0xe0   :  { %1953 = vmatprep.subr.mxu1 %v9953_v59  ;;  %2450 = vmatprep.subr.mxu0 %v9851_v51  ;;  %13903 = vst [vmem:[#allocation49_spill] sm:$0xff] %v10255_v50  ;;  %v172_v51 = vlaneseq }
  0xe1   :  { %1954 = vmatpush1.msra.mxu1 %v9958_v60  ;;  %2451 = vmatpush1.msra.mxu0 %v9856_v52  ;;  %v10259_v52 = vld [vmem:[#allocation5 + $0xf0] sm:$0xff] }
  0xe2   :  { %1955 = vmatprep.subr.mxu1 %v9962_v61  ;;  %2452 = vmatprep.subr.mxu0 %v9860_v53  ;;  %13904 = vst [vmem:[#allocation50_spill] sm:$0xff] %v10259_v52  ;;  %v10263_v53 = vld [vmem:[#allocation5 + $0xd8] sm:$0xff] }
  0xe3   :  { %1956 = vmatpush1.msra.mxu1 %v9966_v62  ;;  %2453 = vmatpush1.msra.mxu0 %v9864_v54  ;;  %13905 = vst [vmem:[#allocation51_spill] sm:$0xff] %v10263_v53  ;;  %v10267_v54 = vld [vmem:[#allocation5 + $0xd0] sm:$0xff] }
  0xe4   :  { %1957 = vmatprep.subr.mxu1 %v9970_v63  ;;  %2454 = vmatprep.subr.mxu0 %v9868_v55  ;;  %13906 = vst [vmem:[#allocation52_spill] sm:$0xff] %v10267_v54  ;;  %v10271_v55 = vld [vmem:[#allocation5 + $0xb8] sm:$0xff] }
  0xe5   :  { %1958 = vmatpush1.msra.mxu1 %v9974_v1  ;;  %1991 = vmatprep.mubr.f32.mxu1 %v13569_v0  ;;  %13907 = vst [vmem:[#allocation53_spill] sm:$0xff] %v10271_v55 }
  0xe6   :  { %2455 = vmatpush1.msra.mxu0 %v9872_v56  ;;  %2488 = vmatprep.mubr.f32.mxu0 %v13569_v0  ;;  %v10273_v56 = vshrl.u32 %v172_v51, 7 }
  0xe7   :  { %8583 = vmatmul.mubr.msk.f32.vlgmr.msra.gmra.mxu1 %vm197_vm1, %v9708_v28  ;;  %2093 = vmatprep.subr.mxu1 %v9942_v57  ;;  %v10163_v28 = vld [vmem:[#allocation5 + $0x48] sm:$0xff] }
  0xe8   :  { %8590 = vmatmul.mubr.msk.f32.vlgmr.msra.gmra.mxu0 %vm197_vm1, %v9843_v49  ;;  %2634 = vmatprep.subr.mxu0 %v10048_v2  ;;  %13890 = vst [vmem:[#allocation36_spill] sm:$0xff] %v10163_v28  ;;  %v10308_v51 = vsub.s32 1, %v10273_v56 }
  0xe9   :  { %2094 = vmatpush1.msra.mxu1 %v9948_v58  ;;  %2635 = vmatpush1.msra.mxu0 %v10052_v3 }
  0xea   :  { %2095 = vmatprep.subr.mxu1 %v9953_v59  ;;  %2636 = vmatprep.subr.mxu0 %v10057_v4  ;;  %13915 = vst [vmem:[#allocation61_spill] sm:$0xff] %v10308_v51 }
  0xeb   :  { %2096 = vmatpush1.msra.mxu1 %v9958_v60  ;;  %2637 = vmatpush1.msra.mxu0 %v10062_v5 }
  0xec   :  { %2097 = vmatprep.subr.mxu1 %v9962_v61  ;;  %2638 = vmatprep.subr.mxu0 %v10066_v6 }
  0xed   :  { %2098 = vmatpush1.msra.mxu1 %v9966_v62  ;;  %2639 = vmatpush1.msra.mxu0 %v10070_v7 }
  0xee   :  { %2099 = vmatprep.subr.mxu1 %v9970_v63  ;;  %2640 = vmatprep.subr.mxu0 %v10074_v8 }
  0xef   :  { %2100 = vmatpush1.msra.mxu1 %v9974_v1  ;;  %2133 = vmatprep.mubr.f32.mxu1 %v13569_v0 }
  0xf0   :  { %2641 = vmatpush1.msra.mxu0 %v10080_v9  ;;  %8585 = vmatmul.mubr.msk.f32.vlgmr.msra.gmra.mxu1 %vm197_vm1, %v9748_v36  ;;  %v10200_v36 = vld [vmem:[#allocation5 + $0x1d8] sm:$0xff] }
  0xf1   :  { %2235 = vmatprep.subr.mxu1 %v9942_v57  ;;  %2642 = vmatprep.subr.mxu0 %v10084_v10 }
  0xf2   :  { %2236 = vmatpush1.msra.mxu1 %v9948_v58  ;;  %2643 = vmatpush1.msra.mxu0 %v10088_v11 }
  0xf3   :  { %2237 = vmatprep.subr.mxu1 %v9953_v59  ;;  %2644 = vmatprep.subr.mxu0 %v10093_v12 }
  0xf4   :  { %2238 = vmatpush1.msra.mxu1 %v9958_v60  ;;  %2645 = vmatpush1.msra.mxu0 %v10097_v13 }
  0xf5   :  { %2239 = vmatprep.subr.mxu1 %v9962_v61  ;;  %2646 = vmatprep.subr.mxu0 %v10101_v14 }
  0xf6   :  { %2240 = vmatpush1.msra.mxu1 %v9966_v62  ;;  %2647 = vmatpush1.msra.mxu0 %v10105_v15 }
  0xf7   :  { %2241 = vmatprep.subr.mxu1 %v9970_v63  ;;  %2648 = vmatprep.subr.mxu0 %v10109_v16 }
  0xf8   :  { %2242 = vmatpush1.msra.mxu1 %v9974_v1  ;;  %2275 = vmatprep.mubr.f32.mxu1 %v13569_v0 }
  0xf9   :  { %2649 = vmatpush1.msra.mxu0 %v10115_v17  ;;  %8587 = vmatmul.mubr.msk.f32.vlgmr.msra.gmra.mxu1 %vm197_vm1, %v9779_v40  ;;  %v10215_v40 = vld [vmem:[#allocation5 + $0x198] sm:$0xff] }
  0xfa   :  { %2377 = vmatprep.subr.mxu1 %v9942_v57  ;;  %2650 = vmatprep.subr.mxu0 %v10119_v18 }
  0xfb   :  { %2378 = vmatpush1.msra.mxu1 %v9948_v58  ;;  %2651 = vmatpush1.msra.mxu0 %v10123_v19 }
  0xfc   :  { %2379 = vmatprep.subr.mxu1 %v9953_v59  ;;  %2652 = vmatprep.subr.mxu0 %v10128_v20 }
  0xfd   :  { %2380 = vmatpush1.msra.mxu1 %v9958_v60  ;;  %2653 = vmatpush1.msra.mxu0 %v10132_v21 }
  0xfe   :  { %2381 = vmatprep.subr.mxu1 %v9962_v61  ;;  %2654 = vmatprep.subr.mxu0 %v10136_v22 }
  0xff   :  { %2382 = vmatpush1.msra.mxu1 %v9966_v62  ;;  %2655 = vmatpush1.msra.mxu0 %v10140_v23 }
 0x100   :  { %2383 = vmatprep.subr.mxu1 %v9970_v63  ;;  %2656 = vmatprep.subr.mxu0 %v10144_v24 }
 0x101   :  { %2384 = vmatpush1.msra.mxu1 %v9974_v1  ;;  %2417 = vmatprep.mubr.f32.mxu1 %v13569_v0 }
 0x102   :  { %2657 = vmatpush1.msra.mxu0 %v10150_v25  ;;  %8589 = vmatmul.mubr.msk.f32.vlgmr.msra.gmra.mxu1 %vm197_vm1, %v9810_v44  ;;  %v10231_v44 = vld [vmem:[#allocation5 + $0x158] sm:$0xff] }
 0x103   :  { %2519 = vmatprep.subr.mxu1 %v9942_v57  ;;  %2658 = vmatprep.subr.mxu0 %v10154_v26  ;;  %13897 = vst [vmem:[#allocation43_spill] sm:$0xff] %v10231_v44  ;;  %v10277_v57 = vld [vmem:[#allocation5 + $0xb0] sm:$0xff] }
 0x104   :  { %2520 = vmatpush1.msra.mxu1 %v9948_v58  ;;  %2659 = vmatpush1.msra.mxu0 %v10158_v27  ;;  %13908 = vst [vmem:[#allocation54_spill] sm:$0xff] %v10277_v57  ;;  %v10281_v58 = vld [vmem:[#allocation5 + $0x98] sm:$0xff] }
 0x105   :  { %2521 = vmatprep.subr.mxu1 %v9953_v59  ;;  %2660 = vmatprep.subr.mxu0 %v10163_v28  ;;  %13909 = vst [vmem:[#allocation55_spill] sm:$0xff] %v10281_v58  ;;  %v10285_v59 = vld [vmem:[#allocation5 + $0x90] sm:$0xff] }
 0x106   :  { %2522 = vmatpush1.msra.mxu1 %v9958_v60  ;;  %2661 = vmatpush1.msra.mxu0 %v10167_v29  ;;  %13910 = vst [vmem:[#allocation56_spill] sm:$0xff] %v10285_v59  ;;  %v10289_v60 = vld [vmem:[#allocation5 + $0x78] sm:$0xff] }
 0x107   :  { %2523 = vmatprep.subr.mxu1 %v9962_v61  ;;  %2662 = vmatprep.subr.mxu0 %v10171_v30  ;;  %13911 = vst [vmem:[#allocation57_spill] sm:$0xff] %v10289_v60  ;;  %v10292_v61 = vsub.s32 0, %v10273_v56 }
 0x108   :  { %2524 = vmatpush1.msra.mxu1 %v9966_v62  ;;  %2663 = vmatpush1.msra.mxu0 %v10175_v31  ;;  %v10296_v62 = vld [vmem:[#allocation5 + $0x70] sm:$0xff] }
 0x109   :  { %2525 = vmatprep.subr.mxu1 %v9970_v63  ;;  %2664 = vmatprep.subr.mxu0 %v10179_v32  ;;  %13912 = vst [vmem:[#allocation58_spill] sm:$0xff] %v10292_v61  ;;  %13913 = vst [vmem:[#allocation59_spill] sm:$0xff] %v10296_v62  ;;  %v10301_v63 = vld [vmem:[%s13551_s2] sm:$0xf] }
 0x10a   :  { %2526 = vmatpush1.msra.mxu1 %v9974_v1  ;;  %2559 = vmatprep.mubr.f32.mxu1 %v13569_v0  ;;  %v10305_v1 = vld [vmem:[#allocation5 + $0x58] sm:$0xff] }
 0x10b   :  { %2665 = vmatpush1.msra.mxu0 %v10185_v33  ;;  %2698 = vmatprep.mubr.f32.mxu0 %v13569_v0  ;;  %13914 = vst [vmem:[#allocation60_spill] sm:$0xff] %v10305_v1 }
 0x10c   :  { %8591 = vmatmul.mubr.msk.f32.vlgmr.msra.gmra.mxu1 %vm197_vm1, %v9843_v49  ;;  %2699 = vmatmul.mubr.f32.vlgmr.msra.gmra.mxu0 %v13569_v0  ;;  %v10251_v49 = vld [vmem:[#allocation5 + $0x110] sm:$0xff] }
 0x10d   :  { %2705 = vmatprep.subr.mxu1 %v10191_v34  ;;  %2769 = vmatprep.mubr.f32.mxu1 %v13569_v0  ;;  %13902 = vst [vmem:[#allocation48_spill] sm:$0xff] %v10251_v49  ;;  %v10312_v0 = vld [vmem:[#allocation5 + $0x50] sm:$0xff] }
 0x10e   :  { %2706 = vmatpush1.msra.mxu1 %v10195_v35  ;;  %2808 = vmatprep.subr.mxu0 %v10048_v2  ;;  %13916 = vst [vmem:[#allocation62_spill] sm:$0xff] %v10312_v0 }
 0x10f   :  { %2707 = vmatprep.subr.mxu1 %v10200_v36  ;;  %2809 = vmatpush1.msra.mxu0 %v10052_v3 }
 0x110   :  { %2708 = vmatpush1.msra.mxu1 %v10203_v37  ;;  %2810 = vmatprep.subr.mxu0 %v10057_v4 }
 0x111   :  { %2709 = vmatprep.subr.mxu1 %v10207_v38  ;;  %2811 = vmatpush1.msra.mxu0 %v10062_v5 }
 0x112   :  { %2710 = vmatpush1.msra.mxu1 %v10211_v39  ;;  %2812 = vmatprep.subr.mxu0 %v10066_v6 }
 0x113   :  { %2711 = vmatprep.subr.mxu1 %v10215_v40  ;;  %2813 = vmatpush1.msra.mxu0 %v10070_v7 }
 0x114   :  { %2712 = vmatpush1.msra.mxu1 %v10219_v41  ;;  %2814 = vmatprep.subr.mxu0 %v10074_v8 }
 0x115   :  { %2713 = vmatprep.subr.mxu1 %v10223_v42  ;;  %2815 = vmatpush1.msra.mxu0 %v10080_v9 }
 0x116   :  { %2714 = vmatpush1.msra.mxu1 %v10227_v43  ;;  %2816 = vmatprep.subr.mxu0 %v10084_v10 }
 0x117   :  { %2715 = vmatprep.subr.mxu1 %v10231_v44  ;;  %2817 = vmatpush1.msra.mxu0 %v10088_v11 }
 0x118   :  { %2716 = vmatpush1.msra.mxu1 %v10235_v45  ;;  %2818 = vmatprep.subr.mxu0 %v10093_v12 }
 0x119   :  { %2717 = vmatprep.subr.mxu1 %v10239_v46  ;;  %2819 = vmatpush1.msra.mxu0 %v10097_v13 }
 0x11a   :  { %2718 = vmatpush1.msra.mxu1 %v10243_v47  ;;  %2820 = vmatprep.subr.mxu0 %v10101_v14 }
 0x11b   :  { %2719 = vmatprep.subr.mxu1 %v10247_v48  ;;  %2821 = vmatpush1.msra.mxu0 %v10105_v15 }
 0x11c   :  { %2720 = vmatpush1.msra.mxu1 %v10251_v49  ;;  %2822 = vmatprep.subr.mxu0 %v10109_v16 }
 0x11d   :  { %2721 = vmatprep.subr.mxu1 %v10255_v50  ;;  %2823 = vmatpush1.msra.mxu0 %v10115_v17 }
 0x11e   :  { %2722 = vmatpush1.msra.mxu1 %v10259_v52  ;;  %2824 = vmatprep.subr.mxu0 %v10119_v18 }
 0x11f   :  { %2723 = vmatprep.subr.mxu1 %v10263_v53  ;;  %2825 = vmatpush1.msra.mxu0 %v10123_v19 }
 0x120   :  { %2724 = vmatpush1.msra.mxu1 %v10267_v54  ;;  %2826 = vmatprep.subr.mxu0 %v10128_v20  ;;  %v10332_v20 = vrot.slane %v10301_v63, %v10308_v51 }
 0x121   :  { %2725 = vmatprep.subr.mxu1 %v10271_v55  ;;  %2827 = vmatpush1.msra.mxu0 %v10132_v21  ;;  %v10324_v21 = vld [vmem:[#allocation5 + $0x30] sm:$0xff] }
 0x122   :  { %2726 = vmatpush1.msra.mxu1 %v10277_v57  ;;  %2828 = vmatprep.subr.mxu0 %v10136_v22  ;;  %v10316_v22 = vld [vmem:[#allocation5 + $0x38] sm:$0xff]  ;;  %13918 = vst [vmem:[#allocation64_spill] sm:$0xff] %v10324_v21 }
 0x123   :  { %2727 = vmatprep.subr.mxu1 %v10281_v58  ;;  %2829 = vmatpush1.msra.mxu0 %v10140_v23  ;;  %13917 = vst [vmem:[#allocation63_spill] sm:$0xff] %v10316_v22  ;;  %v10320_v23 = vrot.slane %v10301_v63, %v10292_v61 }
 0x124   :  { %2728 = vmatpush1.msra.mxu1 %v10285_v59  ;;  %2830 = vmatprep.subr.mxu0 %v10144_v24 }
 0x125   :  { %2729 = vmatprep.subr.mxu1 %v10289_v60  ;;  %2831 = vmatpush1.msra.mxu0 %v10150_v25  ;;  %v10328_v25 = vld [vmem:[#allocation5 + $0x18] sm:$0xff] }
 0x126   :  { %2730 = vmatpush1.msra.mxu1 %v10296_v62  ;;  %2832 = vmatprep.subr.mxu0 %v10154_v26  ;;  %13919 = vst [vmem:[#allocation65_spill] sm:$0xff] %v10328_v25  ;;  %v10339_v26 = vld [vmem:[#allocation5 + $0x10] sm:$0xff] }
 0x127   :  { %2731 = vmatprep.subr.mxu1 %v10305_v1  ;;  %v566_v24 = vpop.f32.mrf.mxu0  ;;  %2833 = vmatpush1.msra.mxu0 %v10158_v27  ;;  %13920 = vst [vmem:[#allocation66_spill] sm:$0xff] %v10339_v26 }
 0x128   :  { %2732 = vmatpush1.msra.mxu1 %v10312_v0  ;;  %v10335_v19 = vadd.f32 %v566_v24, %v10320_v23  ;;  %2834 = vmatprep.subr.mxu0 %v10163_v28  ;;  %v10350_v24 = vpop.f32.mrf.mxu1  ;;  %v13921_v28 = vmov 0.0  }
 0x129   :  { %2733 = vmatprep.subr.mxu1 %v10316_v22  ;;  %v568_v18 = vpop.f32.mrf.mxu0  ;;  %2835 = vmatpush1.msra.mxu0 %v10167_v29 }
 0x12a   :  { %2734 = vmatpush1.msra.mxu1 %v10324_v21  ;;  %v10344_v27 = vadd.f32 %v568_v18, %v10332_v20  ;;  %2836 = vmatprep.subr.mxu0 %v10171_v30  ;;  %v10359_v18 = vpop.f32.mrf.mxu1 }
 0x12b   :  { %2735 = vmatprep.subr.mxu1 %v10328_v25  ;;  %2837 = vmatpush1.msra.mxu0 %v10175_v31 }
 0x12c   :  { %2736 = vmatpush1.msra.mxu1 %v10339_v26  ;;  %2838 = vmatprep.subr.mxu0 %v10179_v32 }
 0x12d   :  { %2770 = vmatmul.mubr.f32.vlgmr.msra.gmra.mxu1 %v13921_v28  ;;  %2879 = vmatprep.subr.mxu1 %v10191_v34 }
 0x12e   :  { %2880 = vmatpush1.msra.mxu1 %v10195_v35  ;;  %2839 = vmatpush1.msra.mxu0 %v10185_v33  ;;  %v10365_v32 = vpop.f32.mrf.mxu1 }
 0x12f   :  { %2881 = vmatprep.subr.mxu1 %v10200_v36  ;;  %2872 = vmatprep.mubr.f32.mxu0 %v13921_v28 }
 0x130   :  { %2882 = vmatpush1.msra.mxu1 %v10203_v37  ;;  %2943 = vmatprep.mubr.f32.mxu1 %v13921_v28  ;;  %v10377_v28 = vpop.f32.mrf.mxu1 }
 0x131   :  { %v716_v31 = vpop.f32.mrf.mxu0  ;;  %2883 = vmatprep.subr.mxu1 %v10207_v38  ;;  %2982 = vmatprep.subr.mxu0 %v10048_v2 }
 0x132   :  { %v10368_v30 = vadd.f32 %v716_v31, %v10320_v23  ;;  %2884 = vmatpush1.msra.mxu1 %v10211_v39 }
 0x133   :  { %v718_v33 = vpop.f32.mrf.mxu0  ;;  %2885 = vmatprep.subr.mxu1 %v10215_v40 }
 0x134   :  { %v10373_v29 = vadd.f32 %v718_v33, %v10332_v20  ;;  %2886 = vmatpush1.msra.mxu1 %v10219_v41 }
 0x135   :  { %2887 = vmatprep.subr.mxu1 %v10223_v42 }
 0x136   :  { %2888 = vmatpush1.msra.mxu1 %v10227_v43 }
 0x137   :  { %2889 = vmatprep.subr.mxu1 %v10231_v44 }
 0x138   :  { %v416_v2 = vpop.f32.mrf.mxu1  ;;  %2890 = vmatpush1.msra.mxu1 %v10235_v45 }
 0x139   :  { %v10383_v31 = vadd.f32 %v416_v2, %v10320_v23  ;;  %2891 = vmatprep.subr.mxu1 %v10239_v46 }
 0x13a   :  { %v418_v33 = vpop.f32.mrf.mxu1  ;;  %2892 = vmatpush1.msra.mxu1 %v10243_v47 }
 0x13b   :  { %v10388_v17 = vadd.f32 %v418_v33, %v10332_v20  ;;  %v866_v16 = vpop.f32.mrf.mxu0  ;;  %2893 = vmatprep.subr.mxu1 %v10247_v48 }
 0x13c   :  { %v10392_v15 = vadd.f32 %v866_v16, %v10320_v23  ;;  %2894 = vmatpush1.msra.mxu1 %v10251_v49 }
 0x13d   :  { %v868_v14 = vpop.f32.mrf.mxu0  ;;  %2895 = vmatprep.subr.mxu1 %v10255_v50 }
 0x13e   :  { %v10397_v2 = vadd.f32 %v868_v14, %v10332_v20  ;;  %2896 = vmatpush1.msra.mxu1 %v10259_v52 }
 0x13f   :  { %2897 = vmatprep.subr.mxu1 %v10263_v53 }
 0x140   :  { %2898 = vmatpush1.msra.mxu1 %v10267_v54 }
 0x141   :  { %2899 = vmatprep.subr.mxu1 %v10271_v55 }
 0x142   :  { %2900 = vmatpush1.msra.mxu1 %v10277_v57 }
 0x143   :  { %2901 = vmatprep.subr.mxu1 %v10281_v58 }
 0x144   :  { %2902 = vmatpush1.msra.mxu1 %v10285_v59 }
 0x145   :  { %v1016_v16 = vpop.f32.mrf.mxu0  ;;  %2903 = vmatprep.subr.mxu1 %v10289_v60 }
 0x146   :  { %v1017_v14 = vadd.f32 %v1016_v16, %v10320_v23  ;;  %2904 = vmatpush1.msra.mxu1 %v10296_v62 }
 0x147   :  { %v1018_v33 = vpop.f32.mrf.mxu0  ;;  %2905 = vmatprep.subr.mxu1 %v10305_v1 }
 0x148   :  { %v1019_v54 = vadd.f32 %v1018_v33, %v10332_v20  ;;  %2906 = vmatpush1.msra.mxu1 %v10312_v0 }
 0x149   :  { %2907 = vmatprep.subr.mxu1 %v10316_v22 }
 0x14a   :  { %2908 = vmatpush1.msra.mxu1 %v10324_v21  ;;  %v10424_v21 = vpop.f32.mrf.mxu1 }
 0x14b   :  { %2909 = vmatprep.subr.mxu1 %v10328_v25  ;;  %v1408_v25 = vld [vmem:[%s13553_s4] sm:$0xf] }
 0x14c   :  { %2910 = vmatpush1.msra.mxu1 %v10339_v26  ;;  %v10432_v26 = vpop.f32.mrf.mxu1 }
 0x14d   :  { %3053 = vmatprep.subr.mxu1 %v10191_v34  ;;  %v10427_v34 = vrot.slane %v1408_v25, %v10292_v61 }
 0x14e   :  { %v10435_v58 = vpop.f32.mrf.mxu1 }
 0x14f   :  { %v1166_v16 = vpop.f32.mrf.mxu0 }
 0x150   :  { %v1167_v62 = vadd.f32 %v1166_v16, %v10320_v23  ;;  %v10430_v16 = vrot.slane %v1408_v25, %v10308_v51  ;;  %v10442_v52 = vpop.f32.mrf.mxu1 }
 0x151   :  { %v1168_v60 = vpop.f32.mrf.mxu0 }
 0x152   :  { %v1169_v1 = vadd.f32 %v1168_v60, %v10332_v20 }
 0x156   :  { %v10444_v61 = vpop.f32.mrf.mxu1 }
 0x158   :  { %v10447_v48 = vpop.f32.mrf.mxu1 }
 0x159   :  { %v1316_v59 = vpop.f32.mrf.mxu0 }
 0x15a   :  { %v1317_v33 = vadd.f32 %v1316_v59, %v10320_v23 }
 0x15b   :  { %v1318_v0 = vpop.f32.mrf.mxu0 }
 0x15c   :  { %v1319_v22 = vadd.f32 %v1318_v0, %v10332_v20 }
 0x160   :  { %v10452_v46 = vpop.f32.mrf.mxu1 }
 0x163   :  { %v1496_v60 = vpop.f32.mrf.mxu0 }
 0x164   :  { %v1497_v59 = vadd.f32 %v1496_v60, %v10427_v34 }
 0x165   :  { %v1498_v0 = vpop.f32.mrf.mxu0 }
 0x166   :  { %v1499_v57 = vadd.f32 %v1498_v0, %v10430_v16  ;;  %v10438_v55 = vadd.f32 %v1497_v59, %v1317_v33 }
 0x168   :  { %13922 = vst [vmem:[#allocation67_spill] sm:$0xff] %v10438_v55  ;;  %v10440_v53 = vadd.f32 %v1499_v57, %v1319_v22  ;;  %v10456_v22 = vpop.f32.mrf.mxu1 }
 0x16a   :  { %13923 = vst [vmem:[#allocation68_spill] sm:$0xff] %v10440_v53 }
 0x16b   :  { %v1087_v59 = vpop.f32.mrf.mxu1 }
 0x16c   :  { %v1638_v51 = vpop.f32.mrf.mxu0 }
 0x16d   :  { %v1639_v50 = vadd.f32 %v1638_v51, %v10427_v34  ;;  %v1089_v45 = vpop.f32.mrf.mxu1 }
 0x16e   :  { %v1640_v49 = vpop.f32.mrf.mxu0 }
 0x16f   :  { %v1641_v60 = vadd.f32 %v1640_v49, %v10430_v16  ;;  %v10450_v47 = vadd.f32 %v1639_v50, %v1167_v62 }
 0x171   :  { %13924 = vst [vmem:[#allocation69_spill] sm:$0xff] %v10450_v47  ;;  %v10454_v33 = vadd.f32 %v1641_v60, %v1169_v1 }
 0x173   :  { %13925 = vst [vmem:[#allocation70_spill] sm:$0xff] %v10454_v33 }
 0x175   :  { %v1237_v49 = vpop.f32.mrf.mxu1 }
 0x176   :  { %v1780_v57 = vpop.f32.mrf.mxu0 }
 0x177   :  { %v1781_v0 = vadd.f32 %v1780_v57, %v10427_v34  ;;  %v1239_v62 = vpop.f32.mrf.mxu1  ;;  %v10470_v57 = vsub.s32 2, %v10273_v56 }
 0x178   :  { %v1782_v53 = vpop.f32.mrf.mxu0 }
 0x179   :  { %v1783_v51 = vadd.f32 %v1782_v53, %v10430_v16  ;;  %v10460_v55 = vadd.f32 %v1781_v0, %v1017_v14  ;;  %13929 = vst [vmem:[#allocation74_spill] sm:$0xff] %v10470_v57  ;;  %v10479_v14 = vrot.slane %v1408_v25, %v10470_v57 }
 0x17b   :  { %13926 = vst [vmem:[#allocation71_spill] sm:$0xff] %v10460_v55  ;;  %v10462_v13 = vadd.f32 %v1783_v51, %v1019_v54  ;;  %v10476_v54 = vsub.s32 3, %v10273_v56  ;;  %v10483_v51 = vrot.slane %v10301_v63, %v10470_v57 }
 0x17d   :  { %13927 = vst [vmem:[#allocation72_spill] sm:$0xff] %v10462_v13  ;;  %13931 = vst [vmem:[#allocation76_spill] sm:$0xff] %v10476_v54 }
 0x17f   :  { %v1387_v33 = vpop.f32.mrf.mxu1 }
 0x180   :  { %v1922_v50 = vpop.f32.mrf.mxu0 }
 0x181   :  { %v1923_v1 = vadd.f32 %v1922_v50, %v10427_v34  ;;  %v1389_v0 = vpop.f32.mrf.mxu1 }
 0x182   :  { %v1924_v60 = vpop.f32.mrf.mxu0 }
 0x183   :  { %v1925_v47 = vadd.f32 %v1924_v60, %v10430_v16  ;;  %v10467_v44 = vadd.f32 %v1923_v1, %v10392_v15  ;;  %v10486_v15 = vrot.slane %v1408_v25, %v10476_v54  ;;  %v10490_v1 = vrot.slane %v10301_v63, %v10476_v54 }
 0x185   :  { %13928 = vst [vmem:[#allocation73_spill] sm:$0xff] %v10467_v44  ;;  %v10473_v53 = vadd.f32 %v1925_v47, %v10397_v2  ;;  %v1388_v47 = vadd.f32 %v1387_v33, %v10483_v51  ;;  %v1390_v55 = vadd.f32 %v1389_v0, %v10490_v1 }
 0x187   :  { %13930 = vst [vmem:[#allocation75_spill] sm:$0xff] %v10473_v53 }
 0x189   :  { %v1567_v50 = vpop.f32.mrf.mxu1 }
 0x18a   :  { %v1568_v56 = vadd.f32 %v1567_v50, %v10479_v14  ;;  %v2064_v2 = vpop.f32.mrf.mxu0 }
 0x18b   :  { %v2065_v60 = vadd.f32 %v2064_v2, %v10427_v34  ;;  %v1569_v13 = vpop.f32.mrf.mxu1  ;;  %v1238_v2 = vadd.f32 %v1237_v49, %v10483_v51 }
 0x18c   :  { %v1570_v57 = vadd.f32 %v1569_v13, %v10486_v15  ;;  %v2066_v53 = vpop.f32.mrf.mxu0  ;;  %v10497_v25 = vadd.f32 %v1568_v56, %v1388_v47  ;;  %v1240_v56 = vadd.f32 %v1239_v62, %v10490_v1 }
 0x18d   :  { %v2067_v44 = vadd.f32 %v2066_v53, %v10430_v16  ;;  %v10501_v63 = vadd.f32 %v2065_v60, %v10368_v30 }
 0x18e   :  { %13932 = vst [vmem:[#allocation77_spill] sm:$0xff] %v10497_v25  ;;  %v10503_v54 = vadd.f32 %v1570_v57, %v1390_v55 }
 0x18f   :  { %v10506_v33 = vadd.f32 %v2067_v44, %v10373_v29 }
 0x190   :  { %13933 = vst [vmem:[#allocation78_spill] sm:$0xff] %v10503_v54 }
 0x193   :  { %v1709_v50 = vpop.f32.mrf.mxu1 }
 0x194   :  { %v1710_v0 = vadd.f32 %v1709_v50, %v10479_v14  ;;  %v2206_v12 = vpop.f32.mrf.mxu0 }
 0x195   :  { %v2207_v13 = vadd.f32 %v2206_v12, %v10427_v34  ;;  %v1711_v47 = vpop.f32.mrf.mxu1  ;;  %v1088_v12 = vadd.f32 %v1087_v59, %v10483_v51 }
 0x196   :  { %v1712_v53 = vadd.f32 %v1711_v47, %v10486_v15  ;;  %v2208_v30 = vpop.f32.mrf.mxu0  ;;  %v10513_v60 = vadd.f32 %v1710_v0, %v1238_v2  ;;  %v1090_v0 = vadd.f32 %v1089_v45, %v10490_v1 }
 0x197   :  { %v2209_v55 = vadd.f32 %v2208_v30, %v10430_v16  ;;  %v10517_v29 = vadd.f32 %v2207_v13, %v10335_v19 }
 0x198   :  { %13934 = vst [vmem:[#allocation79_spill] sm:$0xff] %v10513_v60  ;;  %v10519_v44 = vadd.f32 %v1712_v53, %v1240_v56 }
 0x199   :  { %v10522_v49 = vadd.f32 %v2209_v55, %v10344_v27 }
 0x19a   :  { %13935 = vst [vmem:[#allocation80_spill] sm:$0xff] %v10519_v44 }
 0x19d   :  { %v1851_v57 = vpop.f32.mrf.mxu1 }
 0x19e   :  { %v1852_v62 = vadd.f32 %v1851_v57, %v10479_v14  ;;  %v2348_v50 = vpop.f32.mrf.mxu0  ;;  %v938_v57 = vadd.f32 %v10452_v46, %v10483_v51  ;;  %v790_v46 = vadd.f32 %v10447_v48, %v10490_v1 }
 0x19f   :  { %v2349_v47 = vadd.f32 %v2348_v50, %v10427_v34  ;;  %v1853_v2 = vpop.f32.mrf.mxu1 }
 0x1a0   :  { %v1854_v30 = vadd.f32 %v1853_v2, %v10486_v15  ;;  %v2350_v19 = vpop.f32.mrf.mxu0  ;;  %v10529_v13 = vadd.f32 %v1852_v62, %v1088_v12  ;;  %v940_v12 = vadd.f32 %v10456_v22, %v10490_v1 }
 0x1a1   :  { %v2351_v56 = vadd.f32 %v2350_v19, %v10430_v16  ;;  %v10533_v27 = vadd.f32 %v2349_v47, %v10383_v31 }
 0x1a2   :  { %13936 = vst [vmem:[#allocation81_spill] sm:$0xff] %v10529_v13  ;;  %v10535_v53 = vadd.f32 %v1854_v30, %v1090_v0  ;;  %v10910_v13 = vld [vmem:[#allocation5 + $0x90] sm:$0xff] }
 0x1a3   :  { %v10538_v59 = vadd.f32 %v2351_v56, %v10388_v17  ;;  %v788_v17 = vadd.f32 %v10444_v61, %v10483_v51  ;;  %v640_v61 = vadd.f32 %v10442_v52, %v10490_v1 }
 0x1a4   :  { %13937 = vst [vmem:[#allocation82_spill] sm:$0xff] %v10535_v53  ;;  %v10906_v53 = vld [vmem:[#allocation5 + $0x98] sm:$0xff] }
 0x1a7   :  { %v1993_v55 = vpop.f32.mrf.mxu1 }
 0x1a8   :  { %v1994_v45 = vadd.f32 %v1993_v55, %v10479_v14 }
 0x1a9   :  { %v1995_v50 = vpop.f32.mrf.mxu1 }
 0x1aa   :  { %v1996_v62 = vadd.f32 %v1995_v50, %v10486_v15  ;;  %v10546_v2 = vadd.f32 %v1994_v45, %v938_v57  ;;  %v638_v57 = vadd.f32 %v10435_v58, %v10483_v51  ;;  %v490_v58 = vadd.f32 %v10432_v26, %v10490_v1 }
 0x1ac   :  { %13938 = vst [vmem:[#allocation83_spill] sm:$0xff] %v10546_v2  ;;  %v10548_v31 = vadd.f32 %v1996_v62, %v940_v12  ;;  %v10918_v2 = vld [vmem:[#allocation5 + $0x70] sm:$0xff] }
 0x1ae   :  { %13939 = vst [vmem:[#allocation84_spill] sm:$0xff] %v10548_v31  ;;  %v10914_v31 = vld [vmem:[#allocation5 + $0x78] sm:$0xff] }
 0x1b0   :  { %v2135_v47 = vpop.f32.mrf.mxu1 }
 0x1b1   :  { %v2136_v0 = vadd.f32 %v2135_v47, %v10479_v14 }
 0x1b2   :  { %v2137_v30 = vpop.f32.mrf.mxu1 }
 0x1b3   :  { %v2138_v19 = vadd.f32 %v2137_v30, %v10486_v15  ;;  %v10556_v56 = vadd.f32 %v2136_v0, %v788_v17  ;;  %v488_v17 = vadd.f32 %v10424_v21, %v10483_v51  ;;  %v267_v21 = vadd.f32 %v10350_v24, %v10320_v23 }
 0x1b4   :  { %v338_v23 = vadd.f32 %v10365_v32, %v10483_v51  ;;  %v340_v24 = vadd.f32 %v10377_v28, %v10490_v1 }
 0x1b5   :  { %v10558_v22 = vadd.f32 %v2138_v19, %v790_v46 }
 0x1b9   :  { %v2277_v55 = vpop.f32.mrf.mxu1 }
 0x1ba   :  { %v2278_v45 = vadd.f32 %v2277_v55, %v10479_v14  ;;  %v2490_v55 = vpop.f32.mrf.mxu0 }
 0x1bb   :  { %v2279_v50 = vpop.f32.mrf.mxu1 }
 0x1bc   :  { %v2280_v12 = vadd.f32 %v2279_v50, %v10486_v15  ;;  %v10566_v62 = vadd.f32 %v2278_v45, %v638_v57  ;;  %v2492_v57 = vpop.f32.mrf.mxu0  ;;  %v2491_v45 = vadd.f32 %v2490_v55, %v10427_v34 }
 0x1be   :  { %v10568_v48 = vadd.f32 %v2280_v12, %v640_v61  ;;  %v2493_v61 = vadd.f32 %v2492_v57, %v10430_v16  ;;  %v269_v12 = vadd.f32 %v10359_v18, %v10332_v20  ;;  %v2566_v26 = vadd.f32 %v2491_v45, %v267_v21 }
 0x1c2   :  { %v2419_v47 = vpop.f32.mrf.mxu1 }
 0x1c3   :  { %v2420_v0 = vadd.f32 %v2419_v47, %v10479_v14 }
 0x1c4   :  { %v2421_v30 = vpop.f32.mrf.mxu1 }
 0x1c5   :  { %v2422_v46 = vadd.f32 %v2421_v30, %v10486_v15  ;;  %v10576_v19 = vadd.f32 %v2420_v0, %v488_v17  ;;  %v2567_v30 = vadd.f32 %v2493_v61, %v269_v12 }
 0x1c7   :  { %v10578_v52 = vadd.f32 %v2422_v46, %v490_v58 }
 0x1cc   :  { %v2700_v50 = vpop.f32.mrf.mxu0  ;;  %v2561_v54 = vpop.f32.mrf.mxu1 }
 0x1cd   :  { %v2776_v17 = vadd.f32 %v2700_v50, %v2566_v26  ;;  %v2562_v55 = vadd.f32 %v2561_v54, %v10479_v14 }
 0x1ce   :  { %v2702_v47 = vpop.f32.mrf.mxu0  ;;  %v2563_v34 = vpop.f32.mrf.mxu1 }
 0x1cf   :  { %v2777_v0 = vadd.f32 %v2702_v47, %v2567_v30  ;;  %v8592_v58 = vmul.f32 -1.442695, %v2776_v17  ;;  %v2564_v20 = vadd.f32 %v2563_v34, %v10486_v15  ;;  %v2568_v45 = vadd.f32 %v2562_v55, %v338_v23  ;;  %v13949_v34 = vld [vmem:[#allocation24_spill] sm:$0xff]  ;;  %v13951_v55 = vld [vmem:[#allocation25_spill] sm:$0xff] }
 0x1d0   :  { %v13954_v23 = vld [vmem:[#allocation49_spill] sm:$0xff] }
 0x1d1   :  { %v8593_v46 = vmul.f32 -1.442695, %v2777_v0  ;;  %8720 = vpow2.f32 %v8592_v58  ;;  %v2569_v12 = vadd.f32 %v2564_v20, %v340_v24  ;;  %v13955_v20 = vld [vmem:[#allocation27_spill] sm:$0xff]  ;;  %v13956_v24 = vld [vmem:[#allocation50_spill] sm:$0xff]  ;;  %14000 = vst [vmem:[#allocation49_spill] sm:$0xff] %v10910_v13 }
 0x1d2   :  { %14001 = vst [vmem:[#allocation27_spill] sm:$0xff] %v10914_v31  ;;  %14002 = vst [vmem:[#allocation50_spill] sm:$0xff] %v10918_v2 }
 0x1d3   :  { %8722 = vpow2.f32 %v8593_v46 }
 0x1de   :  { %v8721_v16 = vpop.eup %8720 }
 0x1df   :  { %v2789_v18 = vadd.f32 1.0, %v8721_v16  ;;  %v13952_v16 = vld [vmem:[#allocation48_spill] sm:$0xff] }
 0x1e0   :  { %v8723_v57 = vpop.eup %8722 }
 0x1e1   :  { %v2790_v50 = vadd.f32 1.0, %v8723_v57  ;;  %8724 = vrcp.f32 %v2789_v18  ;;  %v13953_v57 = vld [vmem:[#allocation26_spill] sm:$0xff]  ;;  %v13957_v18 = vld [vmem:[#allocation28_spill] sm:$0xff] }
 0x1e2   :  { %13999 = vst [vmem:[#allocation26_spill] sm:$0xff] %v10906_v53 }
 0x1e3   :  { %8726 = vrcp.f32 %v2790_v50  ;;  %v13959_v50 = vld [vmem:[#allocation29_spill] sm:$0xff] }
 0x1ed   :  { %v2771_v61 = vpop.f32.mrf.mxu1 }
 0x1ee   :  { %v2778_v21 = vadd.f32 %v2771_v61, %v2568_v45  ;;  %v8725_v14 = vpop.eup %8724  ;;  %v13958_v45 = vld [vmem:[#allocation51_spill] sm:$0xff]  ;;  %v13960_v61 = vld [vmem:[#allocation52_spill] sm:$0xff] }
 0x1ef   :  { %v2773_v26 = vpop.f32.mrf.mxu1 }
 0x1f0   :  { %v8594_v47 = vmul.f32 -1.442695, %v2778_v21  ;;  %v2779_v54 = vadd.f32 %v2773_v26, %v2569_v12  ;;  %v8727_v32 = vpop.eup %8726  ;;  %v13961_v21 = vld [vmem:[#allocation30_spill] sm:$0xff]  ;;  %v13962_v12 = vld [vmem:[#allocation53_spill] sm:$0xff]  ;;  %v13963_v26 = vld [vmem:[#allocation31_spill] sm:$0xff] }
 0x1f1   :  { %v2799_v17 = vmul.f32 0.0, %v8727_v32  ;;  %v13967_v32 = vld [vmem:[#allocation33_spill] sm:$0xff] }
 0x1f2   :  { %8728 = vpow2.f32 %v8594_v47  ;;  %v13964_v47 = vld [vmem:[#allocation54_spill] sm:$0xff] }
 0x1f3   :  { %8730 = vtanh.f32 %v2779_v54  ;;  %v13965_v54 = vld [vmem:[#allocation32_spill] sm:$0xff] }
 0x1ff   :  { %v8729_v51 = vpop.eup %8728 }
 0x200   :  { %v8731_v15 = vpop.eup %8730  ;;  %v2791_v30 = vadd.f32 1.0, %v8729_v51  ;;  %v13968_v51 = vld [vmem:[#allocation56_spill] sm:$0xff] }
 0x201   :  { %v2800_v28 = vmul.f32 %v8731_v15, %v8725_v14  ;;  %v13966_v14 = vld [vmem:[#allocation55_spill] sm:$0xff]  ;;  %v13969_v15 = vld [vmem:[#allocation34_spill] sm:$0xff] }
 0x202   :  { %8732 = vrcp.f32 %v2791_v30  ;;  %v13970_v30 = vld [vmem:[#allocation57_spill] sm:$0xff] }
 0x203   :  { %v10592_v1 = vadd.f32 %v2800_v28, %v2799_v17  ;;  %v13971_v17 = vld [vmem:[#allocation35_spill] sm:$0xff] }
 0x204   :  { %v13972_v28 = vld [vmem:[#allocation59_spill] sm:$0xff] }
 0x205   :  { %8734 = vtanh.f32 %v10592_v1 }
 0x20f   :  { %v8733_v0 = vpop.eup %8732 }
 0x212   :  { %v8735_v58 = vpop.eup %8734 }
 0x213   :  { %v10595_v46 = vmul.f32 %v8735_v58, %v8733_v0  ;;  %v13973_v0 = vld [vmem:[#allocation36_spill] sm:$0xff] }
 0x214   :  { %v13974_v58 = vld [vmem:[#allocation60_spill] sm:$0xff] }
 0x215   :  { %13940 = vst [vmem:[#allocation85_spill] sm:$0xff] %v10595_v46  ;;  %2873 = vmatmul.mubr.f32.vlgmr.msra.gmra.mxu0 %v10595_v46  ;;  %2944 = vmatmul.mubr.f32.vlgmr.msra.gmra.mxu1 %v10595_v46 }
 0x216   :  { %2983 = vmatpush1.msra.mxu0 %v10052_v3  ;;  %3054 = vmatpush1.msra.mxu1 %v10195_v35  ;;  %v13941_v3 = vld [vmem:[#allocation20_spill] sm:$0xff] }
 0x217   :  { %2984 = vmatprep.subr.mxu0 %v10057_v4  ;;  %3055 = vmatprep.subr.mxu1 %v10200_v36  ;;  %v13942_v4 = vld [vmem:[#allocation43_spill] sm:$0xff] }
 0x218   :  { %2985 = vmatpush1.msra.mxu0 %v10062_v5  ;;  %3056 = vmatpush1.msra.mxu1 %v10203_v37  ;;  %v13943_v5 = vld [vmem:[#allocation21_spill] sm:$0xff] }
 0x219   :  { %2986 = vmatprep.subr.mxu0 %v10066_v6  ;;  %3057 = vmatprep.subr.mxu1 %v10207_v38  ;;  %v13944_v6 = vld [vmem:[#allocation44_spill] sm:$0xff] }
 0x21a   :  { %2987 = vmatpush1.msra.mxu0 %v10070_v7  ;;  %3058 = vmatpush1.msra.mxu1 %v10211_v39  ;;  %v13945_v7 = vld [vmem:[#allocation22_spill] sm:$0xff] }
 0x21b   :  { %2988 = vmatprep.subr.mxu0 %v10074_v8  ;;  %3059 = vmatprep.subr.mxu1 %v10215_v40  ;;  %v13946_v8 = vld [vmem:[#allocation45_spill] sm:$0xff] }
 0x21c   :  { %2989 = vmatpush1.msra.mxu0 %v10080_v9  ;;  %3060 = vmatpush1.msra.mxu1 %v10219_v41  ;;  %v13947_v9 = vld [vmem:[#allocation23_spill] sm:$0xff] }
 0x21d   :  { %2990 = vmatprep.subr.mxu0 %v10084_v10  ;;  %3061 = vmatprep.subr.mxu1 %v10223_v42  ;;  %v13948_v10 = vld [vmem:[#allocation46_spill] sm:$0xff] }
 0x21e   :  { %2991 = vmatpush1.msra.mxu0 %v10088_v11  ;;  %3062 = vmatpush1.msra.mxu1 %v10227_v43  ;;  %v13950_v11 = vld [vmem:[#allocation47_spill] sm:$0xff] }
 0x21f   :  { %2992 = vmatprep.subr.mxu0 %v13941_v3  ;;  %3063 = vmatprep.subr.mxu1 %v13942_v4  ;;  %v13975_v3 = vld [vmem:[#allocation37_spill] sm:$0xff] }
 0x220   :  { %2993 = vmatpush1.msra.mxu0 %v13943_v5  ;;  %3064 = vmatpush1.msra.mxu1 %v13944_v6  ;;  %v13976_v5 = vld [vmem:[#allocation62_spill] sm:$0xff] }
 0x221   :  { %2994 = vmatprep.subr.mxu0 %v13945_v7  ;;  %3065 = vmatprep.subr.mxu1 %v13946_v8  ;;  %v13977_v7 = vld [vmem:[#allocation38_spill] sm:$0xff] }
 0x222   :  { %2995 = vmatpush1.msra.mxu0 %v13947_v9  ;;  %3066 = vmatpush1.msra.mxu1 %v13948_v10  ;;  %v13978_v9 = vld [vmem:[#allocation63_spill] sm:$0xff] }
 0x223   :  { %2996 = vmatprep.subr.mxu0 %v13949_v34  ;;  %3067 = vmatprep.subr.mxu1 %v13950_v11  ;;  %v13979_v34 = vld [vmem:[#allocation39_spill] sm:$0xff] }
 0x224   :  { %2997 = vmatpush1.msra.mxu0 %v13951_v55  ;;  %3068 = vmatpush1.msra.mxu1 %v13952_v16  ;;  %v13980_v55 = vld [vmem:[#allocation64_spill] sm:$0xff] }
 0x225   :  { %2998 = vmatprep.subr.mxu0 %v13953_v57  ;;  %3069 = vmatprep.subr.mxu1 %v13954_v23  ;;  %v13981_v57 = vld [vmem:[#allocation40_spill] sm:$0xff] }
 0x226   :  { %2999 = vmatpush1.msra.mxu0 %v13955_v20  ;;  %3070 = vmatpush1.msra.mxu1 %v13956_v24  ;;  %v13982_v20 = vld [vmem:[#allocation65_spill] sm:$0xff] }
 0x227   :  { %3000 = vmatprep.subr.mxu0 %v13957_v18  ;;  %3071 = vmatprep.subr.mxu1 %v13958_v45  ;;  %v13983_v18 = vld [vmem:[#allocation41_spill] sm:$0xff] }
 0x228   :  { %3001 = vmatpush1.msra.mxu0 %v13959_v50  ;;  %3072 = vmatpush1.msra.mxu1 %v13960_v61  ;;  %v13984_v50 = vmov 0.0  }
 0x229   :  { %3002 = vmatprep.subr.mxu0 %v13961_v21  ;;  %3073 = vmatprep.subr.mxu1 %v13962_v12  ;;  %v13985_v21 = vld [vmem:[#allocation66_spill] sm:$0xff] }
 0x22a   :  { %3003 = vmatpush1.msra.mxu0 %v13963_v26  ;;  %3074 = vmatpush1.msra.mxu1 %v13964_v47  ;;  %v10663_v26 = vld [vmem:[#allocation5 + $0x1e8] sm:$0xff] }
 0x22b   :  { %3004 = vmatprep.subr.mxu0 %v13965_v54  ;;  %3075 = vmatprep.subr.mxu1 %v13966_v14  ;;  %13986 = vst [vmem:[#allocation20_spill] sm:$0xff] %v10663_v26  ;;  %v13987_v54 = vld [vmem:[#allocation42_spill] sm:$0xff] }
 0x22c   :  { %3005 = vmatpush1.msra.mxu0 %v13967_v32  ;;  %3076 = vmatpush1.msra.mxu1 %v13968_v51 }
 0x22d   :  { %3006 = vmatprep.subr.mxu0 %v13969_v15  ;;  %3077 = vmatprep.subr.mxu1 %v13970_v30 }
 0x22e   :  { %3007 = vmatpush1.msra.mxu0 %v13971_v17  ;;  %3078 = vmatpush1.msra.mxu1 %v13972_v28 }
 0x22f   :  { %3008 = vmatprep.subr.mxu0 %v13973_v0  ;;  %3079 = vmatprep.subr.mxu1 %v13974_v58 }
 0x230   :  { %3009 = vmatpush1.msra.mxu0 %v13975_v3  ;;  %3080 = vmatpush1.msra.mxu1 %v13976_v5 }
 0x231   :  { %3010 = vmatprep.subr.mxu0 %v13977_v7  ;;  %3081 = vmatprep.subr.mxu1 %v13978_v9 }
 0x232   :  { %3011 = vmatpush1.msra.mxu0 %v13979_v34  ;;  %3082 = vmatpush1.msra.mxu1 %v13980_v55 }
 0x233   :  { %3012 = vmatprep.subr.mxu0 %v13981_v57  ;;  %3083 = vmatprep.subr.mxu1 %v13982_v20 }
 0x234   :  { %3013 = vmatpush1.msra.mxu0 %v13983_v18  ;;  %3046 = vmatprep.mubr.f32.mxu0 %v13984_v50 }
 0x235   :  { %3084 = vmatpush1.msra.mxu1 %v13985_v21  ;;  %3117 = vmatprep.mubr.f32.mxu1 %v13984_v50 }
 0x236   :  { %3156 = vmatprep.subr.mxu0 %v10663_v26  ;;  %3227 = vmatprep.subr.mxu1 %v13987_v54 }
 0x2d5   :  { %v2874_v32 = vpop.f32.mrf.mxu0  ;;  %v2945_v34 = vpop.f32.mrf.mxu1 }
 0x2d6   :  { %v2950_v15 = vadd.f32 %v2874_v32, %v10533_v27  ;;  %v2952_v57 = vadd.f32 %v2945_v34, %v10576_v19  ;;  %v10691_v34 = vld [vmem:[#allocation5 + $0x1a8] sm:$0xff] }
 0x2d7   :  { %v2876_v17 = vpop.f32.mrf.mxu0  ;;  %v2947_v18 = vpop.f32.mrf.mxu1 }
 0x2d8   :  { %v8595_v0 = vmul.f32 -1.442695, %v2950_v15  ;;  %v2951_v3 = vadd.f32 %v2876_v17, %v10538_v59  ;;  %v8597_v25 = vmul.f32 -1.442695, %v2952_v57  ;;  %v2953_v46 = vadd.f32 %v2947_v18, %v10578_v52  ;;  %v10695_v57 = vld [vmem:[#allocation5 + $0x1a0] sm:$0xff] }
 0x2da   :  { %8736 = vpow2.f32 %v8595_v0  ;;  %v8596_v7 = vmul.f32 -1.442695, %v2951_v3 }
 0x2dc   :  { %8738 = vpow2.f32 %v8596_v7 }
 0x2dd   :  { %8740 = vpow2.f32 %v8597_v25 }
 0x2de   :  { %8742 = vtanh.f32 %v2953_v46  ;;  %v10687_v46 = vld [vmem:[#allocation5 + $0x1c0] sm:$0xff] }
 0x2e7   :  { %v8737_v44 = vpop.eup %8736 }
 0x2e8   :  { %v2963_v60 = vadd.f32 1.0, %v8737_v44 }
 0x2e9   :  { %v8739_v54 = vpop.eup %8738 }
 0x2ea   :  { %8744 = vrcp.f32 %v2963_v60  ;;  %v2964_v27 = vadd.f32 1.0, %v8739_v54  ;;  %v8741_v32 = vpop.eup %8740  ;;  %v10679_v60 = vld [vmem:[#allocation5 + $0x1e0] sm:$0xff] }
 0x2eb   :  { %v8743_v59 = vpop.eup %8742  ;;  %v2965_v3 = vadd.f32 1.0, %v8741_v32 }
 0x2ec   :  { %8746 = vrcp.f32 %v2964_v27 }
 0x2ed   :  { %8748 = vrcp.f32 %v2965_v3 }
 0x2f7   :  { %v8745_v15 = vpop.eup %8744 }
 0x2f8   :  { %v2974_v17 = vmul.f32 %v8745_v15, %v8743_v59 }
 0x2f9   :  { %v8747_v0 = vpop.eup %8746 }
 0x2fa   :  { %v2973_v19 = vmul.f32 %v8747_v0, %v10592_v1  ;;  %v8749_v44 = vpop.eup %8748  ;;  %v10683_v1 = vld [vmem:[#allocation5 + $0x1c8] sm:$0xff] }
 0x2fc   :  { %v10672_v7 = vadd.f32 %v2974_v17, %v2973_v19 }
 0x2fe   :  { %8750 = vtanh.f32 %v10672_v7 }
 0x30b   :  { %v8751_v25 = vpop.eup %8750 }
 0x30c   :  { %v10675_v52 = vmul.f32 %v8751_v25, %v8749_v44 }
 0x30e   :  { %13988 = vst [vmem:[#allocation43_spill] sm:$0xff] %v10675_v52  ;;  %3047 = vmatmul.mubr.f32.vlgmr.msra.gmra.mxu0 %v10675_v52  ;;  %3118 = vmatmul.mubr.f32.vlgmr.msra.gmra.mxu1 %v10675_v52  ;;  %v10902_v52 = vld [vmem:[#allocation5 + $0xb0] sm:$0xff] }
 0x30f   :  { %3157 = vmatpush1.msra.mxu0 %v10679_v60  ;;  %3228 = vmatpush1.msra.mxu1 %v10195_v35  ;;  %v10699_v35 = vld [vmem:[#allocation5 + $0x188] sm:$0xff] }
 0x310   :  { %3158 = vmatprep.subr.mxu0 %v10683_v1  ;;  %3229 = vmatprep.subr.mxu1 %v10200_v36  ;;  %v10703_v36 = vld [vmem:[#allocation5 + $0x180] sm:$0xff] }
 0x311   :  { %3159 = vmatpush1.msra.mxu0 %v10687_v46  ;;  %3230 = vmatpush1.msra.mxu1 %v10203_v37  ;;  %v10707_v37 = vld [vmem:[#allocation5 + $0x168] sm:$0xff] }
 0x312   :  { %3160 = vmatprep.subr.mxu0 %v10691_v34  ;;  %3231 = vmatprep.subr.mxu1 %v10207_v38  ;;  %v10711_v38 = vld [vmem:[#allocation5 + $0x160] sm:$0xff] }
 0x313   :  { %3161 = vmatpush1.msra.mxu0 %v10695_v57  ;;  %3232 = vmatpush1.msra.mxu1 %v10211_v39  ;;  %v10715_v39 = vld [vmem:[#allocation5 + $0x148] sm:$0xff] }
 0x314   :  { %3162 = vmatprep.subr.mxu0 %v10699_v35  ;;  %3233 = vmatprep.subr.mxu1 %v10215_v40  ;;  %v10719_v40 = vld [vmem:[#allocation5 + $0x140] sm:$0xff] }
 0x315   :  { %3163 = vmatpush1.msra.mxu0 %v10703_v36  ;;  %3234 = vmatpush1.msra.mxu1 %v10219_v41  ;;  %v10723_v41 = vld [vmem:[#allocation5 + $0x128] sm:$0xff] }
 0x316   :  { %3164 = vmatprep.subr.mxu0 %v10707_v37  ;;  %3235 = vmatprep.subr.mxu1 %v10223_v42  ;;  %v10727_v42 = vld [vmem:[#allocation5 + $0x120] sm:$0xff] }
 0x317   :  { %3165 = vmatpush1.msra.mxu0 %v10711_v38  ;;  %3236 = vmatpush1.msra.mxu1 %v10227_v43  ;;  %v10731_v43 = vld [vmem:[#allocation5 + $0x108] sm:$0xff] }
 0x318   :  { %3166 = vmatprep.subr.mxu0 %v10715_v39  ;;  %3237 = vmatprep.subr.mxu1 %v13942_v4  ;;  %v10735_v4 = vld [vmem:[#allocation5 + $0x100] sm:$0xff] }
 0x319   :  { %3167 = vmatpush1.msra.mxu0 %v10719_v40  ;;  %3238 = vmatpush1.msra.mxu1 %v13944_v6  ;;  %v10739_v6 = vld [vmem:[#allocation5 + $0xe8] sm:$0xff] }
 0x31a   :  { %3168 = vmatprep.subr.mxu0 %v10723_v41  ;;  %3239 = vmatprep.subr.mxu1 %v13946_v8  ;;  %v10743_v8 = vld [vmem:[#allocation5 + $0xe0] sm:$0xff] }
 0x31b   :  { %3169 = vmatpush1.msra.mxu0 %v10727_v42  ;;  %3240 = vmatpush1.msra.mxu1 %v13948_v10  ;;  %v10747_v10 = vld [vmem:[#allocation5 + $0xc8] sm:$0xff] }
 0x31c   :  { %3170 = vmatprep.subr.mxu0 %v10731_v43  ;;  %3241 = vmatprep.subr.mxu1 %v13950_v11  ;;  %v10751_v11 = vld [vmem:[#allocation5 + $0xc0] sm:$0xff] }
 0x31d   :  { %3171 = vmatpush1.msra.mxu0 %v10735_v4  ;;  %3242 = vmatpush1.msra.mxu1 %v13952_v16  ;;  %v10755_v16 = vld [vmem:[#allocation5 + $0xa8] sm:$0xff] }
 0x31e   :  { %3172 = vmatprep.subr.mxu0 %v10739_v6  ;;  %3243 = vmatprep.subr.mxu1 %v13954_v23  ;;  %v10759_v23 = vld [vmem:[#allocation5 + $0xa0] sm:$0xff] }
 0x31f   :  { %3173 = vmatpush1.msra.mxu0 %v10743_v8  ;;  %3244 = vmatpush1.msra.mxu1 %v13956_v24  ;;  %v10763_v24 = vld [vmem:[#allocation5 + $0x88] sm:$0xff] }
 0x320   :  { %3174 = vmatprep.subr.mxu0 %v10747_v10  ;;  %3245 = vmatprep.subr.mxu1 %v13958_v45  ;;  %v10767_v45 = vld [vmem:[#allocation5 + $0x80] sm:$0xff] }
 0x321   :  { %3175 = vmatpush1.msra.mxu0 %v10751_v11  ;;  %3246 = vmatpush1.msra.mxu1 %v13960_v61  ;;  %v10771_v61 = vld [vmem:[#allocation5 + $0x68] sm:$0xff] }
 0x322   :  { %3176 = vmatprep.subr.mxu0 %v10755_v16  ;;  %3247 = vmatprep.subr.mxu1 %v13962_v12  ;;  %13989 = vst [vmem:[#allocation21_spill] sm:$0xff] %v10771_v61  ;;  %v10775_v12 = vld [vmem:[#allocation5 + $0x60] sm:$0xff] }
 0x323   :  { %3177 = vmatpush1.msra.mxu0 %v10759_v23  ;;  %3248 = vmatpush1.msra.mxu1 %v13964_v47  ;;  %13990 = vst [vmem:[#allocation44_spill] sm:$0xff] %v10775_v12  ;;  %v10779_v47 = vld [vmem:[#allocation5 + $0x48] sm:$0xff] }
 0x324   :  { %3178 = vmatprep.subr.mxu0 %v10763_v24  ;;  %3249 = vmatprep.subr.mxu1 %v13966_v14  ;;  %13991 = vst [vmem:[#allocation22_spill] sm:$0xff] %v10779_v47  ;;  %v10783_v14 = vld [vmem:[#allocation5 + $0x40] sm:$0xff] }
 0x325   :  { %3179 = vmatpush1.msra.mxu0 %v10767_v45  ;;  %3250 = vmatpush1.msra.mxu1 %v13968_v51  ;;  %13992 = vst [vmem:[#allocation45_spill] sm:$0xff] %v10783_v14  ;;  %v10787_v51 = vld [vmem:[#allocation5 + $0x28] sm:$0xff] }
 0x326   :  { %3180 = vmatprep.subr.mxu0 %v10771_v61  ;;  %3251 = vmatprep.subr.mxu1 %v13970_v30  ;;  %13993 = vst [vmem:[#allocation23_spill] sm:$0xff] %v10787_v51  ;;  %v10791_v30 = vld [vmem:[#allocation5 + $0x20] sm:$0xff] }
 0x327   :  { %3181 = vmatpush1.msra.mxu0 %v10775_v12  ;;  %3252 = vmatpush1.msra.mxu1 %v13972_v28  ;;  %13994 = vst [vmem:[#allocation46_spill] sm:$0xff] %v10791_v30  ;;  %v10795_v28 = vld [vmem:[#allocation5 + $0x8] sm:$0xff] }
 0x328   :  { %3182 = vmatprep.subr.mxu0 %v10779_v47  ;;  %3253 = vmatprep.subr.mxu1 %v13974_v58  ;;  %13995 = vst [vmem:[#allocation24_spill] sm:$0xff] %v10795_v28  ;;  %v10799_v58 = vld [vmem:[#allocation5] sm:$0xff] }
 0x329   :  { %3183 = vmatpush1.msra.mxu0 %v10783_v14  ;;  %3254 = vmatpush1.msra.mxu1 %v13976_v5  ;;  %13996 = vst [vmem:[#allocation47_spill] sm:$0xff] %v10799_v58  ;;  %v10806_v5 = vld [vmem:[#allocation5 + $0x1f8] sm:$0xff] }
 0x32a   :  { %3184 = vmatprep.subr.mxu0 %v10787_v51  ;;  %3255 = vmatprep.subr.mxu1 %v13978_v9  ;;  %13997 = vst [vmem:[#allocation25_spill] sm:$0xff] %v10806_v5 }
 0x32b   :  { %3185 = vmatpush1.msra.mxu0 %v10791_v30  ;;  %3256 = vmatpush1.msra.mxu1 %v13980_v55 }
 0x32c   :  { %3186 = vmatprep.subr.mxu0 %v10795_v28  ;;  %3257 = vmatprep.subr.mxu1 %v13982_v20 }
 0x32d   :  { %3187 = vmatpush1.msra.mxu0 %v10799_v58  ;;  %3220 = vmatprep.mubr.f32.mxu0 %v13984_v50 }
 0x32e   :  { %3258 = vmatpush1.msra.mxu1 %v13985_v21  ;;  %3291 = vmatprep.mubr.f32.mxu1 %v13984_v50 }
 0x32f   :  { %3330 = vmatprep.subr.mxu0 %v10663_v26  ;;  %3401 = vmatprep.subr.mxu1 %v10806_v5 }
 0x3ce   :  { %v3048_v9 = vpop.f32.mrf.mxu0  ;;  %v3119_v32 = vpop.f32.mrf.mxu1 }
 0x3cf   :  { %v3124_v55 = vadd.f32 %v3048_v9, %v10517_v29  ;;  %v3126_v21 = vadd.f32 %v3119_v32, %v10566_v62  ;;  %v10822_v32 = vld [vmem:[#allocation5 + $0x1f0] sm:$0xff] }
 0x3d0   :  { %v3050_v20 = vpop.f32.mrf.mxu0  ;;  %v3121_v59 = vpop.f32.mrf.mxu1 }
 0x3d1   :  { %v8598_v18 = vmul.f32 -1.442695, %v3124_v55  ;;  %v3125_v54 = vadd.f32 %v3050_v20, %v10522_v49  ;;  %v8600_v15 = vmul.f32 -1.442695, %v3126_v21  ;;  %v3127_v17 = vadd.f32 %v3121_v59, %v10568_v48  ;;  %v10830_v21 = vld [vmem:[#allocation5 + $0x1d0] sm:$0xff]  ;;  %v10834_v59 = vld [vmem:[#allocation5 + $0x1b8] sm:$0xff] }
 0x3d3   :  { %8752 = vpow2.f32 %v8598_v18  ;;  %v8599_v27 = vmul.f32 -1.442695, %v3125_v54 }
 0x3d5   :  { %8754 = vpow2.f32 %v8599_v27 }
 0x3d6   :  { %8756 = vpow2.f32 %v8600_v15  ;;  %v10838_v15 = vld [vmem:[#allocation5 + $0x1b0] sm:$0xff] }
 0x3d7   :  { %8758 = vtanh.f32 %v3127_v17  ;;  %v10842_v17 = vld [vmem:[#allocation5 + $0x198] sm:$0xff] }
 0x3e0   :  { %v8753_v0 = vpop.eup %8752 }
 0x3e1   :  { %v3137_v3 = vadd.f32 1.0, %v8753_v0  ;;  %v10846_v0 = vld [vmem:[#allocation5 + $0x190] sm:$0xff] }
 0x3e2   :  { %v8755_v19 = vpop.eup %8754 }
 0x3e3   :  { %8760 = vrcp.f32 %v3137_v3  ;;  %v3138_v29 = vadd.f32 1.0, %v8755_v19  ;;  %v8757_v44 = vpop.eup %8756  ;;  %v10850_v3 = vld [vmem:[#allocation5 + $0x178] sm:$0xff]  ;;  %v10854_v19 = vld [vmem:[#allocation5 + $0x170] sm:$0xff] }
 0x3e4   :  { %v8759_v49 = vpop.eup %8758  ;;  %v3139_v20 = vadd.f32 1.0, %v8757_v44  ;;  %v10862_v44 = vld [vmem:[#allocation5 + $0x150] sm:$0xff] }
 0x3e5   :  { %8762 = vrcp.f32 %v3138_v29  ;;  %v10858_v29 = vld [vmem:[#allocation5 + $0x158] sm:$0xff] }
 0x3e6   :  { %8764 = vrcp.f32 %v3139_v20  ;;  %v10882_v20 = vld [vmem:[#allocation5 + $0xf8] sm:$0xff] }
 0x3f0   :  { %v8761_v25 = vpop.eup %8760 }
 0x3f1   :  { %v3148_v9 = vmul.f32 %v8761_v25, %v8759_v49  ;;  %v10866_v49 = vld [vmem:[#allocation5 + $0x138] sm:$0xff]  ;;  %v10870_v25 = vld [vmem:[#allocation5 + $0x130] sm:$0xff] }
 0x3f2   :  { %v8763_v55 = vpop.eup %8762 }
 0x3f3   :  { %v3147_v62 = vmul.f32 %v8763_v55, %v10672_v7  ;;  %v8765_v48 = vpop.eup %8764  ;;  %v10826_v7 = vld [vmem:[#allocation5 + $0x1d8] sm:$0xff]  ;;  %v10878_v55 = vld [vmem:[#allocation5 + $0x110] sm:$0xff] }
 0x3f5   :  { %v10814_v18 = vadd.f32 %v3148_v9, %v3147_v62  ;;  %v10874_v9 = vld [vmem:[#allocation5 + $0x118] sm:$0xff]  ;;  %v10886_v62 = vld [vmem:[#allocation5 + $0xf0] sm:$0xff] }
 0x3f7   :  { %8766 = vtanh.f32 %v10814_v18 }
 0x404   :  { %v8767_v54 = vpop.eup %8766 }
 0x405   :  { %v10817_v27 = vmul.f32 %v8767_v54, %v8765_v48  ;;  %v10890_v48 = vld [vmem:[#allocation5 + $0xd8] sm:$0xff]  ;;  %v10894_v54 = vld [vmem:[#allocation5 + $0xd0] sm:$0xff] }
 0x407   :  { %13998 = vst [vmem:[#allocation48_spill] sm:$0xff] %v10817_v27  ;;  %3221 = vmatmul.mubr.f32.vlgmr.msra.gmra.mxu0 %v10817_v27  ;;  %3292 = vmatmul.mubr.f32.vlgmr.msra.gmra.mxu1 %v10817_v27  ;;  %v10898_v27 = vld [vmem:[#allocation5 + $0xb8] sm:$0xff] }
 0x408   :  { %3331 = vmatpush1.msra.mxu0 %v10679_v60  ;;  %3402 = vmatpush1.msra.mxu1 %v10822_v32 }
 0x409   :  { %3332 = vmatprep.subr.mxu0 %v10683_v1  ;;  %3403 = vmatprep.subr.mxu1 %v10826_v7 }
 0x40a   :  { %3333 = vmatpush1.msra.mxu0 %v10687_v46  ;;  %3404 = vmatpush1.msra.mxu1 %v10830_v21 }
 0x40b   :  { %3334 = vmatprep.subr.mxu0 %v10691_v34  ;;  %3405 = vmatprep.subr.mxu1 %v10834_v59 }
 0x40c   :  { %3335 = vmatpush1.msra.mxu0 %v10695_v57  ;;  %3406 = vmatpush1.msra.mxu1 %v10838_v15 }
 0x40d   :  { %3336 = vmatprep.subr.mxu0 %v10699_v35  ;;  %3407 = vmatprep.subr.mxu1 %v10842_v17 }
 0x40e   :  { %3337 = vmatpush1.msra.mxu0 %v10703_v36  ;;  %3408 = vmatpush1.msra.mxu1 %v10846_v0 }
 0x40f   :  { %3338 = vmatprep.subr.mxu0 %v10707_v37  ;;  %3409 = vmatprep.subr.mxu1 %v10850_v3 }
 0x410   :  { %3339 = vmatpush1.msra.mxu0 %v10711_v38  ;;  %3410 = vmatpush1.msra.mxu1 %v10854_v19 }
 0x411   :  { %3340 = vmatprep.subr.mxu0 %v10715_v39  ;;  %3411 = vmatprep.subr.mxu1 %v10858_v29 }
 0x412   :  { %3341 = vmatpush1.msra.mxu0 %v10719_v40  ;;  %3412 = vmatpush1.msra.mxu1 %v10862_v44 }
 0x413   :  { %3342 = vmatprep.subr.mxu0 %v10723_v41  ;;  %3413 = vmatprep.subr.mxu1 %v10866_v49 }
 0x414   :  { %3343 = vmatpush1.msra.mxu0 %v10727_v42  ;;  %3414 = vmatpush1.msra.mxu1 %v10870_v25 }
 0x415   :  { %3344 = vmatprep.subr.mxu0 %v10731_v43  ;;  %3415 = vmatprep.subr.mxu1 %v10874_v9 }
 0x416   :  { %3345 = vmatpush1.msra.mxu0 %v10735_v4  ;;  %3416 = vmatpush1.msra.mxu1 %v10878_v55 }
 0x417   :  { %3346 = vmatprep.subr.mxu0 %v10739_v6  ;;  %3417 = vmatprep.subr.mxu1 %v10882_v20 }
 0x418   :  { %3347 = vmatpush1.msra.mxu0 %v10743_v8  ;;  %3418 = vmatpush1.msra.mxu1 %v10886_v62 }
 0x419   :  { %3348 = vmatprep.subr.mxu0 %v10747_v10  ;;  %3419 = vmatprep.subr.mxu1 %v10890_v48 }
 0x41a   :  { %3349 = vmatpush1.msra.mxu0 %v10751_v11  ;;  %3420 = vmatpush1.msra.mxu1 %v10894_v54 }
 0x41b   :  { %3350 = vmatprep.subr.mxu0 %v10755_v16  ;;  %3421 = vmatprep.subr.mxu1 %v10898_v27 }
 0x41c   :  { %3351 = vmatpush1.msra.mxu0 %v10759_v23  ;;  %3422 = vmatpush1.msra.mxu1 %v10902_v52 }
 0x41d   :  { %3352 = vmatprep.subr.mxu0 %v10763_v24  ;;  %3423 = vmatprep.subr.mxu1 %v10906_v53  ;;  %v10922_v53 = vld [vmem:[#allocation5 + $0x58] sm:$0xff] }
 0x41e   :  { %3353 = vmatpush1.msra.mxu0 %v10767_v45  ;;  %3424 = vmatpush1.msra.mxu1 %v10910_v13  ;;  %14003 = vst [vmem:[#allocation28_spill] sm:$0xff] %v10922_v53  ;;  %v10926_v13 = vld [vmem:[#allocation5 + $0x50] sm:$0xff] }
 0x41f   :  { %3354 = vmatprep.subr.mxu0 %v10771_v61  ;;  %3425 = vmatprep.subr.mxu1 %v10914_v31  ;;  %14004 = vst [vmem:[#allocation51_spill] sm:$0xff] %v10926_v13  ;;  %v10930_v31 = vld [vmem:[#allocation5 + $0x38] sm:$0xff] }
 0x420   :  { %3355 = vmatpush1.msra.mxu0 %v10775_v12  ;;  %3426 = vmatpush1.msra.mxu1 %v10918_v2  ;;  %14005 = vst [vmem:[#allocation29_spill] sm:$0xff] %v10930_v31  ;;  %v10934_v2 = vld [vmem:[#allocation5 + $0x30] sm:$0xff] }
 0x421   :  { %3356 = vmatprep.subr.mxu0 %v10779_v47  ;;  %3427 = vmatprep.subr.mxu1 %v10922_v53  ;;  %14006 = vst [vmem:[#allocation52_spill] sm:$0xff] %v10934_v2  ;;  %v10938_v53 = vld [vmem:[#allocation5 + $0x18] sm:$0xff] }
 0x422   :  { %3357 = vmatpush1.msra.mxu0 %v10783_v14  ;;  %3428 = vmatpush1.msra.mxu1 %v10926_v13  ;;  %14007 = vst [vmem:[#allocation30_spill] sm:$0xff] %v10938_v53 }
 0x423   :  { %3358 = vmatprep.subr.mxu0 %v10787_v51  ;;  %3429 = vmatprep.subr.mxu1 %v10930_v31  ;;  %v10943_v51 = vld [vmem:[#allocation5 + $0x10] sm:$0xff] }
 0x424   :  { %3359 = vmatpush1.msra.mxu0 %v10791_v30  ;;  %3430 = vmatpush1.msra.mxu1 %v10934_v2  ;;  %14008 = vst [vmem:[#allocation53_spill] sm:$0xff] %v10943_v51 }
 0x425   :  { %3360 = vmatprep.subr.mxu0 %v10795_v28  ;;  %3431 = vmatprep.subr.mxu1 %v10938_v53 }
 0x426   :  { %3361 = vmatpush1.msra.mxu0 %v10799_v58  ;;  %3394 = vmatprep.mubr.f32.mxu0 %v13984_v50 }
 0x427   :  { %3432 = vmatpush1.msra.mxu1 %v10943_v51  ;;  %3465 = vmatprep.mubr.f32.mxu1 %v13984_v50 }
 0x428   :  { %3504 = vmatprep.subr.mxu0 %v10663_v26  ;;  %3575 = vmatprep.subr.mxu1 %v10806_v5 }
 0x4c7   :  { %v3222_v2 = vpop.f32.mrf.mxu0  ;;  %v3293_v13 = vpop.f32.mrf.mxu1 }
 0x4c8   :  { %v3298_v28 = vadd.f32 %v3222_v2, %v10501_v63  ;;  %v3300_v14 = vadd.f32 %v3293_v13, %v10556_v56 }
 0x4c9   :  { %v3224_v30 = vpop.f32.mrf.mxu0  ;;  %v3295_v51 = vpop.f32.mrf.mxu1 }
 0x4ca   :  { %v8601_v31 = vmul.f32 -1.442695, %v3298_v28  ;;  %v3299_v53 = vadd.f32 %v3224_v30, %v10506_v33  ;;  %v8603_v47 = vmul.f32 -1.442695, %v3300_v14  ;;  %v3301_v50 = vadd.f32 %v3295_v51, %v10558_v22  ;;  %v14012_v14 = vld [vmem:[#allocation27_spill] sm:$0xff]  ;;  %v14013_v51 = vld [vmem:[#allocation44_spill] sm:$0xff] }
 0x4cc   :  { %8768 = vpow2.f32 %v8601_v31  ;;  %v8602_v58 = vmul.f32 -1.442695, %v3299_v53 }
 0x4ce   :  { %8770 = vpow2.f32 %v8602_v58  ;;  %v14014_v58 = vld [vmem:[#allocation50_spill] sm:$0xff] }
 0x4cf   :  { %8772 = vpow2.f32 %v8603_v47 }
 0x4d0   :  { %8774 = vtanh.f32 %v3301_v50  ;;  %v14010_v50 = vld [vmem:[#allocation26_spill] sm:$0xff] }
 0x4d9   :  { %v8769_v26 = vpop.eup %8768 }
 0x4da   :  { %v3311_v12 = vadd.f32 1.0, %v8769_v26 }
 0x4db   :  { %v8771_v5 = vpop.eup %8770 }
 0x4dc   :  { %8776 = vrcp.f32 %v3311_v12  ;;  %v3312_v63 = vadd.f32 1.0, %v8771_v5  ;;  %v8773_v2 = vpop.eup %8772  ;;  %v14011_v12 = vld [vmem:[#allocation49_spill] sm:$0xff]  ;;  %v14015_v5 = vld [vmem:[#allocation22_spill] sm:$0xff] }
 0x4dd   :  { %v8775_v33 = vpop.eup %8774  ;;  %v3313_v28 = vadd.f32 1.0, %v8773_v2  ;;  %v14018_v2 = vld [vmem:[#allocation51_spill] sm:$0xff] }
 0x4de   :  { %8778 = vrcp.f32 %v3312_v63  ;;  %v14017_v63 = vld [vmem:[#allocation45_spill] sm:$0xff] }
 0x4df   :  { %8780 = vrcp.f32 %v3313_v28  ;;  %v14023_v28 = vld [vmem:[#allocation24_spill] sm:$0xff] }
 0x4e9   :  { %v8777_v31 = vpop.eup %8776 }
 0x4ea   :  { %v3322_v53 = vmul.f32 %v8777_v31, %v8775_v33  ;;  %v14019_v33 = vld [vmem:[#allocation23_spill] sm:$0xff]  ;;  %v14020_v31 = vld [vmem:[#allocation29_spill] sm:$0xff] }
 0x4eb   :  { %v8779_v30 = vpop.eup %8778 }
 0x4ec   :  { %v3321_v13 = vmul.f32 %v8779_v30, %v10814_v18  ;;  %v8781_v22 = vpop.eup %8780  ;;  %v14016_v18 = vld [vmem:[#allocation28_spill] sm:$0xff] }
 0x4ed   :  { %v14022_v30 = vld [vmem:[#allocation52_spill] sm:$0xff] }
 0x4ee   :  { %v10954_v56 = vadd.f32 %v3322_v53, %v3321_v13  ;;  %v14021_v53 = vld [vmem:[#allocation46_spill] sm:$0xff] }
 0x4ef   :  { %v14024_v13 = vld [vmem:[#allocation30_spill] sm:$0xff] }
 0x4f0   :  { %8782 = vtanh.f32 %v10954_v56 }
 0x4fd   :  { %v8783_v26 = vpop.eup %8782 }
 0x4fe   :  { %v10957_v47 = vmul.f32 %v8783_v26, %v8781_v22  ;;  %v14025_v22 = vld [vmem:[#allocation47_spill] sm:$0xff]  ;;  %v14026_v26 = vmov 0.0  }
 0x500   :  { %14009 = vst [vmem:[#allocation31_spill] sm:$0xff] %v10957_v47  ;;  %3395 = vmatmul.mubr.f32.vlgmr.msra.gmra.mxu0 %v10957_v47  ;;  %3466 = vmatmul.mubr.f32.vlgmr.msra.gmra.mxu1 %v10957_v47  ;;  %v14027_v47 = vld [vmem:[#allocation53_spill] sm:$0xff] }
 0x501   :  { %3505 = vmatpush1.msra.mxu0 %v10679_v60  ;;  %3576 = vmatpush1.msra.mxu1 %v10822_v32 }
 0x502   :  { %3506 = vmatprep.subr.mxu0 %v10683_v1  ;;  %3577 = vmatprep.subr.mxu1 %v10826_v7 }
 0x503   :  { %3507 = vmatpush1.msra.mxu0 %v10687_v46  ;;  %3578 = vmatpush1.msra.mxu1 %v10830_v21 }
 0x504   :  { %3508 = vmatprep.subr.mxu0 %v10691_v34  ;;  %3579 = vmatprep.subr.mxu1 %v10834_v59 }
 0x505   :  { %3509 = vmatpush1.msra.mxu0 %v10695_v57  ;;  %3580 = vmatpush1.msra.mxu1 %v10838_v15 }
 0x506   :  { %3510 = vmatprep.subr.mxu0 %v10699_v35  ;;  %3581 = vmatprep.subr.mxu1 %v10842_v17 }
 0x507   :  { %3511 = vmatpush1.msra.mxu0 %v10703_v36  ;;  %3582 = vmatpush1.msra.mxu1 %v10846_v0 }
 0x508   :  { %3512 = vmatprep.subr.mxu0 %v10707_v37  ;;  %3583 = vmatprep.subr.mxu1 %v10850_v3 }
 0x509   :  { %3513 = vmatpush1.msra.mxu0 %v10711_v38  ;;  %3584 = vmatpush1.msra.mxu1 %v10854_v19 }
 0x50a   :  { %3514 = vmatprep.subr.mxu0 %v10715_v39  ;;  %3585 = vmatprep.subr.mxu1 %v10858_v29 }
 0x50b   :  { %3515 = vmatpush1.msra.mxu0 %v10719_v40  ;;  %3586 = vmatpush1.msra.mxu1 %v10862_v44 }
 0x50c   :  { %3516 = vmatprep.subr.mxu0 %v10723_v41  ;;  %3587 = vmatprep.subr.mxu1 %v10866_v49 }
 0x50d   :  { %3517 = vmatpush1.msra.mxu0 %v10727_v42  ;;  %3588 = vmatpush1.msra.mxu1 %v10870_v25 }
 0x50e   :  { %3518 = vmatprep.subr.mxu0 %v10731_v43  ;;  %3589 = vmatprep.subr.mxu1 %v10874_v9 }
 0x50f   :  { %3519 = vmatpush1.msra.mxu0 %v10735_v4  ;;  %3590 = vmatpush1.msra.mxu1 %v10878_v55 }
 0x510   :  { %3520 = vmatprep.subr.mxu0 %v10739_v6  ;;  %3591 = vmatprep.subr.mxu1 %v10882_v20 }
 0x511   :  { %3521 = vmatpush1.msra.mxu0 %v10743_v8  ;;  %3592 = vmatpush1.msra.mxu1 %v10886_v62 }
 0x512   :  { %3522 = vmatprep.subr.mxu0 %v10747_v10  ;;  %3593 = vmatprep.subr.mxu1 %v10890_v48 }
 0x513   :  { %3523 = vmatpush1.msra.mxu0 %v10751_v11  ;;  %3594 = vmatpush1.msra.mxu1 %v10894_v54 }
 0x514   :  { %3524 = vmatprep.subr.mxu0 %v10755_v16  ;;  %3595 = vmatprep.subr.mxu1 %v10898_v27 }
 0x515   :  { %3525 = vmatpush1.msra.mxu0 %v10759_v23  ;;  %3596 = vmatpush1.msra.mxu1 %v10902_v52 }
 0x516   :  { %3526 = vmatprep.subr.mxu0 %v10763_v24  ;;  %3597 = vmatprep.subr.mxu1 %v14010_v50 }
 0x517   :  { %3527 = vmatpush1.msra.mxu0 %v10767_v45  ;;  %3598 = vmatpush1.msra.mxu1 %v14011_v12 }
 0x518   :  { %3528 = vmatprep.subr.mxu0 %v10771_v61  ;;  %3599 = vmatprep.subr.mxu1 %v14012_v14 }
 0x519   :  { %3529 = vmatpush1.msra.mxu0 %v14013_v51  ;;  %3600 = vmatpush1.msra.mxu1 %v14014_v58  ;;  %v14032_v58 = vld [vmem:[#allocation83_spill] sm:$0xff] }
 0x51a   :  { %3530 = vmatprep.subr.mxu0 %v14015_v5  ;;  %3601 = vmatprep.subr.mxu1 %v14016_v18 }
 0x51b   :  { %3531 = vmatpush1.msra.mxu0 %v14017_v63  ;;  %3602 = vmatpush1.msra.mxu1 %v14018_v2  ;;  %v14028_v2 = vld [vmem:[#allocation20_spill] sm:$0xff] }
 0x51c   :  { %3532 = vmatprep.subr.mxu0 %v14019_v33  ;;  %3603 = vmatprep.subr.mxu1 %v14020_v31  ;;  %v14029_v33 = vld [vmem:[#allocation25_spill] sm:$0xff] }
 0x51d   :  { %3533 = vmatpush1.msra.mxu0 %v14021_v53  ;;  %3604 = vmatpush1.msra.mxu1 %v14022_v30  ;;  %v14030_v53 = vld [vmem:[#allocation73_spill] sm:$0xff] }
 0x51e   :  { %3534 = vmatprep.subr.mxu0 %v14023_v28  ;;  %3605 = vmatprep.subr.mxu1 %v14024_v13  ;;  %v14031_v28 = vld [vmem:[#allocation75_spill] sm:$0xff] }
 0x51f   :  { %3535 = vmatpush1.msra.mxu0 %v14025_v22  ;;  %3568 = vmatprep.mubr.f32.mxu0 %v14026_v26 }
 0x520   :  { %3606 = vmatpush1.msra.mxu1 %v14027_v47  ;;  %3639 = vmatprep.mubr.f32.mxu1 %v14026_v26  ;;  %v14033_v26 = vld [vmem:[#allocation84_spill] sm:$0xff] }
 0x521   :  { %3678 = vmatprep.subr.mxu0 %v14028_v2  ;;  %3749 = vmatprep.subr.mxu1 %v14029_v33 }
 0x5c0   :  { %v3396_v31 = vpop.f32.mrf.mxu0  ;;  %v3467_v22 = vpop.f32.mrf.mxu1 }
 0x5c1   :  { %v3472_v63 = vadd.f32 %v3396_v31, %v14030_v53  ;;  %v3474_v51 = vadd.f32 %v3467_v22, %v14032_v58  ;;  %v14040_v22 = vld [vmem:[#allocation22_spill] sm:$0xff] }
 0x5c2   :  { %v3398_v30 = vpop.f32.mrf.mxu0  ;;  %v3469_v47 = vpop.f32.mrf.mxu1 }
 0x5c3   :  { %v8604_v18 = vmul.f32 -1.442695, %v3472_v63  ;;  %v3473_v5 = vadd.f32 %v3398_v30, %v14031_v28  ;;  %v8606_v14 = vmul.f32 -1.442695, %v3474_v51  ;;  %v3475_v61 = vadd.f32 %v3469_v47, %v14033_v26  ;;  %v14041_v26 = vld [vmem:[#allocation28_spill] sm:$0xff] }
 0x5c5   :  { %8784 = vpow2.f32 %v8604_v18  ;;  %v8605_v13 = vmul.f32 -1.442695, %v3473_v5 }
 0x5c7   :  { %8786 = vpow2.f32 %v8605_v13 }
 0x5c8   :  { %8788 = vpow2.f32 %v8606_v14 }
 0x5c9   :  { %8790 = vtanh.f32 %v3475_v61  ;;  %v14035_v61 = vld [vmem:[#allocation49_spill] sm:$0xff] }
 0x5d2   :  { %v8785_v2 = vpop.eup %8784 }
 0x5d3   :  { %v3485_v12 = vadd.f32 1.0, %v8785_v2  ;;  %v14038_v2 = vld [vmem:[#allocation44_spill] sm:$0xff] }
 0x5d4   :  { %v8787_v33 = vpop.eup %8786 }
 0x5d5   :  { %8792 = vrcp.f32 %v3485_v12  ;;  %v3486_v31 = vadd.f32 1.0, %v8787_v33  ;;  %v8789_v63 = vpop.eup %8788  ;;  %v14037_v12 = vld [vmem:[#allocation27_spill] sm:$0xff]  ;;  %v14039_v33 = vld [vmem:[#allocation50_spill] sm:$0xff] }
 0x5d6   :  { %v8791_v53 = vpop.eup %8790  ;;  %v3487_v28 = vadd.f32 1.0, %v8789_v63  ;;  %v14043_v63 = vld [vmem:[#allocation51_spill] sm:$0xff] }
 0x5d7   :  { %8794 = vrcp.f32 %v3486_v31  ;;  %v14042_v31 = vld [vmem:[#allocation45_spill] sm:$0xff] }
 0x5d8   :  { %8796 = vrcp.f32 %v3487_v28  ;;  %v14048_v28 = vld [vmem:[#allocation24_spill] sm:$0xff] }
 0x5e2   :  { %v8793_v18 = vpop.eup %8792 }
 0x5e3   :  { %v3496_v5 = vmul.f32 %v8793_v18, %v8791_v53  ;;  %v14044_v53 = vld [vmem:[#allocation23_spill] sm:$0xff]  ;;  %v14045_v18 = vld [vmem:[#allocation29_spill] sm:$0xff] }
 0x5e4   :  { %v8795_v30 = vpop.eup %8794 }
 0x5e5   :  { %v3495_v58 = vmul.f32 %v8795_v30, %v10954_v56  ;;  %v8797_v47 = vpop.eup %8796  ;;  %v14036_v56 = vld [vmem:[#allocation21_spill] sm:$0xff]  ;;  %v14047_v30 = vld [vmem:[#allocation52_spill] sm:$0xff] }
 0x5e7   :  { %v11032_v13 = vadd.f32 %v3496_v5, %v3495_v58  ;;  %v14046_v5 = vld [vmem:[#allocation46_spill] sm:$0xff] }
 0x5e8   :  { %v14049_v58 = vld [vmem:[#allocation30_spill] sm:$0xff] }
 0x5e9   :  { %8798 = vtanh.f32 %v11032_v13 }
 0x5f6   :  { %v8799_v14 = vpop.eup %8798 }
 0x5f7   :  { %v11035_v51 = vmul.f32 %v8799_v14, %v8797_v47  ;;  %v14050_v47 = vld [vmem:[#allocation47_spill] sm:$0xff]  ;;  %v14051_v14 = vmov 0.0  }
 0x5f9   :  { %14034 = vst [vmem:[#allocation54_spill] sm:$0xff] %v11035_v51  ;;  %3569 = vmatmul.mubr.f32.vlgmr.msra.gmra.mxu0 %v11035_v51  ;;  %3640 = vmatmul.mubr.f32.vlgmr.msra.gmra.mxu1 %v11035_v51  ;;  %v14052_v51 = vld [vmem:[#allocation53_spill] sm:$0xff] }
 0x5fa   :  { %3679 = vmatpush1.msra.mxu0 %v10679_v60  ;;  %3750 = vmatpush1.msra.mxu1 %v10822_v32 }
 0x5fb   :  { %3680 = vmatprep.subr.mxu0 %v10683_v1  ;;  %3751 = vmatprep.subr.mxu1 %v10826_v7 }
 0x5fc   :  { %3681 = vmatpush1.msra.mxu0 %v10687_v46  ;;  %3752 = vmatpush1.msra.mxu1 %v10830_v21 }
 0x5fd   :  { %3682 = vmatprep.subr.mxu0 %v10691_v34  ;;  %3753 = vmatprep.subr.mxu1 %v10834_v59 }
 0x5fe   :  { %3683 = vmatpush1.msra.mxu0 %v10695_v57  ;;  %3754 = vmatpush1.msra.mxu1 %v10838_v15 }
 0x5ff   :  { %3684 = vmatprep.subr.mxu0 %v10699_v35  ;;  %3755 = vmatprep.subr.mxu1 %v10842_v17 }
 0x600   :  { %3685 = vmatpush1.msra.mxu0 %v10703_v36  ;;  %3756 = vmatpush1.msra.mxu1 %v10846_v0 }
 0x601   :  { %3686 = vmatprep.subr.mxu0 %v10707_v37  ;;  %3757 = vmatprep.subr.mxu1 %v10850_v3 }
 0x602   :  { %3687 = vmatpush1.msra.mxu0 %v10711_v38  ;;  %3758 = vmatpush1.msra.mxu1 %v10854_v19 }
 0x603   :  { %3688 = vmatprep.subr.mxu0 %v10715_v39  ;;  %3759 = vmatprep.subr.mxu1 %v10858_v29 }
 0x604   :  { %3689 = vmatpush1.msra.mxu0 %v10719_v40  ;;  %3760 = vmatpush1.msra.mxu1 %v10862_v44 }
 0x605   :  { %3690 = vmatprep.subr.mxu0 %v10723_v41  ;;  %3761 = vmatprep.subr.mxu1 %v10866_v49 }
 0x606   :  { %3691 = vmatpush1.msra.mxu0 %v10727_v42  ;;  %3762 = vmatpush1.msra.mxu1 %v10870_v25 }
 0x607   :  { %3692 = vmatprep.subr.mxu0 %v10731_v43  ;;  %3763 = vmatprep.subr.mxu1 %v10874_v9 }
 0x608   :  { %3693 = vmatpush1.msra.mxu0 %v10735_v4  ;;  %3764 = vmatpush1.msra.mxu1 %v10878_v55 }
 0x609   :  { %3694 = vmatprep.subr.mxu0 %v10739_v6  ;;  %3765 = vmatprep.subr.mxu1 %v10882_v20 }
 0x60a   :  { %3695 = vmatpush1.msra.mxu0 %v10743_v8  ;;  %3766 = vmatpush1.msra.mxu1 %v10886_v62 }
 0x60b   :  { %3696 = vmatprep.subr.mxu0 %v10747_v10  ;;  %3767 = vmatprep.subr.mxu1 %v10890_v48 }
 0x60c   :  { %3697 = vmatpush1.msra.mxu0 %v10751_v11  ;;  %3768 = vmatpush1.msra.mxu1 %v10894_v54 }
 0x60d   :  { %3698 = vmatprep.subr.mxu0 %v10755_v16  ;;  %3769 = vmatprep.subr.mxu1 %v10898_v27 }
 0x60e   :  { %3699 = vmatpush1.msra.mxu0 %v10759_v23  ;;  %3770 = vmatpush1.msra.mxu1 %v10902_v52 }
 0x60f   :  { %3700 = vmatprep.subr.mxu0 %v10763_v24  ;;  %3771 = vmatprep.subr.mxu1 %v14010_v50 }
 0x610   :  { %3701 = vmatpush1.msra.mxu0 %v10767_v45  ;;  %3772 = vmatpush1.msra.mxu1 %v14035_v61 }
 0x611   :  { %3702 = vmatprep.subr.mxu0 %v14036_v56  ;;  %3773 = vmatprep.subr.mxu1 %v14037_v12 }
 0x612   :  { %3703 = vmatpush1.msra.mxu0 %v14038_v2  ;;  %3774 = vmatpush1.msra.mxu1 %v14039_v33  ;;  %v14057_v33 = vld [vmem:[#allocation81_spill] sm:$0xff] }
 0x613   :  { %3704 = vmatprep.subr.mxu0 %v14040_v22  ;;  %3775 = vmatprep.subr.mxu1 %v14041_v26 }
 0x614   :  { %3705 = vmatpush1.msra.mxu0 %v14042_v31  ;;  %3776 = vmatpush1.msra.mxu1 %v14043_v63  ;;  %v14053_v63 = vld [vmem:[#allocation20_spill] sm:$0xff] }
 0x615   :  { %3706 = vmatprep.subr.mxu0 %v14044_v53  ;;  %3777 = vmatprep.subr.mxu1 %v14045_v18  ;;  %v14054_v53 = vld [vmem:[#allocation25_spill] sm:$0xff] }
 0x616   :  { %3707 = vmatpush1.msra.mxu0 %v14046_v5  ;;  %3778 = vmatpush1.msra.mxu1 %v14047_v30  ;;  %v14055_v5 = vld [vmem:[#allocation71_spill] sm:$0xff] }
 0x617   :  { %3708 = vmatprep.subr.mxu0 %v14048_v28  ;;  %3779 = vmatprep.subr.mxu1 %v14049_v58  ;;  %v14056_v28 = vld [vmem:[#allocation72_spill] sm:$0xff] }
 0x618   :  { %3709 = vmatpush1.msra.mxu0 %v14050_v47  ;;  %3742 = vmatprep.mubr.f32.mxu0 %v14051_v14 }
 0x619   :  { %3780 = vmatpush1.msra.mxu1 %v14052_v51  ;;  %3813 = vmatprep.mubr.f32.mxu1 %v14051_v14  ;;  %v14058_v14 = vld [vmem:[#allocation82_spill] sm:$0xff] }
 0x61a   :  { %3852 = vmatprep.subr.mxu0 %v14053_v63  ;;  %3923 = vmatprep.subr.mxu1 %v14054_v53 }
 0x6b9   :  { %v3570_v18 = vpop.f32.mrf.mxu0  ;;  %v3641_v47 = vpop.f32.mrf.mxu1 }
 0x6ba   :  { %v3646_v31 = vadd.f32 %v3570_v18, %v14055_v5  ;;  %v3648_v2 = vadd.f32 %v3641_v47, %v14057_v33 }
 0x6bb   :  { %v3572_v30 = vpop.f32.mrf.mxu0  ;;  %v3643_v51 = vpop.f32.mrf.mxu1 }
 0x6bc   :  { %v8607_v26 = vmul.f32 -1.442695, %v3646_v31  ;;  %v3647_v22 = vadd.f32 %v3572_v30, %v14056_v28  ;;  %v8609_v12 = vmul.f32 -1.442695, %v3648_v2  ;;  %v3649_v56 = vadd.f32 %v3643_v51, %v14058_v14 }
 0x6be   :  { %8800 = vpow2.f32 %v8607_v26  ;;  %v8608_v58 = vmul.f32 -1.442695, %v3647_v22 }
 0x6c0   :  { %8802 = vpow2.f32 %v8608_v58 }
 0x6c1   :  { %8804 = vpow2.f32 %v8609_v12 }
 0x6c2   :  { %8806 = vtanh.f32 %v3649_v56 }
 0x6cb   :  { %v8801_v63 = vpop.eup %8800 }
 0x6cc   :  { %v3659_v61 = vadd.f32 1.0, %v8801_v63  ;;  %v11197_v63 = vld [vmem:[#allocation7 + $0x1e0] sm:$0xff] }
 0x6cd   :  { %v8803_v53 = vpop.eup %8802 }
 0x6ce   :  { %8808 = vrcp.f32 %v3659_v61  ;;  %v3660_v18 = vadd.f32 1.0, %v8803_v53  ;;  %v8805_v31 = vpop.eup %8804  ;;  %v11199_v53 = vld [vmem:[#allocation7 + $0x1f0] sm:$0xff] }
 0x6cf   :  { %v8807_v5 = vpop.eup %8806  ;;  %v3661_v28 = vadd.f32 1.0, %v8805_v31  ;;  %v11203_v31 = vld [vmem:[#allocation7 + $0x1d8] sm:$0xff] }
 0x6d0   :  { %8810 = vrcp.f32 %v3660_v18  ;;  %v11201_v18 = vld [vmem:[#allocation7 + $0x1c8] sm:$0xff] }
 0x6d1   :  { %8812 = vrcp.f32 %v3661_v28  ;;  %v11219_v28 = vld [vmem:[#allocation7 + $0x1a0] sm:$0xff] }
 0x6db   :  { %v8809_v26 = vpop.eup %8808 }
 0x6dc   :  { %v3670_v22 = vmul.f32 %v8809_v26, %v8807_v5  ;;  %v11207_v5 = vld [vmem:[#allocation7 + $0x1c0] sm:$0xff]  ;;  %v11209_v26 = vld [vmem:[#allocation7 + $0x1d0] sm:$0xff] }
 0x6dd   :  { %v8811_v30 = vpop.eup %8810 }
 0x6de   :  { %v3669_v33 = vmul.f32 %v8811_v30, %v11032_v13  ;;  %v8813_v51 = vpop.eup %8812  ;;  %v11215_v30 = vld [vmem:[#allocation7 + $0x1b8] sm:$0xff] }
 0x6e0   :  { %v11110_v58 = vadd.f32 %v3670_v22, %v3669_v33  ;;  %v11213_v22 = vld [vmem:[#allocation7 + $0x1a8] sm:$0xff]  ;;  %v11221_v33 = vld [vmem:[#allocation7 + $0x1b0] sm:$0xff] }
 0x6e2   :  { %8814 = vtanh.f32 %v11110_v58 }
 0x6ef   :  { %v8815_v12 = vpop.eup %8814 }
 0x6f0   :  { %v11113_v2 = vmul.f32 %v8815_v12, %v8813_v51  ;;  %v11227_v51 = vld [vmem:[#allocation7 + $0x198] sm:$0xff]  ;;  %v11231_v12 = vld [vmem:[#allocation7 + $0x180] sm:$0xff] }
 0x6f2   :  { %14059 = vst [vmem:[#allocation32_spill] sm:$0xff] %v11113_v2  ;;  %3743 = vmatmul.mubr.f32.vlgmr.msra.gmra.mxu0 %v11113_v2  ;;  %3814 = vmatmul.mubr.f32.vlgmr.msra.gmra.mxu1 %v11113_v2  ;;  %v11375_v2 = vld [vmem:[#allocation7] sm:$0xff] }
 0x6f3   :  { %3853 = vmatpush1.msra.mxu0 %v10679_v60  ;;  %3924 = vmatpush1.msra.mxu1 %v10822_v32  ;;  %v14060_v60 = vld [vmem:[#allocation49_spill] sm:$0xff]  ;;  %v14079_v32 = vld [vmem:[#allocation70_spill] sm:$0xff] }
 0x6f4   :  { %3854 = vmatprep.subr.mxu0 %v10683_v1  ;;  %3925 = vmatprep.subr.mxu1 %v10826_v7  ;;  %v14061_v1 = vld [vmem:[#allocation21_spill] sm:$0xff] }
 0x6f5   :  { %3855 = vmatpush1.msra.mxu0 %v10687_v46  ;;  %3926 = vmatpush1.msra.mxu1 %v10830_v21  ;;  %v14062_v46 = vld [vmem:[#allocation27_spill] sm:$0xff] }
 0x6f6   :  { %3856 = vmatprep.subr.mxu0 %v10691_v34  ;;  %3927 = vmatprep.subr.mxu1 %v10834_v59  ;;  %v14063_v34 = vld [vmem:[#allocation44_spill] sm:$0xff] }
 0x6f7   :  { %3857 = vmatpush1.msra.mxu0 %v10695_v57  ;;  %3928 = vmatpush1.msra.mxu1 %v10838_v15  ;;  %v14064_v57 = vld [vmem:[#allocation50_spill] sm:$0xff]  ;;  %v14080_v15 = vld [vmem:[#allocation79_spill] sm:$0xff] }
 0x6f8   :  { %3858 = vmatprep.subr.mxu0 %v10699_v35  ;;  %3929 = vmatprep.subr.mxu1 %v10842_v17  ;;  %v14065_v35 = vld [vmem:[#allocation22_spill] sm:$0xff] }
 0x6f9   :  { %3859 = vmatpush1.msra.mxu0 %v10703_v36  ;;  %3930 = vmatpush1.msra.mxu1 %v10846_v0  ;;  %v14066_v36 = vld [vmem:[#allocation28_spill] sm:$0xff] }
 0x6fa   :  { %3860 = vmatprep.subr.mxu0 %v10707_v37  ;;  %3931 = vmatprep.subr.mxu1 %v10850_v3  ;;  %v14068_v37 = vld [vmem:[#allocation51_spill] sm:$0xff] }
 0x6fb   :  { %3861 = vmatpush1.msra.mxu0 %v10711_v38  ;;  %3932 = vmatpush1.msra.mxu1 %v10854_v19  ;;  %v14069_v38 = vld [vmem:[#allocation23_spill] sm:$0xff]  ;;  %v14081_v19 = vld [vmem:[#allocation80_spill] sm:$0xff] }
 0x6fc   :  { %3862 = vmatprep.subr.mxu0 %v10715_v39  ;;  %3933 = vmatprep.subr.mxu1 %v10858_v29  ;;  %v14070_v39 = vld [vmem:[#allocation29_spill] sm:$0xff] }
 0x6fd   :  { %3863 = vmatpush1.msra.mxu0 %v10719_v40  ;;  %3934 = vmatpush1.msra.mxu1 %v10862_v44  ;;  %v14071_v40 = vld [vmem:[#allocation46_spill] sm:$0xff] }
 0x6fe   :  { %3864 = vmatprep.subr.mxu0 %v10723_v41  ;;  %3935 = vmatprep.subr.mxu1 %v10866_v49  ;;  %v14072_v41 = vld [vmem:[#allocation52_spill] sm:$0xff] }
 0x6ff   :  { %3865 = vmatpush1.msra.mxu0 %v10727_v42  ;;  %3936 = vmatpush1.msra.mxu1 %v10870_v25  ;;  %v14073_v42 = vld [vmem:[#allocation24_spill] sm:$0xff] }
 0x700   :  { %3866 = vmatprep.subr.mxu0 %v10731_v43  ;;  %3937 = vmatprep.subr.mxu1 %v10874_v9  ;;  %v14074_v43 = vld [vmem:[#allocation30_spill] sm:$0xff] }
 0x701   :  { %3867 = vmatpush1.msra.mxu0 %v10735_v4  ;;  %3938 = vmatpush1.msra.mxu1 %v10878_v55  ;;  %v14075_v4 = vld [vmem:[#allocation47_spill] sm:$0xff] }
 0x702   :  { %3868 = vmatprep.subr.mxu0 %v10739_v6  ;;  %3939 = vmatprep.subr.mxu1 %v10882_v20  ;;  %v14076_v6 = vld [vmem:[#allocation53_spill] sm:$0xff] }
 0x703   :  { %3869 = vmatpush1.msra.mxu0 %v10743_v8  ;;  %3940 = vmatpush1.msra.mxu1 %v10886_v62  ;;  %v14077_v8 = vmov 0.0  }
 0x704   :  { %3870 = vmatprep.subr.mxu0 %v10747_v10  ;;  %3941 = vmatprep.subr.mxu1 %v10890_v48  ;;  %v11181_v10 = vld [vmem:[#allocation7 + $0x1e8] sm:$0xff] }
 0x705   :  { %3871 = vmatpush1.msra.mxu0 %v10751_v11  ;;  %3942 = vmatpush1.msra.mxu1 %v10894_v54  ;;  %v11183_v11 = vld [vmem:[#allocation7 + $0x1f8] sm:$0xff] }
 0x706   :  { %3872 = vmatprep.subr.mxu0 %v10755_v16  ;;  %3943 = vmatprep.subr.mxu1 %v10898_v27 }
 0x707   :  { %3873 = vmatpush1.msra.mxu0 %v10759_v23  ;;  %3944 = vmatpush1.msra.mxu1 %v10902_v52  ;;  %v14067_v52 = vld [vmem:[#allocation45_spill] sm:$0xff] }
 0x708   :  { %3874 = vmatprep.subr.mxu0 %v10763_v24  ;;  %3945 = vmatprep.subr.mxu1 %v14010_v50  ;;  %v14078_v23 = vld [vmem:[#allocation69_spill] sm:$0xff] }
 0x709   :  { %3875 = vmatpush1.msra.mxu0 %v10767_v45  ;;  %3946 = vmatpush1.msra.mxu1 %v14060_v60  ;;  %v11233_v60 = vld [vmem:[#allocation7 + $0x190] sm:$0xff] }
 0x70a   :  { %3876 = vmatprep.subr.mxu0 %v14061_v1  ;;  %3947 = vmatprep.subr.mxu1 %v14062_v46  ;;  %v11237_v1 = vld [vmem:[#allocation7 + $0x168] sm:$0xff]  ;;  %v11239_v46 = vld [vmem:[#allocation7 + $0x178] sm:$0xff] }
 0x70b   :  { %3877 = vmatpush1.msra.mxu0 %v14063_v34  ;;  %3948 = vmatpush1.msra.mxu1 %v14064_v57  ;;  %v11243_v34 = vld [vmem:[#allocation7 + $0x160] sm:$0xff]  ;;  %v11245_v57 = vld [vmem:[#allocation7 + $0x170] sm:$0xff] }
 0x70c   :  { %3878 = vmatprep.subr.mxu0 %v14065_v35  ;;  %3949 = vmatprep.subr.mxu1 %v14066_v36  ;;  %v11249_v35 = vld [vmem:[#allocation7 + $0x148] sm:$0xff]  ;;  %v11251_v36 = vld [vmem:[#allocation7 + $0x158] sm:$0xff] }
 0x70d   :  { %3879 = vmatpush1.msra.mxu0 %v14067_v52  ;;  %3950 = vmatpush1.msra.mxu1 %v14068_v37  ;;  %v11255_v52 = vld [vmem:[#allocation7 + $0x140] sm:$0xff]  ;;  %v11257_v37 = vld [vmem:[#allocation7 + $0x150] sm:$0xff] }
 0x70e   :  { %3880 = vmatprep.subr.mxu0 %v14069_v38  ;;  %3951 = vmatprep.subr.mxu1 %v14070_v39  ;;  %v11261_v38 = vld [vmem:[#allocation7 + $0x128] sm:$0xff]  ;;  %v11263_v39 = vld [vmem:[#allocation7 + $0x138] sm:$0xff] }
 0x70f   :  { %3881 = vmatpush1.msra.mxu0 %v14071_v40  ;;  %3952 = vmatpush1.msra.mxu1 %v14072_v41  ;;  %v11267_v40 = vld [vmem:[#allocation7 + $0x120] sm:$0xff]  ;;  %v11269_v41 = vld [vmem:[#allocation7 + $0x130] sm:$0xff] }
 0x710   :  { %3882 = vmatprep.subr.mxu0 %v14073_v42  ;;  %3953 = vmatprep.subr.mxu1 %v14074_v43  ;;  %v11273_v42 = vld [vmem:[#allocation7 + $0x108] sm:$0xff]  ;;  %v11275_v43 = vld [vmem:[#allocation7 + $0x118] sm:$0xff] }
 0x711   :  { %3883 = vmatpush1.msra.mxu0 %v14075_v4  ;;  %3954 = vmatpush1.msra.mxu1 %v14076_v6  ;;  %v11279_v4 = vld [vmem:[#allocation7 + $0x100] sm:$0xff]  ;;  %v11281_v6 = vld [vmem:[#allocation7 + $0x110] sm:$0xff] }
 0x712   :  { %3916 = vmatprep.mubr.f32.mxu0 %v14077_v8  ;;  %3987 = vmatprep.mubr.f32.mxu1 %v14077_v8 }
 0x713   :  { %4108 = vmatprep.subr.mxu0 %v11181_v10  ;;  %4179 = vmatprep.subr.mxu1 %v11183_v11 }
 0x7b2   :  { %v3744_v16 = vpop.f32.mrf.mxu0  ;;  %v3815_v59 = vpop.f32.mrf.mxu1 }
 0x7b3   :  { %v3820_v24 = vadd.f32 %v3744_v16, %v14078_v23  ;;  %v3822_v17 = vadd.f32 %v3815_v59, %v14080_v15  ;;  %v11285_v16 = vld [vmem:[#allocation7 + $0xe8] sm:$0xff]  ;;  %v11287_v23 = vld [vmem:[#allocation7 + $0xf8] sm:$0xff] }
 0x7b4   :  { %v3746_v45 = vpop.f32.mrf.mxu0  ;;  %v3817_v0 = vpop.f32.mrf.mxu1  ;;  %v11309_v59 = vld [vmem:[#allocation7 + $0xa8] sm:$0xff]  ;;  %v11311_v15 = vld [vmem:[#allocation7 + $0xb8] sm:$0xff] }
 0x7b5   :  { %v8610_v27 = vmul.f32 -1.442695, %v3820_v24  ;;  %v3821_v7 = vadd.f32 %v3746_v45, %v14079_v32  ;;  %v8612_v3 = vmul.f32 -1.442695, %v3822_v17  ;;  %v3823_v29 = vadd.f32 %v3817_v0, %v14081_v19  ;;  %v11291_v24 = vld [vmem:[#allocation7 + $0xe0] sm:$0xff]  ;;  %v11293_v45 = vld [vmem:[#allocation7 + $0xf0] sm:$0xff] }
 0x7b6   :  { %v11299_v32 = vld [vmem:[#allocation7 + $0xd8] sm:$0xff]  ;;  %14085 = vst [vmem:[#allocation34_spill] sm:$0xff] %v11311_v15  ;;  %v11315_v17 = vld [vmem:[#allocation7 + $0xa0] sm:$0xff]  ;;  %v11317_v0 = vld [vmem:[#allocation7 + $0xb0] sm:$0xff] }
 0x7b7   :  { %8816 = vpow2.f32 %v8610_v27  ;;  %v8611_v21 = vmul.f32 -1.442695, %v3821_v7  ;;  %v11297_v27 = vld [vmem:[#allocation7 + $0xc8] sm:$0xff]  ;;  %v11303_v7 = vld [vmem:[#allocation7 + $0xc0] sm:$0xff]  ;;  %14086 = vst [vmem:[#allocation57_spill] sm:$0xff] %v11315_v17  ;;  %14087 = vst [vmem:[#allocation35_spill] sm:$0xff] %v11317_v0 }
 0x7b8   :  { %14084 = vst [vmem:[#allocation56_spill] sm:$0xff] %v11303_v7  ;;  %v11323_v19 = vld [vmem:[#allocation7 + $0x98] sm:$0xff] }
 0x7b9   :  { %8818 = vpow2.f32 %v8611_v21  ;;  %v11305_v21 = vld [vmem:[#allocation7 + $0xd0] sm:$0xff] }
 0x7ba   :  { %8820 = vpow2.f32 %v8612_v3  ;;  %v11321_v3 = vld [vmem:[#allocation7 + $0x88] sm:$0xff] }
 0x7bb   :  { %8822 = vtanh.f32 %v3823_v29  ;;  %14088 = vst [vmem:[#allocation59_spill] sm:$0xff] %v11321_v3  ;;  %v11327_v29 = vld [vmem:[#allocation7 + $0x80] sm:$0xff] }
 0x7bc   :  { %14089 = vst [vmem:[#allocation36_spill] sm:$0xff] %v11327_v29 }
 0x7c4   :  { %v8817_v44 = vpop.eup %8816 }
 0x7c5   :  { %v3833_v49 = vadd.f32 1.0, %v8817_v44  ;;  %v11329_v44 = vld [vmem:[#allocation7 + $0x90] sm:$0xff] }
 0x7c6   :  { %v8819_v25 = vpop.eup %8818  ;;  %14090 = vst [vmem:[#allocation60_spill] sm:$0xff] %v11329_v44 }
 0x7c7   :  { %8824 = vrcp.f32 %v3833_v49  ;;  %v3834_v9 = vadd.f32 1.0, %v8819_v25  ;;  %v8821_v55 = vpop.eup %8820  ;;  %v11333_v49 = vld [vmem:[#allocation7 + $0x68] sm:$0xff]  ;;  %v11335_v25 = vld [vmem:[#allocation7 + $0x78] sm:$0xff] }
 0x7c8   :  { %v8823_v20 = vpop.eup %8822  ;;  %v3835_v50 = vadd.f32 1.0, %v8821_v55  ;;  %v11341_v55 = vld [vmem:[#allocation7 + $0x70] sm:$0xff] }
 0x7c9   :  { %8826 = vrcp.f32 %v3834_v9  ;;  %v11339_v9 = vld [vmem:[#allocation7 + $0x60] sm:$0xff] }
 0x7ca   :  { %8828 = vrcp.f32 %v3835_v50  ;;  %v11357_v50 = vld [vmem:[#allocation7 + $0x28] sm:$0xff] }
 0x7d4   :  { %v8825_v62 = vpop.eup %8824 }
 0x7d5   :  { %v3844_v48 = vmul.f32 %v8825_v62, %v8823_v20  ;;  %v11345_v20 = vld [vmem:[#allocation7 + $0x48] sm:$0xff]  ;;  %v11347_v62 = vld [vmem:[#allocation7 + $0x58] sm:$0xff] }
 0x7d6   :  { %v8827_v54 = vpop.eup %8826  ;;  %14091 = vst [vmem:[#allocation37_spill] sm:$0xff] %v11347_v62 }
 0x7d7   :  { %v3843_v13 = vmul.f32 %v8827_v54, %v11110_v58  ;;  %v8829_v56 = vpop.eup %8828  ;;  %v11225_v58 = vld [vmem:[#allocation7 + $0x188] sm:$0xff]  ;;  %v11353_v54 = vld [vmem:[#allocation7 + $0x50] sm:$0xff] }
 0x7d8   :  { %14092 = vst [vmem:[#allocation62_spill] sm:$0xff] %v11353_v54 }
 0x7d9   :  { %v11192_v61 = vadd.f32 %v3844_v48, %v3843_v13  ;;  %v11351_v48 = vld [vmem:[#allocation7 + $0x40] sm:$0xff]  ;;  %v11359_v13 = vld [vmem:[#allocation7 + $0x38] sm:$0xff] }
 0x7da   :  { %14093 = vst [vmem:[#allocation38_spill] sm:$0xff] %v11359_v13 }
 0x7db   :  { %14082 = vst [vmem:[#allocation55_spill] sm:$0xff] %v11192_v61  ;;  %8830 = vtanh.f32 %v11192_v61  ;;  %v11371_v61 = vld [vmem:[#allocation7 + $0x18] sm:$0xff] }
 0x7e8   :  { %v8831_v47 = vpop.eup %8830 }
 0x7e9   :  { %v11195_v14 = vmul.f32 %v8831_v47, %v8829_v56  ;;  %v11363_v56 = vld [vmem:[#allocation7 + $0x20] sm:$0xff]  ;;  %v11365_v47 = vld [vmem:[#allocation7 + $0x30] sm:$0xff] }
 0x7eb   :  { %14083 = vst [vmem:[#allocation33_spill] sm:$0xff] %v11195_v14  ;;  %3917 = vmatmul.mubr.f32.vlgmr.msra.gmra.mxu0 %v11195_v14  ;;  %3988 = vmatmul.mubr.f32.vlgmr.msra.gmra.mxu1 %v11195_v14  ;;  %v11369_v14 = vld [vmem:[#allocation7 + $0x8] sm:$0xff] }
 0x7ec   :  { %4109 = vmatpush1.msra.mxu0 %v11197_v63  ;;  %4180 = vmatpush1.msra.mxu1 %v11199_v53 }
 0x7ed   :  { %4110 = vmatprep.subr.mxu0 %v11201_v18  ;;  %4181 = vmatprep.subr.mxu1 %v11203_v31 }
 0x7ee   :  { %4111 = vmatpush1.msra.mxu0 %v11207_v5  ;;  %4182 = vmatpush1.msra.mxu1 %v11209_v26 }
 0x7ef   :  { %4112 = vmatprep.subr.mxu0 %v11213_v22  ;;  %4183 = vmatprep.subr.mxu1 %v11215_v30 }
 0x7f0   :  { %4113 = vmatpush1.msra.mxu0 %v11219_v28  ;;  %4184 = vmatpush1.msra.mxu1 %v11221_v33 }
 0x7f1   :  { %4114 = vmatprep.subr.mxu0 %v11225_v58  ;;  %4185 = vmatprep.subr.mxu1 %v11227_v51 }
 0x7f2   :  { %4115 = vmatpush1.msra.mxu0 %v11231_v12  ;;  %4186 = vmatpush1.msra.mxu1 %v11233_v60 }
 0x7f3   :  { %4116 = vmatprep.subr.mxu0 %v11237_v1  ;;  %4187 = vmatprep.subr.mxu1 %v11239_v46 }
 0x7f4   :  { %4117 = vmatpush1.msra.mxu0 %v11243_v34  ;;  %4188 = vmatpush1.msra.mxu1 %v11245_v57 }
 0x7f5   :  { %4118 = vmatprep.subr.mxu0 %v11249_v35  ;;  %4189 = vmatprep.subr.mxu1 %v11251_v36 }
 0x7f6   :  { %4119 = vmatpush1.msra.mxu0 %v11255_v52  ;;  %4190 = vmatpush1.msra.mxu1 %v11257_v37 }
 0x7f7   :  { %4120 = vmatprep.subr.mxu0 %v11261_v38  ;;  %4191 = vmatprep.subr.mxu1 %v11263_v39 }
 0x7f8   :  { %4121 = vmatpush1.msra.mxu0 %v11267_v40  ;;  %4192 = vmatpush1.msra.mxu1 %v11269_v41 }
 0x7f9   :  { %4122 = vmatprep.subr.mxu0 %v11273_v42  ;;  %4193 = vmatprep.subr.mxu1 %v11275_v43 }
 0x7fa   :  { %4123 = vmatpush1.msra.mxu0 %v11279_v4  ;;  %4194 = vmatpush1.msra.mxu1 %v11281_v6 }
 0x7fb   :  { %4124 = vmatprep.subr.mxu0 %v11285_v16  ;;  %4195 = vmatprep.subr.mxu1 %v11287_v23 }
 0x7fc   :  { %4125 = vmatpush1.msra.mxu0 %v11291_v24  ;;  %4196 = vmatpush1.msra.mxu1 %v11293_v45 }
 0x7fd   :  { %4126 = vmatprep.subr.mxu0 %v11297_v27  ;;  %4197 = vmatprep.subr.mxu1 %v11299_v32 }
 0x7fe   :  { %4127 = vmatpush1.msra.mxu0 %v11303_v7  ;;  %4198 = vmatpush1.msra.mxu1 %v11305_v21 }
 0x7ff   :  { %4128 = vmatprep.subr.mxu0 %v11309_v59  ;;  %4199 = vmatprep.subr.mxu1 %v11311_v15 }
 0x800   :  { %4129 = vmatpush1.msra.mxu0 %v11315_v17  ;;  %4200 = vmatpush1.msra.mxu1 %v11317_v0 }
 0x801   :  { %4130 = vmatprep.subr.mxu0 %v11321_v3  ;;  %4201 = vmatprep.subr.mxu1 %v11323_v19 }
 0x802   :  { %4131 = vmatpush1.msra.mxu0 %v11327_v29  ;;  %4202 = vmatpush1.msra.mxu1 %v11329_v44 }
 0x803   :  { %4132 = vmatprep.subr.mxu0 %v11333_v49  ;;  %4203 = vmatprep.subr.mxu1 %v11335_v25 }
 0x804   :  { %4133 = vmatpush1.msra.mxu0 %v11339_v9  ;;  %4204 = vmatpush1.msra.mxu1 %v11341_v55 }
 0x805   :  { %4134 = vmatprep.subr.mxu0 %v11345_v20  ;;  %4205 = vmatprep.subr.mxu1 %v11347_v62  ;;  %v11379_v62 = vld [vmem:[#allocation7 + $0x10] sm:$0xff] }
 0x806   :  { %4135 = vmatpush1.msra.mxu0 %v11351_v48  ;;  %4206 = vmatpush1.msra.mxu1 %v11353_v54 }
 0x807   :  { %4136 = vmatprep.subr.mxu0 %v11357_v50  ;;  %4207 = vmatprep.subr.mxu1 %v11359_v13  ;;  %v14094_v13 = vld [vmem:[#allocation85_spill] sm:$0xff] }
 0x808   :  { %4137 = vmatpush1.msra.mxu0 %v11363_v56  ;;  %4208 = vmatpush1.msra.mxu1 %v11365_v47 }
 0x809   :  { %4138 = vmatprep.subr.mxu0 %v11369_v14  ;;  %4209 = vmatprep.subr.mxu1 %v11371_v61 }
 0x80a   :  { %4139 = vmatpush1.msra.mxu0 %v11375_v2  ;;  %4172 = vmatprep.mubr.f32.mxu0 %v14077_v8 }
 0x80b   :  { %4210 = vmatpush1.msra.mxu1 %v11379_v62  ;;  %4243 = vmatprep.mubr.f32.mxu1 %v14077_v8 }
 0x80c   :  { %4173 = vmatmul.mubr.f32.vlgmr.msra.gmra.mxu0 %v14094_v13  ;;  %4244 = vmatmul.mubr.f32.vlgmr.msra.gmra.mxu1 %v14094_v13  ;;  %v14095_v13 = vld [vmem:[#allocation37_spill] sm:$0xff] }
 0x80d   :  { %4250 = vmatprep.subr.mxu0 %v11181_v10  ;;  %4321 = vmatprep.subr.mxu1 %v11183_v11 }
 0x80e   :  { %4251 = vmatpush1.msra.mxu0 %v11197_v63  ;;  %4322 = vmatpush1.msra.mxu1 %v11199_v53 }
 0x80f   :  { %4252 = vmatprep.subr.mxu0 %v11201_v18  ;;  %4323 = vmatprep.subr.mxu1 %v11203_v31 }
 0x810   :  { %4253 = vmatpush1.msra.mxu0 %v11207_v5  ;;  %4324 = vmatpush1.msra.mxu1 %v11209_v26 }
 0x811   :  { %4254 = vmatprep.subr.mxu0 %v11213_v22  ;;  %4325 = vmatprep.subr.mxu1 %v11215_v30 }
 0x812   :  { %4255 = vmatpush1.msra.mxu0 %v11219_v28  ;;  %4326 = vmatpush1.msra.mxu1 %v11221_v33 }
 0x813   :  { %4256 = vmatprep.subr.mxu0 %v11225_v58  ;;  %4327 = vmatprep.subr.mxu1 %v11227_v51 }
 0x814   :  { %4257 = vmatpush1.msra.mxu0 %v11231_v12  ;;  %4328 = vmatpush1.msra.mxu1 %v11233_v60 }
 0x815   :  { %4258 = vmatprep.subr.mxu0 %v11237_v1  ;;  %4329 = vmatprep.subr.mxu1 %v11239_v46 }
 0x816   :  { %4259 = vmatpush1.msra.mxu0 %v11243_v34  ;;  %4330 = vmatpush1.msra.mxu1 %v11245_v57 }
 0x817   :  { %4260 = vmatprep.subr.mxu0 %v11249_v35  ;;  %4331 = vmatprep.subr.mxu1 %v11251_v36 }
 0x818   :  { %4261 = vmatpush1.msra.mxu0 %v11255_v52  ;;  %4332 = vmatpush1.msra.mxu1 %v11257_v37 }
 0x819   :  { %4262 = vmatprep.subr.mxu0 %v11261_v38  ;;  %4333 = vmatprep.subr.mxu1 %v11263_v39 }
 0x81a   :  { %4263 = vmatpush1.msra.mxu0 %v11267_v40  ;;  %4334 = vmatpush1.msra.mxu1 %v11269_v41 }
 0x81b   :  { %4264 = vmatprep.subr.mxu0 %v11273_v42  ;;  %4335 = vmatprep.subr.mxu1 %v11275_v43 }
 0x81c   :  { %4265 = vmatpush1.msra.mxu0 %v11279_v4  ;;  %4336 = vmatpush1.msra.mxu1 %v11281_v6 }
 0x81d   :  { %4266 = vmatprep.subr.mxu0 %v11285_v16  ;;  %4337 = vmatprep.subr.mxu1 %v11287_v23 }
 0x81e   :  { %4267 = vmatpush1.msra.mxu0 %v11291_v24  ;;  %4338 = vmatpush1.msra.mxu1 %v11293_v45 }
 0x81f   :  { %4268 = vmatprep.subr.mxu0 %v11297_v27  ;;  %4339 = vmatprep.subr.mxu1 %v11299_v32 }
 0x820   :  { %4269 = vmatpush1.msra.mxu0 %v11303_v7  ;;  %4340 = vmatpush1.msra.mxu1 %v11305_v21 }
 0x821   :  { %4270 = vmatprep.subr.mxu0 %v11309_v59  ;;  %4341 = vmatprep.subr.mxu1 %v11311_v15 }
 0x822   :  { %4271 = vmatpush1.msra.mxu0 %v11315_v17  ;;  %4342 = vmatpush1.msra.mxu1 %v11317_v0 }
 0x823   :  { %4272 = vmatprep.subr.mxu0 %v11321_v3  ;;  %4343 = vmatprep.subr.mxu1 %v11323_v19 }
 0x824   :  { %4273 = vmatpush1.msra.mxu0 %v11327_v29  ;;  %4344 = vmatpush1.msra.mxu1 %v11329_v44  ;;  %v14096_v29 = vld [vmem:[#allocation38_spill] sm:$0xff] }
 0x825   :  { %4274 = vmatprep.subr.mxu0 %v11333_v49  ;;  %4345 = vmatprep.subr.mxu1 %v11335_v25 }
 0x826   :  { %4275 = vmatpush1.msra.mxu0 %v11339_v9  ;;  %4346 = vmatpush1.msra.mxu1 %v11341_v55 }
 0x827   :  { %4276 = vmatprep.subr.mxu0 %v11345_v20  ;;  %4347 = vmatprep.subr.mxu1 %v14095_v13 }
 0x828   :  { %4277 = vmatpush1.msra.mxu0 %v11351_v48  ;;  %4348 = vmatpush1.msra.mxu1 %v11353_v54  ;;  %v14097_v54 = vld [vmem:[#allocation43_spill] sm:$0xff] }
 0x829   :  { %4278 = vmatprep.subr.mxu0 %v11357_v50  ;;  %4349 = vmatprep.subr.mxu1 %v14096_v29 }
 0x82a   :  { %4279 = vmatpush1.msra.mxu0 %v11363_v56  ;;  %4350 = vmatpush1.msra.mxu1 %v11365_v47 }
 0x82b   :  { %4280 = vmatprep.subr.mxu0 %v11369_v14  ;;  %4351 = vmatprep.subr.mxu1 %v11371_v61 }
 0x82c   :  { %4281 = vmatpush1.msra.mxu0 %v11375_v2  ;;  %4314 = vmatprep.mubr.f32.mxu0 %v14077_v8 }
 0x82d   :  { %4352 = vmatpush1.msra.mxu1 %v11379_v62  ;;  %4385 = vmatprep.mubr.f32.mxu1 %v14077_v8 }
 0x82e   :  { %4315 = vmatmul.mubr.f32.vlgmr.msra.gmra.mxu0 %v14097_v54  ;;  %4386 = vmatmul.mubr.f32.vlgmr.msra.gmra.mxu1 %v14097_v54  ;;  %v14098_v54 = vld [vmem:[#allocation36_spill] sm:$0xff] }
 0x82f   :  { %4392 = vmatprep.subr.mxu0 %v11181_v10  ;;  %4463 = vmatprep.subr.mxu1 %v11183_v11 }
 0x830   :  { %4393 = vmatpush1.msra.mxu0 %v11197_v63  ;;  %4464 = vmatpush1.msra.mxu1 %v11199_v53 }
 0x831   :  { %4394 = vmatprep.subr.mxu0 %v11201_v18  ;;  %4465 = vmatprep.subr.mxu1 %v11203_v31 }
 0x832   :  { %4395 = vmatpush1.msra.mxu0 %v11207_v5  ;;  %4466 = vmatpush1.msra.mxu1 %v11209_v26 }
 0x833   :  { %4396 = vmatprep.subr.mxu0 %v11213_v22  ;;  %4467 = vmatprep.subr.mxu1 %v11215_v30 }
 0x834   :  { %4397 = vmatpush1.msra.mxu0 %v11219_v28  ;;  %4468 = vmatpush1.msra.mxu1 %v11221_v33 }
 0x835   :  { %4398 = vmatprep.subr.mxu0 %v11225_v58  ;;  %4469 = vmatprep.subr.mxu1 %v11227_v51 }
 0x836   :  { %4399 = vmatpush1.msra.mxu0 %v11231_v12  ;;  %4470 = vmatpush1.msra.mxu1 %v11233_v60 }
 0x837   :  { %4400 = vmatprep.subr.mxu0 %v11237_v1  ;;  %4471 = vmatprep.subr.mxu1 %v11239_v46 }
 0x838   :  { %4401 = vmatpush1.msra.mxu0 %v11243_v34  ;;  %4472 = vmatpush1.msra.mxu1 %v11245_v57 }
 0x839   :  { %4402 = vmatprep.subr.mxu0 %v11249_v35  ;;  %4473 = vmatprep.subr.mxu1 %v11251_v36 }
 0x83a   :  { %4403 = vmatpush1.msra.mxu0 %v11255_v52  ;;  %4474 = vmatpush1.msra.mxu1 %v11257_v37 }
 0x83b   :  { %4404 = vmatprep.subr.mxu0 %v11261_v38  ;;  %4475 = vmatprep.subr.mxu1 %v11263_v39 }
 0x83c   :  { %4405 = vmatpush1.msra.mxu0 %v11267_v40  ;;  %4476 = vmatpush1.msra.mxu1 %v11269_v41 }
 0x83d   :  { %4406 = vmatprep.subr.mxu0 %v11273_v42  ;;  %4477 = vmatprep.subr.mxu1 %v11275_v43 }
 0x83e   :  { %4407 = vmatpush1.msra.mxu0 %v11279_v4  ;;  %4478 = vmatpush1.msra.mxu1 %v11281_v6 }
 0x83f   :  { %4408 = vmatprep.subr.mxu0 %v11285_v16  ;;  %4479 = vmatprep.subr.mxu1 %v11287_v23 }
 0x840   :  { %4409 = vmatpush1.msra.mxu0 %v11291_v24  ;;  %4480 = vmatpush1.msra.mxu1 %v11293_v45 }
 0x841   :  { %4410 = vmatprep.subr.mxu0 %v11297_v27  ;;  %4481 = vmatprep.subr.mxu1 %v11299_v32 }
 0x842   :  { %4411 = vmatpush1.msra.mxu0 %v11303_v7  ;;  %4482 = vmatpush1.msra.mxu1 %v11305_v21 }
 0x843   :  { %4412 = vmatprep.subr.mxu0 %v11309_v59  ;;  %4483 = vmatprep.subr.mxu1 %v11311_v15 }
 0x844   :  { %4413 = vmatpush1.msra.mxu0 %v11315_v17  ;;  %4484 = vmatpush1.msra.mxu1 %v11317_v0 }
 0x845   :  { %4414 = vmatprep.subr.mxu0 %v11321_v3  ;;  %4485 = vmatprep.subr.mxu1 %v11323_v19  ;;  %v14099_v3 = vld [vmem:[#allocation62_spill] sm:$0xff] }
 0x846   :  { %4415 = vmatpush1.msra.mxu0 %v14098_v54  ;;  %4486 = vmatpush1.msra.mxu1 %v11329_v44 }
 0x847   :  { %4416 = vmatprep.subr.mxu0 %v11333_v49  ;;  %4487 = vmatprep.subr.mxu1 %v11335_v25 }
 0x848   :  { %4417 = vmatpush1.msra.mxu0 %v11339_v9  ;;  %4488 = vmatpush1.msra.mxu1 %v11341_v55 }
 0x849   :  { %4418 = vmatprep.subr.mxu0 %v11345_v20  ;;  %4489 = vmatprep.subr.mxu1 %v14095_v13 }
 0x84a   :  { %4419 = vmatpush1.msra.mxu0 %v11351_v48  ;;  %4490 = vmatpush1.msra.mxu1 %v14099_v3  ;;  %v14100_v3 = vld [vmem:[#allocation48_spill] sm:$0xff] }
 0x84b   :  { %4420 = vmatprep.subr.mxu0 %v11357_v50  ;;  %4491 = vmatprep.subr.mxu1 %v14096_v29 }
 0x84c   :  { %4421 = vmatpush1.msra.mxu0 %v11363_v56  ;;  %4492 = vmatpush1.msra.mxu1 %v11365_v47 }
 0x84d   :  { %4422 = vmatprep.subr.mxu0 %v11369_v14  ;;  %4493 = vmatprep.subr.mxu1 %v11371_v61 }
 0x84e   :  { %4423 = vmatpush1.msra.mxu0 %v11375_v2  ;;  %4456 = vmatprep.mubr.f32.mxu0 %v14077_v8 }
 0x84f   :  { %4494 = vmatpush1.msra.mxu1 %v11379_v62  ;;  %4527 = vmatprep.mubr.f32.mxu1 %v14077_v8 }
 0x850   :  { %4457 = vmatmul.mubr.f32.vlgmr.msra.gmra.mxu0 %v14100_v3  ;;  %4528 = vmatmul.mubr.f32.vlgmr.msra.gmra.mxu1 %v14100_v3  ;;  %v14101_v3 = vld [vmem:[#allocation59_spill] sm:$0xff] }
 0x851   :  { %4534 = vmatprep.subr.mxu0 %v11181_v10  ;;  %4605 = vmatprep.subr.mxu1 %v11183_v11 }
 0x852   :  { %4535 = vmatpush1.msra.mxu0 %v11197_v63  ;;  %4606 = vmatpush1.msra.mxu1 %v11199_v53 }
 0x853   :  { %4536 = vmatprep.subr.mxu0 %v11201_v18  ;;  %4607 = vmatprep.subr.mxu1 %v11203_v31 }
 0x854   :  { %4537 = vmatpush1.msra.mxu0 %v11207_v5  ;;  %4608 = vmatpush1.msra.mxu1 %v11209_v26 }
 0x855   :  { %4538 = vmatprep.subr.mxu0 %v11213_v22  ;;  %4609 = vmatprep.subr.mxu1 %v11215_v30 }
 0x856   :  { %4539 = vmatpush1.msra.mxu0 %v11219_v28  ;;  %4610 = vmatpush1.msra.mxu1 %v11221_v33 }
 0x857   :  { %4540 = vmatprep.subr.mxu0 %v11225_v58  ;;  %4611 = vmatprep.subr.mxu1 %v11227_v51 }
 0x858   :  { %4541 = vmatpush1.msra.mxu0 %v11231_v12  ;;  %4612 = vmatpush1.msra.mxu1 %v11233_v60 }
 0x859   :  { %4542 = vmatprep.subr.mxu0 %v11237_v1  ;;  %4613 = vmatprep.subr.mxu1 %v11239_v46 }
 0x85a   :  { %4543 = vmatpush1.msra.mxu0 %v11243_v34  ;;  %4614 = vmatpush1.msra.mxu1 %v11245_v57 }
 0x85b   :  { %4544 = vmatprep.subr.mxu0 %v11249_v35  ;;  %4615 = vmatprep.subr.mxu1 %v11251_v36 }
 0x85c   :  { %4545 = vmatpush1.msra.mxu0 %v11255_v52  ;;  %4616 = vmatpush1.msra.mxu1 %v11257_v37 }
 0x85d   :  { %4546 = vmatprep.subr.mxu0 %v11261_v38  ;;  %4617 = vmatprep.subr.mxu1 %v11263_v39 }
 0x85e   :  { %4547 = vmatpush1.msra.mxu0 %v11267_v40  ;;  %4618 = vmatpush1.msra.mxu1 %v11269_v41 }
 0x85f   :  { %4548 = vmatprep.subr.mxu0 %v11273_v42  ;;  %4619 = vmatprep.subr.mxu1 %v11275_v43 }
 0x860   :  { %4549 = vmatpush1.msra.mxu0 %v11279_v4  ;;  %4620 = vmatpush1.msra.mxu1 %v11281_v6 }
 0x861   :  { %4550 = vmatprep.subr.mxu0 %v11285_v16  ;;  %4621 = vmatprep.subr.mxu1 %v11287_v23 }
 0x862   :  { %4551 = vmatpush1.msra.mxu0 %v11291_v24  ;;  %4622 = vmatpush1.msra.mxu1 %v11293_v45 }
 0x863   :  { %4552 = vmatprep.subr.mxu0 %v11297_v27  ;;  %4623 = vmatprep.subr.mxu1 %v11299_v32 }
 0x864   :  { %4553 = vmatpush1.msra.mxu0 %v11303_v7  ;;  %4624 = vmatpush1.msra.mxu1 %v11305_v21 }
 0x865   :  { %4554 = vmatprep.subr.mxu0 %v11309_v59  ;;  %4625 = vmatprep.subr.mxu1 %v11311_v15 }
 0x866   :  { %4555 = vmatpush1.msra.mxu0 %v11315_v17  ;;  %4626 = vmatpush1.msra.mxu1 %v11317_v0 }
 0x867   :  { %4556 = vmatprep.subr.mxu0 %v14101_v3  ;;  %4627 = vmatprep.subr.mxu1 %v11323_v19  ;;  %v14102_v3 = vld [vmem:[#allocation62_spill] sm:$0xff] }
 0x868   :  { %4557 = vmatpush1.msra.mxu0 %v14098_v54  ;;  %4628 = vmatpush1.msra.mxu1 %v11329_v44 }
 0x869   :  { %4558 = vmatprep.subr.mxu0 %v11333_v49  ;;  %4629 = vmatprep.subr.mxu1 %v11335_v25 }
 0x86a   :  { %4559 = vmatpush1.msra.mxu0 %v11339_v9  ;;  %4630 = vmatpush1.msra.mxu1 %v11341_v55 }
 0x86b   :  { %4560 = vmatprep.subr.mxu0 %v11345_v20  ;;  %4631 = vmatprep.subr.mxu1 %v14095_v13 }
 0x86c   :  { %4561 = vmatpush1.msra.mxu0 %v11351_v48  ;;  %4632 = vmatpush1.msra.mxu1 %v14102_v3  ;;  %v14103_v3 = vld [vmem:[#allocation31_spill] sm:$0xff] }
 0x86d   :  { %4562 = vmatprep.subr.mxu0 %v11357_v50  ;;  %4633 = vmatprep.subr.mxu1 %v14096_v29 }
 0x86e   :  { %4563 = vmatpush1.msra.mxu0 %v11363_v56  ;;  %4634 = vmatpush1.msra.mxu1 %v11365_v47 }
 0x86f   :  { %4564 = vmatprep.subr.mxu0 %v11369_v14  ;;  %4635 = vmatprep.subr.mxu1 %v11371_v61 }
 0x870   :  { %4565 = vmatpush1.msra.mxu0 %v11375_v2  ;;  %4598 = vmatprep.mubr.f32.mxu0 %v14077_v8 }
 0x871   :  { %4636 = vmatpush1.msra.mxu1 %v11379_v62  ;;  %4669 = vmatprep.mubr.f32.mxu1 %v14077_v8 }
 0x872   :  { %4599 = vmatmul.mubr.f32.vlgmr.msra.gmra.mxu0 %v14103_v3  ;;  %4670 = vmatmul.mubr.f32.vlgmr.msra.gmra.mxu1 %v14103_v3  ;;  %v14104_v3 = vld [vmem:[#allocation59_spill] sm:$0xff] }
 0x873   :  { %4676 = vmatprep.subr.mxu0 %v11181_v10  ;;  %4747 = vmatprep.subr.mxu1 %v11183_v11 }
 0x874   :  { %4677 = vmatpush1.msra.mxu0 %v11197_v63  ;;  %4748 = vmatpush1.msra.mxu1 %v11199_v53 }
 0x875   :  { %4678 = vmatprep.subr.mxu0 %v11201_v18  ;;  %4749 = vmatprep.subr.mxu1 %v11203_v31 }
 0x876   :  { %4679 = vmatpush1.msra.mxu0 %v11207_v5  ;;  %4750 = vmatpush1.msra.mxu1 %v11209_v26 }
 0x877   :  { %4680 = vmatprep.subr.mxu0 %v11213_v22  ;;  %4751 = vmatprep.subr.mxu1 %v11215_v30 }
 0x878   :  { %4681 = vmatpush1.msra.mxu0 %v11219_v28  ;;  %4752 = vmatpush1.msra.mxu1 %v11221_v33 }
 0x879   :  { %4682 = vmatprep.subr.mxu0 %v11225_v58  ;;  %4753 = vmatprep.subr.mxu1 %v11227_v51 }
 0x87a   :  { %4683 = vmatpush1.msra.mxu0 %v11231_v12  ;;  %4754 = vmatpush1.msra.mxu1 %v11233_v60 }
 0x87b   :  { %4684 = vmatprep.subr.mxu0 %v11237_v1  ;;  %4755 = vmatprep.subr.mxu1 %v11239_v46 }
 0x87c   :  { %4685 = vmatpush1.msra.mxu0 %v11243_v34  ;;  %4756 = vmatpush1.msra.mxu1 %v11245_v57 }
 0x87d   :  { %4686 = vmatprep.subr.mxu0 %v11249_v35  ;;  %4757 = vmatprep.subr.mxu1 %v11251_v36 }
 0x87e   :  { %4687 = vmatpush1.msra.mxu0 %v11255_v52  ;;  %4758 = vmatpush1.msra.mxu1 %v11257_v37 }
 0x87f   :  { %4688 = vmatprep.subr.mxu0 %v11261_v38  ;;  %4759 = vmatprep.subr.mxu1 %v11263_v39 }
 0x880   :  { %4689 = vmatpush1.msra.mxu0 %v11267_v40  ;;  %4760 = vmatpush1.msra.mxu1 %v11269_v41 }
 0x881   :  { %4690 = vmatprep.subr.mxu0 %v11273_v42  ;;  %4761 = vmatprep.subr.mxu1 %v11275_v43 }
 0x882   :  { %4691 = vmatpush1.msra.mxu0 %v11279_v4  ;;  %4762 = vmatpush1.msra.mxu1 %v11281_v6 }
 0x883   :  { %4692 = vmatprep.subr.mxu0 %v11285_v16  ;;  %4763 = vmatprep.subr.mxu1 %v11287_v23 }
 0x884   :  { %4693 = vmatpush1.msra.mxu0 %v11291_v24  ;;  %4764 = vmatpush1.msra.mxu1 %v11293_v45 }
 0x885   :  { %4694 = vmatprep.subr.mxu0 %v11297_v27  ;;  %4765 = vmatprep.subr.mxu1 %v11299_v32 }
 0x886   :  { %4695 = vmatpush1.msra.mxu0 %v11303_v7  ;;  %4766 = vmatpush1.msra.mxu1 %v11305_v21 }
 0x887   :  { %4696 = vmatprep.subr.mxu0 %v11309_v59  ;;  %4767 = vmatprep.subr.mxu1 %v11311_v15 }
 0x888   :  { %4697 = vmatpush1.msra.mxu0 %v11315_v17  ;;  %4768 = vmatpush1.msra.mxu1 %v11317_v0 }
 0x889   :  { %4698 = vmatprep.subr.mxu0 %v14104_v3  ;;  %4769 = vmatprep.subr.mxu1 %v11323_v19  ;;  %v14105_v3 = vld [vmem:[#allocation62_spill] sm:$0xff] }
 0x88a   :  { %4699 = vmatpush1.msra.mxu0 %v14098_v54  ;;  %4770 = vmatpush1.msra.mxu1 %v11329_v44 }
 0x88b   :  { %4700 = vmatprep.subr.mxu0 %v11333_v49  ;;  %4771 = vmatprep.subr.mxu1 %v11335_v25 }
 0x88c   :  { %4701 = vmatpush1.msra.mxu0 %v11339_v9  ;;  %4772 = vmatpush1.msra.mxu1 %v11341_v55 }
 0x88d   :  { %4702 = vmatprep.subr.mxu0 %v11345_v20  ;;  %4773 = vmatprep.subr.mxu1 %v14095_v13 }
 0x88e   :  { %4703 = vmatpush1.msra.mxu0 %v11351_v48  ;;  %4774 = vmatpush1.msra.mxu1 %v14105_v3  ;;  %v14106_v3 = vld [vmem:[#allocation54_spill] sm:$0xff] }
 0x88f   :  { %4704 = vmatprep.subr.mxu0 %v11357_v50  ;;  %4775 = vmatprep.subr.mxu1 %v14096_v29 }
 0x890   :  { %4705 = vmatpush1.msra.mxu0 %v11363_v56  ;;  %4776 = vmatpush1.msra.mxu1 %v11365_v47 }
 0x891   :  { %4706 = vmatprep.subr.mxu0 %v11369_v14  ;;  %4777 = vmatprep.subr.mxu1 %v11371_v61 }
 0x892   :  { %4707 = vmatpush1.msra.mxu0 %v11375_v2  ;;  %4740 = vmatprep.mubr.f32.mxu0 %v14077_v8 }
 0x893   :  { %4778 = vmatpush1.msra.mxu1 %v11379_v62  ;;  %4811 = vmatprep.mubr.f32.mxu1 %v14077_v8 }
 0x894   :  { %4741 = vmatmul.mubr.f32.vlgmr.msra.gmra.mxu0 %v14106_v3  ;;  %4812 = vmatmul.mubr.f32.vlgmr.msra.gmra.mxu1 %v14106_v3  ;;  %v14108_v3 = vld [vmem:[#allocation67_spill] sm:$0xff] }
 0x895   :  { %4818 = vmatprep.subr.mxu0 %v11181_v10  ;;  %4889 = vmatprep.subr.mxu1 %v11183_v11  ;;  %v14107_v10 = vld [vmem:[#allocation59_spill] sm:$0xff] }
 0x896   :  { %4819 = vmatpush1.msra.mxu0 %v11197_v63  ;;  %4890 = vmatpush1.msra.mxu1 %v11199_v53 }
 0x897   :  { %4820 = vmatprep.subr.mxu0 %v11201_v18  ;;  %4891 = vmatprep.subr.mxu1 %v11203_v31 }
 0x898   :  { %4821 = vmatpush1.msra.mxu0 %v11207_v5  ;;  %4892 = vmatpush1.msra.mxu1 %v11209_v26 }
 0x899   :  { %4822 = vmatprep.subr.mxu0 %v11213_v22  ;;  %4893 = vmatprep.subr.mxu1 %v11215_v30 }
 0x89a   :  { %4823 = vmatpush1.msra.mxu0 %v11219_v28  ;;  %4894 = vmatpush1.msra.mxu1 %v11221_v33 }
 0x89b   :  { %4824 = vmatprep.subr.mxu0 %v11225_v58  ;;  %4895 = vmatprep.subr.mxu1 %v11227_v51 }
 0x89c   :  { %4825 = vmatpush1.msra.mxu0 %v11231_v12  ;;  %4896 = vmatpush1.msra.mxu1 %v11233_v60 }
 0x89d   :  { %4826 = vmatprep.subr.mxu0 %v11237_v1  ;;  %4897 = vmatprep.subr.mxu1 %v11239_v46 }
 0x89e   :  { %4827 = vmatpush1.msra.mxu0 %v11243_v34  ;;  %4898 = vmatpush1.msra.mxu1 %v11245_v57 }
 0x89f   :  { %4828 = vmatprep.subr.mxu0 %v11249_v35  ;;  %4899 = vmatprep.subr.mxu1 %v11251_v36 }
 0x8a0   :  { %4829 = vmatpush1.msra.mxu0 %v11255_v52  ;;  %4900 = vmatpush1.msra.mxu1 %v11257_v37 }
 0x8a1   :  { %4830 = vmatprep.subr.mxu0 %v11261_v38  ;;  %4901 = vmatprep.subr.mxu1 %v11263_v39 }
 0x8a2   :  { %4831 = vmatpush1.msra.mxu0 %v11267_v40  ;;  %4902 = vmatpush1.msra.mxu1 %v11269_v41 }
 0x8a3   :  { %4832 = vmatprep.subr.mxu0 %v11273_v42  ;;  %4903 = vmatprep.subr.mxu1 %v11275_v43 }
 0x8a4   :  { %4833 = vmatpush1.msra.mxu0 %v11279_v4  ;;  %4904 = vmatpush1.msra.mxu1 %v11281_v6 }
 0x8a5   :  { %4834 = vmatprep.subr.mxu0 %v11285_v16  ;;  %4905 = vmatprep.subr.mxu1 %v11287_v23 }
 0x8a6   :  { %4835 = vmatpush1.msra.mxu0 %v11291_v24  ;;  %4906 = vmatpush1.msra.mxu1 %v11293_v45 }
 0x8a7   :  { %4836 = vmatprep.subr.mxu0 %v11297_v27  ;;  %4907 = vmatprep.subr.mxu1 %v11299_v32 }
 0x8a8   :  { %4837 = vmatpush1.msra.mxu0 %v11303_v7  ;;  %4908 = vmatpush1.msra.mxu1 %v11305_v21 }
 0x8a9   :  { %4838 = vmatprep.subr.mxu0 %v11309_v59  ;;  %4909 = vmatprep.subr.mxu1 %v11311_v15 }
 0x8aa   :  { %4839 = vmatpush1.msra.mxu0 %v11315_v17  ;;  %4910 = vmatpush1.msra.mxu1 %v11317_v0 }
 0x8ab   :  { %4840 = vmatprep.subr.mxu0 %v14107_v10  ;;  %4911 = vmatprep.subr.mxu1 %v11323_v19  ;;  %v3918_v11 = vpop.f32.mrf.mxu0  ;;  %v14109_v10 = vld [vmem:[#allocation68_spill] sm:$0xff] }
 0x8ac   :  { %4841 = vmatpush1.msra.mxu0 %v14098_v54  ;;  %4912 = vmatpush1.msra.mxu1 %v11329_v44  ;;  %v3994_v7 = vadd.f32 %v3918_v11, %v14108_v3  ;;  %v14110_v44 = vld [vmem:[#allocation62_spill] sm:$0xff] }
 0x8ad   :  { %4842 = vmatprep.subr.mxu0 %v11333_v49  ;;  %4913 = vmatprep.subr.mxu1 %v11335_v25  ;;  %v3920_v15 = vpop.f32.mrf.mxu0  ;;  %v11735_v11 = vld [vmem:[#allocation7 + $0x1f8] sm:$0xff] }
 0x8ae   :  { %4843 = vmatpush1.msra.mxu0 %v11339_v9  ;;  %4914 = vmatpush1.msra.mxu1 %v11341_v55  ;;  %v8613_v0 = vmul.f32 -1.442695, %v3994_v7  ;;  %v3995_v17 = vadd.f32 %v3920_v15, %v14109_v10  ;;  %v3989_v7 = vpop.f32.mrf.mxu1  ;;  %v14111_v15 = vld [vmem:[#allocation32_spill] sm:$0xff] }
 0x8af   :  { %4844 = vmatprep.subr.mxu0 %v11345_v20  ;;  %4915 = vmatprep.subr.mxu1 %v14095_v13  ;;  %v11732_v10 = vld [vmem:[#allocation7 + $0x1e8] sm:$0xff] }
 0x8b0   :  { %4845 = vmatpush1.msra.mxu0 %v11351_v48  ;;  %4916 = vmatpush1.msra.mxu1 %v14110_v44  ;;  %8832 = vpow2.f32 %v8613_v0  ;;  %v8614_v3 = vmul.f32 -1.442695, %v3995_v17  ;;  %v14112_v17 = vld [vmem:[#allocation77_spill] sm:$0xff] }
 0x8b1   :  { %4846 = vmatprep.subr.mxu0 %v11357_v50  ;;  %4917 = vmatprep.subr.mxu1 %v14096_v29  ;;  %v3996_v0 = vadd.f32 %v3989_v7, %v14112_v17  ;;  %v14113_v7 = vld [vmem:[#allocation78_spill] sm:$0xff] }
 0x8b2   :  { %4847 = vmatpush1.msra.mxu0 %v11363_v56  ;;  %4918 = vmatpush1.msra.mxu1 %v11365_v47  ;;  %8834 = vpow2.f32 %v8614_v3  ;;  %v3991_v3 = vpop.f32.mrf.mxu1 }
 0x8b3   :  { %4848 = vmatprep.subr.mxu0 %v11369_v14  ;;  %4919 = vmatprep.subr.mxu1 %v11371_v61  ;;  %v3997_v17 = vadd.f32 %v3991_v3, %v14113_v7  ;;  %v9095_v3 = vld [vmem:[#allocation7 + $0xd0] sm:$0xff]  ;;  %v9096_v7 = vld [vmem:[#allocation7 + $0xa8] sm:$0xff] }
 0x8b4   :  { %4849 = vmatpush1.msra.mxu0 %v11375_v2  ;;  %4882 = vmatprep.mubr.f32.mxu0 %v14077_v8 }
 0x8b5   :  { %4920 = vmatpush1.msra.mxu1 %v11379_v62  ;;  %4953 = vmatprep.mubr.f32.mxu1 %v14077_v8 }
 0x8b6   :  { %4883 = vmatmul.mubr.f32.vlgmr.msra.gmra.mxu0 %v14111_v15  ;;  %4954 = vmatmul.mubr.f32.vlgmr.msra.gmra.mxu1 %v14111_v15  ;;  %v8615_v15 = vmul.f32 -1.442695, %v3996_v0  ;;  %v9092_v0 = vld [vmem:[#allocation7 + $0xc8] sm:$0xff] }
 0x8b7   :  { %4960 = vmatprep.subr.mxu0 %v11732_v10  ;;  %5031 = vmatprep.subr.mxu1 %v11735_v11 }
 0x8b8   :  { %4961 = vmatpush1.msra.mxu0 %v11197_v63  ;;  %5032 = vmatpush1.msra.mxu1 %v11199_v53  ;;  %8836 = vpow2.f32 %v8615_v15  ;;  %v9091_v15 = vld [vmem:[#allocation7 + $0xf0] sm:$0xff] }
 0x8b9   :  { %4962 = vmatprep.subr.mxu0 %v11201_v18  ;;  %5033 = vmatprep.subr.mxu1 %v11203_v31  ;;  %8838 = vtanh.f32 %v3997_v17  ;;  %v9097_v17 = vld [vmem:[#allocation7 + $0xb8] sm:$0xff] }
 0x8ba   :  { %4963 = vmatpush1.msra.mxu0 %v11207_v5  ;;  %5034 = vmatpush1.msra.mxu1 %v11209_v26  ;;  %v14114_v5 = vld [vmem:[#allocation56_spill] sm:$0xff] }
 0x8bb   :  { %4964 = vmatprep.subr.mxu0 %v11213_v22  ;;  %5035 = vmatprep.subr.mxu1 %v11215_v30  ;;  %v14115_v22 = vld [vmem:[#allocation34_spill] sm:$0xff] }
 0x8bc   :  { %4965 = vmatpush1.msra.mxu0 %v11219_v28  ;;  %5036 = vmatpush1.msra.mxu1 %v11221_v33  ;;  %v14116_v28 = vld [vmem:[#allocation57_spill] sm:$0xff]  ;;  %v14117_v33 = vld [vmem:[#allocation35_spill] sm:$0xff] }
 0x8bd   :  { %v8833_v63 = vpop.eup %8832  ;;  %4966 = vmatprep.subr.mxu0 %v11225_v58  ;;  %5037 = vmatprep.subr.mxu1 %v11227_v51  ;;  %v14118_v51 = vld [vmem:[#allocation59_spill] sm:$0xff] }
 0x8be   :  { %v4007_v53 = vadd.f32 1.0, %v8833_v63  ;;  %4967 = vmatpush1.msra.mxu0 %v11231_v12  ;;  %5038 = vmatpush1.msra.mxu1 %v11233_v60  ;;  %v14119_v60 = vld [vmem:[#allocation60_spill] sm:$0xff] }
 0x8bf   :  { %v8835_v18 = vpop.eup %8834  ;;  %4968 = vmatprep.subr.mxu0 %v11237_v1  ;;  %5039 = vmatprep.subr.mxu1 %v11239_v46  ;;  %v9098_v63 = vld [vmem:[#allocation7 + $0xa0] sm:$0xff] }
 0x8c0   :  { %8840 = vrcp.f32 %v4007_v53  ;;  %v4008_v31 = vadd.f32 1.0, %v8835_v18  ;;  %4969 = vmatpush1.msra.mxu0 %v11243_v34  ;;  %5040 = vmatpush1.msra.mxu1 %v11245_v57  ;;  %v14120_v34 = vld [vmem:[#allocation55_spill] sm:$0xff]  ;;  %v9099_v53 = vld [vmem:[#allocation7 + $0xb0] sm:$0xff]  ;;  %v9100_v18 = vld [vmem:[#allocation7 + $0x88] sm:$0xff] }
 0x8c1   :  { %4970 = vmatprep.subr.mxu0 %v11249_v35  ;;  %5041 = vmatprep.subr.mxu1 %v11251_v36  ;;  %v14121_v36 = vld [vmem:[#allocation33_spill] sm:$0xff] }
 0x8c2   :  { %8842 = vrcp.f32 %v4008_v31  ;;  %4971 = vmatpush1.msra.mxu0 %v11255_v52  ;;  %5042 = vmatpush1.msra.mxu1 %v11257_v37  ;;  %v9058_v52 = vld [vmem:[#allocation7 + $0x1e0] sm:$0xff]  ;;  %v9101_v31 = vld [vmem:[#allocation7 + $0x98] sm:$0xff] }
 0x8c3   :  { %4972 = vmatprep.subr.mxu0 %v11261_v38  ;;  %5043 = vmatprep.subr.mxu1 %v11263_v39  ;;  %v9062_v37 = vld [vmem:[#allocation7 + $0x1c0] sm:$0xff]  ;;  %v9063_v38 = vld [vmem:[#allocation7 + $0x1d0] sm:$0xff]  ;;  %v9064_v39 = vld [vmem:[#allocation7 + $0x1a8] sm:$0xff] }
 0x8c4   :  { %4973 = vmatpush1.msra.mxu0 %v11267_v40  ;;  %5044 = vmatpush1.msra.mxu1 %v11269_v41  ;;  %v9065_v40 = vld [vmem:[#allocation7 + $0x1b8] sm:$0xff]  ;;  %v9066_v41 = vld [vmem:[#allocation7 + $0x1a0] sm:$0xff] }
 0x8c5   :  { %4974 = vmatprep.subr.mxu0 %v11273_v42  ;;  %5045 = vmatprep.subr.mxu1 %v11275_v43  ;;  %v8837_v26 = vpop.eup %8836  ;;  %v9067_v42 = vld [vmem:[#allocation7 + $0x1b0] sm:$0xff]  ;;  %v9068_v43 = vld [vmem:[#allocation7 + $0x188] sm:$0xff] }
 0x8c6   :  { %4975 = vmatpush1.msra.mxu0 %v11279_v4  ;;  %5046 = vmatpush1.msra.mxu1 %v11281_v6  ;;  %v8839_v30 = vpop.eup %8838  ;;  %v4009_v46 = vadd.f32 1.0, %v8837_v26  ;;  %v9069_v4 = vld [vmem:[#allocation7 + $0x198] sm:$0xff]  ;;  %v9103_v26 = vld [vmem:[#allocation7 + $0x90] sm:$0xff] }
 0x8c7   :  { %4976 = vmatprep.subr.mxu0 %v11285_v16  ;;  %5047 = vmatprep.subr.mxu1 %v11287_v23  ;;  %v9070_v16 = vld [vmem:[#allocation7 + $0x180] sm:$0xff]  ;;  %v9071_v23 = vld [vmem:[#allocation7 + $0x190] sm:$0xff] }
 0x8c8   :  { %4977 = vmatpush1.msra.mxu0 %v11291_v24  ;;  %5048 = vmatpush1.msra.mxu1 %v11293_v45  ;;  %8844 = vrcp.f32 %v4009_v46  ;;  %v9072_v45 = vld [vmem:[#allocation7 + $0x168] sm:$0xff]  ;;  %v9113_v46 = vld [vmem:[#allocation7 + $0x38] sm:$0xff] }
 0x8c9   :  { %4978 = vmatprep.subr.mxu0 %v11297_v27  ;;  %5049 = vmatprep.subr.mxu1 %v11299_v32  ;;  %v9073_v27 = vld [vmem:[#allocation7 + $0x178] sm:$0xff]  ;;  %v9074_v32 = vld [vmem:[#allocation7 + $0x160] sm:$0xff] }
 0x8ca   :  { %4979 = vmatpush1.msra.mxu0 %v14114_v5  ;;  %5050 = vmatpush1.msra.mxu1 %v11305_v21  ;;  %v9075_v21 = vld [vmem:[#allocation7 + $0x170] sm:$0xff]  ;;  %v9102_v5 = vld [vmem:[#allocation7 + $0x80] sm:$0xff] }
 0x8cb   :  { %4980 = vmatprep.subr.mxu0 %v11309_v59  ;;  %5051 = vmatprep.subr.mxu1 %v14115_v22  ;;  %v9104_v22 = vld [vmem:[#allocation7 + $0x68] sm:$0xff] }
 0x8cc   :  { %4981 = vmatpush1.msra.mxu0 %v14116_v28  ;;  %5052 = vmatpush1.msra.mxu1 %v14117_v33  ;;  %v9106_v28 = vld [vmem:[#allocation7 + $0x60] sm:$0xff]  ;;  %v9107_v33 = vld [vmem:[#allocation7 + $0x70] sm:$0xff] }
 0x8cd   :  { %v8841_v58 = vpop.eup %8840  ;;  %4982 = vmatprep.subr.mxu0 %v14118_v51  ;;  %5053 = vmatprep.subr.mxu1 %v11323_v19  ;;  %v9076_v19 = vld [vmem:[#allocation7 + $0x148] sm:$0xff]  ;;  %v9109_v51 = vld [vmem:[#allocation7 + $0x58] sm:$0xff] }
 0x8ce   :  { %v4018_v12 = vmul.f32 %v8841_v58, %v8839_v30  ;;  %4983 = vmatpush1.msra.mxu0 %v14098_v54  ;;  %5054 = vmatpush1.msra.mxu1 %v14119_v60  ;;  %v9086_v54 = vld [vmem:[#allocation7 + $0x100] sm:$0xff]  ;;  %v9105_v30 = vld [vmem:[#allocation7 + $0x78] sm:$0xff]  ;;  %v9108_v58 = vld [vmem:[#allocation7 + $0x48] sm:$0xff] }
 0x8cf   :  { %v8843_v1 = vpop.eup %8842  ;;  %4984 = vmatprep.subr.mxu0 %v11333_v49  ;;  %5055 = vmatprep.subr.mxu1 %v11335_v25  ;;  %v9079_v49 = vld [vmem:[#allocation7 + $0x150] sm:$0xff]  ;;  %v9080_v25 = vld [vmem:[#allocation7 + $0x128] sm:$0xff] }
 0x8d0   :  { %v4017_v57 = vmul.f32 %v8843_v1, %v14120_v34  ;;  %4985 = vmatpush1.msra.mxu0 %v11339_v9  ;;  %5056 = vmatpush1.msra.mxu1 %v11341_v55  ;;  %v9081_v9 = vld [vmem:[#allocation7 + $0x138] sm:$0xff]  ;;  %v9082_v55 = vld [vmem:[#allocation7 + $0x120] sm:$0xff]  ;;  %v9111_v60 = vld [vmem:[#allocation7 + $0x50] sm:$0xff] }
 0x8d1   :  { %4986 = vmatprep.subr.mxu0 %v11345_v20  ;;  %5057 = vmatprep.subr.mxu1 %v14095_v13  ;;  %v9083_v20 = vld [vmem:[#allocation7 + $0x130] sm:$0xff]  ;;  %v9088_v13 = vld [vmem:[#allocation7 + $0xe8] sm:$0xff]  ;;  %v9114_v34 = vld [vmem:[#allocation7 + $0x20] sm:$0xff] }
 0x8d2   :  { %v4019_v35 = vadd.f32 %v4018_v12, %v4017_v57  ;;  %4987 = vmatpush1.msra.mxu0 %v11351_v48  ;;  %5058 = vmatpush1.msra.mxu1 %v14110_v44  ;;  %v9078_v44 = vld [vmem:[#allocation7 + $0x140] sm:$0xff]  ;;  %v9085_v48 = vld [vmem:[#allocation7 + $0x118] sm:$0xff]  ;;  %v9112_v1 = vld [vmem:[#allocation7 + $0x28] sm:$0xff] }
 0x8d3   :  { %4988 = vmatprep.subr.mxu0 %v11357_v50  ;;  %5059 = vmatprep.subr.mxu1 %v14096_v29  ;;  %v9077_v29 = vld [vmem:[#allocation7 + $0x158] sm:$0xff]  ;;  %v9087_v50 = vld [vmem:[#allocation7 + $0x110] sm:$0xff]  ;;  %v9110_v12 = vld [vmem:[#allocation7 + $0x40] sm:$0xff] }
 0x8d4   :  { %8846 = vtanh.f32 %v4019_v35  ;;  %4989 = vmatpush1.msra.mxu0 %v11363_v56  ;;  %5060 = vmatpush1.msra.mxu1 %v11365_v47  ;;  %v9089_v56 = vld [vmem:[#allocation7 + $0xf8] sm:$0xff]  ;;  %v9090_v47 = vld [vmem:[#allocation7 + $0xe0] sm:$0xff]  ;;  %v9115_v57 = vld [vmem:[#allocation7 + $0x30] sm:$0xff] }
 0x8d5   :  { %4990 = vmatprep.subr.mxu0 %v11369_v14  ;;  %5061 = vmatprep.subr.mxu1 %v11371_v61  ;;  %v9059_v14 = vld [vmem:[#allocation7 + $0x1f0] sm:$0xff]  ;;  %v9060_v61 = vld [vmem:[#allocation7 + $0x1c8] sm:$0xff]  ;;  %v8845_v6 = vpop.eup %8844 }
 0x8d6   :  { %4991 = vmatpush1.msra.mxu0 %v11375_v2  ;;  %5024 = vmatprep.mubr.f32.mxu0 %v14077_v8  ;;  %v9061_v2 = vld [vmem:[#allocation7 + $0x1d8] sm:$0xff]  ;;  %v9116_v35 = vld [vmem:[#allocation7 + $0x8] sm:$0xff] }
 0x8d7   :  { %5062 = vmatpush1.msra.mxu1 %v11379_v62  ;;  %5095 = vmatprep.mubr.f32.mxu1 %v14077_v8  ;;  %v9084_v62 = vld [vmem:[#allocation7 + $0x108] sm:$0xff] }
 0x8d8   :  { %5025 = vmatmul.mubr.f32.vlgmr.msra.gmra.mxu0 %v14121_v36  ;;  %5096 = vmatmul.mubr.f32.vlgmr.msra.gmra.mxu1 %v14121_v36  ;;  %v11996_v36 = vld [vmem:[#allocation8] sm:$0xff] }
 0x8d9   :  { %5102 = vmatprep.subr.mxu0 %v11732_v10  ;;  %5173 = vmatprep.subr.mxu1 %v11735_v11  ;;  %v9093_v10 = vld [vmem:[#allocation7 + $0xd8] sm:$0xff]  ;;  %v9094_v11 = vld [vmem:[#allocation7 + $0xc0] sm:$0xff] }
 0x8da   :  { %5103 = vmatpush1.msra.mxu0 %v9058_v52  ;;  %5174 = vmatpush1.msra.mxu1 %v9059_v14  ;;  %v9117_v52 = vld [vmem:[#allocation7 + $0x18] sm:$0xff]  ;;  %v9118_v14 = vld [vmem:[#allocation7] sm:$0xff] }
 0x8db   :  { %5104 = vmatprep.subr.mxu0 %v9060_v61  ;;  %5175 = vmatprep.subr.mxu1 %v9061_v2  ;;  %v11811_v61 = vld [vmem:[#allocation8 + $0x1e8] sm:$0xff]  ;;  %v11813_v2 = vld [vmem:[#allocation8 + $0x1f8] sm:$0xff] }
 0x8dc   :  { %5105 = vmatpush1.msra.mxu0 %v9062_v37  ;;  %5176 = vmatpush1.msra.mxu1 %v9063_v38  ;;  %v9119_v37 = vld [vmem:[#allocation7 + $0x10] sm:$0xff]  ;;  %v11816_v38 = vld [vmem:[#allocation8 + $0x1e0] sm:$0xff] }
 0x8dd   :  { %5106 = vmatprep.subr.mxu0 %v9064_v39  ;;  %5177 = vmatprep.subr.mxu1 %v9065_v40  ;;  %v11818_v39 = vld [vmem:[#allocation8 + $0x1f0] sm:$0xff]  ;;  %v11822_v40 = vld [vmem:[#allocation8 + $0x1c8] sm:$0xff] }
 0x8de   :  { %5107 = vmatpush1.msra.mxu0 %v9066_v41  ;;  %5178 = vmatpush1.msra.mxu1 %v9067_v42  ;;  %14123 = vst [vmem:[#allocation39_spill] sm:$0xff] %v11822_v40  ;;  %v11824_v41 = vld [vmem:[#allocation8 + $0x1d8] sm:$0xff]  ;;  %v11828_v42 = vld [vmem:[#allocation8 + $0x1c0] sm:$0xff] }
 0x8df   :  { %5108 = vmatprep.subr.mxu0 %v9068_v43  ;;  %5179 = vmatprep.subr.mxu1 %v9069_v4  ;;  %v11830_v43 = vld [vmem:[#allocation8 + $0x1d0] sm:$0xff]  ;;  %v11834_v4 = vld [vmem:[#allocation8 + $0x1a8] sm:$0xff] }
 0x8e0   :  { %5109 = vmatpush1.msra.mxu0 %v9070_v16  ;;  %5180 = vmatpush1.msra.mxu1 %v9071_v23  ;;  %v11840_v16 = vld [vmem:[#allocation8 + $0x1a0] sm:$0xff]  ;;  %v11842_v23 = vld [vmem:[#allocation8 + $0x1b0] sm:$0xff] }
 0x8e1   :  { %v8847_v24 = vpop.eup %8846  ;;  %5110 = vmatprep.subr.mxu0 %v9072_v45  ;;  %5181 = vmatprep.subr.mxu1 %v9073_v27  ;;  %14124 = vst [vmem:[#allocation64_spill] sm:$0xff] %v11842_v23  ;;  %v11848_v45 = vld [vmem:[#allocation8 + $0x198] sm:$0xff]  ;;  %v11852_v27 = vld [vmem:[#allocation8 + $0x180] sm:$0xff] }
 0x8e2   :  { %5111 = vmatpush1.msra.mxu0 %v9074_v32  ;;  %5182 = vmatpush1.msra.mxu1 %v9075_v21  ;;  %v11808_v59 = vmul.f32 %v8847_v24, %v8845_v6  ;;  %v11836_v6 = vld [vmem:[#allocation8 + $0x1b8] sm:$0xff]  ;;  %v11846_v24 = vld [vmem:[#allocation8 + $0x188] sm:$0xff]  ;;  %v11854_v32 = vld [vmem:[#allocation8 + $0x190] sm:$0xff] }
 0x8e3   :  { %5112 = vmatprep.subr.mxu0 %v9076_v19  ;;  %5183 = vmatprep.subr.mxu1 %v9077_v29  ;;  %v11858_v21 = vld [vmem:[#allocation8 + $0x168] sm:$0xff]  ;;  %v11860_v19 = vld [vmem:[#allocation8 + $0x178] sm:$0xff]  ;;  %v11864_v29 = vld [vmem:[#allocation8 + $0x160] sm:$0xff] }
 0x8e4   :  { %14122 = vst [vmem:[#allocation63_spill] sm:$0xff] %v11808_v59  ;;  %5113 = vmatpush1.msra.mxu0 %v9078_v44  ;;  %5184 = vmatpush1.msra.mxu1 %v9079_v49  ;;  %14125 = vst [vmem:[#allocation40_spill] sm:$0xff] %v11864_v29  ;;  %v11866_v44 = vld [vmem:[#allocation8 + $0x170] sm:$0xff]  ;;  %v11870_v49 = vld [vmem:[#allocation8 + $0x148] sm:$0xff] }
 0x8e5   :  { %5114 = vmatprep.subr.mxu0 %v9080_v25  ;;  %5185 = vmatprep.subr.mxu1 %v9081_v9  ;;  %v11872_v25 = vld [vmem:[#allocation8 + $0x158] sm:$0xff]  ;;  %v11876_v9 = vld [vmem:[#allocation8 + $0x140] sm:$0xff] }
 0x8e6   :  { %5115 = vmatpush1.msra.mxu0 %v9082_v55  ;;  %5186 = vmatpush1.msra.mxu1 %v9083_v20  ;;  %v11878_v55 = vld [vmem:[#allocation8 + $0x150] sm:$0xff]  ;;  %v11882_v20 = vld [vmem:[#allocation8 + $0x128] sm:$0xff] }
 0x8e7   :  { %5116 = vmatprep.subr.mxu0 %v9084_v62  ;;  %5187 = vmatprep.subr.mxu1 %v9085_v48  ;;  %v11884_v62 = vld [vmem:[#allocation8 + $0x138] sm:$0xff]  ;;  %v11888_v48 = vld [vmem:[#allocation8 + $0x120] sm:$0xff] }
 0x8e8   :  { %5117 = vmatpush1.msra.mxu0 %v9086_v54  ;;  %5188 = vmatpush1.msra.mxu1 %v9087_v50  ;;  %v11890_v54 = vld [vmem:[#allocation8 + $0x130] sm:$0xff]  ;;  %v11894_v50 = vld [vmem:[#allocation8 + $0x108] sm:$0xff] }
 0x8e9   :  { %5118 = vmatprep.subr.mxu0 %v9088_v13  ;;  %5189 = vmatprep.subr.mxu1 %v9089_v56  ;;  %v11896_v13 = vld [vmem:[#allocation8 + $0x118] sm:$0xff]  ;;  %v11900_v56 = vld [vmem:[#allocation8 + $0x100] sm:$0xff] }
 0x8ea   :  { %5119 = vmatpush1.msra.mxu0 %v9090_v47  ;;  %5190 = vmatpush1.msra.mxu1 %v9091_v15  ;;  %v11902_v47 = vld [vmem:[#allocation8 + $0x110] sm:$0xff]  ;;  %v11906_v15 = vld [vmem:[#allocation8 + $0xe8] sm:$0xff] }
 0x8eb   :  { %5120 = vmatprep.subr.mxu0 %v9092_v0  ;;  %5191 = vmatprep.subr.mxu1 %v9093_v10  ;;  %v11908_v0 = vld [vmem:[#allocation8 + $0xf8] sm:$0xff]  ;;  %v11912_v10 = vld [vmem:[#allocation8 + $0xe0] sm:$0xff] }
 0x8ec   :  { %5121 = vmatpush1.msra.mxu0 %v9094_v11  ;;  %5192 = vmatpush1.msra.mxu1 %v9095_v3  ;;  %v11914_v11 = vld [vmem:[#allocation8 + $0xf0] sm:$0xff]  ;;  %v11918_v3 = vld [vmem:[#allocation8 + $0xc8] sm:$0xff] }
 0x8ed   :  { %5122 = vmatprep.subr.mxu0 %v9096_v7  ;;  %5193 = vmatprep.subr.mxu1 %v9097_v17  ;;  %v11920_v7 = vld [vmem:[#allocation8 + $0xd8] sm:$0xff]  ;;  %v11924_v17 = vld [vmem:[#allocation8 + $0xc0] sm:$0xff] }
 0x8ee   :  { %5123 = vmatpush1.msra.mxu0 %v9098_v63  ;;  %5194 = vmatpush1.msra.mxu1 %v9099_v53  ;;  %v11926_v63 = vld [vmem:[#allocation8 + $0xd0] sm:$0xff]  ;;  %v11930_v53 = vld [vmem:[#allocation8 + $0xa8] sm:$0xff] }
 0x8ef   :  { %5124 = vmatprep.subr.mxu0 %v9100_v18  ;;  %5195 = vmatprep.subr.mxu1 %v9101_v31  ;;  %v11932_v18 = vld [vmem:[#allocation8 + $0xb8] sm:$0xff]  ;;  %v11936_v31 = vld [vmem:[#allocation8 + $0xa0] sm:$0xff] }
 0x8f0   :  { %5125 = vmatpush1.msra.mxu0 %v9102_v5  ;;  %5196 = vmatpush1.msra.mxu1 %v9103_v26  ;;  %14126 = vst [vmem:[#allocation65_spill] sm:$0xff] %v11936_v31  ;;  %v11938_v5 = vld [vmem:[#allocation8 + $0xb0] sm:$0xff]  ;;  %v11942_v26 = vld [vmem:[#allocation8 + $0x88] sm:$0xff] }
 0x8f1   :  { %5126 = vmatprep.subr.mxu0 %v9104_v22  ;;  %5197 = vmatprep.subr.mxu1 %v9105_v30  ;;  %14127 = vst [vmem:[#allocation41_spill] sm:$0xff] %v11942_v26  ;;  %v11944_v22 = vld [vmem:[#allocation8 + $0x98] sm:$0xff]  ;;  %v11948_v30 = vld [vmem:[#allocation8 + $0x80] sm:$0xff] }
 0x8f2   :  { %5127 = vmatpush1.msra.mxu0 %v9106_v28  ;;  %5198 = vmatpush1.msra.mxu1 %v9107_v33  ;;  %14128 = vst [vmem:[#allocation66_spill] sm:$0xff] %v11948_v30  ;;  %v11950_v28 = vld [vmem:[#allocation8 + $0x90] sm:$0xff]  ;;  %v11954_v33 = vld [vmem:[#allocation8 + $0x68] sm:$0xff] }
 0x8f3   :  { %5128 = vmatprep.subr.mxu0 %v9108_v58  ;;  %5199 = vmatprep.subr.mxu1 %v9109_v51  ;;  %v11956_v58 = vld [vmem:[#allocation8 + $0x78] sm:$0xff]  ;;  %v11960_v51 = vld [vmem:[#allocation8 + $0x60] sm:$0xff] }
 0x8f4   :  { %5129 = vmatpush1.msra.mxu0 %v9110_v12  ;;  %5200 = vmatpush1.msra.mxu1 %v9111_v60  ;;  %v11962_v12 = vld [vmem:[#allocation8 + $0x70] sm:$0xff]  ;;  %v11966_v60 = vld [vmem:[#allocation8 + $0x48] sm:$0xff] }
 0x8f5   :  { %5130 = vmatprep.subr.mxu0 %v9112_v1  ;;  %5201 = vmatprep.subr.mxu1 %v9113_v46  ;;  %v11968_v1 = vld [vmem:[#allocation8 + $0x58] sm:$0xff]  ;;  %v11972_v46 = vld [vmem:[#allocation8 + $0x40] sm:$0xff] }
 0x8f6   :  { %5131 = vmatpush1.msra.mxu0 %v9114_v34  ;;  %5202 = vmatpush1.msra.mxu1 %v9115_v57  ;;  %14129 = vst [vmem:[#allocation42_spill] sm:$0xff] %v11968_v1  ;;  %14130 = vst [vmem:[#allocation26_spill] sm:$0xff] %v11972_v46  ;;  %v11974_v34 = vld [vmem:[#allocation8 + $0x50] sm:$0xff]  ;;  %v11978_v57 = vld [vmem:[#allocation8 + $0x28] sm:$0xff] }
 0x8f7   :  { %5132 = vmatprep.subr.mxu0 %v9116_v35  ;;  %5203 = vmatprep.subr.mxu1 %v9117_v52  ;;  %14131 = vst [vmem:[#allocation73_spill] sm:$0xff] %v11974_v34  ;;  %v11980_v35 = vld [vmem:[#allocation8 + $0x38] sm:$0xff]  ;;  %v11984_v52 = vld [vmem:[#allocation8 + $0x20] sm:$0xff] }
 0x8f8   :  { %5133 = vmatpush1.msra.mxu0 %v9118_v14  ;;  %5166 = vmatprep.mubr.f32.mxu0 %v14077_v8  ;;  %14132 = vst [vmem:[#allocation75_spill] sm:$0xff] %v11980_v35  ;;  %v11986_v14 = vld [vmem:[#allocation8 + $0x30] sm:$0xff] }
 0x8f9   :  { %5204 = vmatpush1.msra.mxu1 %v9119_v37  ;;  %5237 = vmatprep.mubr.f32.mxu1 %v14077_v8  ;;  %v11990_v37 = vld [vmem:[#allocation8 + $0x8] sm:$0xff] }
 0x8fa   :  { %5167 = vmatmul.mubr.f32.vlgmr.msra.gmra.mxu0 %v11808_v59  ;;  %5238 = vmatmul.mubr.f32.vlgmr.msra.gmra.mxu1 %v11808_v59  ;;  %v11992_v59 = vld [vmem:[#allocation8 + $0x18] sm:$0xff] }
 0x8fb   :  { %5308 = vmatprep.subr.mxu0 %v11811_v61  ;;  %5379 = vmatprep.subr.mxu1 %v11813_v2 }
 0x8fc   :  { %5309 = vmatpush1.msra.mxu0 %v11816_v38  ;;  %5380 = vmatpush1.msra.mxu1 %v11818_v39 }
 0x8fd   :  { %5310 = vmatprep.subr.mxu0 %v11822_v40  ;;  %5381 = vmatprep.subr.mxu1 %v11824_v41 }
 0x8fe   :  { %5311 = vmatpush1.msra.mxu0 %v11828_v42  ;;  %5382 = vmatpush1.msra.mxu1 %v11830_v43 }
 0x8ff   :  { %5312 = vmatprep.subr.mxu0 %v11834_v4  ;;  %5383 = vmatprep.subr.mxu1 %v11836_v6 }
 0x900   :  { %5313 = vmatpush1.msra.mxu0 %v11840_v16  ;;  %5384 = vmatpush1.msra.mxu1 %v11842_v23 }
 0x901   :  { %5314 = vmatprep.subr.mxu0 %v11846_v24  ;;  %5385 = vmatprep.subr.mxu1 %v11848_v45 }
 0x902   :  { %5315 = vmatpush1.msra.mxu0 %v11852_v27  ;;  %5386 = vmatpush1.msra.mxu1 %v11854_v32 }
 0x903   :  { %5316 = vmatprep.subr.mxu0 %v11858_v21  ;;  %5387 = vmatprep.subr.mxu1 %v11860_v19 }
 0x904   :  { %5317 = vmatpush1.msra.mxu0 %v11864_v29  ;;  %5388 = vmatpush1.msra.mxu1 %v11866_v44 }
 0x905   :  { %5318 = vmatprep.subr.mxu0 %v11870_v49  ;;  %5389 = vmatprep.subr.mxu1 %v11872_v25 }
 0x906   :  { %5319 = vmatpush1.msra.mxu0 %v11876_v9  ;;  %5390 = vmatpush1.msra.mxu1 %v11878_v55 }
 0x907   :  { %5320 = vmatprep.subr.mxu0 %v11882_v20  ;;  %5391 = vmatprep.subr.mxu1 %v11884_v62 }
 0x908   :  { %5321 = vmatpush1.msra.mxu0 %v11888_v48  ;;  %5392 = vmatpush1.msra.mxu1 %v11890_v54 }
 0x909   :  { %5322 = vmatprep.subr.mxu0 %v11894_v50  ;;  %5393 = vmatprep.subr.mxu1 %v11896_v13 }
 0x90a   :  { %5323 = vmatpush1.msra.mxu0 %v11900_v56  ;;  %5394 = vmatpush1.msra.mxu1 %v11902_v47 }
 0x90b   :  { %5324 = vmatprep.subr.mxu0 %v11906_v15  ;;  %5395 = vmatprep.subr.mxu1 %v11908_v0 }
 0x90c   :  { %5325 = vmatpush1.msra.mxu0 %v11912_v10  ;;  %5396 = vmatpush1.msra.mxu1 %v11914_v11 }
 0x90d   :  { %5326 = vmatprep.subr.mxu0 %v11918_v3  ;;  %5397 = vmatprep.subr.mxu1 %v11920_v7 }
 0x90e   :  { %5327 = vmatpush1.msra.mxu0 %v11924_v17  ;;  %5398 = vmatpush1.msra.mxu1 %v11926_v63 }
 0x90f   :  { %5328 = vmatprep.subr.mxu0 %v11930_v53  ;;  %5399 = vmatprep.subr.mxu1 %v11932_v18 }
 0x910   :  { %5329 = vmatpush1.msra.mxu0 %v11936_v31  ;;  %5400 = vmatpush1.msra.mxu1 %v11938_v5 }
 0x911   :  { %5330 = vmatprep.subr.mxu0 %v11942_v26  ;;  %5401 = vmatprep.subr.mxu1 %v11944_v22 }
 0x912   :  { %5331 = vmatpush1.msra.mxu0 %v11948_v30  ;;  %5402 = vmatpush1.msra.mxu1 %v11950_v28 }
 0x913   :  { %5332 = vmatprep.subr.mxu0 %v11954_v33  ;;  %5403 = vmatprep.subr.mxu1 %v11956_v58 }
 0x914   :  { %5333 = vmatpush1.msra.mxu0 %v11960_v51  ;;  %5404 = vmatpush1.msra.mxu1 %v11962_v12 }
 0x915   :  { %5334 = vmatprep.subr.mxu0 %v11966_v60  ;;  %5405 = vmatprep.subr.mxu1 %v11968_v1  ;;  %v12000_v1 = vld [vmem:[#allocation8 + $0x10] sm:$0xff] }
 0x916   :  { %5335 = vmatpush1.msra.mxu0 %v11972_v46  ;;  %5406 = vmatpush1.msra.mxu1 %v11974_v34  ;;  %14133 = vst [vmem:[#allocation83_spill] sm:$0xff] %v12000_v1 }
 0x917   :  { %5336 = vmatprep.subr.mxu0 %v11978_v57  ;;  %5407 = vmatprep.subr.mxu1 %v11980_v35  ;;  %v14134_v35 = vld [vmem:[#allocation85_spill] sm:$0xff] }
 0x918   :  { %5337 = vmatpush1.msra.mxu0 %v11984_v52  ;;  %5408 = vmatpush1.msra.mxu1 %v11986_v14 }
 0x919   :  { %5338 = vmatprep.subr.mxu0 %v11990_v37  ;;  %5409 = vmatprep.subr.mxu1 %v11992_v59 }
 0x91a   :  { %5339 = vmatpush1.msra.mxu0 %v11996_v36  ;;  %5372 = vmatprep.mubr.f32.mxu0 %v14077_v8 }
 0x91b   :  { %5410 = vmatpush1.msra.mxu1 %v12000_v1  ;;  %5443 = vmatprep.mubr.f32.mxu1 %v14077_v8 }
 0x91c   :  { %5373 = vmatmul.mubr.f32.vlgmr.msra.gmra.mxu0 %v14134_v35  ;;  %5444 = vmatmul.mubr.f32.vlgmr.msra.gmra.mxu1 %v14134_v35  ;;  %v14135_v35 = vld [vmem:[#allocation42_spill] sm:$0xff] }
 0x91d   :  { %5450 = vmatprep.subr.mxu0 %v11811_v61  ;;  %5521 = vmatprep.subr.mxu1 %v11813_v2 }
 0x91e   :  { %5451 = vmatpush1.msra.mxu0 %v11816_v38  ;;  %5522 = vmatpush1.msra.mxu1 %v11818_v39 }
 0x91f   :  { %5452 = vmatprep.subr.mxu0 %v11822_v40  ;;  %5523 = vmatprep.subr.mxu1 %v11824_v41 }
 0x920   :  { %5453 = vmatpush1.msra.mxu0 %v11828_v42  ;;  %5524 = vmatpush1.msra.mxu1 %v11830_v43 }
 0x921   :  { %5454 = vmatprep.subr.mxu0 %v11834_v4  ;;  %5525 = vmatprep.subr.mxu1 %v11836_v6 }
 0x922   :  { %5455 = vmatpush1.msra.mxu0 %v11840_v16  ;;  %5526 = vmatpush1.msra.mxu1 %v11842_v23 }
 0x923   :  { %5456 = vmatprep.subr.mxu0 %v11846_v24  ;;  %5527 = vmatprep.subr.mxu1 %v11848_v45 }
 0x924   :  { %5457 = vmatpush1.msra.mxu0 %v11852_v27  ;;  %5528 = vmatpush1.msra.mxu1 %v11854_v32 }
 0x925   :  { %5458 = vmatprep.subr.mxu0 %v11858_v21  ;;  %5529 = vmatprep.subr.mxu1 %v11860_v19 }
 0x926   :  { %5459 = vmatpush1.msra.mxu0 %v11864_v29  ;;  %5530 = vmatpush1.msra.mxu1 %v11866_v44 }
 0x927   :  { %5460 = vmatprep.subr.mxu0 %v11870_v49  ;;  %5531 = vmatprep.subr.mxu1 %v11872_v25 }
 0x928   :  { %5461 = vmatpush1.msra.mxu0 %v11876_v9  ;;  %5532 = vmatpush1.msra.mxu1 %v11878_v55 }
 0x929   :  { %5462 = vmatprep.subr.mxu0 %v11882_v20  ;;  %5533 = vmatprep.subr.mxu1 %v11884_v62 }
 0x92a   :  { %5463 = vmatpush1.msra.mxu0 %v11888_v48  ;;  %5534 = vmatpush1.msra.mxu1 %v11890_v54 }
 0x92b   :  { %5464 = vmatprep.subr.mxu0 %v11894_v50  ;;  %5535 = vmatprep.subr.mxu1 %v11896_v13 }
 0x92c   :  { %5465 = vmatpush1.msra.mxu0 %v11900_v56  ;;  %5536 = vmatpush1.msra.mxu1 %v11902_v47 }
 0x92d   :  { %5466 = vmatprep.subr.mxu0 %v11906_v15  ;;  %5537 = vmatprep.subr.mxu1 %v11908_v0 }
 0x92e   :  { %5467 = vmatpush1.msra.mxu0 %v11912_v10  ;;  %5538 = vmatpush1.msra.mxu1 %v11914_v11 }
 0x92f   :  { %5468 = vmatprep.subr.mxu0 %v11918_v3  ;;  %5539 = vmatprep.subr.mxu1 %v11920_v7 }
 0x930   :  { %5469 = vmatpush1.msra.mxu0 %v11924_v17  ;;  %5540 = vmatpush1.msra.mxu1 %v11926_v63 }
 0x931   :  { %5470 = vmatprep.subr.mxu0 %v11930_v53  ;;  %5541 = vmatprep.subr.mxu1 %v11932_v18 }
 0x932   :  { %5471 = vmatpush1.msra.mxu0 %v11936_v31  ;;  %5542 = vmatpush1.msra.mxu1 %v11938_v5 }
 0x933   :  { %5472 = vmatprep.subr.mxu0 %v11942_v26  ;;  %5543 = vmatprep.subr.mxu1 %v11944_v22 }
 0x934   :  { %5473 = vmatpush1.msra.mxu0 %v11948_v30  ;;  %5544 = vmatpush1.msra.mxu1 %v11950_v28  ;;  %v14136_v30 = vld [vmem:[#allocation75_spill] sm:$0xff] }
 0x935   :  { %5474 = vmatprep.subr.mxu0 %v11954_v33  ;;  %5545 = vmatprep.subr.mxu1 %v11956_v58 }
 0x936   :  { %5475 = vmatpush1.msra.mxu0 %v11960_v51  ;;  %5546 = vmatpush1.msra.mxu1 %v11962_v12 }
 0x937   :  { %5476 = vmatprep.subr.mxu0 %v11966_v60  ;;  %5547 = vmatprep.subr.mxu1 %v14135_v35 }
 0x938   :  { %5477 = vmatpush1.msra.mxu0 %v11972_v46  ;;  %5548 = vmatpush1.msra.mxu1 %v11974_v34  ;;  %v14137_v34 = vld [vmem:[#allocation43_spill] sm:$0xff] }
 0x939   :  { %5478 = vmatprep.subr.mxu0 %v11978_v57  ;;  %5549 = vmatprep.subr.mxu1 %v14136_v30 }
 0x93a   :  { %5479 = vmatpush1.msra.mxu0 %v11984_v52  ;;  %5550 = vmatpush1.msra.mxu1 %v11986_v14 }
 0x93b   :  { %5480 = vmatprep.subr.mxu0 %v11990_v37  ;;  %5551 = vmatprep.subr.mxu1 %v11992_v59 }
 0x93c   :  { %5481 = vmatpush1.msra.mxu0 %v11996_v36  ;;  %5514 = vmatprep.mubr.f32.mxu0 %v14077_v8 }
 0x93d   :  { %5552 = vmatpush1.msra.mxu1 %v12000_v1  ;;  %5585 = vmatprep.mubr.f32.mxu1 %v14077_v8 }
 0x93e   :  { %5515 = vmatmul.mubr.f32.vlgmr.msra.gmra.mxu0 %v14137_v34  ;;  %5586 = vmatmul.mubr.f32.vlgmr.msra.gmra.mxu1 %v14137_v34  ;;  %v14138_v34 = vld [vmem:[#allocation66_spill] sm:$0xff] }
 0x93f   :  { %5592 = vmatprep.subr.mxu0 %v11811_v61  ;;  %5663 = vmatprep.subr.mxu1 %v11813_v2 }
 0x940   :  { %5593 = vmatpush1.msra.mxu0 %v11816_v38  ;;  %5664 = vmatpush1.msra.mxu1 %v11818_v39 }
 0x941   :  { %5594 = vmatprep.subr.mxu0 %v11822_v40  ;;  %5665 = vmatprep.subr.mxu1 %v11824_v41 }
 0x942   :  { %5595 = vmatpush1.msra.mxu0 %v11828_v42  ;;  %5666 = vmatpush1.msra.mxu1 %v11830_v43 }
 0x943   :  { %5596 = vmatprep.subr.mxu0 %v11834_v4  ;;  %5667 = vmatprep.subr.mxu1 %v11836_v6 }
 0x944   :  { %5597 = vmatpush1.msra.mxu0 %v11840_v16  ;;  %5668 = vmatpush1.msra.mxu1 %v11842_v23 }
 0x945   :  { %5598 = vmatprep.subr.mxu0 %v11846_v24  ;;  %5669 = vmatprep.subr.mxu1 %v11848_v45 }
 0x946   :  { %5599 = vmatpush1.msra.mxu0 %v11852_v27  ;;  %5670 = vmatpush1.msra.mxu1 %v11854_v32 }
 0x947   :  { %5600 = vmatprep.subr.mxu0 %v11858_v21  ;;  %5671 = vmatprep.subr.mxu1 %v11860_v19 }
 0x948   :  { %5601 = vmatpush1.msra.mxu0 %v11864_v29  ;;  %5672 = vmatpush1.msra.mxu1 %v11866_v44 }
 0x949   :  { %5602 = vmatprep.subr.mxu0 %v11870_v49  ;;  %5673 = vmatprep.subr.mxu1 %v11872_v25 }
 0x94a   :  { %5603 = vmatpush1.msra.mxu0 %v11876_v9  ;;  %5674 = vmatpush1.msra.mxu1 %v11878_v55 }
 0x94b   :  { %5604 = vmatprep.subr.mxu0 %v11882_v20  ;;  %5675 = vmatprep.subr.mxu1 %v11884_v62 }
 0x94c   :  { %5605 = vmatpush1.msra.mxu0 %v11888_v48  ;;  %5676 = vmatpush1.msra.mxu1 %v11890_v54 }
 0x94d   :  { %5606 = vmatprep.subr.mxu0 %v11894_v50  ;;  %5677 = vmatprep.subr.mxu1 %v11896_v13 }
 0x94e   :  { %5607 = vmatpush1.msra.mxu0 %v11900_v56  ;;  %5678 = vmatpush1.msra.mxu1 %v11902_v47 }
 0x94f   :  { %5608 = vmatprep.subr.mxu0 %v11906_v15  ;;  %5679 = vmatprep.subr.mxu1 %v11908_v0 }
 0x950   :  { %5609 = vmatpush1.msra.mxu0 %v11912_v10  ;;  %5680 = vmatpush1.msra.mxu1 %v11914_v11 }
 0x951   :  { %5610 = vmatprep.subr.mxu0 %v11918_v3  ;;  %5681 = vmatprep.subr.mxu1 %v11920_v7 }
 0x952   :  { %5611 = vmatpush1.msra.mxu0 %v11924_v17  ;;  %5682 = vmatpush1.msra.mxu1 %v11926_v63 }
 0x953   :  { %5612 = vmatprep.subr.mxu0 %v11930_v53  ;;  %5683 = vmatprep.subr.mxu1 %v11932_v18 }
 0x954   :  { %5613 = vmatpush1.msra.mxu0 %v11936_v31  ;;  %5684 = vmatpush1.msra.mxu1 %v11938_v5 }
 0x955   :  { %5614 = vmatprep.subr.mxu0 %v11942_v26  ;;  %5685 = vmatprep.subr.mxu1 %v11944_v22  ;;  %v14139_v26 = vld [vmem:[#allocation73_spill] sm:$0xff] }
 0x956   :  { %5615 = vmatpush1.msra.mxu0 %v14138_v34  ;;  %5686 = vmatpush1.msra.mxu1 %v11950_v28 }
 0x957   :  { %5616 = vmatprep.subr.mxu0 %v11954_v33  ;;  %5687 = vmatprep.subr.mxu1 %v11956_v58 }
 0x958   :  { %5617 = vmatpush1.msra.mxu0 %v11960_v51  ;;  %5688 = vmatpush1.msra.mxu1 %v11962_v12 }
 0x959   :  { %5618 = vmatprep.subr.mxu0 %v11966_v60  ;;  %5689 = vmatprep.subr.mxu1 %v14135_v35 }
 0x95a   :  { %5619 = vmatpush1.msra.mxu0 %v11972_v46  ;;  %5690 = vmatpush1.msra.mxu1 %v14139_v26  ;;  %v14140_v26 = vld [vmem:[#allocation48_spill] sm:$0xff] }
 0x95b   :  { %5620 = vmatprep.subr.mxu0 %v11978_v57  ;;  %5691 = vmatprep.subr.mxu1 %v14136_v30 }
 0x95c   :  { %5621 = vmatpush1.msra.mxu0 %v11984_v52  ;;  %5692 = vmatpush1.msra.mxu1 %v11986_v14 }
 0x95d   :  { %5622 = vmatprep.subr.mxu0 %v11990_v37  ;;  %5693 = vmatprep.subr.mxu1 %v11992_v59 }
 0x95e   :  { %5623 = vmatpush1.msra.mxu0 %v11996_v36  ;;  %5656 = vmatprep.mubr.f32.mxu0 %v14077_v8 }
 0x95f   :  { %5694 = vmatpush1.msra.mxu1 %v12000_v1  ;;  %5727 = vmatprep.mubr.f32.mxu1 %v14077_v8 }
 0x960   :  { %5657 = vmatmul.mubr.f32.vlgmr.msra.gmra.mxu0 %v14140_v26  ;;  %5728 = vmatmul.mubr.f32.vlgmr.msra.gmra.mxu1 %v14140_v26  ;;  %v14141_v26 = vld [vmem:[#allocation41_spill] sm:$0xff] }
 0x961   :  { %5734 = vmatprep.subr.mxu0 %v11811_v61  ;;  %5805 = vmatprep.subr.mxu1 %v11813_v2 }
 0x962   :  { %5735 = vmatpush1.msra.mxu0 %v11816_v38  ;;  %5806 = vmatpush1.msra.mxu1 %v11818_v39 }
 0x963   :  { %5736 = vmatprep.subr.mxu0 %v11822_v40  ;;  %5807 = vmatprep.subr.mxu1 %v11824_v41 }
 0x964   :  { %5737 = vmatpush1.msra.mxu0 %v11828_v42  ;;  %5808 = vmatpush1.msra.mxu1 %v11830_v43 }
 0x965   :  { %5738 = vmatprep.subr.mxu0 %v11834_v4  ;;  %5809 = vmatprep.subr.mxu1 %v11836_v6 }
 0x966   :  { %5739 = vmatpush1.msra.mxu0 %v11840_v16  ;;  %5810 = vmatpush1.msra.mxu1 %v11842_v23 }
 0x967   :  { %5740 = vmatprep.subr.mxu0 %v11846_v24  ;;  %5811 = vmatprep.subr.mxu1 %v11848_v45 }
 0x968   :  { %5741 = vmatpush1.msra.mxu0 %v11852_v27  ;;  %5812 = vmatpush1.msra.mxu1 %v11854_v32 }
 0x969   :  { %5742 = vmatprep.subr.mxu0 %v11858_v21  ;;  %5813 = vmatprep.subr.mxu1 %v11860_v19 }
 0x96a   :  { %5743 = vmatpush1.msra.mxu0 %v11864_v29  ;;  %5814 = vmatpush1.msra.mxu1 %v11866_v44 }
 0x96b   :  { %5744 = vmatprep.subr.mxu0 %v11870_v49  ;;  %5815 = vmatprep.subr.mxu1 %v11872_v25 }
 0x96c   :  { %5745 = vmatpush1.msra.mxu0 %v11876_v9  ;;  %5816 = vmatpush1.msra.mxu1 %v11878_v55 }
 0x96d   :  { %5746 = vmatprep.subr.mxu0 %v11882_v20  ;;  %5817 = vmatprep.subr.mxu1 %v11884_v62 }
 0x96e   :  { %5747 = vmatpush1.msra.mxu0 %v11888_v48  ;;  %5818 = vmatpush1.msra.mxu1 %v11890_v54 }
 0x96f   :  { %5748 = vmatprep.subr.mxu0 %v11894_v50  ;;  %5819 = vmatprep.subr.mxu1 %v11896_v13 }
 0x970   :  { %5749 = vmatpush1.msra.mxu0 %v11900_v56  ;;  %5820 = vmatpush1.msra.mxu1 %v11902_v47 }
 0x971   :  { %5750 = vmatprep.subr.mxu0 %v11906_v15  ;;  %5821 = vmatprep.subr.mxu1 %v11908_v0 }
 0x972   :  { %5751 = vmatpush1.msra.mxu0 %v11912_v10  ;;  %5822 = vmatpush1.msra.mxu1 %v11914_v11 }
 0x973   :  { %5752 = vmatprep.subr.mxu0 %v11918_v3  ;;  %5823 = vmatprep.subr.mxu1 %v11920_v7 }
 0x974   :  { %5753 = vmatpush1.msra.mxu0 %v11924_v17  ;;  %5824 = vmatpush1.msra.mxu1 %v11926_v63 }
 0x975   :  { %5754 = vmatprep.subr.mxu0 %v11930_v53  ;;  %5825 = vmatprep.subr.mxu1 %v11932_v18 }
 0x976   :  { %5755 = vmatpush1.msra.mxu0 %v11936_v31  ;;  %5826 = vmatpush1.msra.mxu1 %v11938_v5 }
 0x977   :  { %5756 = vmatprep.subr.mxu0 %v14141_v26  ;;  %5827 = vmatprep.subr.mxu1 %v11944_v22  ;;  %v14142_v26 = vld [vmem:[#allocation73_spill] sm:$0xff] }
 0x978   :  { %5757 = vmatpush1.msra.mxu0 %v14138_v34  ;;  %5828 = vmatpush1.msra.mxu1 %v11950_v28 }
 0x979   :  { %5758 = vmatprep.subr.mxu0 %v11954_v33  ;;  %5829 = vmatprep.subr.mxu1 %v11956_v58 }
 0x97a   :  { %5759 = vmatpush1.msra.mxu0 %v11960_v51  ;;  %5830 = vmatpush1.msra.mxu1 %v11962_v12 }
 0x97b   :  { %5760 = vmatprep.subr.mxu0 %v11966_v60  ;;  %5831 = vmatprep.subr.mxu1 %v14135_v35 }
 0x97c   :  { %5761 = vmatpush1.msra.mxu0 %v11972_v46  ;;  %5832 = vmatpush1.msra.mxu1 %v14142_v26  ;;  %v14143_v26 = vld [vmem:[#allocation31_spill] sm:$0xff] }
 0x97d   :  { %5762 = vmatprep.subr.mxu0 %v11978_v57  ;;  %5833 = vmatprep.subr.mxu1 %v14136_v30 }
 0x97e   :  { %5763 = vmatpush1.msra.mxu0 %v11984_v52  ;;  %5834 = vmatpush1.msra.mxu1 %v11986_v14 }
 0x97f   :  { %5764 = vmatprep.subr.mxu0 %v11990_v37  ;;  %5835 = vmatprep.subr.mxu1 %v11992_v59 }
 0x980   :  { %5765 = vmatpush1.msra.mxu0 %v11996_v36  ;;  %5798 = vmatprep.mubr.f32.mxu0 %v14077_v8 }
 0x981   :  { %5836 = vmatpush1.msra.mxu1 %v12000_v1  ;;  %5869 = vmatprep.mubr.f32.mxu1 %v14077_v8 }
 0x982   :  { %5799 = vmatmul.mubr.f32.vlgmr.msra.gmra.mxu0 %v14143_v26  ;;  %5870 = vmatmul.mubr.f32.vlgmr.msra.gmra.mxu1 %v14143_v26  ;;  %v14144_v26 = vld [vmem:[#allocation41_spill] sm:$0xff] }
 0x983   :  { %5876 = vmatprep.subr.mxu0 %v11811_v61  ;;  %5947 = vmatprep.subr.mxu1 %v11813_v2 }
 0x984   :  { %5877 = vmatpush1.msra.mxu0 %v11816_v38  ;;  %5948 = vmatpush1.msra.mxu1 %v11818_v39 }
 0x985   :  { %5878 = vmatprep.subr.mxu0 %v11822_v40  ;;  %5949 = vmatprep.subr.mxu1 %v11824_v41 }
 0x986   :  { %5879 = vmatpush1.msra.mxu0 %v11828_v42  ;;  %5950 = vmatpush1.msra.mxu1 %v11830_v43 }
 0x987   :  { %5880 = vmatprep.subr.mxu0 %v11834_v4  ;;  %5951 = vmatprep.subr.mxu1 %v11836_v6 }
 0x988   :  { %5881 = vmatpush1.msra.mxu0 %v11840_v16  ;;  %5952 = vmatpush1.msra.mxu1 %v11842_v23 }
 0x989   :  { %5882 = vmatprep.subr.mxu0 %v11846_v24  ;;  %5953 = vmatprep.subr.mxu1 %v11848_v45 }
 0x98a   :  { %5883 = vmatpush1.msra.mxu0 %v11852_v27  ;;  %5954 = vmatpush1.msra.mxu1 %v11854_v32 }
 0x98b   :  { %5884 = vmatprep.subr.mxu0 %v11858_v21  ;;  %5955 = vmatprep.subr.mxu1 %v11860_v19 }
 0x98c   :  { %5885 = vmatpush1.msra.mxu0 %v11864_v29  ;;  %5956 = vmatpush1.msra.mxu1 %v11866_v44 }
 0x98d   :  { %5886 = vmatprep.subr.mxu0 %v11870_v49  ;;  %5957 = vmatprep.subr.mxu1 %v11872_v25 }
 0x98e   :  { %5887 = vmatpush1.msra.mxu0 %v11876_v9  ;;  %5958 = vmatpush1.msra.mxu1 %v11878_v55 }
 0x98f   :  { %5888 = vmatprep.subr.mxu0 %v11882_v20  ;;  %5959 = vmatprep.subr.mxu1 %v11884_v62 }
 0x990   :  { %5889 = vmatpush1.msra.mxu0 %v11888_v48  ;;  %5960 = vmatpush1.msra.mxu1 %v11890_v54 }
 0x991   :  { %5890 = vmatprep.subr.mxu0 %v11894_v50  ;;  %5961 = vmatprep.subr.mxu1 %v11896_v13 }
 0x992   :  { %5891 = vmatpush1.msra.mxu0 %v11900_v56  ;;  %5962 = vmatpush1.msra.mxu1 %v11902_v47 }
 0x993   :  { %5892 = vmatprep.subr.mxu0 %v11906_v15  ;;  %5963 = vmatprep.subr.mxu1 %v11908_v0 }
 0x994   :  { %5893 = vmatpush1.msra.mxu0 %v11912_v10  ;;  %5964 = vmatpush1.msra.mxu1 %v11914_v11 }
 0x995   :  { %5894 = vmatprep.subr.mxu0 %v11918_v3  ;;  %5965 = vmatprep.subr.mxu1 %v11920_v7 }
 0x996   :  { %5895 = vmatpush1.msra.mxu0 %v11924_v17  ;;  %5966 = vmatpush1.msra.mxu1 %v11926_v63 }
 0x997   :  { %5896 = vmatprep.subr.mxu0 %v11930_v53  ;;  %5967 = vmatprep.subr.mxu1 %v11932_v18 }
 0x998   :  { %5897 = vmatpush1.msra.mxu0 %v11936_v31  ;;  %5968 = vmatpush1.msra.mxu1 %v11938_v5 }
 0x999   :  { %5898 = vmatprep.subr.mxu0 %v14144_v26  ;;  %5969 = vmatprep.subr.mxu1 %v11944_v22  ;;  %v14145_v26 = vld [vmem:[#allocation73_spill] sm:$0xff] }
 0x99a   :  { %5899 = vmatpush1.msra.mxu0 %v14138_v34  ;;  %5970 = vmatpush1.msra.mxu1 %v11950_v28 }
 0x99b   :  { %5900 = vmatprep.subr.mxu0 %v11954_v33  ;;  %5971 = vmatprep.subr.mxu1 %v11956_v58 }
 0x99c   :  { %5901 = vmatpush1.msra.mxu0 %v11960_v51  ;;  %5972 = vmatpush1.msra.mxu1 %v11962_v12 }
 0x99d   :  { %5902 = vmatprep.subr.mxu0 %v11966_v60  ;;  %5973 = vmatprep.subr.mxu1 %v14135_v35 }
 0x99e   :  { %5903 = vmatpush1.msra.mxu0 %v11972_v46  ;;  %5974 = vmatpush1.msra.mxu1 %v14145_v26  ;;  %v14146_v26 = vld [vmem:[#allocation54_spill] sm:$0xff] }
 0x99f   :  { %5904 = vmatprep.subr.mxu0 %v11978_v57  ;;  %5975 = vmatprep.subr.mxu1 %v14136_v30 }
 0x9a0   :  { %5905 = vmatpush1.msra.mxu0 %v11984_v52  ;;  %5976 = vmatpush1.msra.mxu1 %v11986_v14 }
 0x9a1   :  { %5906 = vmatprep.subr.mxu0 %v11990_v37  ;;  %5977 = vmatprep.subr.mxu1 %v11992_v59 }
 0x9a2   :  { %5907 = vmatpush1.msra.mxu0 %v11996_v36  ;;  %5940 = vmatprep.mubr.f32.mxu0 %v14077_v8 }
 0x9a3   :  { %5978 = vmatpush1.msra.mxu1 %v12000_v1  ;;  %6011 = vmatprep.mubr.f32.mxu1 %v14077_v8 }
 0x9a4   :  { %5941 = vmatmul.mubr.f32.vlgmr.msra.gmra.mxu0 %v14146_v26  ;;  %6012 = vmatmul.mubr.f32.vlgmr.msra.gmra.mxu1 %v14146_v26  ;;  %v12294_v26 = vpop.f32.mrf.mxu0 }
 0x9a5   :  { %6018 = vmatprep.subr.mxu0 %v11811_v61  ;;  %6089 = vmatprep.subr.mxu1 %v11813_v2  ;;  %14147 = vst [vmem:[#allocation84_spill] sm:$0xff] %v12294_v26 }
 0x9a6   :  { %6019 = vmatpush1.msra.mxu0 %v11816_v38  ;;  %6090 = vmatpush1.msra.mxu1 %v11818_v39 }
 0x9a7   :  { %6020 = vmatprep.subr.mxu0 %v11822_v40  ;;  %6091 = vmatprep.subr.mxu1 %v11824_v41  ;;  %v12298_v40 = vpop.f32.mrf.mxu1 }
 0x9a8   :  { %6021 = vmatpush1.msra.mxu0 %v11828_v42  ;;  %6092 = vmatpush1.msra.mxu1 %v11830_v43  ;;  %14148 = vst [vmem:[#allocation20_spill] sm:$0xff] %v12298_v40 }
 0x9a9   :  { %6022 = vmatprep.subr.mxu0 %v11834_v4  ;;  %6093 = vmatprep.subr.mxu1 %v11836_v6  ;;  %v12310_v26 = vpop.f32.mrf.mxu1 }
 0x9aa   :  { %6023 = vmatpush1.msra.mxu0 %v11840_v16  ;;  %6094 = vmatpush1.msra.mxu1 %v11842_v23  ;;  %v12306_v23 = vpop.f32.mrf.mxu0  ;;  %14150 = vst [vmem:[#allocation71_spill] sm:$0xff] %v12310_v26 }
 0x9ab   :  { %6024 = vmatprep.subr.mxu0 %v11846_v24  ;;  %6095 = vmatprep.subr.mxu1 %v11848_v45  ;;  %14149 = vst [vmem:[#allocation25_spill] sm:$0xff] %v12306_v23 }
 0x9ac   :  { %6025 = vmatpush1.msra.mxu0 %v11852_v27  ;;  %6096 = vmatpush1.msra.mxu1 %v11854_v32  ;;  %v12314_v40 = vpop.f32.mrf.mxu0 }
 0x9ad   :  { %6026 = vmatprep.subr.mxu0 %v11858_v21  ;;  %6097 = vmatprep.subr.mxu1 %v11860_v19  ;;  %14151 = vst [vmem:[#allocation72_spill] sm:$0xff] %v12314_v40 }
 0x9ae   :  { %6027 = vmatpush1.msra.mxu0 %v11864_v29  ;;  %6098 = vmatpush1.msra.mxu1 %v11866_v44  ;;  %v12318_v29 = vpop.f32.mrf.mxu1  ;;  %v12326_v26 = vpop.f32.mrf.mxu0 }
 0x9af   :  { %6028 = vmatprep.subr.mxu0 %v11870_v49  ;;  %6099 = vmatprep.subr.mxu1 %v11872_v25  ;;  %14152 = vst [vmem:[#allocation81_spill] sm:$0xff] %v12318_v29  ;;  %14153 = vst [vmem:[#allocation82_spill] sm:$0xff] %v12326_v26  ;;  %v14158_v26 = vld [vmem:[#allocation41_spill] sm:$0xff] }
 0x9b0   :  { %6029 = vmatpush1.msra.mxu0 %v11876_v9  ;;  %6100 = vmatpush1.msra.mxu1 %v11878_v55  ;;  %v12330_v23 = vpop.f32.mrf.mxu1  ;;  %v12334_v29 = vpop.f32.mrf.mxu0 }
 0x9b1   :  { %6030 = vmatprep.subr.mxu0 %v11882_v20  ;;  %6101 = vmatprep.subr.mxu1 %v11884_v62  ;;  %14154 = vst [vmem:[#allocation49_spill] sm:$0xff] %v12330_v23  ;;  %14155 = vst [vmem:[#allocation21_spill] sm:$0xff] %v12334_v29 }
 0x9b2   :  { %6031 = vmatpush1.msra.mxu0 %v11888_v48  ;;  %6102 = vmatpush1.msra.mxu1 %v11890_v54  ;;  %v12338_v40 = vpop.f32.mrf.mxu1  ;;  %v12346_v23 = vpop.f32.mrf.mxu0 }
 0x9b3   :  { %6032 = vmatprep.subr.mxu0 %v11894_v50  ;;  %6103 = vmatprep.subr.mxu1 %v11896_v13  ;;  %14156 = vst [vmem:[#allocation27_spill] sm:$0xff] %v12338_v40  ;;  %14157 = vst [vmem:[#allocation44_spill] sm:$0xff] %v12346_v23 }
 0x9b4   :  { %6033 = vmatpush1.msra.mxu0 %v11900_v56  ;;  %6104 = vmatpush1.msra.mxu1 %v11902_v47  ;;  %v12350_v29 = vpop.f32.mrf.mxu1  ;;  %v12354_v40 = vpop.f32.mrf.mxu0 }
 0x9b5   :  { %6034 = vmatprep.subr.mxu0 %v11906_v15  ;;  %6105 = vmatprep.subr.mxu1 %v11908_v0  ;;  %14159 = vst [vmem:[#allocation50_spill] sm:$0xff] %v12350_v29  ;;  %14160 = vst [vmem:[#allocation22_spill] sm:$0xff] %v12354_v40  ;;  %v14162_v29 = vld [vmem:[#allocation73_spill] sm:$0xff] }
 0x9b6   :  { %6035 = vmatpush1.msra.mxu0 %v11912_v10  ;;  %6106 = vmatpush1.msra.mxu1 %v11914_v11  ;;  %v12366_v23 = vpop.f32.mrf.mxu0 }
 0x9b7   :  { %6036 = vmatprep.subr.mxu0 %v11918_v3  ;;  %6107 = vmatprep.subr.mxu1 %v11920_v7  ;;  %14163 = vst [vmem:[#allocation45_spill] sm:$0xff] %v12366_v23 }
 0x9b8   :  { %6037 = vmatpush1.msra.mxu0 %v11924_v17  ;;  %6108 = vmatpush1.msra.mxu1 %v11926_v63 }
 0x9b9   :  { %6038 = vmatprep.subr.mxu0 %v11930_v53  ;;  %6109 = vmatprep.subr.mxu1 %v11932_v18 }
 0x9ba   :  { %6039 = vmatpush1.msra.mxu0 %v11936_v31  ;;  %6110 = vmatpush1.msra.mxu1 %v11938_v5  ;;  %v12358_v31 = vpop.f32.mrf.mxu1 }
 0x9bb   :  { %6040 = vmatprep.subr.mxu0 %v14158_v26  ;;  %6111 = vmatprep.subr.mxu1 %v11944_v22  ;;  %14161 = vst [vmem:[#allocation28_spill] sm:$0xff] %v12358_v31  ;;  %v12374_v31 = vpop.f32.mrf.mxu0 }
 0x9bc   :  { %6041 = vmatpush1.msra.mxu0 %v14138_v34  ;;  %6112 = vmatpush1.msra.mxu1 %v11950_v28  ;;  %v12370_v40 = vpop.f32.mrf.mxu1  ;;  %14165 = vst [vmem:[#allocation23_spill] sm:$0xff] %v12374_v31 }
 0x9bd   :  { %6042 = vmatprep.subr.mxu0 %v11954_v33  ;;  %6113 = vmatprep.subr.mxu1 %v11956_v58  ;;  %14164 = vst [vmem:[#allocation51_spill] sm:$0xff] %v12370_v40  ;;  %v14167_v40 = vld [vmem:[#allocation32_spill] sm:$0xff]  ;;  %v12386_v23 = vpop.f32.mrf.mxu0 }
 0x9be   :  { %6043 = vmatpush1.msra.mxu0 %v11960_v51  ;;  %6114 = vmatpush1.msra.mxu1 %v11962_v12  ;;  %14168 = vst [vmem:[#allocation46_spill] sm:$0xff] %v12386_v23  ;;  %v12675_v23 = vld [vmem:[#allocation10 + $0x60] sm:$0xff] }
 0x9bf   :  { %6044 = vmatprep.subr.mxu0 %v11966_v60  ;;  %6115 = vmatprep.subr.mxu1 %v14135_v35 }
 0x9c0   :  { %6045 = vmatpush1.msra.mxu0 %v11972_v46  ;;  %6116 = vmatpush1.msra.mxu1 %v14162_v29  ;;  %v12378_v46 = vpop.f32.mrf.mxu1 }
 0x9c1   :  { %6046 = vmatprep.subr.mxu0 %v11978_v57  ;;  %6117 = vmatprep.subr.mxu1 %v14136_v30  ;;  %14166 = vst [vmem:[#allocation29_spill] sm:$0xff] %v12378_v46  ;;  %v12394_v46 = vpop.f32.mrf.mxu0 }
 0x9c2   :  { %6047 = vmatpush1.msra.mxu0 %v11984_v52  ;;  %6118 = vmatpush1.msra.mxu1 %v11986_v14  ;;  %v12390_v31 = vpop.f32.mrf.mxu1 }
 0x9c3   :  { %6048 = vmatprep.subr.mxu0 %v11990_v37  ;;  %6119 = vmatprep.subr.mxu1 %v11992_v59  ;;  %14169 = vst [vmem:[#allocation52_spill] sm:$0xff] %v12390_v31 }
 0x9c4   :  { %6049 = vmatpush1.msra.mxu0 %v11996_v36  ;;  %6082 = vmatprep.mubr.f32.mxu0 %v14077_v8 }
 0x9c5   :  { %6120 = vmatpush1.msra.mxu1 %v12000_v1  ;;  %6153 = vmatprep.mubr.f32.mxu1 %v14077_v8  ;;  %v14170_v1 = vld [vmem:[#allocation39_spill] sm:$0xff]  ;;  %v12398_v8 = vpop.f32.mrf.mxu1 }
 0x9c6   :  { %6083 = vmatmul.mubr.f32.vlgmr.msra.gmra.mxu0 %v14167_v40  ;;  %6154 = vmatmul.mubr.f32.vlgmr.msra.gmra.mxu1 %v14167_v40 }
 0x9c7   :  { %6160 = vmatprep.subr.mxu0 %v11811_v61  ;;  %6231 = vmatprep.subr.mxu1 %v11813_v2  ;;  %v14171_v61 = vld [vmem:[#allocation64_spill] sm:$0xff]  ;;  %v12406_v2 = vpop.f32.mrf.mxu0 }
 0x9c8   :  { %6161 = vmatpush1.msra.mxu0 %v11816_v38  ;;  %6232 = vmatpush1.msra.mxu1 %v11818_v39  ;;  %v12410_v38 = vpop.f32.mrf.mxu1  ;;  %14217 = vst [vmem:[#allocation64_spill] sm:$0xff] %v12675_v23 }
 0x9c9   :  { %6162 = vmatprep.subr.mxu0 %v14170_v1  ;;  %6233 = vmatprep.subr.mxu1 %v11824_v41  ;;  %v12414_v39 = vpop.f32.mrf.mxu0  ;;  %v14172_v41 = vld [vmem:[#allocation40_spill] sm:$0xff] }
 0x9ca   :  { %6163 = vmatpush1.msra.mxu0 %v11828_v42  ;;  %6234 = vmatpush1.msra.mxu1 %v11830_v43  ;;  %v12418_v40 = vpop.f32.mrf.mxu1  ;;  %v9134_v1 = vld [vmem:[#allocation8 + $0x180] sm:$0xff] }
 0x9cb   :  { %6164 = vmatprep.subr.mxu0 %v11834_v4  ;;  %6235 = vmatprep.subr.mxu1 %v11836_v6  ;;  %v12426_v42 = vpop.f32.mrf.mxu0  ;;  %v4086_v6 = vld [vmem:[%s13557_s8] sm:$0xf] }
 0x9cc   :  { %6165 = vmatpush1.msra.mxu0 %v11840_v16  ;;  %6236 = vmatpush1.msra.mxu1 %v14171_v61  ;;  %v12430_v43 = vpop.f32.mrf.mxu1  ;;  %v9142_v61 = vld [vmem:[#allocation8 + $0x140] sm:$0xff] }
 0x9cd   :  { %6166 = vmatprep.subr.mxu0 %v11846_v24  ;;  %6237 = vmatprep.subr.mxu1 %v11848_v45  ;;  %v5168_v4 = vpop.f32.mrf.mxu0  ;;  %v14173_v24 = vld [vmem:[#allocation58_spill] sm:$0xff] }
 0x9ce   :  { %6167 = vmatpush1.msra.mxu0 %v11852_v27  ;;  %6238 = vmatpush1.msra.mxu1 %v11854_v32  ;;  %v5239_v16 = vpop.f32.mrf.mxu1  ;;  %v12446_v45 = vrot.slane %v4086_v6, %v14173_v24  ;;  %v14174_v27 = vld [vmem:[#allocation74_spill] sm:$0xff] }
 0x9cf   :  { %6168 = vmatprep.subr.mxu0 %v11858_v21  ;;  %6239 = vmatprep.subr.mxu1 %v11860_v19  ;;  %v12449_v32 = vrot.slane %v4086_v6, %v14174_v27  ;;  %v5170_v21 = vpop.f32.mrf.mxu0  ;;  %v14175_v19 = vld [vmem:[#allocation61_spill] sm:$0xff]  ;;  %v12639_v27 = vld [vmem:[#allocation10 + $0xb8] sm:$0xff] }
 0x9d0   :  { %6169 = vmatpush1.msra.mxu0 %v14172_v41  ;;  %6240 = vmatpush1.msra.mxu1 %v11866_v44  ;;  %v12454_v44 = vrot.slane %v4086_v6, %v14175_v19  ;;  %v9143_v41 = vld [vmem:[#allocation8 + $0x150] sm:$0xff]  ;;  %14209 = vst [vmem:[#allocation66_spill] sm:$0xff] %v12639_v27  ;;  %v12643_v19 = vld [vmem:[#allocation10 + $0xa0] sm:$0xff] }
 0x9d1   :  { %6170 = vmatprep.subr.mxu0 %v11870_v49  ;;  %6241 = vmatprep.subr.mxu1 %v11872_v25  ;;  %v5241_v49 = vpop.f32.mrf.mxu1  ;;  %v14177_v25 = vld [vmem:[#allocation76_spill] sm:$0xff]  ;;  %14210 = vst [vmem:[#allocation48_spill] sm:$0xff] %v12643_v19  ;;  %v12645_v24 = vld [vmem:[#allocation10 + $0xb0] sm:$0xff] }
 0x9d2   :  { %6171 = vmatpush1.msra.mxu0 %v11876_v9  ;;  %6242 = vmatpush1.msra.mxu1 %v11878_v55  ;;  %14176 = vst [vmem:[#allocation24_spill] sm:$0xff] %v12454_v44  ;;  %v12459_v9 = vrot.slane %v4086_v6, %v14177_v25  ;;  %v5169_v55 = vadd.f32 %v5168_v4, %v12446_v45  ;;  %v9144_v4 = vld [vmem:[#allocation8 + $0x128] sm:$0xff]  ;;  %v9145_v6 = vld [vmem:[#allocation8 + $0x138] sm:$0xff]  ;;  %14211 = vst [vmem:[#allocation31_spill] sm:$0xff] %v12645_v24 }
 0x9d3   :  { %6172 = vmatprep.subr.mxu0 %v11882_v20  ;;  %6243 = vmatprep.subr.mxu1 %v11884_v62  ;;  %v5240_v20 = vadd.f32 %v5239_v16, %v12449_v32  ;;  %v5171_v62 = vadd.f32 %v5170_v21, %v12454_v44  ;;  %v9146_v16 = vld [vmem:[#allocation8 + $0x120] sm:$0xff]  ;;  %v9147_v21 = vld [vmem:[#allocation8 + $0x130] sm:$0xff]  ;;  %v12637_v25 = vld [vmem:[#allocation10 + $0xa8] sm:$0xff] }
 0x9d4   :  { %6173 = vmatpush1.msra.mxu0 %v11888_v48  ;;  %6244 = vmatpush1.msra.mxu1 %v11890_v54  ;;  %v14178_v48 = vld [vmem:[#allocation65_spill] sm:$0xff]  ;;  %14208 = vst [vmem:[#allocation43_spill] sm:$0xff] %v12637_v25  ;;  %v4958_v31 = vadd.f32 %v12410_v38, %v12459_v9 }
 0x9d5   :  { %6174 = vmatprep.subr.mxu0 %v11894_v50  ;;  %6245 = vmatprep.subr.mxu1 %v11896_v13  ;;  %v5242_v13 = vadd.f32 %v5241_v49, %v12459_v9  ;;  %v9148_v49 = vld [vmem:[#allocation8 + $0x108] sm:$0xff] }
 0x9d6   :  { %6175 = vmatpush1.msra.mxu0 %v11900_v56  ;;  %6246 = vmatpush1.msra.mxu1 %v11902_v47 }
 0x9d7   :  { %6176 = vmatprep.subr.mxu0 %v11906_v15  ;;  %6247 = vmatprep.subr.mxu1 %v11908_v0 }
 0x9d8   :  { %6177 = vmatpush1.msra.mxu0 %v11912_v10  ;;  %6248 = vmatpush1.msra.mxu1 %v11914_v11 }
 0x9d9   :  { %6178 = vmatprep.subr.mxu0 %v11918_v3  ;;  %6249 = vmatprep.subr.mxu1 %v11920_v7  ;;  %v14183_v3 = vld [vmem:[#allocation26_spill] sm:$0xff]  ;;  %v14184_v7 = vmov 0.0  }
 0x9da   :  { %6179 = vmatpush1.msra.mxu0 %v11924_v17  ;;  %6250 = vmatpush1.msra.mxu1 %v11926_v63  ;;  %v14185_v17 = vld [vmem:[#allocation83_spill] sm:$0xff]  ;;  %v9120_v63 = vld [vmem:[#allocation8 + $0x1e8] sm:$0xff] }
 0x9db   :  { %6180 = vmatprep.subr.mxu0 %v11930_v53  ;;  %6251 = vmatprep.subr.mxu1 %v11932_v18  ;;  %v9121_v53 = vld [vmem:[#allocation8 + $0x1f8] sm:$0xff]  ;;  %v9122_v18 = vld [vmem:[#allocation8 + $0x1e0] sm:$0xff] }
 0x9dc   :  { %6181 = vmatpush1.msra.mxu0 %v14178_v48  ;;  %6252 = vmatpush1.msra.mxu1 %v11938_v5  ;;  %v5374_v54 = vpop.f32.mrf.mxu0  ;;  %v5445_v50 = vpop.f32.mrf.mxu1  ;;  %v9123_v5 = vld [vmem:[#allocation8 + $0x1f0] sm:$0xff]  ;;  %v9152_v48 = vld [vmem:[#allocation8 + $0xe8] sm:$0xff] }
 0x9dd   :  { %6182 = vmatprep.subr.mxu0 %v14158_v26  ;;  %6253 = vmatprep.subr.mxu1 %v11944_v22  ;;  %v12471_v56 = vadd.f32 %v5374_v54, %v5169_v55  ;;  %v12473_v47 = vadd.f32 %v5445_v50, %v5240_v20  ;;  %v9126_v22 = vld [vmem:[#allocation8 + $0x1c0] sm:$0xff]  ;;  %v9141_v26 = vld [vmem:[#allocation8 + $0x158] sm:$0xff] }
 0x9de   :  { %6183 = vmatpush1.msra.mxu0 %v14138_v34  ;;  %6254 = vmatpush1.msra.mxu1 %v11950_v28  ;;  %v5376_v15 = vpop.f32.mrf.mxu0  ;;  %v5447_v0 = vpop.f32.mrf.mxu1  ;;  %v9128_v28 = vld [vmem:[#allocation8 + $0x1a8] sm:$0xff]  ;;  %v9149_v55 = vld [vmem:[#allocation8 + $0x118] sm:$0xff]  ;;  %v9150_v20 = vld [vmem:[#allocation8 + $0x100] sm:$0xff] }
 0x9df   :  { %14179 = vst [vmem:[#allocation30_spill] sm:$0xff] %v12471_v56  ;;  %14180 = vst [vmem:[#allocation47_spill] sm:$0xff] %v12473_v47  ;;  %6184 = vmatprep.subr.mxu0 %v11954_v33  ;;  %6255 = vmatprep.subr.mxu1 %v11956_v58  ;;  %v12479_v10 = vadd.f32 %v5376_v15, %v5171_v62  ;;  %v12481_v11 = vadd.f32 %v5447_v0, %v5242_v13  ;;  %v9129_v33 = vld [vmem:[#allocation8 + $0x1b8] sm:$0xff]  ;;  %v9130_v58 = vld [vmem:[#allocation8 + $0x1a0] sm:$0xff] }
 0x9e0   :  { %6185 = vmatpush1.msra.mxu0 %v11960_v51  ;;  %6256 = vmatpush1.msra.mxu1 %v11962_v12  ;;  %v9131_v51 = vld [vmem:[#allocation8 + $0x1b0] sm:$0xff]  ;;  %v9132_v12 = vld [vmem:[#allocation8 + $0x188] sm:$0xff]  ;;  %v9153_v54 = vld [vmem:[#allocation8 + $0xf8] sm:$0xff]  ;;  %v4956_v56 = vadd.f32 %v12398_v8, %v12449_v32 }
 0x9e1   :  { %14181 = vst [vmem:[#allocation53_spill] sm:$0xff] %v12479_v10  ;;  %14182 = vst [vmem:[#allocation69_spill] sm:$0xff] %v12481_v11  ;;  %6186 = vmatprep.subr.mxu0 %v11966_v60  ;;  %6257 = vmatprep.subr.mxu1 %v14135_v35  ;;  %v9133_v60 = vld [vmem:[#allocation8 + $0x198] sm:$0xff]  ;;  %v9136_v35 = vld [vmem:[#allocation8 + $0x168] sm:$0xff]  ;;  %v4885_v10 = vadd.f32 %v12394_v46, %v12446_v45 }
 0x9e2   :  { %6187 = vmatpush1.msra.mxu0 %v14183_v3  ;;  %6258 = vmatpush1.msra.mxu1 %v14162_v29  ;;  %v14186_v29 = vld [vmem:[#allocation33_spill] sm:$0xff]  ;;  %v9154_v50 = vld [vmem:[#allocation8 + $0xe0] sm:$0xff]  ;;  %v9157_v0 = vld [vmem:[#allocation8 + $0xd8] sm:$0xff] }
 0x9e3   :  { %6188 = vmatprep.subr.mxu0 %v11978_v57  ;;  %6259 = vmatprep.subr.mxu1 %v14136_v30  ;;  %v9127_v30 = vld [vmem:[#allocation8 + $0x1d0] sm:$0xff]  ;;  %v9140_v34 = vld [vmem:[#allocation8 + $0x148] sm:$0xff]  ;;  %v9158_v3 = vld [vmem:[#allocation8 + $0xc0] sm:$0xff] }
 0x9e4   :  { %6189 = vmatpush1.msra.mxu0 %v11984_v52  ;;  %6260 = vmatpush1.msra.mxu1 %v11986_v14  ;;  %v9135_v57 = vld [vmem:[#allocation8 + $0x190] sm:$0xff]  ;;  %v9137_v52 = vld [vmem:[#allocation8 + $0x178] sm:$0xff]  ;;  %v9138_v14 = vld [vmem:[#allocation8 + $0x160] sm:$0xff] }
 0x9e5   :  { %6190 = vmatprep.subr.mxu0 %v11990_v37  ;;  %6261 = vmatprep.subr.mxu1 %v11992_v59  ;;  %v9124_v59 = vld [vmem:[#allocation8 + $0x1c8] sm:$0xff]  ;;  %v9139_v37 = vld [vmem:[#allocation8 + $0x170] sm:$0xff]  ;;  %v12651_v47 = vld [vmem:[#allocation10 + $0x98] sm:$0xff] }
 0x9e6   :  { %6191 = vmatpush1.msra.mxu0 %v11996_v36  ;;  %6224 = vmatprep.mubr.f32.mxu0 %v14184_v7  ;;  %v9125_v36 = vld [vmem:[#allocation8 + $0x1d8] sm:$0xff]  ;;  %v9151_v62 = vld [vmem:[#allocation8 + $0x110] sm:$0xff]  ;;  %v9156_v15 = vld [vmem:[#allocation8 + $0xc8] sm:$0xff]  ;;  %14213 = vst [vmem:[#allocation41_spill] sm:$0xff] %v12651_v47 }
 0x9e7   :  { %6262 = vmatpush1.msra.mxu1 %v14185_v17  ;;  %6295 = vmatprep.mubr.f32.mxu1 %v14184_v7  ;;  %v9155_v13 = vld [vmem:[#allocation8 + $0xf0] sm:$0xff]  ;;  %v12649_v11 = vld [vmem:[#allocation10 + $0x88] sm:$0xff]  ;;  %v12669_v46 = vld [vmem:[#allocation10 + $0x78] sm:$0xff] }
 0x9e8   :  { %6225 = vmatmul.mubr.f32.vlgmr.msra.gmra.mxu0 %v14186_v29  ;;  %6296 = vmatmul.mubr.f32.vlgmr.msra.gmra.mxu1 %v14186_v29  ;;  %v9159_v17 = vld [vmem:[#allocation8 + $0xd0] sm:$0xff]  ;;  %v5027_v29 = vadd.f32 %v12414_v39, %v12446_v45  ;;  %v9164_v39 = vld [vmem:[#allocation8 + $0x88] sm:$0xff]  ;;  %14212 = vst [vmem:[#allocation54_spill] sm:$0xff] %v12649_v11  ;;  %14216 = vst [vmem:[#allocation39_spill] sm:$0xff] %v12669_v46 }
 0x9e9   :  { %6302 = vmatprep.subr.mxu0 %v9120_v63  ;;  %6373 = vmatprep.subr.mxu1 %v9121_v53  ;;  %v5098_v63 = vadd.f32 %v12418_v40, %v12449_v32  ;;  %v9160_v53 = vld [vmem:[#allocation8 + $0xa8] sm:$0xff] }
 0x9ea   :  { %6303 = vmatpush1.msra.mxu0 %v9122_v18  ;;  %6374 = vmatpush1.msra.mxu1 %v9123_v5  ;;  %v9161_v18 = vld [vmem:[#allocation8 + $0xb8] sm:$0xff]  ;;  %v5029_v5 = vadd.f32 %v12426_v42, %v12454_v44  ;;  %v9167_v42 = vld [vmem:[#allocation8 + $0x90] sm:$0xff] }
 0x9eb   :  { %6304 = vmatprep.subr.mxu0 %v9124_v59  ;;  %6375 = vmatprep.subr.mxu1 %v9125_v36  ;;  %v9162_v59 = vld [vmem:[#allocation8 + $0xa0] sm:$0xff]  ;;  %v9163_v36 = vld [vmem:[#allocation8 + $0xb0] sm:$0xff] }
 0x9ec   :  { %6305 = vmatpush1.msra.mxu0 %v9126_v22  ;;  %6376 = vmatpush1.msra.mxu1 %v9127_v30 }
 0x9ed   :  { %6306 = vmatprep.subr.mxu0 %v9128_v28  ;;  %6377 = vmatprep.subr.mxu1 %v9129_v33  ;;  %v5100_v28 = vadd.f32 %v12430_v43, %v12459_v9  ;;  %v9165_v33 = vld [vmem:[#allocation8 + $0x98] sm:$0xff] }
 0x9ee   :  { %6307 = vmatpush1.msra.mxu0 %v9130_v58  ;;  %6378 = vmatpush1.msra.mxu1 %v9131_v51  ;;  %v9166_v51 = vld [vmem:[#allocation8 + $0x80] sm:$0xff] }
 0x9ef   :  { %6308 = vmatprep.subr.mxu0 %v9132_v12  ;;  %6379 = vmatprep.subr.mxu1 %v9133_v60 }
 0x9f0   :  { %6309 = vmatpush1.msra.mxu0 %v9134_v1  ;;  %6380 = vmatpush1.msra.mxu1 %v9135_v57  ;;  %v9168_v1 = vld [vmem:[#allocation8 + $0x68] sm:$0xff]  ;;  %v9169_v57 = vld [vmem:[#allocation8 + $0x78] sm:$0xff] }
 0x9f1   :  { %6310 = vmatprep.subr.mxu0 %v9136_v35  ;;  %6381 = vmatprep.subr.mxu1 %v9137_v52  ;;  %v9170_v52 = vld [vmem:[#allocation8 + $0x60] sm:$0xff] }
 0x9f2   :  { %6311 = vmatpush1.msra.mxu0 %v9138_v14  ;;  %6382 = vmatpush1.msra.mxu1 %v9139_v37  ;;  %v9171_v14 = vld [vmem:[#allocation8 + $0x70] sm:$0xff]  ;;  %v9172_v37 = vld [vmem:[#allocation8 + $0x48] sm:$0xff] }
 0x9f3   :  { %6312 = vmatprep.subr.mxu0 %v9140_v34  ;;  %6383 = vmatprep.subr.mxu1 %v9141_v26  ;;  %v9173_v34 = vld [vmem:[#allocation8 + $0x58] sm:$0xff]  ;;  %v9174_v26 = vld [vmem:[#allocation8 + $0x40] sm:$0xff] }
 0x9f4   :  { %6313 = vmatpush1.msra.mxu0 %v9142_v61  ;;  %6384 = vmatpush1.msra.mxu1 %v9143_v41  ;;  %v9175_v61 = vld [vmem:[#allocation8 + $0x50] sm:$0xff]  ;;  %v9176_v41 = vld [vmem:[#allocation8 + $0x28] sm:$0xff] }
 0x9f5   :  { %6314 = vmatprep.subr.mxu0 %v9144_v4  ;;  %6385 = vmatprep.subr.mxu1 %v9145_v6  ;;  %v9177_v4 = vld [vmem:[#allocation8 + $0x38] sm:$0xff]  ;;  %v9178_v6 = vld [vmem:[#allocation8 + $0x20] sm:$0xff] }
 0x9f6   :  { %6315 = vmatpush1.msra.mxu0 %v9146_v16  ;;  %6386 = vmatpush1.msra.mxu1 %v9147_v21  ;;  %v9179_v16 = vld [vmem:[#allocation8 + $0x30] sm:$0xff]  ;;  %v9180_v21 = vld [vmem:[#allocation8 + $0x8] sm:$0xff] }
 0x9f7   :  { %6316 = vmatprep.subr.mxu0 %v9148_v49  ;;  %6387 = vmatprep.subr.mxu1 %v9149_v55  ;;  %v9181_v49 = vld [vmem:[#allocation8 + $0x18] sm:$0xff]  ;;  %v9182_v55 = vld [vmem:[#allocation8] sm:$0xff] }
 0x9f8   :  { %6317 = vmatpush1.msra.mxu0 %v9150_v20  ;;  %6388 = vmatpush1.msra.mxu1 %v9151_v62  ;;  %v12518_v20 = vld [vmem:[#allocation10 + $0x1e8] sm:$0xff]  ;;  %v12520_v62 = vld [vmem:[#allocation10 + $0x1f8] sm:$0xff] }
 0x9f9   :  { %6318 = vmatprep.subr.mxu0 %v9152_v48  ;;  %6389 = vmatprep.subr.mxu1 %v9153_v54  ;;  %14191 = vst [vmem:[#allocation38_spill] sm:$0xff] %v12518_v20  ;;  %14192 = vst [vmem:[#allocation36_spill] sm:$0xff] %v12520_v62  ;;  %v9183_v48 = vld [vmem:[#allocation8 + $0x10] sm:$0xff]  ;;  %v12523_v54 = vld [vmem:[#allocation10 + $0x1e0] sm:$0xff] }
 0x9fa   :  { %6319 = vmatpush1.msra.mxu0 %v9154_v50  ;;  %6390 = vmatpush1.msra.mxu1 %v9155_v13  ;;  %v12525_v50 = vld [vmem:[#allocation10 + $0x1f0] sm:$0xff]  ;;  %v14193_v13 = vld [vmem:[#allocation63_spill] sm:$0xff] }
 0x9fb   :  { %6320 = vmatprep.subr.mxu0 %v9156_v15  ;;  %6391 = vmatprep.subr.mxu1 %v9157_v0  ;;  %v12529_v15 = vld [vmem:[#allocation10 + $0x1c8] sm:$0xff]  ;;  %v12531_v0 = vld [vmem:[#allocation10 + $0x1d8] sm:$0xff] }
 0x9fc   :  { %6321 = vmatpush1.msra.mxu0 %v9158_v3  ;;  %6392 = vmatpush1.msra.mxu1 %v9159_v17  ;;  %v12535_v3 = vld [vmem:[#allocation10 + $0x1c0] sm:$0xff]  ;;  %v12537_v17 = vld [vmem:[#allocation10 + $0x1d0] sm:$0xff] }
 0x9fd   :  { %6322 = vmatprep.subr.mxu0 %v9160_v53  ;;  %6393 = vmatprep.subr.mxu1 %v9161_v18  ;;  %v12547_v53 = vld [vmem:[#allocation10 + $0x1a0] sm:$0xff]  ;;  %v12549_v18 = vld [vmem:[#allocation10 + $0x1b0] sm:$0xff] }
 0x9fe   :  { %6323 = vmatpush1.msra.mxu0 %v9162_v59  ;;  %6394 = vmatpush1.msra.mxu1 %v9163_v36  ;;  %v5516_v22 = vpop.f32.mrf.mxu0  ;;  %v5587_v30 = vpop.f32.mrf.mxu1  ;;  %v12555_v59 = vld [vmem:[#allocation10 + $0x198] sm:$0xff]  ;;  %v12559_v36 = vld [vmem:[#allocation10 + $0x180] sm:$0xff] }
 0x9ff   :  { %6324 = vmatprep.subr.mxu0 %v9164_v39  ;;  %6395 = vmatprep.subr.mxu1 %v9165_v33  ;;  %v12509_v40 = vadd.f32 %v5516_v22, %v5027_v29  ;;  %v12511_v58 = vadd.f32 %v5587_v30, %v5098_v63  ;;  %v12541_v29 = vld [vmem:[#allocation10 + $0x1a8] sm:$0xff]  ;;  %v12543_v63 = vld [vmem:[#allocation10 + $0x1b8] sm:$0xff]  ;;  %v12561_v22 = vld [vmem:[#allocation10 + $0x190] sm:$0xff] }
 0xa00   :  { %6325 = vmatpush1.msra.mxu0 %v9166_v51  ;;  %6396 = vmatpush1.msra.mxu1 %v9167_v42  ;;  %v5518_v12 = vpop.f32.mrf.mxu0  ;;  %v5589_v60 = vpop.f32.mrf.mxu1  ;;  %v12565_v30 = vld [vmem:[#allocation10 + $0x168] sm:$0xff]  ;;  %v12571_v39 = vld [vmem:[#allocation10 + $0x160] sm:$0xff]  ;;  %v12573_v33 = vld [vmem:[#allocation10 + $0x170] sm:$0xff] }
 0xa01   :  { %14187 = vst [vmem:[#allocation70_spill] sm:$0xff] %v12509_v40  ;;  %14188 = vst [vmem:[#allocation79_spill] sm:$0xff] %v12511_v58  ;;  %6326 = vmatprep.subr.mxu0 %v9168_v1  ;;  %6397 = vmatprep.subr.mxu1 %v9169_v57  ;;  %v12513_v35 = vadd.f32 %v5518_v12, %v5029_v5  ;;  %v12515_v43 = vadd.f32 %v5589_v60, %v5100_v28  ;;  %v12553_v5 = vld [vmem:[#allocation10 + $0x188] sm:$0xff]  ;;  %v12567_v28 = vld [vmem:[#allocation10 + $0x178] sm:$0xff] }
 0xa02   :  { %6327 = vmatpush1.msra.mxu0 %v9170_v52  ;;  %6398 = vmatpush1.msra.mxu1 %v9171_v14  ;;  %v12577_v51 = vld [vmem:[#allocation10 + $0x148] sm:$0xff]  ;;  %v12579_v42 = vld [vmem:[#allocation10 + $0x158] sm:$0xff]  ;;  %v12583_v12 = vld [vmem:[#allocation10 + $0x140] sm:$0xff]  ;;  %v4887_v58 = vadd.f32 %v12406_v2, %v12454_v44 }
 0xa03   :  { %14189 = vst [vmem:[#allocation80_spill] sm:$0xff] %v12513_v35  ;;  %14190 = vst [vmem:[#allocation37_spill] sm:$0xff] %v12515_v43  ;;  %6328 = vmatprep.subr.mxu0 %v9172_v37  ;;  %6399 = vmatprep.subr.mxu1 %v9173_v34  ;;  %v12585_v60 = vld [vmem:[#allocation10 + $0x150] sm:$0xff]  ;;  %v12589_v1 = vld [vmem:[#allocation10 + $0x128] sm:$0xff] }
 0xa04   :  { %6329 = vmatpush1.msra.mxu0 %v9174_v26  ;;  %6400 = vmatpush1.msra.mxu1 %v9175_v61  ;;  %v12591_v57 = vld [vmem:[#allocation10 + $0x138] sm:$0xff]  ;;  %v12595_v52 = vld [vmem:[#allocation10 + $0x120] sm:$0xff]  ;;  %v12597_v14 = vld [vmem:[#allocation10 + $0x130] sm:$0xff] }
 0xa05   :  { %6330 = vmatprep.subr.mxu0 %v9176_v41  ;;  %6401 = vmatprep.subr.mxu1 %v9177_v4  ;;  %14194 = vst [vmem:[#allocation67_spill] sm:$0xff] %v12595_v52  ;;  %14195 = vst [vmem:[#allocation68_spill] sm:$0xff] %v12597_v14  ;;  %v12601_v37 = vld [vmem:[#allocation10 + $0x108] sm:$0xff]  ;;  %v12603_v34 = vld [vmem:[#allocation10 + $0x118] sm:$0xff] }
 0xa06   :  { %6331 = vmatpush1.msra.mxu0 %v9178_v6  ;;  %6402 = vmatpush1.msra.mxu1 %v9179_v16  ;;  %14196 = vst [vmem:[#allocation62_spill] sm:$0xff] %v12601_v37  ;;  %14197 = vst [vmem:[#allocation77_spill] sm:$0xff] %v12603_v34  ;;  %v12607_v26 = vld [vmem:[#allocation10 + $0x100] sm:$0xff]  ;;  %v12609_v61 = vld [vmem:[#allocation10 + $0x110] sm:$0xff] }
 0xa07   :  { %6332 = vmatprep.subr.mxu0 %v9180_v21  ;;  %6403 = vmatprep.subr.mxu1 %v9181_v49  ;;  %14198 = vst [vmem:[#allocation78_spill] sm:$0xff] %v12607_v26  ;;  %14199 = vst [vmem:[#allocation56_spill] sm:$0xff] %v12609_v61  ;;  %v12613_v41 = vld [vmem:[#allocation10 + $0xe8] sm:$0xff]  ;;  %v12615_v4 = vld [vmem:[#allocation10 + $0xf8] sm:$0xff] }
 0xa08   :  { %6333 = vmatpush1.msra.mxu0 %v9182_v55  ;;  %6366 = vmatprep.mubr.f32.mxu0 %v14184_v7  ;;  %14200 = vst [vmem:[#allocation34_spill] sm:$0xff] %v12613_v41  ;;  %14201 = vst [vmem:[#allocation57_spill] sm:$0xff] %v12615_v4  ;;  %v12619_v6 = vld [vmem:[#allocation10 + $0xe0] sm:$0xff]  ;;  %v12621_v16 = vld [vmem:[#allocation10 + $0xf0] sm:$0xff] }
 0xa09   :  { %6404 = vmatpush1.msra.mxu1 %v9183_v48  ;;  %6437 = vmatprep.mubr.f32.mxu1 %v14184_v7  ;;  %14202 = vst [vmem:[#allocation35_spill] sm:$0xff] %v12619_v6  ;;  %14203 = vst [vmem:[#allocation59_spill] sm:$0xff] %v12621_v16  ;;  %v12625_v21 = vld [vmem:[#allocation10 + $0xc8] sm:$0xff]  ;;  %v12627_v49 = vld [vmem:[#allocation10 + $0xd8] sm:$0xff] }
 0xa0a   :  { %6367 = vmatmul.mubr.f32.vlgmr.msra.gmra.mxu0 %v14193_v13  ;;  %6438 = vmatmul.mubr.f32.vlgmr.msra.gmra.mxu1 %v14193_v13  ;;  %14204 = vst [vmem:[#allocation60_spill] sm:$0xff] %v12625_v21  ;;  %14205 = vst [vmem:[#allocation55_spill] sm:$0xff] %v12627_v49  ;;  %v12631_v55 = vld [vmem:[#allocation10 + $0xc0] sm:$0xff]  ;;  %v12633_v48 = vld [vmem:[#allocation10 + $0xd0] sm:$0xff] }
 0xa0b   :  { %6512 = vmatprep.subr.mxu0 %v12518_v20  ;;  %6583 = vmatprep.subr.mxu1 %v12520_v62  ;;  %14206 = vst [vmem:[#allocation42_spill] sm:$0xff] %v12631_v55  ;;  %14207 = vst [vmem:[#allocation75_spill] sm:$0xff] %v12633_v48  ;;  %v12659_v13 = vld [vmem:[#allocation10 + $0x80] sm:$0xff]  ;;  %v12661_v43 = vld [vmem:[#allocation10 + $0x90] sm:$0xff] }
 0xa0c   :  { %6513 = vmatpush1.msra.mxu0 %v12523_v54  ;;  %6584 = vmatpush1.msra.mxu1 %v12525_v50  ;;  %14214 = vst [vmem:[#allocation73_spill] sm:$0xff] %v12661_v43  ;;  %v12667_v35 = vld [vmem:[#allocation10 + $0x68] sm:$0xff]  ;;  %v12677_v2 = vld [vmem:[#allocation10 + $0x70] sm:$0xff] }
 0xa0d   :  { %6514 = vmatprep.subr.mxu0 %v12529_v15  ;;  %6585 = vmatprep.subr.mxu1 %v12531_v0  ;;  %14215 = vst [vmem:[#allocation32_spill] sm:$0xff] %v12667_v35  ;;  %14218 = vst [vmem:[#allocation40_spill] sm:$0xff] %v12677_v2  ;;  %v12685_v44 = vld [vmem:[#allocation10 + $0x48] sm:$0xff] }
 0xa0e   :  { %6515 = vmatpush1.msra.mxu0 %v12535_v3  ;;  %6586 = vmatpush1.msra.mxu1 %v12537_v17  ;;  %14221 = vst [vmem:[#allocation83_spill] sm:$0xff] %v12685_v44 }
 0xa0f   :  { %6516 = vmatprep.subr.mxu0 %v12541_v29  ;;  %6587 = vmatprep.subr.mxu1 %v12543_v63 }
 0xa10   :  { %6517 = vmatpush1.msra.mxu0 %v12547_v53  ;;  %6588 = vmatpush1.msra.mxu1 %v12549_v18 }
 0xa11   :  { %6518 = vmatprep.subr.mxu0 %v12553_v5  ;;  %6589 = vmatprep.subr.mxu1 %v12555_v59 }
 0xa12   :  { %6519 = vmatpush1.msra.mxu0 %v12559_v36  ;;  %6590 = vmatpush1.msra.mxu1 %v12561_v22 }
 0xa13   :  { %6520 = vmatprep.subr.mxu0 %v12565_v30  ;;  %6591 = vmatprep.subr.mxu1 %v12567_v28 }
 0xa14   :  { %6521 = vmatpush1.msra.mxu0 %v12571_v39  ;;  %6592 = vmatpush1.msra.mxu1 %v12573_v33 }
 0xa15   :  { %6522 = vmatprep.subr.mxu0 %v12577_v51  ;;  %6593 = vmatprep.subr.mxu1 %v12579_v42 }
 0xa16   :  { %6523 = vmatpush1.msra.mxu0 %v12583_v12  ;;  %6594 = vmatpush1.msra.mxu1 %v12585_v60 }
 0xa17   :  { %6524 = vmatprep.subr.mxu0 %v12589_v1  ;;  %6595 = vmatprep.subr.mxu1 %v12591_v57 }
 0xa18   :  { %6525 = vmatpush1.msra.mxu0 %v12595_v52  ;;  %6596 = vmatpush1.msra.mxu1 %v12597_v14 }
 0xa19   :  { %6526 = vmatprep.subr.mxu0 %v12601_v37  ;;  %6597 = vmatprep.subr.mxu1 %v12603_v34 }
 0xa1a   :  { %6527 = vmatpush1.msra.mxu0 %v12607_v26  ;;  %6598 = vmatpush1.msra.mxu1 %v12609_v61 }
 0xa1b   :  { %6528 = vmatprep.subr.mxu0 %v12613_v41  ;;  %6599 = vmatprep.subr.mxu1 %v12615_v4 }
 0xa1c   :  { %6529 = vmatpush1.msra.mxu0 %v12619_v6  ;;  %6600 = vmatpush1.msra.mxu1 %v12621_v16 }
 0xa1d   :  { %6530 = vmatprep.subr.mxu0 %v12625_v21  ;;  %6601 = vmatprep.subr.mxu1 %v12627_v49 }
 0xa1e   :  { %6531 = vmatpush1.msra.mxu0 %v12631_v55  ;;  %6602 = vmatpush1.msra.mxu1 %v12633_v48 }
 0xa1f   :  { %6532 = vmatprep.subr.mxu0 %v12637_v25  ;;  %6603 = vmatprep.subr.mxu1 %v12639_v27  ;;  %v12687_v27 = vld [vmem:[#allocation10 + $0x58] sm:$0xff] }
 0xa20   :  { %6533 = vmatpush1.msra.mxu0 %v12643_v19  ;;  %6604 = vmatpush1.msra.mxu1 %v12645_v24  ;;  %v5658_v8 = vpop.f32.mrf.mxu0  ;;  %v5729_v40 = vpop.f32.mrf.mxu1  ;;  %14222 = vst [vmem:[#allocation33_spill] sm:$0xff] %v12687_v27 }
 0xa21   :  { %6534 = vmatprep.subr.mxu0 %v12649_v11  ;;  %6605 = vmatprep.subr.mxu1 %v12651_v47  ;;  %v12679_v19 = vadd.f32 %v5658_v8, %v4885_v10  ;;  %v12681_v24 = vadd.f32 %v5729_v40, %v4956_v56  ;;  %v12691_v47 = vld [vmem:[#allocation10 + $0x40] sm:$0xff]  ;;  %v12693_v10 = vld [vmem:[#allocation10 + $0x50] sm:$0xff]  ;;  %v12701_v8 = vld [vmem:[#allocation10 + $0x28] sm:$0xff] }
 0xa22   :  { %6535 = vmatpush1.msra.mxu0 %v12659_v13  ;;  %6606 = vmatpush1.msra.mxu1 %v12661_v43  ;;  %v5660_v38 = vpop.f32.mrf.mxu0  ;;  %v5731_v11 = vpop.f32.mrf.mxu1  ;;  %14223 = vst [vmem:[#allocation86_spill] sm:$0xff] %v12691_v47  ;;  %14224 = vst [vmem:[#allocation87_spill] sm:$0xff] %v12693_v10 }
 0xa23   :  { %14219 = vst [vmem:[#allocation65_spill] sm:$0xff] %v12679_v19  ;;  %14220 = vst [vmem:[#allocation26_spill] sm:$0xff] %v12681_v24  ;;  %6536 = vmatprep.subr.mxu0 %v12667_v35  ;;  %6607 = vmatprep.subr.mxu1 %v12669_v46  ;;  %v12695_v56 = vadd.f32 %v5660_v38, %v4887_v58  ;;  %v12697_v40 = vadd.f32 %v5731_v11, %v4958_v31  ;;  %v12703_v24 = vld [vmem:[#allocation10 + $0x38] sm:$0xff]  ;;  %v12707_v19 = vld [vmem:[#allocation10 + $0x20] sm:$0xff] }
 0xa24   :  { %6537 = vmatpush1.msra.mxu0 %v12675_v23  ;;  %6608 = vmatpush1.msra.mxu1 %v12677_v2  ;;  %14227 = vst [vmem:[#allocation90_spill] sm:$0xff] %v12701_v8  ;;  %14228 = vst [vmem:[#allocation91_spill] sm:$0xff] %v12703_v24  ;;  %v12709_v46 = vld [vmem:[#allocation10 + $0x30] sm:$0xff]  ;;  %v12713_v31 = vld [vmem:[#allocation10 + $0x8] sm:$0xff] }
 0xa25   :  { %14225 = vst [vmem:[#allocation88_spill] sm:$0xff] %v12695_v56  ;;  %14226 = vst [vmem:[#allocation89_spill] sm:$0xff] %v12697_v40  ;;  %6538 = vmatprep.subr.mxu0 %v12685_v44  ;;  %6609 = vmatprep.subr.mxu1 %v12687_v27  ;;  %v12715_v11 = vld [vmem:[#allocation10 + $0x18] sm:$0xff]  ;;  %v12719_v58 = vld [vmem:[#allocation10] sm:$0xff] }
 0xa26   :  { %14229 = vst [vmem:[#allocation92_spill] sm:$0xff] %v12707_v19  ;;  %14230 = vst [vmem:[#allocation93_spill] sm:$0xff] %v12709_v46  ;;  %6539 = vmatpush1.msra.mxu0 %v12691_v47  ;;  %6610 = vmatpush1.msra.mxu1 %v12693_v10  ;;  %v12723_v38 = vld [vmem:[#allocation10 + $0x10] sm:$0xff]  ;;  %v14235_v40 = vld [vmem:[#allocation23_spill] sm:$0xff] }
 0xa27   :  { %14231 = vst [vmem:[#allocation94_spill] sm:$0xff] %v12713_v31  ;;  %14232 = vst [vmem:[#allocation95_spill] sm:$0xff] %v12715_v11  ;;  %6540 = vmatprep.subr.mxu0 %v12701_v8  ;;  %6611 = vmatprep.subr.mxu1 %v12703_v24  ;;  %v4743_v56 = vadd.f32 %v14235_v40, %v12446_v45 }
 0xa28   :  { %14233 = vst [vmem:[#allocation96_spill] sm:$0xff] %v12719_v58  ;;  %6541 = vmatpush1.msra.mxu0 %v12707_v19  ;;  %6612 = vmatpush1.msra.mxu1 %v12709_v46  ;;  %14234 = vst [vmem:[#allocation97_spill] sm:$0xff] %v12723_v38 }
 0xa29   :  { %6542 = vmatprep.subr.mxu0 %v12713_v31  ;;  %6613 = vmatprep.subr.mxu1 %v12715_v11 }
 0xa2a   :  { %6543 = vmatpush1.msra.mxu0 %v12719_v58  ;;  %6576 = vmatprep.mubr.f32.mxu0 %v14184_v7 }
 0xa2b   :  { %6614 = vmatpush1.msra.mxu1 %v12723_v38  ;;  %6647 = vmatprep.mubr.f32.mxu1 %v14184_v7 }
 0xa2c   :  { %6577 = vmatmul.mubr.f32.vlgmr.msra.gmra.mxu0 %v14184_v7  ;;  %6648 = vmatmul.mubr.f32.vlgmr.msra.gmra.mxu1 %v14184_v7 }
 0xa2d   :  { %6686 = vmatprep.subr.mxu0 %v12518_v20  ;;  %6757 = vmatprep.subr.mxu1 %v12520_v62 }
 0xa2e   :  { %6687 = vmatpush1.msra.mxu0 %v12523_v54  ;;  %6758 = vmatpush1.msra.mxu1 %v12525_v50 }
 0xa2f   :  { %6688 = vmatprep.subr.mxu0 %v12529_v15  ;;  %6759 = vmatprep.subr.mxu1 %v12531_v0 }
 0xa30   :  { %6689 = vmatpush1.msra.mxu0 %v12535_v3  ;;  %6760 = vmatpush1.msra.mxu1 %v12537_v17 }
 0xa31   :  { %6690 = vmatprep.subr.mxu0 %v12541_v29  ;;  %6761 = vmatprep.subr.mxu1 %v12543_v63 }
 0xa32   :  { %6691 = vmatpush1.msra.mxu0 %v12547_v53  ;;  %6762 = vmatpush1.msra.mxu1 %v12549_v18 }
 0xa33   :  { %6692 = vmatprep.subr.mxu0 %v12553_v5  ;;  %6763 = vmatprep.subr.mxu1 %v12555_v59 }
 0xa34   :  { %6693 = vmatpush1.msra.mxu0 %v12559_v36  ;;  %6764 = vmatpush1.msra.mxu1 %v12561_v22 }
 0xa35   :  { %6694 = vmatprep.subr.mxu0 %v12565_v30  ;;  %6765 = vmatprep.subr.mxu1 %v12567_v28 }
 0xa36   :  { %6695 = vmatpush1.msra.mxu0 %v12571_v39  ;;  %6766 = vmatpush1.msra.mxu1 %v12573_v33 }
 0xa37   :  { %6696 = vmatprep.subr.mxu0 %v12577_v51  ;;  %6767 = vmatprep.subr.mxu1 %v12579_v42 }
 0xa38   :  { %6697 = vmatpush1.msra.mxu0 %v12583_v12  ;;  %6768 = vmatpush1.msra.mxu1 %v12585_v60 }
 0xa39   :  { %6698 = vmatprep.subr.mxu0 %v12589_v1  ;;  %6769 = vmatprep.subr.mxu1 %v12591_v57 }
 0xa3a   :  { %6699 = vmatpush1.msra.mxu0 %v12595_v52  ;;  %6770 = vmatpush1.msra.mxu1 %v12597_v14 }
 0xa3b   :  { %6700 = vmatprep.subr.mxu0 %v12601_v37  ;;  %6771 = vmatprep.subr.mxu1 %v12603_v34 }
 0xa3c   :  { %6701 = vmatpush1.msra.mxu0 %v12607_v26  ;;  %6772 = vmatpush1.msra.mxu1 %v12609_v61  ;;  %v14236_v61 = vld [vmem:[#allocation29_spill] sm:$0xff] }
 0xa3d   :  { %6702 = vmatprep.subr.mxu0 %v12613_v41  ;;  %6773 = vmatprep.subr.mxu1 %v12615_v4  ;;  %v4814_v41 = vadd.f32 %v14236_v61, %v12449_v32  ;;  %v14237_v4 = vld [vmem:[#allocation66_spill] sm:$0xff] }
 0xa3e   :  { %6703 = vmatpush1.msra.mxu0 %v12619_v6  ;;  %6774 = vmatpush1.msra.mxu1 %v12621_v16  ;;  %v14238_v6 = vld [vmem:[#allocation24_spill] sm:$0xff]  ;;  %v14239_v16 = vld [vmem:[#allocation46_spill] sm:$0xff] }
 0xa3f   :  { %6704 = vmatprep.subr.mxu0 %v12625_v21  ;;  %6775 = vmatprep.subr.mxu1 %v12627_v49  ;;  %v4745_v26 = vadd.f32 %v14239_v16, %v14238_v6  ;;  %v14240_v49 = vld [vmem:[#allocation48_spill] sm:$0xff]  ;;  %v14245_v61 = vld [vmem:[#allocation54_spill] sm:$0xff] }
 0xa40   :  { %6705 = vmatpush1.msra.mxu0 %v12631_v55  ;;  %6776 = vmatpush1.msra.mxu1 %v12633_v48  ;;  %v14241_v55 = vld [vmem:[#allocation31_spill] sm:$0xff]  ;;  %v14242_v48 = vld [vmem:[#allocation52_spill] sm:$0xff] }
 0xa41   :  { %6706 = vmatprep.subr.mxu0 %v12637_v25  ;;  %6777 = vmatprep.subr.mxu1 %v14237_v4  ;;  %v4816_v37 = vadd.f32 %v14242_v48, %v12459_v9  ;;  %v14246_v25 = vld [vmem:[#allocation41_spill] sm:$0xff] }
 0xa42   :  { %v5800_v21 = vpop.f32.mrf.mxu0  ;;  %v5871_v34 = vpop.f32.mrf.mxu1  ;;  %6707 = vmatpush1.msra.mxu0 %v14240_v49  ;;  %6778 = vmatpush1.msra.mxu1 %v14241_v55  ;;  %v14252_v48 = vld [vmem:[#allocation45_spill] sm:$0xff] }
 0xa43   :  { %v12785_v40 = vadd.f32 %v5800_v21, %v4743_v56  ;;  %v12787_v14 = vadd.f32 %v5871_v34, %v4814_v41  ;;  %6708 = vmatprep.subr.mxu0 %v14245_v61  ;;  %6779 = vmatprep.subr.mxu1 %v14246_v25  ;;  %v14249_v21 = vld [vmem:[#allocation39_spill] sm:$0xff]  ;;  %v14251_v34 = vld [vmem:[#allocation28_spill] sm:$0xff]  ;;  %v4603_v56 = vadd.f32 %v14252_v48, %v14238_v6 }
 0xa44   :  { %v5802_v4 = vpop.f32.mrf.mxu0  ;;  %v5873_v52 = vpop.f32.mrf.mxu1  ;;  %6709 = vmatpush1.msra.mxu0 %v12659_v13  ;;  %6780 = vmatpush1.msra.mxu1 %v12661_v43 }
 0xa45   :  { %14243 = vst [vmem:[#allocation23_spill] sm:$0xff] %v12785_v40  ;;  %14244 = vst [vmem:[#allocation29_spill] sm:$0xff] %v12787_v14  ;;  %v12793_v16 = vadd.f32 %v5802_v4, %v4745_v26  ;;  %v12795_v55 = vadd.f32 %v5873_v52, %v4816_v37  ;;  %6710 = vmatprep.subr.mxu0 %v12667_v35  ;;  %6781 = vmatprep.subr.mxu1 %v14249_v21  ;;  %v14250_v52 = vld [vmem:[#allocation22_spill] sm:$0xff] }
 0xa46   :  { %6711 = vmatpush1.msra.mxu0 %v12675_v23  ;;  %6782 = vmatpush1.msra.mxu1 %v12677_v2  ;;  %v4601_v37 = vadd.f32 %v14250_v52, %v12446_v45  ;;  %v4672_v26 = vadd.f32 %v14251_v34, %v12449_v32  ;;  %v14258_v34 = vld [vmem:[#allocation21_spill] sm:$0xff] }
 0xa47   :  { %14247 = vst [vmem:[#allocation24_spill] sm:$0xff] %v12793_v16  ;;  %14248 = vst [vmem:[#allocation46_spill] sm:$0xff] %v12795_v55  ;;  %6712 = vmatprep.subr.mxu0 %v12685_v44  ;;  %6783 = vmatprep.subr.mxu1 %v12687_v27  ;;  %v14253_v55 = vld [vmem:[#allocation51_spill] sm:$0xff] }
 0xa48   :  { %6713 = vmatpush1.msra.mxu0 %v12691_v47  ;;  %6784 = vmatpush1.msra.mxu1 %v12693_v10  ;;  %v4674_v14 = vadd.f32 %v14253_v55, %v12459_v9  ;;  %v14260_v55 = vld [vmem:[#allocation44_spill] sm:$0xff] }
 0xa49   :  { %6714 = vmatprep.subr.mxu0 %v12701_v8  ;;  %6785 = vmatprep.subr.mxu1 %v12703_v24 }
 0xa4a   :  { %6715 = vmatpush1.msra.mxu0 %v12707_v19  ;;  %6786 = vmatpush1.msra.mxu1 %v12709_v46 }
 0xa4b   :  { %6716 = vmatprep.subr.mxu0 %v12713_v31  ;;  %6787 = vmatprep.subr.mxu1 %v12715_v11 }
 0xa4c   :  { %6717 = vmatpush1.msra.mxu0 %v12719_v58  ;;  %6750 = vmatprep.mubr.f32.mxu0 %v14184_v7  ;;  %v14259_v58 = vld [vmem:[#allocation27_spill] sm:$0xff] }
 0xa4d   :  { %6788 = vmatpush1.msra.mxu1 %v12723_v38  ;;  %6821 = vmatprep.mubr.f32.mxu1 %v14184_v7  ;;  %v4459_v7 = vadd.f32 %v14258_v34, %v12446_v45  ;;  %v4530_v11 = vadd.f32 %v14259_v58, %v12449_v32  ;;  %v14266_v58 = vld [vmem:[#allocation72_spill] sm:$0xff] }
 0xa4e   :  { %6860 = vmatprep.subr.mxu0 %v12518_v20  ;;  %6931 = vmatprep.subr.mxu1 %v12520_v62 }
 0xa64   :  { %v5942_v41 = vpop.f32.mrf.mxu0  ;;  %v6013_v4 = vpop.f32.mrf.mxu1 }
 0xa65   :  { %v12825_v16 = vadd.f32 %v5942_v41, %v4601_v37  ;;  %v12827_v40 = vadd.f32 %v6013_v4, %v4672_v26  ;;  %v4461_v37 = vadd.f32 %v14260_v55, %v14238_v6  ;;  %v14261_v26 = vld [vmem:[#allocation50_spill] sm:$0xff] }
 0xa66   :  { %v5944_v20 = vpop.f32.mrf.mxu0  ;;  %v6015_v62 = vpop.f32.mrf.mxu1  ;;  %v4532_v41 = vadd.f32 %v14261_v26, %v12459_v9  ;;  %v14268_v26 = vld [vmem:[#allocation82_spill] sm:$0xff] }
 0xa67   :  { %14254 = vst [vmem:[#allocation48_spill] sm:$0xff] %v12825_v16  ;;  %14255 = vst [vmem:[#allocation52_spill] sm:$0xff] %v12827_v40  ;;  %v12829_v38 = vadd.f32 %v5944_v20, %v4603_v56  ;;  %v12831_v52 = vadd.f32 %v6015_v62, %v4674_v14  ;;  %v14267_v40 = vld [vmem:[#allocation81_spill] sm:$0xff] }
 0xa69   :  { %14256 = vst [vmem:[#allocation54_spill] sm:$0xff] %v12829_v38  ;;  %14257 = vst [vmem:[#allocation41_spill] sm:$0xff] %v12831_v52  ;;  %v4317_v52 = vadd.f32 %v14266_v58, %v12446_v45  ;;  %v4388_v38 = vadd.f32 %v14267_v40, %v12449_v32  ;;  %v14273_v40 = vld [vmem:[#allocation84_spill] sm:$0xff] }
 0xa86   :  { %v6084_v48 = vpop.f32.mrf.mxu0  ;;  %v6155_v31 = vpop.f32.mrf.mxu1 }
 0xa87   :  { %v12841_v4 = vadd.f32 %v6084_v48, %v4459_v7  ;;  %v12843_v20 = vadd.f32 %v6155_v31, %v4530_v11  ;;  %v4319_v7 = vadd.f32 %v14268_v26, %v14238_v6  ;;  %v14269_v31 = vld [vmem:[#allocation49_spill] sm:$0xff] }
 0xa88   :  { %v6086_v62 = vpop.f32.mrf.mxu0  ;;  %v6157_v14 = vpop.f32.mrf.mxu1  ;;  %v4390_v11 = vadd.f32 %v14269_v31, %v12459_v9  ;;  %v14274_v26 = vld [vmem:[#allocation25_spill] sm:$0xff] }
 0xa89   :  { %14262 = vst [vmem:[#allocation22_spill] sm:$0xff] %v12841_v4  ;;  %14263 = vst [vmem:[#allocation28_spill] sm:$0xff] %v12843_v20  ;;  %v12845_v56 = vadd.f32 %v6086_v62, %v4461_v37  ;;  %v12847_v34 = vadd.f32 %v6157_v14, %v4532_v41  ;;  %v4175_v20 = vadd.f32 %v14273_v40, %v12446_v45 }
 0xa8a   :  { %v4177_v4 = vadd.f32 %v14274_v26, %v14238_v6  ;;  %v14276_v6 = vld [vmem:[#allocation71_spill] sm:$0xff] }
 0xa8b   :  { %14264 = vst [vmem:[#allocation45_spill] sm:$0xff] %v12845_v56  ;;  %14265 = vst [vmem:[#allocation51_spill] sm:$0xff] %v12847_v34 }
 0xaa8   :  { %v6226_v55 = vpop.f32.mrf.mxu0  ;;  %v6297_v16 = vpop.f32.mrf.mxu1 }
 0xaa9   :  { %v12857_v48 = vadd.f32 %v6226_v55, %v4317_v52  ;;  %v12859_v37 = vadd.f32 %v6297_v16, %v4388_v38 }
 0xaaa   :  { %v6228_v41 = vpop.f32.mrf.mxu0  ;;  %v6299_v62 = vpop.f32.mrf.mxu1 }
 0xaab   :  { %14270 = vst [vmem:[#allocation21_spill] sm:$0xff] %v12857_v48  ;;  %14271 = vst [vmem:[#allocation27_spill] sm:$0xff] %v12859_v37  ;;  %v12861_v14 = vadd.f32 %v6228_v41, %v4319_v7  ;;  %v12863_v58 = vadd.f32 %v6299_v62, %v4390_v11  ;;  %v14275_v41 = vld [vmem:[#allocation20_spill] sm:$0xff] }
 0xaac   :  { %v4246_v62 = vadd.f32 %v14275_v41, %v12449_v32 }
 0xaad   :  { %14272 = vst [vmem:[#allocation44_spill] sm:$0xff] %v12863_v58 }
 0xaca   :  { %v6368_v34 = vpop.f32.mrf.mxu0  ;;  %v6439_v16 = vpop.f32.mrf.mxu1 }
 0xacb   :  { %v6444_v46 = vadd.f32 %v6368_v34, %v4175_v20  ;;  %v6446_v40 = vadd.f32 %v6439_v16, %v4246_v62  ;;  %v4248_v20 = vadd.f32 %v14276_v6, %v12459_v9  ;;  %v14279_v6 = vld [vmem:[#allocation62_spill] sm:$0xff] }
 0xacc   :  { %v6370_v56 = vpop.f32.mrf.mxu0  ;;  %v6441_v11 = vpop.f32.mrf.mxu1 }
 0xacd   :  { %v6445_v52 = vadd.f32 %v6370_v56, %v4177_v4  ;;  %v6447_v4 = vadd.f32 %v6441_v11, %v4248_v20  ;;  %v14280_v20 = vld [vmem:[#allocation77_spill] sm:$0xff] }
 0xaec   :  { %v6578_v31 = vpop.f32.mrf.mxu0  ;;  %v6649_v45 = vpop.f32.mrf.mxu1 }
 0xaed   :  { %v6654_v55 = vadd.f32 %v6578_v31, %v6444_v46  ;;  %v6656_v58 = vadd.f32 %v6649_v45, %v6446_v40  ;;  %v14277_v45 = vld [vmem:[#allocation67_spill] sm:$0xff]  ;;  %v14278_v40 = vld [vmem:[#allocation68_spill] sm:$0xff] }
 0xaee   :  { %v6580_v38 = vpop.f32.mrf.mxu0  ;;  %v6651_v34 = vpop.f32.mrf.mxu1 }
 0xaef   :  { %v8616_v37 = vmul.f32 -1.442695, %v6654_v55  ;;  %v6655_v48 = vadd.f32 %v6580_v38, %v6445_v52  ;;  %v8618_v46 = vmul.f32 -1.442695, %v6656_v58  ;;  %v6657_v26 = vadd.f32 %v6651_v34, %v6447_v4  ;;  %v14281_v34 = vld [vmem:[#allocation78_spill] sm:$0xff]  ;;  %v14282_v4 = vld [vmem:[#allocation56_spill] sm:$0xff] }
 0xaf1   :  { %8848 = vpow2.f32 %v8616_v37  ;;  %v8617_v7 = vmul.f32 -1.442695, %v6655_v48 }
 0xaf3   :  { %8850 = vpow2.f32 %v8617_v7 }
 0xaf4   :  { %8852 = vpow2.f32 %v8618_v46  ;;  %v14283_v46 = vld [vmem:[#allocation34_spill] sm:$0xff] }
 0xafe   :  { %v8849_v56 = vpop.eup %8848 }
 0xaff   :  { %v6667_v31 = vadd.f32 1.0, %v8849_v56  ;;  %v14284_v56 = vld [vmem:[#allocation57_spill] sm:$0xff] }
 0xb00   :  { %v8851_v52 = vpop.eup %8850 }
 0xb01   :  { %8854 = vrcp.f32 %v6667_v31  ;;  %v6668_v48 = vadd.f32 1.0, %v8851_v52  ;;  %v8853_v37 = vpop.eup %8852  ;;  %v14286_v31 = vld [vmem:[#allocation59_spill] sm:$0xff]  ;;  %v14287_v52 = vld [vmem:[#allocation60_spill] sm:$0xff] }
 0xb02   :  { %8856 = vtanh.f32 %v6657_v26  ;;  %v6669_v16 = vadd.f32 1.0, %v8853_v37  ;;  %v14285_v26 = vld [vmem:[#allocation35_spill] sm:$0xff]  ;;  %v14289_v37 = vld [vmem:[#allocation42_spill] sm:$0xff] }
 0xb03   :  { %8858 = vrcp.f32 %v6668_v48  ;;  %v14288_v48 = vld [vmem:[#allocation55_spill] sm:$0xff] }
 0xb04   :  { %8860 = vrcp.f32 %v6669_v16  ;;  %v14293_v16 = vld [vmem:[#allocation31_spill] sm:$0xff] }
 0xb0e   :  { %v8855_v32 = vpop.eup %8854 }
 0xb0f   :  { %v8857_v55 = vpop.eup %8856 }
 0xb10   :  { %v8859_v38 = vpop.eup %8858  ;;  %v6678_v41 = vmul.f32 %v8857_v55, %v8855_v32  ;;  %v14290_v32 = vld [vmem:[#allocation75_spill] sm:$0xff] }
 0xb11   :  { %v6677_v7 = vmul.f32 0.0, %v8859_v38  ;;  %v8861_v58 = vpop.eup %8860  ;;  %v14291_v55 = vld [vmem:[#allocation43_spill] sm:$0xff]  ;;  %v14292_v38 = vld [vmem:[#allocation66_spill] sm:$0xff] }
 0xb13   :  { %v12873_v9 = vadd.f32 %v6678_v41, %v6677_v7  ;;  %v14294_v7 = vld [vmem:[#allocation93_spill] sm:$0xff]  ;;  %v14295_v41 = vld [vmem:[#allocation94_spill] sm:$0xff] }
 0xb15   :  { %8862 = vtanh.f32 %v12873_v9 }
 0xb22   :  { %v8863_v11 = vpop.eup %8862 }
 0xb23   :  { %v6681_v62 = vmul.f32 %v8863_v11, %v8861_v58  ;;  %v14296_v58 = vld [vmem:[#allocation95_spill] sm:$0xff]  ;;  %v14297_v11 = vld [vmem:[#allocation96_spill] sm:$0xff] }
 0xb25   :  { %6751 = vmatmul.mubr.f32.vlgmr.msra.gmra.mxu0 %v6681_v62  ;;  %6822 = vmatmul.mubr.f32.vlgmr.msra.gmra.mxu1 %v6681_v62  ;;  %v14298_v62 = vmov 0.0  }
 0xb26   :  { %6861 = vmatpush1.msra.mxu0 %v12523_v54  ;;  %6932 = vmatpush1.msra.mxu1 %v12525_v50 }
 0xb27   :  { %6862 = vmatprep.subr.mxu0 %v12529_v15  ;;  %6933 = vmatprep.subr.mxu1 %v12531_v0 }
 0xb28   :  { %6863 = vmatpush1.msra.mxu0 %v12535_v3  ;;  %6934 = vmatpush1.msra.mxu1 %v12537_v17 }
 0xb29   :  { %6864 = vmatprep.subr.mxu0 %v12541_v29  ;;  %6935 = vmatprep.subr.mxu1 %v12543_v63 }
 0xb2a   :  { %6865 = vmatpush1.msra.mxu0 %v12547_v53  ;;  %6936 = vmatpush1.msra.mxu1 %v12549_v18 }
 0xb2b   :  { %6866 = vmatprep.subr.mxu0 %v12553_v5  ;;  %6937 = vmatprep.subr.mxu1 %v12555_v59 }
 0xb2c   :  { %6867 = vmatpush1.msra.mxu0 %v12559_v36  ;;  %6938 = vmatpush1.msra.mxu1 %v12561_v22 }
 0xb2d   :  { %6868 = vmatprep.subr.mxu0 %v12565_v30  ;;  %6939 = vmatprep.subr.mxu1 %v12567_v28 }
 0xb2e   :  { %6869 = vmatpush1.msra.mxu0 %v12571_v39  ;;  %6940 = vmatpush1.msra.mxu1 %v12573_v33 }
 0xb2f   :  { %6870 = vmatprep.subr.mxu0 %v12577_v51  ;;  %6941 = vmatprep.subr.mxu1 %v12579_v42 }
 0xb30   :  { %6871 = vmatpush1.msra.mxu0 %v12583_v12  ;;  %6942 = vmatpush1.msra.mxu1 %v12585_v60 }
 0xb31   :  { %6872 = vmatprep.subr.mxu0 %v12589_v1  ;;  %6943 = vmatprep.subr.mxu1 %v12591_v57 }
 0xb32   :  { %6873 = vmatpush1.msra.mxu0 %v14277_v45  ;;  %6944 = vmatpush1.msra.mxu1 %v14278_v40 }
 0xb33   :  { %6874 = vmatprep.subr.mxu0 %v14279_v6  ;;  %6945 = vmatprep.subr.mxu1 %v14280_v20 }
 0xb34   :  { %6875 = vmatpush1.msra.mxu0 %v14281_v34  ;;  %6946 = vmatpush1.msra.mxu1 %v14282_v4 }
 0xb35   :  { %6876 = vmatprep.subr.mxu0 %v14283_v46  ;;  %6947 = vmatprep.subr.mxu1 %v14284_v56 }
 0xb36   :  { %6877 = vmatpush1.msra.mxu0 %v14285_v26  ;;  %6948 = vmatpush1.msra.mxu1 %v14286_v31 }
 0xb37   :  { %6878 = vmatprep.subr.mxu0 %v14287_v52  ;;  %6949 = vmatprep.subr.mxu1 %v14288_v48 }
 0xb38   :  { %6879 = vmatpush1.msra.mxu0 %v14289_v37  ;;  %6950 = vmatpush1.msra.mxu1 %v14290_v32 }
 0xb39   :  { %6880 = vmatprep.subr.mxu0 %v14291_v55  ;;  %6951 = vmatprep.subr.mxu1 %v14292_v38 }
 0xb3a   :  { %6881 = vmatpush1.msra.mxu0 %v14240_v49  ;;  %6952 = vmatpush1.msra.mxu1 %v14293_v16 }
 0xb3b   :  { %6882 = vmatprep.subr.mxu0 %v14245_v61  ;;  %6953 = vmatprep.subr.mxu1 %v14246_v25 }
 0xb3c   :  { %6883 = vmatpush1.msra.mxu0 %v12659_v13  ;;  %6954 = vmatpush1.msra.mxu1 %v12661_v43 }
 0xb3d   :  { %6884 = vmatprep.subr.mxu0 %v12667_v35  ;;  %6955 = vmatprep.subr.mxu1 %v14249_v21 }
 0xb3e   :  { %6885 = vmatpush1.msra.mxu0 %v12675_v23  ;;  %6956 = vmatpush1.msra.mxu1 %v12677_v2  ;;  %v14303_v2 = vld [vmem:[#allocation27_spill] sm:$0xff] }
 0xb3f   :  { %6886 = vmatprep.subr.mxu0 %v12685_v44  ;;  %6957 = vmatprep.subr.mxu1 %v12687_v27  ;;  %v14299_v27 = vld [vmem:[#allocation97_spill] sm:$0xff] }
 0xb40   :  { %6887 = vmatpush1.msra.mxu0 %v12691_v47  ;;  %6958 = vmatpush1.msra.mxu1 %v12693_v10  ;;  %v14300_v10 = vld [vmem:[#allocation38_spill] sm:$0xff] }
 0xb41   :  { %6888 = vmatprep.subr.mxu0 %v12701_v8  ;;  %6959 = vmatprep.subr.mxu1 %v12703_v24  ;;  %v14301_v8 = vld [vmem:[#allocation36_spill] sm:$0xff] }
 0xb42   :  { %6889 = vmatpush1.msra.mxu0 %v12707_v19  ;;  %6960 = vmatpush1.msra.mxu1 %v14294_v7  ;;  %v14302_v19 = vld [vmem:[#allocation21_spill] sm:$0xff] }
 0xb43   :  { %6890 = vmatprep.subr.mxu0 %v14295_v41  ;;  %6961 = vmatprep.subr.mxu1 %v14296_v58 }
 0xb44   :  { %6891 = vmatpush1.msra.mxu0 %v14297_v11  ;;  %6924 = vmatprep.mubr.f32.mxu0 %v14298_v62 }
 0xb45   :  { %6962 = vmatpush1.msra.mxu1 %v14299_v27  ;;  %6995 = vmatprep.mubr.f32.mxu1 %v14298_v62  ;;  %v14304_v62 = vld [vmem:[#allocation44_spill] sm:$0xff] }
 0xb46   :  { %7034 = vmatprep.subr.mxu0 %v14300_v10  ;;  %7105 = vmatprep.subr.mxu1 %v14301_v8 }
 0xbe5   :  { %v6752_v24 = vpop.f32.mrf.mxu0  ;;  %v6823_v11 = vpop.f32.mrf.mxu1 }
 0xbe6   :  { %v6828_v47 = vadd.f32 %v6752_v24, %v14302_v19  ;;  %v6830_v23 = vadd.f32 %v6823_v11, %v14303_v2  ;;  %v14312_v11 = vld [vmem:[#allocation86_spill] sm:$0xff] }
 0xbe7   :  { %v6754_v7 = vpop.f32.mrf.mxu0  ;;  %v6825_v27 = vpop.f32.mrf.mxu1 }
 0xbe8   :  { %v8619_v44 = vmul.f32 -1.442695, %v6828_v47  ;;  %v6829_v41 = vadd.f32 %v6754_v7, %v12861_v14  ;;  %v8621_v21 = vmul.f32 -1.442695, %v6830_v23  ;;  %v6831_v35 = vadd.f32 %v6825_v27, %v14304_v62  ;;  %v14313_v62 = vld [vmem:[#allocation87_spill] sm:$0xff] }
 0xbea   :  { %8864 = vpow2.f32 %v8619_v44  ;;  %v8620_v58 = vmul.f32 -1.442695, %v6829_v41 }
 0xbec   :  { %8866 = vpow2.f32 %v8620_v58 }
 0xbed   :  { %8868 = vpow2.f32 %v8621_v21  ;;  %v14310_v21 = vld [vmem:[#allocation83_spill] sm:$0xff] }
 0xbee   :  { %8870 = vtanh.f32 %v6831_v35  ;;  %v14305_v35 = vld [vmem:[#allocation73_spill] sm:$0xff] }
 0xbf7   :  { %v8865_v10 = vpop.eup %8864 }
 0xbf8   :  { %v6841_v43 = vadd.f32 1.0, %v8865_v10 }
 0xbf9   :  { %v8867_v8 = vpop.eup %8866 }
 0xbfa   :  { %8872 = vrcp.f32 %v6841_v43  ;;  %v6842_v24 = vadd.f32 1.0, %v8867_v8  ;;  %v8869_v19 = vpop.eup %8868  ;;  %v14306_v43 = vld [vmem:[#allocation32_spill] sm:$0xff] }
 0xbfb   :  { %v8871_v47 = vpop.eup %8870  ;;  %v6843_v41 = vadd.f32 1.0, %v8869_v19  ;;  %v14309_v8 = vld [vmem:[#allocation40_spill] sm:$0xff]  ;;  %v14315_v19 = vld [vmem:[#allocation91_spill] sm:$0xff] }
 0xbfc   :  { %8874 = vrcp.f32 %v6842_v24  ;;  %v14314_v24 = vld [vmem:[#allocation90_spill] sm:$0xff] }
 0xbfd   :  { %8876 = vrcp.f32 %v6843_v41  ;;  %v14320_v41 = vld [vmem:[#allocation96_spill] sm:$0xff] }
 0xc07   :  { %v8873_v44 = vpop.eup %8872 }
 0xc08   :  { %v6852_v14 = vmul.f32 %v8873_v44, %v8871_v47  ;;  %v14316_v47 = vld [vmem:[#allocation92_spill] sm:$0xff]  ;;  %v14317_v44 = vld [vmem:[#allocation93_spill] sm:$0xff] }
 0xc09   :  { %v8875_v7 = vpop.eup %8874 }
 0xc0a   :  { %v6851_v2 = vmul.f32 %v8875_v7, %v12873_v9  ;;  %v8877_v23 = vpop.eup %8876  ;;  %v14311_v9 = vld [vmem:[#allocation33_spill] sm:$0xff]  ;;  %v14319_v7 = vld [vmem:[#allocation95_spill] sm:$0xff] }
 0xc0c   :  { %v12947_v58 = vadd.f32 %v6852_v14, %v6851_v2  ;;  %v14318_v14 = vld [vmem:[#allocation94_spill] sm:$0xff]  ;;  %v14321_v2 = vmov 0.0  }
 0xc0e   :  { %8878 = vtanh.f32 %v12947_v58 }
 0xc1b   :  { %v8879_v27 = vpop.eup %8878 }
 0xc1c   :  { %v6855_v10 = vmul.f32 %v8879_v27, %v8877_v23  ;;  %v14322_v23 = vld [vmem:[#allocation97_spill] sm:$0xff]  ;;  %v14323_v27 = vld [vmem:[#allocation38_spill] sm:$0xff] }
 0xc1e   :  { %6925 = vmatmul.mubr.f32.vlgmr.msra.gmra.mxu0 %v6855_v10  ;;  %6996 = vmatmul.mubr.f32.vlgmr.msra.gmra.mxu1 %v6855_v10  ;;  %v14324_v10 = vld [vmem:[#allocation36_spill] sm:$0xff] }
 0xc1f   :  { %7035 = vmatpush1.msra.mxu0 %v12523_v54  ;;  %7106 = vmatpush1.msra.mxu1 %v12525_v50  ;;  %v14307_v54 = vld [vmem:[#allocation39_spill] sm:$0xff]  ;;  %v14308_v50 = vld [vmem:[#allocation64_spill] sm:$0xff] }
 0xc20   :  { %7036 = vmatprep.subr.mxu0 %v12529_v15  ;;  %7107 = vmatprep.subr.mxu1 %v12531_v0 }
 0xc21   :  { %7037 = vmatpush1.msra.mxu0 %v12535_v3  ;;  %7108 = vmatpush1.msra.mxu1 %v12537_v17 }
 0xc22   :  { %7038 = vmatprep.subr.mxu0 %v12541_v29  ;;  %7109 = vmatprep.subr.mxu1 %v12543_v63 }
 0xc23   :  { %7039 = vmatpush1.msra.mxu0 %v12547_v53  ;;  %7110 = vmatpush1.msra.mxu1 %v12549_v18 }
 0xc24   :  { %7040 = vmatprep.subr.mxu0 %v12553_v5  ;;  %7111 = vmatprep.subr.mxu1 %v12555_v59 }
 0xc25   :  { %7041 = vmatpush1.msra.mxu0 %v12559_v36  ;;  %7112 = vmatpush1.msra.mxu1 %v12561_v22 }
 0xc26   :  { %7042 = vmatprep.subr.mxu0 %v12565_v30  ;;  %7113 = vmatprep.subr.mxu1 %v12567_v28 }
 0xc27   :  { %7043 = vmatpush1.msra.mxu0 %v12571_v39  ;;  %7114 = vmatpush1.msra.mxu1 %v12573_v33 }
 0xc28   :  { %7044 = vmatprep.subr.mxu0 %v12577_v51  ;;  %7115 = vmatprep.subr.mxu1 %v12579_v42 }
 0xc29   :  { %7045 = vmatpush1.msra.mxu0 %v12583_v12  ;;  %7116 = vmatpush1.msra.mxu1 %v12585_v60 }
 0xc2a   :  { %7046 = vmatprep.subr.mxu0 %v12589_v1  ;;  %7117 = vmatprep.subr.mxu1 %v12591_v57 }
 0xc2b   :  { %7047 = vmatpush1.msra.mxu0 %v14277_v45  ;;  %7118 = vmatpush1.msra.mxu1 %v14278_v40 }
 0xc2c   :  { %7048 = vmatprep.subr.mxu0 %v14279_v6  ;;  %7119 = vmatprep.subr.mxu1 %v14280_v20 }
 0xc2d   :  { %7049 = vmatpush1.msra.mxu0 %v14281_v34  ;;  %7120 = vmatpush1.msra.mxu1 %v14282_v4 }
 0xc2e   :  { %7050 = vmatprep.subr.mxu0 %v14283_v46  ;;  %7121 = vmatprep.subr.mxu1 %v14284_v56 }
 0xc2f   :  { %7051 = vmatpush1.msra.mxu0 %v14285_v26  ;;  %7122 = vmatpush1.msra.mxu1 %v14286_v31 }
 0xc30   :  { %7052 = vmatprep.subr.mxu0 %v14287_v52  ;;  %7123 = vmatprep.subr.mxu1 %v14288_v48 }
 0xc31   :  { %7053 = vmatpush1.msra.mxu0 %v14289_v37  ;;  %7124 = vmatpush1.msra.mxu1 %v14290_v32 }
 0xc32   :  { %7054 = vmatprep.subr.mxu0 %v14291_v55  ;;  %7125 = vmatprep.subr.mxu1 %v14292_v38 }
 0xc33   :  { %7055 = vmatpush1.msra.mxu0 %v14240_v49  ;;  %7126 = vmatpush1.msra.mxu1 %v14293_v16 }
 0xc34   :  { %7056 = vmatprep.subr.mxu0 %v14245_v61  ;;  %7127 = vmatprep.subr.mxu1 %v14246_v25 }
 0xc35   :  { %7057 = vmatpush1.msra.mxu0 %v12659_v13  ;;  %7128 = vmatpush1.msra.mxu1 %v14305_v35 }
 0xc36   :  { %7058 = vmatprep.subr.mxu0 %v14306_v43  ;;  %7129 = vmatprep.subr.mxu1 %v14307_v54 }
 0xc37   :  { %7059 = vmatpush1.msra.mxu0 %v14308_v50  ;;  %7130 = vmatpush1.msra.mxu1 %v14309_v8 }
 0xc38   :  { %7060 = vmatprep.subr.mxu0 %v14310_v21  ;;  %7131 = vmatprep.subr.mxu1 %v14311_v9  ;;  %v14327_v9 = vld [vmem:[#allocation28_spill] sm:$0xff] }
 0xc39   :  { %7061 = vmatpush1.msra.mxu0 %v14312_v11  ;;  %7132 = vmatpush1.msra.mxu1 %v14313_v62 }
 0xc3a   :  { %7062 = vmatprep.subr.mxu0 %v14314_v24  ;;  %7133 = vmatprep.subr.mxu1 %v14315_v19 }
 0xc3b   :  { %7063 = vmatpush1.msra.mxu0 %v14316_v47  ;;  %7134 = vmatpush1.msra.mxu1 %v14317_v44  ;;  %v14325_v47 = vld [vmem:[#allocation22_spill] sm:$0xff] }
 0xc3c   :  { %7064 = vmatprep.subr.mxu0 %v14318_v14  ;;  %7135 = vmatprep.subr.mxu1 %v14319_v7  ;;  %v14326_v14 = vld [vmem:[#allocation45_spill] sm:$0xff] }
 0xc3d   :  { %7065 = vmatpush1.msra.mxu0 %v14320_v41  ;;  %7098 = vmatprep.mubr.f32.mxu0 %v14321_v2 }
 0xc3e   :  { %7136 = vmatpush1.msra.mxu1 %v14322_v23  ;;  %7169 = vmatprep.mubr.f32.mxu1 %v14321_v2  ;;  %v14328_v2 = vld [vmem:[#allocation51_spill] sm:$0xff] }
 0xc3f   :  { %7208 = vmatprep.subr.mxu0 %v14323_v27  ;;  %7279 = vmatprep.subr.mxu1 %v14324_v10 }
 0xcde   :  { %v6926_v19 = vpop.f32.mrf.mxu0  ;;  %v6997_v41 = vpop.f32.mrf.mxu1 }
 0xcdf   :  { %v7002_v24 = vadd.f32 %v6926_v19, %v14325_v47  ;;  %v7004_v21 = vadd.f32 %v6997_v41, %v14327_v9 }
 0xce0   :  { %v6928_v44 = vpop.f32.mrf.mxu0  ;;  %v6999_v23 = vpop.f32.mrf.mxu1 }
 0xce1   :  { %v8622_v62 = vmul.f32 -1.442695, %v7002_v24  ;;  %v7003_v11 = vadd.f32 %v6928_v44, %v14326_v14  ;;  %v8624_v8 = vmul.f32 -1.442695, %v7004_v21  ;;  %v7005_v50 = vadd.f32 %v6999_v23, %v14328_v2 }
 0xce3   :  { %8880 = vpow2.f32 %v8622_v62  ;;  %v8623_v7 = vmul.f32 -1.442695, %v7003_v11 }
 0xce5   :  { %8882 = vpow2.f32 %v8623_v7 }
 0xce6   :  { %8884 = vpow2.f32 %v8624_v8 }
 0xce7   :  { %8886 = vtanh.f32 %v7005_v50  ;;  %v13027_v50 = vld [vmem:[#allocation10 + $0x1f0] sm:$0xff] }
 0xcf0   :  { %v8881_v27 = vpop.eup %8880 }
 0xcf1   :  { %v7015_v54 = vadd.f32 1.0, %v8881_v27  ;;  %v13108_v27 = vld [vmem:[#allocation10 + $0x1c8] sm:$0xff] }
 0xcf2   :  { %v8883_v10 = vpop.eup %8882 }
 0xcf3   :  { %8888 = vrcp.f32 %v7015_v54  ;;  %v7016_v19 = vadd.f32 1.0, %v8883_v10  ;;  %v8885_v24 = vpop.eup %8884  ;;  %v13024_v54 = vld [vmem:[#allocation10 + $0x1e0] sm:$0xff]  ;;  %v13111_v10 = vld [vmem:[#allocation10 + $0x1d8] sm:$0xff] }
 0xcf4   :  { %v8887_v47 = vpop.eup %8886  ;;  %v7017_v14 = vadd.f32 1.0, %v8885_v24  ;;  %v13117_v24 = vld [vmem:[#allocation10 + $0x1d0] sm:$0xff] }
 0xcf5   :  { %8890 = vrcp.f32 %v7016_v19  ;;  %v13114_v19 = vld [vmem:[#allocation10 + $0x1c0] sm:$0xff] }
 0xcf6   :  { %8892 = vrcp.f32 %v7017_v14  ;;  %v13132_v14 = vld [vmem:[#allocation10 + $0x188] sm:$0xff] }
 0xd00   :  { %v8889_v62 = vpop.eup %8888 }
 0xd01   :  { %v7026_v11 = vmul.f32 %v8889_v62, %v8887_v47  ;;  %v13120_v47 = vld [vmem:[#allocation10 + $0x1a8] sm:$0xff]  ;;  %v13123_v62 = vld [vmem:[#allocation10 + $0x1b8] sm:$0xff] }
 0xd02   :  { %v8891_v44 = vpop.eup %8890 }
 0xd03   :  { %v7025_v9 = vmul.f32 %v8891_v44, %v12947_v58  ;;  %v8893_v21 = vpop.eup %8892  ;;  %v13129_v44 = vld [vmem:[#allocation10 + $0x1b0] sm:$0xff] }
 0xd05   :  { %v13021_v7 = vadd.f32 %v7026_v11, %v7025_v9  ;;  %v13126_v11 = vld [vmem:[#allocation10 + $0x1a0] sm:$0xff]  ;;  %v13135_v9 = vld [vmem:[#allocation10 + $0x198] sm:$0xff] }
 0xd07   :  { %8894 = vtanh.f32 %v13021_v7 }
 0xd14   :  { %v8895_v8 = vpop.eup %8894 }
 0xd15   :  { %v7029_v41 = vmul.f32 %v8895_v8, %v8893_v21  ;;  %v13141_v21 = vld [vmem:[#allocation10 + $0x190] sm:$0xff]  ;;  %v13144_v8 = vld [vmem:[#allocation10 + $0x168] sm:$0xff] }
 0xd17   :  { %7099 = vmatmul.mubr.f32.vlgmr.msra.gmra.mxu0 %v7029_v41  ;;  %7170 = vmatmul.mubr.f32.vlgmr.msra.gmra.mxu1 %v7029_v41  ;;  %v13147_v41 = vld [vmem:[#allocation10 + $0x178] sm:$0xff] }
 0xd18   :  { %7209 = vmatpush1.msra.mxu0 %v13024_v54  ;;  %7280 = vmatpush1.msra.mxu1 %v13027_v50 }
 0xd19   :  { %7210 = vmatprep.subr.mxu0 %v12529_v15  ;;  %7281 = vmatprep.subr.mxu1 %v12531_v0  ;;  %v14329_v15 = vld [vmem:[#allocation39_spill] sm:$0xff]  ;;  %v14330_v0 = vld [vmem:[#allocation64_spill] sm:$0xff] }
 0xd1a   :  { %7211 = vmatpush1.msra.mxu0 %v12535_v3  ;;  %7282 = vmatpush1.msra.mxu1 %v12537_v17  ;;  %v14331_v3 = vld [vmem:[#allocation40_spill] sm:$0xff]  ;;  %v14332_v17 = vld [vmem:[#allocation83_spill] sm:$0xff] }
 0xd1b   :  { %7212 = vmatprep.subr.mxu0 %v12541_v29  ;;  %7283 = vmatprep.subr.mxu1 %v12543_v63  ;;  %v14333_v29 = vld [vmem:[#allocation33_spill] sm:$0xff]  ;;  %v14334_v63 = vld [vmem:[#allocation86_spill] sm:$0xff] }
 0xd1c   :  { %7213 = vmatpush1.msra.mxu0 %v12547_v53  ;;  %7284 = vmatpush1.msra.mxu1 %v12549_v18  ;;  %v14335_v53 = vld [vmem:[#allocation87_spill] sm:$0xff]  ;;  %v14338_v18 = vld [vmem:[#allocation92_spill] sm:$0xff] }
 0xd1d   :  { %7214 = vmatprep.subr.mxu0 %v12553_v5  ;;  %7285 = vmatprep.subr.mxu1 %v12555_v59  ;;  %v14339_v5 = vld [vmem:[#allocation93_spill] sm:$0xff]  ;;  %v14340_v59 = vld [vmem:[#allocation94_spill] sm:$0xff] }
 0xd1e   :  { %7215 = vmatpush1.msra.mxu0 %v12559_v36  ;;  %7286 = vmatpush1.msra.mxu1 %v12561_v22  ;;  %v14341_v36 = vld [vmem:[#allocation95_spill] sm:$0xff]  ;;  %v14342_v22 = vld [vmem:[#allocation96_spill] sm:$0xff] }
 0xd1f   :  { %7216 = vmatprep.subr.mxu0 %v12565_v30  ;;  %7287 = vmatprep.subr.mxu1 %v12567_v28  ;;  %v14343_v30 = vmov 0.0   ;;  %v14344_v28 = vld [vmem:[#allocation97_spill] sm:$0xff] }
 0xd20   :  { %7217 = vmatpush1.msra.mxu0 %v12571_v39  ;;  %7288 = vmatpush1.msra.mxu1 %v12573_v33  ;;  %v13092_v39 = vld [vmem:[#allocation10 + $0x1e8] sm:$0xff]  ;;  %v13095_v33 = vld [vmem:[#allocation10 + $0x1f8] sm:$0xff] }
 0xd21   :  { %7218 = vmatprep.subr.mxu0 %v12577_v51  ;;  %7289 = vmatprep.subr.mxu1 %v12579_v42  ;;  %14345 = vst [vmem:[#allocation50_spill] sm:$0xff] %v13092_v39  ;;  %14346 = vst [vmem:[#allocation72_spill] sm:$0xff] %v13095_v33  ;;  %v14347_v42 = vld [vmem:[#allocation48_spill] sm:$0xff] }
 0xd22   :  { %7219 = vmatpush1.msra.mxu0 %v12583_v12  ;;  %7290 = vmatpush1.msra.mxu1 %v12585_v60 }
 0xd23   :  { %7220 = vmatprep.subr.mxu0 %v12589_v1  ;;  %7291 = vmatprep.subr.mxu1 %v12591_v57  ;;  %v14348_v57 = vld [vmem:[#allocation54_spill] sm:$0xff] }
 0xd24   :  { %7221 = vmatpush1.msra.mxu0 %v14277_v45  ;;  %7292 = vmatpush1.msra.mxu1 %v14278_v40  ;;  %v14349_v40 = vld [vmem:[#allocation52_spill] sm:$0xff] }
 0xd25   :  { %7222 = vmatprep.subr.mxu0 %v14279_v6  ;;  %7293 = vmatprep.subr.mxu1 %v14280_v20 }
 0xd26   :  { %7223 = vmatpush1.msra.mxu0 %v14281_v34  ;;  %7294 = vmatpush1.msra.mxu1 %v14282_v4  ;;  %v14350_v4 = vld [vmem:[#allocation41_spill] sm:$0xff] }
 0xd27   :  { %7224 = vmatprep.subr.mxu0 %v14283_v46  ;;  %7295 = vmatprep.subr.mxu1 %v14284_v56 }
 0xd28   :  { %7225 = vmatpush1.msra.mxu0 %v14285_v26  ;;  %7296 = vmatpush1.msra.mxu1 %v14286_v31 }
 0xd29   :  { %7226 = vmatprep.subr.mxu0 %v14287_v52  ;;  %7297 = vmatprep.subr.mxu1 %v14288_v48 }
 0xd2a   :  { %7227 = vmatpush1.msra.mxu0 %v14289_v37  ;;  %7298 = vmatpush1.msra.mxu1 %v14290_v32 }
 0xd2b   :  { %7228 = vmatprep.subr.mxu0 %v14291_v55  ;;  %7299 = vmatprep.subr.mxu1 %v14292_v38 }
 0xd2c   :  { %7229 = vmatpush1.msra.mxu0 %v14240_v49  ;;  %7300 = vmatpush1.msra.mxu1 %v14293_v16 }
 0xd2d   :  { %7230 = vmatprep.subr.mxu0 %v14245_v61  ;;  %7301 = vmatprep.subr.mxu1 %v14246_v25  ;;  %v14336_v25 = vld [vmem:[#allocation90_spill] sm:$0xff] }
 0xd2e   :  { %7231 = vmatpush1.msra.mxu0 %v12659_v13  ;;  %7302 = vmatpush1.msra.mxu1 %v14305_v35  ;;  %v14337_v13 = vld [vmem:[#allocation91_spill] sm:$0xff] }
 0xd2f   :  { %7232 = vmatprep.subr.mxu0 %v14306_v43  ;;  %7303 = vmatprep.subr.mxu1 %v14329_v15  ;;  %v13150_v15 = vld [vmem:[#allocation10 + $0x160] sm:$0xff] }
 0xd30   :  { %7233 = vmatpush1.msra.mxu0 %v14330_v0  ;;  %7304 = vmatpush1.msra.mxu1 %v14331_v3  ;;  %v13153_v0 = vld [vmem:[#allocation10 + $0x170] sm:$0xff]  ;;  %v13156_v3 = vld [vmem:[#allocation10 + $0x148] sm:$0xff] }
 0xd31   :  { %7234 = vmatprep.subr.mxu0 %v14332_v17  ;;  %7305 = vmatprep.subr.mxu1 %v14333_v29  ;;  %v13159_v17 = vld [vmem:[#allocation10 + $0x158] sm:$0xff]  ;;  %v13162_v29 = vld [vmem:[#allocation10 + $0x140] sm:$0xff] }
 0xd32   :  { %7235 = vmatpush1.msra.mxu0 %v14334_v63  ;;  %7306 = vmatpush1.msra.mxu1 %v14335_v53  ;;  %v13165_v63 = vld [vmem:[#allocation10 + $0x150] sm:$0xff]  ;;  %v13168_v53 = vld [vmem:[#allocation10 + $0x128] sm:$0xff] }
 0xd33   :  { %7236 = vmatprep.subr.mxu0 %v14336_v25  ;;  %7307 = vmatprep.subr.mxu1 %v14337_v13  ;;  %v13171_v25 = vld [vmem:[#allocation10 + $0x138] sm:$0xff]  ;;  %v13174_v13 = vld [vmem:[#allocation10 + $0x120] sm:$0xff] }
 0xd34   :  { %7237 = vmatpush1.msra.mxu0 %v14338_v18  ;;  %7308 = vmatpush1.msra.mxu1 %v14339_v5  ;;  %v13177_v18 = vld [vmem:[#allocation10 + $0x130] sm:$0xff]  ;;  %v13180_v5 = vld [vmem:[#allocation10 + $0x108] sm:$0xff] }
 0xd35   :  { %7238 = vmatprep.subr.mxu0 %v14340_v59  ;;  %7309 = vmatprep.subr.mxu1 %v14341_v36  ;;  %v13183_v59 = vld [vmem:[#allocation10 + $0x118] sm:$0xff]  ;;  %v13186_v36 = vld [vmem:[#allocation10 + $0x100] sm:$0xff] }
 0xd36   :  { %7239 = vmatpush1.msra.mxu0 %v14342_v22  ;;  %7272 = vmatprep.mubr.f32.mxu0 %v14343_v30  ;;  %v13189_v22 = vld [vmem:[#allocation10 + $0x110] sm:$0xff] }
 0xd37   :  { %7310 = vmatpush1.msra.mxu1 %v14344_v28  ;;  %7343 = vmatprep.mubr.f32.mxu1 %v14343_v30  ;;  %v13192_v28 = vld [vmem:[#allocation10 + $0xe8] sm:$0xff] }
 0xd38   :  { %7382 = vmatprep.subr.mxu0 %v13092_v39  ;;  %7453 = vmatprep.subr.mxu1 %v13095_v33 }
 0xdd7   :  { %v7100_v51 = vpop.f32.mrf.mxu0  ;;  %v7171_v45 = vpop.f32.mrf.mxu1 }
 0xdd8   :  { %v7176_v12 = vadd.f32 %v7100_v51, %v14347_v42  ;;  %v7178_v6 = vadd.f32 %v7171_v45, %v14349_v40  ;;  %v13195_v51 = vld [vmem:[#allocation10 + $0xf8] sm:$0xff]  ;;  %v13198_v42 = vld [vmem:[#allocation10 + $0xe0] sm:$0xff] }
 0xdd9   :  { %v7102_v60 = vpop.f32.mrf.mxu0  ;;  %v7173_v20 = vpop.f32.mrf.mxu1  ;;  %v13219_v45 = vld [vmem:[#allocation10 + $0xb8] sm:$0xff]  ;;  %v13222_v40 = vld [vmem:[#allocation10 + $0xa0] sm:$0xff] }
 0xdda   :  { %v8625_v1 = vmul.f32 -1.442695, %v7176_v12  ;;  %v7177_v49 = vadd.f32 %v7102_v60, %v14348_v57  ;;  %v8627_v34 = vmul.f32 -1.442695, %v7178_v6  ;;  %v7179_v46 = vadd.f32 %v7173_v20, %v14350_v4  ;;  %v13201_v12 = vld [vmem:[#allocation10 + $0xf0] sm:$0xff]  ;;  %v13204_v60 = vld [vmem:[#allocation10 + $0xc8] sm:$0xff] }
 0xddb   :  { %v13210_v57 = vld [vmem:[#allocation10 + $0xc0] sm:$0xff]  ;;  %v13225_v6 = vld [vmem:[#allocation10 + $0xb0] sm:$0xff]  ;;  %v13228_v20 = vld [vmem:[#allocation10 + $0x88] sm:$0xff] }
 0xddc   :  { %8896 = vpow2.f32 %v8625_v1  ;;  %v8626_v61 = vmul.f32 -1.442695, %v7177_v49  ;;  %v13207_v1 = vld [vmem:[#allocation10 + $0xd8] sm:$0xff]  ;;  %v13213_v49 = vld [vmem:[#allocation10 + $0xd0] sm:$0xff]  ;;  %v13234_v4 = vld [vmem:[#allocation10 + $0x80] sm:$0xff] }
 0xdde   :  { %8898 = vpow2.f32 %v8626_v61  ;;  %v13216_v61 = vld [vmem:[#allocation10 + $0xa8] sm:$0xff] }
 0xddf   :  { %8900 = vpow2.f32 %v8627_v34  ;;  %v13231_v34 = vld [vmem:[#allocation10 + $0x98] sm:$0xff] }
 0xde0   :  { %8902 = vtanh.f32 %v7179_v46  ;;  %v13237_v46 = vld [vmem:[#allocation10 + $0x90] sm:$0xff] }
 0xde1   :  { %14351 = vst [vmem:[#allocation81_spill] sm:$0xff] %v13237_v46 }
 0xde9   :  { %v8897_v56 = vpop.eup %8896 }
 0xdea   :  { %v7189_v26 = vadd.f32 1.0, %v8897_v56  ;;  %v13240_v56 = vld [vmem:[#allocation10 + $0x68] sm:$0xff] }
 0xdeb   :  { %v8899_v31 = vpop.eup %8898  ;;  %14352 = vst [vmem:[#allocation82_spill] sm:$0xff] %v13240_v56 }
 0xdec   :  { %8904 = vrcp.f32 %v7189_v26  ;;  %v7190_v52 = vadd.f32 1.0, %v8899_v31  ;;  %v8901_v48 = vpop.eup %8900  ;;  %v13243_v26 = vld [vmem:[#allocation10 + $0x78] sm:$0xff]  ;;  %v13246_v31 = vld [vmem:[#allocation10 + $0x60] sm:$0xff] }
 0xded   :  { %v8903_v37 = vpop.eup %8902  ;;  %v7191_v16 = vadd.f32 1.0, %v8901_v48  ;;  %14353 = vst [vmem:[#allocation49_spill] sm:$0xff] %v13243_v26  ;;  %14354 = vst [vmem:[#allocation84_spill] sm:$0xff] %v13246_v31  ;;  %v13252_v48 = vld [vmem:[#allocation10 + $0x48] sm:$0xff] }
 0xdee   :  { %8906 = vrcp.f32 %v7190_v52  ;;  %v13249_v52 = vld [vmem:[#allocation10 + $0x70] sm:$0xff]  ;;  %14356 = vst [vmem:[#allocation20_spill] sm:$0xff] %v13252_v48 }
 0xdef   :  { %8908 = vrcp.f32 %v7191_v16  ;;  %14355 = vst [vmem:[#allocation25_spill] sm:$0xff] %v13249_v52  ;;  %v13267_v16 = vld [vmem:[#allocation10 + $0x38] sm:$0xff] }
 0xdf0   :  { %14361 = vst [vmem:[#allocation77_spill] sm:$0xff] %v13267_v16 }
 0xdf9   :  { %v8905_v32 = vpop.eup %8904 }
 0xdfa   :  { %v7200_v55 = vmul.f32 %v8905_v32, %v8903_v37  ;;  %v13255_v37 = vld [vmem:[#allocation10 + $0x58] sm:$0xff]  ;;  %v13258_v32 = vld [vmem:[#allocation10 + $0x40] sm:$0xff] }
 0xdfb   :  { %v8907_v38 = vpop.eup %8906  ;;  %14357 = vst [vmem:[#allocation71_spill] sm:$0xff] %v13255_v37  ;;  %14358 = vst [vmem:[#allocation67_spill] sm:$0xff] %v13258_v32 }
 0xdfc   :  { %v7199_v58 = vmul.f32 %v8907_v38, %v13021_v7  ;;  %v8909_v43 = vpop.eup %8908  ;;  %v13138_v7 = vld [vmem:[#allocation10 + $0x180] sm:$0xff]  ;;  %v13264_v38 = vld [vmem:[#allocation10 + $0x28] sm:$0xff] }
 0xdfd   :  { %14360 = vst [vmem:[#allocation62_spill] sm:$0xff] %v13264_v38 }
 0xdfe   :  { %v13103_v35 = vadd.f32 %v7200_v55, %v7199_v58  ;;  %v13261_v55 = vld [vmem:[#allocation10 + $0x50] sm:$0xff]  ;;  %v13270_v58 = vld [vmem:[#allocation10 + $0x20] sm:$0xff] }
 0xdff   :  { %14359 = vst [vmem:[#allocation68_spill] sm:$0xff] %v13261_v55  ;;  %14362 = vst [vmem:[#allocation78_spill] sm:$0xff] %v13270_v58 }
 0xe00   :  { %8910 = vtanh.f32 %v13103_v35 }
 0xe0d   :  { %v8911_v2 = vpop.eup %8910 }
 0xe0e   :  { %v7203_v23 = vmul.f32 %v8911_v2, %v8909_v43  ;;  %v13273_v43 = vld [vmem:[#allocation10 + $0x30] sm:$0xff]  ;;  %v13276_v2 = vld [vmem:[#allocation10 + $0x8] sm:$0xff] }
 0xe0f   :  { %14363 = vst [vmem:[#allocation56_spill] sm:$0xff] %v13273_v43  ;;  %14364 = vst [vmem:[#allocation34_spill] sm:$0xff] %v13276_v2 }
 0xe10   :  { %7273 = vmatmul.mubr.f32.vlgmr.msra.gmra.mxu0 %v7203_v23  ;;  %7344 = vmatmul.mubr.f32.vlgmr.msra.gmra.mxu1 %v7203_v23  ;;  %v13279_v23 = vld [vmem:[#allocation10 + $0x18] sm:$0xff] }
 0xe11   :  { %7383 = vmatpush1.msra.mxu0 %v13024_v54  ;;  %7454 = vmatpush1.msra.mxu1 %v13027_v50  ;;  %14365 = vst [vmem:[#allocation57_spill] sm:$0xff] %v13279_v23 }
 0xe12   :  { %7384 = vmatprep.subr.mxu0 %v13108_v27  ;;  %7455 = vmatprep.subr.mxu1 %v13111_v10 }
 0xe13   :  { %7385 = vmatpush1.msra.mxu0 %v13114_v19  ;;  %7456 = vmatpush1.msra.mxu1 %v13117_v24 }
 0xe14   :  { %7386 = vmatprep.subr.mxu0 %v13120_v47  ;;  %7457 = vmatprep.subr.mxu1 %v13123_v62 }
 0xe15   :  { %7387 = vmatpush1.msra.mxu0 %v13126_v11  ;;  %7458 = vmatpush1.msra.mxu1 %v13129_v44 }
 0xe16   :  { %7388 = vmatprep.subr.mxu0 %v13132_v14  ;;  %7459 = vmatprep.subr.mxu1 %v13135_v9 }
 0xe17   :  { %7389 = vmatpush1.msra.mxu0 %v13138_v7  ;;  %7460 = vmatpush1.msra.mxu1 %v13141_v21 }
 0xe18   :  { %7390 = vmatprep.subr.mxu0 %v13144_v8  ;;  %7461 = vmatprep.subr.mxu1 %v13147_v41 }
 0xe19   :  { %7391 = vmatpush1.msra.mxu0 %v13150_v15  ;;  %7462 = vmatpush1.msra.mxu1 %v13153_v0 }
 0xe1a   :  { %7392 = vmatprep.subr.mxu0 %v13156_v3  ;;  %7463 = vmatprep.subr.mxu1 %v13159_v17 }
 0xe1b   :  { %7393 = vmatpush1.msra.mxu0 %v13162_v29  ;;  %7464 = vmatpush1.msra.mxu1 %v13165_v63 }
 0xe1c   :  { %7394 = vmatprep.subr.mxu0 %v13168_v53  ;;  %7465 = vmatprep.subr.mxu1 %v13171_v25 }
 0xe1d   :  { %7395 = vmatpush1.msra.mxu0 %v13174_v13  ;;  %7466 = vmatpush1.msra.mxu1 %v13177_v18 }
 0xe1e   :  { %7396 = vmatprep.subr.mxu0 %v13180_v5  ;;  %7467 = vmatprep.subr.mxu1 %v13183_v59 }
 0xe1f   :  { %7397 = vmatpush1.msra.mxu0 %v13186_v36  ;;  %7468 = vmatpush1.msra.mxu1 %v13189_v22 }
 0xe20   :  { %7398 = vmatprep.subr.mxu0 %v13192_v28  ;;  %7469 = vmatprep.subr.mxu1 %v13195_v51 }
 0xe21   :  { %7399 = vmatpush1.msra.mxu0 %v13198_v42  ;;  %7470 = vmatpush1.msra.mxu1 %v13201_v12 }
 0xe22   :  { %7400 = vmatprep.subr.mxu0 %v13204_v60  ;;  %7471 = vmatprep.subr.mxu1 %v13207_v1 }
 0xe23   :  { %7401 = vmatpush1.msra.mxu0 %v13210_v57  ;;  %7472 = vmatpush1.msra.mxu1 %v13213_v49 }
 0xe24   :  { %7402 = vmatprep.subr.mxu0 %v13216_v61  ;;  %7473 = vmatprep.subr.mxu1 %v13219_v45 }
 0xe25   :  { %7403 = vmatpush1.msra.mxu0 %v13222_v40  ;;  %7474 = vmatpush1.msra.mxu1 %v13225_v6 }
 0xe26   :  { %7404 = vmatprep.subr.mxu0 %v13228_v20  ;;  %7475 = vmatprep.subr.mxu1 %v13231_v34 }
 0xe27   :  { %7405 = vmatpush1.msra.mxu0 %v13234_v4  ;;  %7476 = vmatpush1.msra.mxu1 %v13237_v46 }
 0xe28   :  { %7406 = vmatprep.subr.mxu0 %v13240_v56  ;;  %7477 = vmatprep.subr.mxu1 %v13243_v26 }
 0xe29   :  { %7407 = vmatpush1.msra.mxu0 %v13246_v31  ;;  %7478 = vmatpush1.msra.mxu1 %v13249_v52  ;;  %v14370_v52 = vld [vmem:[#allocation29_spill] sm:$0xff] }
 0xe2a   :  { %7408 = vmatprep.subr.mxu0 %v13252_v48  ;;  %7479 = vmatprep.subr.mxu1 %v13255_v37 }
 0xe2b   :  { %7409 = vmatpush1.msra.mxu0 %v13258_v32  ;;  %7480 = vmatpush1.msra.mxu1 %v13261_v55  ;;  %v14369_v32 = vld [vmem:[#allocation24_spill] sm:$0xff] }
 0xe2c   :  { %7410 = vmatprep.subr.mxu0 %v13264_v38  ;;  %7481 = vmatprep.subr.mxu1 %v13267_v16  ;;  %v13282_v38 = vld [vmem:[#allocation10] sm:$0xff]  ;;  %v13286_v16 = vld [vmem:[#allocation10 + $0x10] sm:$0xff] }
 0xe2d   :  { %7411 = vmatpush1.msra.mxu0 %v13270_v58  ;;  %7482 = vmatpush1.msra.mxu1 %v13273_v43  ;;  %14366 = vst [vmem:[#allocation35_spill] sm:$0xff] %v13282_v38  ;;  %14367 = vst [vmem:[#allocation59_spill] sm:$0xff] %v13286_v16  ;;  %v14368_v43 = vld [vmem:[#allocation23_spill] sm:$0xff] }
 0xe2e   :  { %7412 = vmatprep.subr.mxu0 %v13276_v2  ;;  %7483 = vmatprep.subr.mxu1 %v13279_v23 }
 0xe2f   :  { %7413 = vmatpush1.msra.mxu0 %v13282_v38  ;;  %7446 = vmatprep.mubr.f32.mxu0 %v14343_v30 }
 0xe30   :  { %7484 = vmatpush1.msra.mxu1 %v13286_v16  ;;  %7517 = vmatprep.mubr.f32.mxu1 %v14343_v30  ;;  %v14371_v30 = vld [vmem:[#allocation46_spill] sm:$0xff] }
 0xe31   :  { %7556 = vmatprep.subr.mxu0 %v13092_v39  ;;  %7627 = vmatprep.subr.mxu1 %v13095_v33 }
 0xed0   :  { %v7274_v2 = vpop.f32.mrf.mxu0  ;;  %v7345_v48 = vpop.f32.mrf.mxu1 }
 0xed1   :  { %v7350_v58 = vadd.f32 %v7274_v2, %v14368_v43  ;;  %v7352_v31 = vadd.f32 %v7345_v48, %v14370_v52 }
 0xed2   :  { %v7276_v23 = vpop.f32.mrf.mxu0  ;;  %v7347_v16 = vpop.f32.mrf.mxu1 }
 0xed3   :  { %v8628_v55 = vmul.f32 -1.442695, %v7350_v58  ;;  %v7351_v37 = vadd.f32 %v7276_v23, %v14369_v32  ;;  %v8630_v26 = vmul.f32 -1.442695, %v7352_v31  ;;  %v7353_v56 = vadd.f32 %v7347_v16, %v14371_v30  ;;  %v14376_v31 = vld [vmem:[#allocation25_spill] sm:$0xff]  ;;  %v14377_v16 = vld [vmem:[#allocation20_spill] sm:$0xff] }
 0xed4   :  { %v14378_v23 = vld [vmem:[#allocation71_spill] sm:$0xff] }
 0xed5   :  { %8912 = vpow2.f32 %v8628_v55  ;;  %v8629_v38 = vmul.f32 -1.442695, %v7351_v37 }
 0xed7   :  { %8914 = vpow2.f32 %v8629_v38 }
 0xed8   :  { %8916 = vpow2.f32 %v8630_v26 }
 0xed9   :  { %8918 = vtanh.f32 %v7353_v56  ;;  %v14375_v56 = vld [vmem:[#allocation84_spill] sm:$0xff] }
 0xee2   :  { %v8913_v39 = vpop.eup %8912 }
 0xee3   :  { %v7363_v46 = vadd.f32 1.0, %v8913_v39 }
 0xee4   :  { %v8915_v33 = vpop.eup %8914 }
 0xee5   :  { %8920 = vrcp.f32 %v7363_v46  ;;  %v7364_v43 = vadd.f32 1.0, %v8915_v33  ;;  %v8917_v58 = vpop.eup %8916  ;;  %v14372_v33 = vld [vmem:[#allocation81_spill] sm:$0xff] }
 0xee6   :  { %v8919_v32 = vpop.eup %8918  ;;  %v7365_v2 = vadd.f32 1.0, %v8917_v58  ;;  %v14374_v46 = vld [vmem:[#allocation49_spill] sm:$0xff]  ;;  %v14380_v58 = vld [vmem:[#allocation68_spill] sm:$0xff] }
 0xee7   :  { %8922 = vrcp.f32 %v7364_v43  ;;  %v14379_v43 = vld [vmem:[#allocation67_spill] sm:$0xff] }
 0xee8   :  { %8924 = vrcp.f32 %v7365_v2  ;;  %v14385_v2 = vld [vmem:[#allocation34_spill] sm:$0xff] }
 0xef2   :  { %v8921_v55 = vpop.eup %8920 }
 0xef3   :  { %v7374_v37 = vmul.f32 %v8921_v55, %v8919_v32  ;;  %v14381_v32 = vld [vmem:[#allocation62_spill] sm:$0xff]  ;;  %v14382_v55 = vld [vmem:[#allocation77_spill] sm:$0xff] }
 0xef4   :  { %v8923_v38 = vpop.eup %8922 }
 0xef5   :  { %v7373_v52 = vmul.f32 %v8923_v38, %v13103_v35  ;;  %v8925_v30 = vpop.eup %8924  ;;  %v14373_v35 = vld [vmem:[#allocation82_spill] sm:$0xff]  ;;  %v14384_v38 = vld [vmem:[#allocation56_spill] sm:$0xff] }
 0xef7   :  { %v13297_v48 = vadd.f32 %v7374_v37, %v7373_v52  ;;  %v14383_v37 = vld [vmem:[#allocation78_spill] sm:$0xff]  ;;  %v14386_v52 = vld [vmem:[#allocation57_spill] sm:$0xff] }
 0xef9   :  { %8926 = vtanh.f32 %v13297_v48 }
 0xf06   :  { %v8927_v39 = vpop.eup %8926 }
 0xf07   :  { %v7377_v26 = vmul.f32 %v8927_v39, %v8925_v30  ;;  %v14387_v30 = vld [vmem:[#allocation35_spill] sm:$0xff]  ;;  %v14388_v39 = vmov 0.0  }
 0xf09   :  { %7447 = vmatmul.mubr.f32.vlgmr.msra.gmra.mxu0 %v7377_v26  ;;  %7518 = vmatmul.mubr.f32.vlgmr.msra.gmra.mxu1 %v7377_v26  ;;  %v14389_v26 = vld [vmem:[#allocation59_spill] sm:$0xff] }
 0xf0a   :  { %7557 = vmatpush1.msra.mxu0 %v13024_v54  ;;  %7628 = vmatpush1.msra.mxu1 %v13027_v50 }
 0xf0b   :  { %7558 = vmatprep.subr.mxu0 %v13108_v27  ;;  %7629 = vmatprep.subr.mxu1 %v13111_v10 }
 0xf0c   :  { %7559 = vmatpush1.msra.mxu0 %v13114_v19  ;;  %7630 = vmatpush1.msra.mxu1 %v13117_v24 }
 0xf0d   :  { %7560 = vmatprep.subr.mxu0 %v13120_v47  ;;  %7631 = vmatprep.subr.mxu1 %v13123_v62 }
 0xf0e   :  { %7561 = vmatpush1.msra.mxu0 %v13126_v11  ;;  %7632 = vmatpush1.msra.mxu1 %v13129_v44 }
 0xf0f   :  { %7562 = vmatprep.subr.mxu0 %v13132_v14  ;;  %7633 = vmatprep.subr.mxu1 %v13135_v9 }
 0xf10   :  { %7563 = vmatpush1.msra.mxu0 %v13138_v7  ;;  %7634 = vmatpush1.msra.mxu1 %v13141_v21 }
 0xf11   :  { %7564 = vmatprep.subr.mxu0 %v13144_v8  ;;  %7635 = vmatprep.subr.mxu1 %v13147_v41 }
 0xf12   :  { %7565 = vmatpush1.msra.mxu0 %v13150_v15  ;;  %7636 = vmatpush1.msra.mxu1 %v13153_v0 }
 0xf13   :  { %7566 = vmatprep.subr.mxu0 %v13156_v3  ;;  %7637 = vmatprep.subr.mxu1 %v13159_v17 }
 0xf14   :  { %7567 = vmatpush1.msra.mxu0 %v13162_v29  ;;  %7638 = vmatpush1.msra.mxu1 %v13165_v63 }
 0xf15   :  { %7568 = vmatprep.subr.mxu0 %v13168_v53  ;;  %7639 = vmatprep.subr.mxu1 %v13171_v25 }
 0xf16   :  { %7569 = vmatpush1.msra.mxu0 %v13174_v13  ;;  %7640 = vmatpush1.msra.mxu1 %v13177_v18 }
 0xf17   :  { %7570 = vmatprep.subr.mxu0 %v13180_v5  ;;  %7641 = vmatprep.subr.mxu1 %v13183_v59 }
 0xf18   :  { %7571 = vmatpush1.msra.mxu0 %v13186_v36  ;;  %7642 = vmatpush1.msra.mxu1 %v13189_v22 }
 0xf19   :  { %7572 = vmatprep.subr.mxu0 %v13192_v28  ;;  %7643 = vmatprep.subr.mxu1 %v13195_v51 }
 0xf1a   :  { %7573 = vmatpush1.msra.mxu0 %v13198_v42  ;;  %7644 = vmatpush1.msra.mxu1 %v13201_v12 }
 0xf1b   :  { %7574 = vmatprep.subr.mxu0 %v13204_v60  ;;  %7645 = vmatprep.subr.mxu1 %v13207_v1 }
 0xf1c   :  { %7575 = vmatpush1.msra.mxu0 %v13210_v57  ;;  %7646 = vmatpush1.msra.mxu1 %v13213_v49 }
 0xf1d   :  { %7576 = vmatprep.subr.mxu0 %v13216_v61  ;;  %7647 = vmatprep.subr.mxu1 %v13219_v45 }
 0xf1e   :  { %7577 = vmatpush1.msra.mxu0 %v13222_v40  ;;  %7648 = vmatpush1.msra.mxu1 %v13225_v6 }
 0xf1f   :  { %7578 = vmatprep.subr.mxu0 %v13228_v20  ;;  %7649 = vmatprep.subr.mxu1 %v13231_v34 }
 0xf20   :  { %7579 = vmatpush1.msra.mxu0 %v13234_v4  ;;  %7650 = vmatpush1.msra.mxu1 %v14372_v33 }
 0xf21   :  { %7580 = vmatprep.subr.mxu0 %v14373_v35  ;;  %7651 = vmatprep.subr.mxu1 %v14374_v46 }
 0xf22   :  { %7581 = vmatpush1.msra.mxu0 %v14375_v56  ;;  %7652 = vmatpush1.msra.mxu1 %v14376_v31  ;;  %v14394_v31 = vld [vmem:[#allocation26_spill] sm:$0xff] }
 0xf23   :  { %7582 = vmatprep.subr.mxu0 %v14377_v16  ;;  %7653 = vmatprep.subr.mxu1 %v14378_v23 }
 0xf24   :  { %7583 = vmatpush1.msra.mxu0 %v14379_v43  ;;  %7654 = vmatpush1.msra.mxu1 %v14380_v58  ;;  %v14390_v58 = vld [vmem:[#allocation50_spill] sm:$0xff] }
 0xf25   :  { %7584 = vmatprep.subr.mxu0 %v14381_v32  ;;  %7655 = vmatprep.subr.mxu1 %v14382_v55  ;;  %v14391_v32 = vld [vmem:[#allocation72_spill] sm:$0xff] }
 0xf26   :  { %7585 = vmatpush1.msra.mxu0 %v14383_v37  ;;  %7656 = vmatpush1.msra.mxu1 %v14384_v38  ;;  %v14392_v37 = vld [vmem:[#allocation65_spill] sm:$0xff] }
 0xf27   :  { %7586 = vmatprep.subr.mxu0 %v14385_v2  ;;  %7657 = vmatprep.subr.mxu1 %v14386_v52  ;;  %v14393_v2 = vld [vmem:[#allocation88_spill] sm:$0xff] }
 0xf28   :  { %7587 = vmatpush1.msra.mxu0 %v14387_v30  ;;  %7620 = vmatprep.mubr.f32.mxu0 %v14388_v39 }
 0xf29   :  { %7658 = vmatpush1.msra.mxu1 %v14389_v26  ;;  %7691 = vmatprep.mubr.f32.mxu1 %v14388_v39  ;;  %v14395_v39 = vld [vmem:[#allocation89_spill] sm:$0xff] }
 0xf2a   :  { %7730 = vmatprep.subr.mxu0 %v14390_v58  ;;  %7801 = vmatprep.subr.mxu1 %v14391_v32 }
 0xfc9   :  { %v7448_v55 = vpop.f32.mrf.mxu0  ;;  %v7519_v30 = vpop.f32.mrf.mxu1 }
 0xfca   :  { %v7524_v43 = vadd.f32 %v7448_v55, %v14392_v37  ;;  %v7526_v56 = vadd.f32 %v7519_v30, %v14394_v31 }
 0xfcb   :  { %v7450_v38 = vpop.f32.mrf.mxu0  ;;  %v7521_v26 = vpop.f32.mrf.mxu1 }
 0xfcc   :  { %v8631_v23 = vmul.f32 -1.442695, %v7524_v43  ;;  %v7525_v16 = vadd.f32 %v7450_v38, %v14393_v2  ;;  %v8633_v46 = vmul.f32 -1.442695, %v7526_v56  ;;  %v7527_v35 = vadd.f32 %v7521_v26, %v14395_v39 }
 0xfce   :  { %8928 = vpow2.f32 %v8631_v23  ;;  %v8632_v52 = vmul.f32 -1.442695, %v7525_v16 }
 0xfd0   :  { %8930 = vpow2.f32 %v8632_v52 }
 0xfd1   :  { %8932 = vpow2.f32 %v8633_v46 }
 0xfd2   :  { %8934 = vtanh.f32 %v7527_v35 }
 0xfdb   :  { %v8929_v58 = vpop.eup %8928 }
 0xfdc   :  { %v7537_v33 = vadd.f32 1.0, %v8929_v58  ;;  %v8024_v58 = vld [vmem:[#allocation13 + $0x1e0] sm:$0xff] }
 0xfdd   :  { %v8931_v32 = vpop.eup %8930 }
 0xfde   :  { %8936 = vrcp.f32 %v7537_v33  ;;  %v7538_v55 = vadd.f32 1.0, %v8931_v32  ;;  %v8933_v43 = vpop.eup %8932  ;;  %v8026_v32 = vld [vmem:[#allocation13 + $0x1f0] sm:$0xff] }
 0xfdf   :  { %v8935_v37 = vpop.eup %8934  ;;  %v7539_v2 = vadd.f32 1.0, %v8933_v43  ;;  %v8023_v43 = vld [vmem:[#allocation13 + $0x1d8] sm:$0xff] }
 0xfe0   :  { %8938 = vrcp.f32 %v7538_v55  ;;  %v8021_v55 = vld [vmem:[#allocation13 + $0x1c8] sm:$0xff] }
 0xfe1   :  { %8940 = vrcp.f32 %v7539_v2  ;;  %v8016_v2 = vld [vmem:[#allocation13 + $0x1a0] sm:$0xff] }
 0xfeb   :  { %v8937_v23 = vpop.eup %8936 }
 0xfec   :  { %v7548_v16 = vmul.f32 %v8937_v23, %v8935_v37  ;;  %v8020_v37 = vld [vmem:[#allocation13 + $0x1c0] sm:$0xff]  ;;  %v8022_v23 = vld [vmem:[#allocation13 + $0x1d0] sm:$0xff] }
 0xfed   :  { %v8939_v38 = vpop.eup %8938 }
 0xfee   :  { %v7547_v31 = vmul.f32 %v8939_v38, %v13297_v48  ;;  %v8941_v56 = vpop.eup %8940  ;;  %v8019_v38 = vld [vmem:[#allocation13 + $0x1b8] sm:$0xff] }
 0xff0   :  { %v13371_v52 = vadd.f32 %v7548_v16, %v7547_v31  ;;  %v8017_v16 = vld [vmem:[#allocation13 + $0x1a8] sm:$0xff]  ;;  %v8018_v31 = vld [vmem:[#allocation13 + $0x1b0] sm:$0xff] }
 0xff2   :  { %8942 = vtanh.f32 %v13371_v52 }
 0xfff   :  { %v8943_v46 = vpop.eup %8942 }
0x1000   :  { %v7551_v30 = vmul.f32 %v8943_v46, %v8941_v56  ;;  %v8015_v56 = vld [vmem:[#allocation13 + $0x198] sm:$0xff]  ;;  %v8012_v46 = vld [vmem:[#allocation13 + $0x180] sm:$0xff] }
0x1002   :  { %7621 = vmatmul.mubr.f32.vlgmr.msra.gmra.mxu0 %v7551_v30  ;;  %7692 = vmatmul.mubr.f32.vlgmr.msra.gmra.mxu1 %v7551_v30  ;;  %v8014_v30 = vld [vmem:[#allocation13 + $0x190] sm:$0xff] }
0x1003   :  { %7731 = vmatpush1.msra.mxu0 %v13024_v54  ;;  %7802 = vmatpush1.msra.mxu1 %v13027_v50  ;;  %v14396_v54 = vld [vmem:[#allocation81_spill] sm:$0xff]  ;;  %v14397_v50 = vld [vmem:[#allocation82_spill] sm:$0xff] }
0x1004   :  { %7732 = vmatprep.subr.mxu0 %v13108_v27  ;;  %7803 = vmatprep.subr.mxu1 %v13111_v10  ;;  %v14398_v27 = vld [vmem:[#allocation49_spill] sm:$0xff]  ;;  %v14399_v10 = vld [vmem:[#allocation84_spill] sm:$0xff] }
0x1005   :  { %7733 = vmatpush1.msra.mxu0 %v13114_v19  ;;  %7804 = vmatpush1.msra.mxu1 %v13117_v24  ;;  %v14400_v19 = vld [vmem:[#allocation25_spill] sm:$0xff]  ;;  %v14401_v24 = vld [vmem:[#allocation20_spill] sm:$0xff] }
0x1006   :  { %7734 = vmatprep.subr.mxu0 %v13120_v47  ;;  %7805 = vmatprep.subr.mxu1 %v13123_v62  ;;  %v14402_v47 = vld [vmem:[#allocation71_spill] sm:$0xff] }
0x1007   :  { %7735 = vmatpush1.msra.mxu0 %v13126_v11  ;;  %7806 = vmatpush1.msra.mxu1 %v13129_v44  ;;  %v14403_v62 = vld [vmem:[#allocation67_spill] sm:$0xff]  ;;  %v14404_v11 = vld [vmem:[#allocation68_spill] sm:$0xff]  ;;  %v14405_v44 = vld [vmem:[#allocation62_spill] sm:$0xff] }
0x1008   :  { %7736 = vmatprep.subr.mxu0 %v13132_v14  ;;  %7807 = vmatprep.subr.mxu1 %v13135_v9  ;;  %v14406_v14 = vld [vmem:[#allocation77_spill] sm:$0xff]  ;;  %v14407_v9 = vld [vmem:[#allocation78_spill] sm:$0xff] }
0x1009   :  { %7737 = vmatpush1.msra.mxu0 %v13138_v7  ;;  %7808 = vmatpush1.msra.mxu1 %v13141_v21  ;;  %v14408_v7 = vld [vmem:[#allocation56_spill] sm:$0xff]  ;;  %v14409_v21 = vld [vmem:[#allocation34_spill] sm:$0xff] }
0x100a   :  { %7738 = vmatprep.subr.mxu0 %v13144_v8  ;;  %7809 = vmatprep.subr.mxu1 %v13147_v41  ;;  %v14410_v8 = vld [vmem:[#allocation57_spill] sm:$0xff]  ;;  %v14411_v41 = vld [vmem:[#allocation35_spill] sm:$0xff] }
0x100b   :  { %7739 = vmatpush1.msra.mxu0 %v13150_v15  ;;  %7810 = vmatpush1.msra.mxu1 %v13153_v0  ;;  %v14412_v15 = vld [vmem:[#allocation59_spill] sm:$0xff]  ;;  %v14413_v0 = vmov 0.0  }
0x100c   :  { %7740 = vmatprep.subr.mxu0 %v13156_v3  ;;  %7811 = vmatprep.subr.mxu1 %v13159_v17  ;;  %v8025_v3 = vld [vmem:[#allocation13 + $0x1e8] sm:$0xff]  ;;  %v8027_v17 = vld [vmem:[#allocation13 + $0x1f8] sm:$0xff] }
0x100d   :  { %7741 = vmatpush1.msra.mxu0 %v13162_v29  ;;  %7812 = vmatpush1.msra.mxu1 %v13165_v63  ;;  %v14414_v63 = vld [vmem:[#allocation70_spill] sm:$0xff] }
0x100e   :  { %7742 = vmatprep.subr.mxu0 %v13168_v53  ;;  %7813 = vmatprep.subr.mxu1 %v13171_v25 }
0x100f   :  { %7743 = vmatpush1.msra.mxu0 %v13174_v13  ;;  %7814 = vmatpush1.msra.mxu1 %v13177_v18  ;;  %v14415_v18 = vld [vmem:[#allocation80_spill] sm:$0xff] }
0x1010   :  { %7744 = vmatprep.subr.mxu0 %v13180_v5  ;;  %7815 = vmatprep.subr.mxu1 %v13183_v59 }
0x1011   :  { %7745 = vmatpush1.msra.mxu0 %v13186_v36  ;;  %7816 = vmatpush1.msra.mxu1 %v13189_v22  ;;  %v14416_v22 = vld [vmem:[#allocation79_spill] sm:$0xff] }
0x1012   :  { %7746 = vmatprep.subr.mxu0 %v13192_v28  ;;  %7817 = vmatprep.subr.mxu1 %v13195_v51 }
0x1013   :  { %7747 = vmatpush1.msra.mxu0 %v13198_v42  ;;  %7818 = vmatpush1.msra.mxu1 %v13201_v12  ;;  %v14417_v12 = vld [vmem:[#allocation37_spill] sm:$0xff] }
0x1014   :  { %7748 = vmatprep.subr.mxu0 %v13204_v60  ;;  %7819 = vmatprep.subr.mxu1 %v13207_v1 }
0x1015   :  { %7749 = vmatpush1.msra.mxu0 %v13210_v57  ;;  %7820 = vmatpush1.msra.mxu1 %v13213_v49 }
0x1016   :  { %7750 = vmatprep.subr.mxu0 %v13216_v61  ;;  %7821 = vmatprep.subr.mxu1 %v13219_v45 }
0x1017   :  { %7751 = vmatpush1.msra.mxu0 %v13222_v40  ;;  %7822 = vmatpush1.msra.mxu1 %v13225_v6 }
0x1018   :  { %7752 = vmatprep.subr.mxu0 %v13228_v20  ;;  %7823 = vmatprep.subr.mxu1 %v13231_v34 }
0x1019   :  { %7753 = vmatpush1.msra.mxu0 %v13234_v4  ;;  %7824 = vmatpush1.msra.mxu1 %v14396_v54  ;;  %v8009_v54 = vld [vmem:[#allocation13 + $0x168] sm:$0xff] }
0x101a   :  { %7754 = vmatprep.subr.mxu0 %v14397_v50  ;;  %7825 = vmatprep.subr.mxu1 %v14398_v27  ;;  %v8011_v50 = vld [vmem:[#allocation13 + $0x178] sm:$0xff]  ;;  %v8008_v27 = vld [vmem:[#allocation13 + $0x160] sm:$0xff] }
0x101b   :  { %7755 = vmatpush1.msra.mxu0 %v14399_v10  ;;  %7826 = vmatpush1.msra.mxu1 %v14400_v19  ;;  %v8010_v10 = vld [vmem:[#allocation13 + $0x170] sm:$0xff]  ;;  %v8005_v19 = vld [vmem:[#allocation13 + $0x148] sm:$0xff] }
0x101c   :  { %7756 = vmatprep.subr.mxu0 %v14401_v24  ;;  %7827 = vmatprep.subr.mxu1 %v14402_v47  ;;  %v8007_v24 = vld [vmem:[#allocation13 + $0x158] sm:$0xff]  ;;  %v8004_v47 = vld [vmem:[#allocation13 + $0x140] sm:$0xff] }
0x101d   :  { %7757 = vmatpush1.msra.mxu0 %v14403_v62  ;;  %7828 = vmatpush1.msra.mxu1 %v14404_v11  ;;  %v8006_v62 = vld [vmem:[#allocation13 + $0x150] sm:$0xff]  ;;  %v8001_v11 = vld [vmem:[#allocation13 + $0x128] sm:$0xff] }
0x101e   :  { %7758 = vmatprep.subr.mxu0 %v14405_v44  ;;  %7829 = vmatprep.subr.mxu1 %v14406_v14  ;;  %v8003_v44 = vld [vmem:[#allocation13 + $0x138] sm:$0xff]  ;;  %v8000_v14 = vld [vmem:[#allocation13 + $0x120] sm:$0xff] }
0x101f   :  { %7759 = vmatpush1.msra.mxu0 %v14407_v9  ;;  %7830 = vmatpush1.msra.mxu1 %v14408_v7  ;;  %v8002_v9 = vld [vmem:[#allocation13 + $0x130] sm:$0xff]  ;;  %v7997_v7 = vld [vmem:[#allocation13 + $0x108] sm:$0xff] }
0x1020   :  { %7760 = vmatprep.subr.mxu0 %v14409_v21  ;;  %7831 = vmatprep.subr.mxu1 %v14410_v8  ;;  %v7999_v21 = vld [vmem:[#allocation13 + $0x118] sm:$0xff]  ;;  %v7996_v8 = vld [vmem:[#allocation13 + $0x100] sm:$0xff] }
0x1021   :  { %7761 = vmatpush1.msra.mxu0 %v14411_v41  ;;  %7832 = vmatpush1.msra.mxu1 %v14412_v15  ;;  %v7998_v41 = vld [vmem:[#allocation13 + $0x110] sm:$0xff]  ;;  %v7993_v15 = vld [vmem:[#allocation13 + $0xe8] sm:$0xff] }
0x1022   :  { %7794 = vmatprep.mubr.f32.mxu0 %v14413_v0  ;;  %7865 = vmatprep.mubr.f32.mxu1 %v14413_v0 }
0x1023   :  { %8028 = vmatprep.subr.mxu0 %v8025_v3  ;;  %8099 = vmatprep.subr.mxu1 %v8027_v17  ;;  %v7995_v3 = vld [vmem:[#allocation13 + $0xf8] sm:$0xff]  ;;  %v7992_v17 = vld [vmem:[#allocation13 + $0xe0] sm:$0xff] }
0x10c2   :  { %v7622_v29 = vpop.f32.mrf.mxu0  ;;  %v7693_v36 = vpop.f32.mrf.mxu1 }
0x10c3   :  { %v7698_v53 = vadd.f32 %v7622_v29, %v14414_v63  ;;  %v7700_v28 = vadd.f32 %v7693_v36, %v14416_v22  ;;  %v7994_v29 = vld [vmem:[#allocation13 + $0xf0] sm:$0xff]  ;;  %v7989_v63 = vld [vmem:[#allocation13 + $0xc8] sm:$0xff] }
0x10c4   :  { %v7624_v25 = vpop.f32.mrf.mxu0  ;;  %v7695_v51 = vpop.f32.mrf.mxu1  ;;  %v7986_v36 = vld [vmem:[#allocation13 + $0xb0] sm:$0xff]  ;;  %v7981_v22 = vld [vmem:[#allocation13 + $0x88] sm:$0xff] }
0x10c5   :  { %v8634_v13 = vmul.f32 -1.442695, %v7698_v53  ;;  %v7699_v5 = vadd.f32 %v7624_v25, %v14415_v18  ;;  %v8636_v42 = vmul.f32 -1.442695, %v7700_v28  ;;  %v7701_v60 = vadd.f32 %v7695_v51, %v14417_v12  ;;  %v7991_v53 = vld [vmem:[#allocation13 + $0xd8] sm:$0xff]  ;;  %v7988_v25 = vld [vmem:[#allocation13 + $0xc0] sm:$0xff] }
0x10c6   :  { %v7985_v18 = vld [vmem:[#allocation13 + $0xa8] sm:$0xff]  ;;  %v7983_v28 = vld [vmem:[#allocation13 + $0x98] sm:$0xff]  ;;  %v7980_v51 = vld [vmem:[#allocation13 + $0x80] sm:$0xff] }
0x10c7   :  { %8944 = vpow2.f32 %v8634_v13  ;;  %v8635_v59 = vmul.f32 -1.442695, %v7699_v5  ;;  %v7990_v13 = vld [vmem:[#allocation13 + $0xd0] sm:$0xff]  ;;  %v7987_v5 = vld [vmem:[#allocation13 + $0xb8] sm:$0xff]  ;;  %v7977_v12 = vld [vmem:[#allocation13 + $0x68] sm:$0xff] }
0x10c9   :  { %8946 = vpow2.f32 %v8635_v59  ;;  %v7984_v59 = vld [vmem:[#allocation13 + $0xa0] sm:$0xff] }
0x10ca   :  { %8948 = vpow2.f32 %v8636_v42  ;;  %v7982_v42 = vld [vmem:[#allocation13 + $0x90] sm:$0xff] }
0x10cb   :  { %8950 = vtanh.f32 %v7701_v60  ;;  %v7979_v60 = vld [vmem:[#allocation13 + $0x78] sm:$0xff] }
0x10d4   :  { %v8945_v1 = vpop.eup %8944 }
0x10d5   :  { %v7711_v57 = vadd.f32 1.0, %v8945_v1  ;;  %v7976_v1 = vld [vmem:[#allocation13 + $0x60] sm:$0xff] }
0x10d6   :  { %v8947_v49 = vpop.eup %8946 }
0x10d7   :  { %8952 = vrcp.f32 %v7711_v57  ;;  %v7712_v61 = vadd.f32 1.0, %v8947_v49  ;;  %v8949_v45 = vpop.eup %8948  ;;  %v7978_v57 = vld [vmem:[#allocation13 + $0x70] sm:$0xff]  ;;  %v7973_v49 = vld [vmem:[#allocation13 + $0x48] sm:$0xff] }
0x10d8   :  { %v8951_v40 = vpop.eup %8950  ;;  %v7713_v4 = vadd.f32 1.0, %v8949_v45  ;;  %v7972_v45 = vld [vmem:[#allocation13 + $0x40] sm:$0xff] }
0x10d9   :  { %8954 = vrcp.f32 %v7712_v61  ;;  %v7975_v61 = vld [vmem:[#allocation13 + $0x58] sm:$0xff] }
0x10da   :  { %8956 = vrcp.f32 %v7713_v4  ;;  %v7970_v4 = vld [vmem:[#allocation13 + $0x30] sm:$0xff] }
0x10e4   :  { %v8953_v6 = vpop.eup %8952 }
0x10e5   :  { %v7722_v20 = vmul.f32 %v8953_v6, %v8951_v40  ;;  %v7974_v40 = vld [vmem:[#allocation13 + $0x50] sm:$0xff]  ;;  %v7969_v6 = vld [vmem:[#allocation13 + $0x28] sm:$0xff] }
0x10e6   :  { %v8955_v34 = vpop.eup %8954 }
0x10e7   :  { %v7721_v48 = vmul.f32 %v8955_v34, %v13371_v52  ;;  %v8957_v35 = vpop.eup %8956  ;;  %v8013_v52 = vld [vmem:[#allocation13 + $0x188] sm:$0xff]  ;;  %v7968_v34 = vld [vmem:[#allocation13 + $0x20] sm:$0xff] }
0x10e9   :  { %v13443_v33 = vadd.f32 %v7722_v20, %v7721_v48  ;;  %v7971_v20 = vld [vmem:[#allocation13 + $0x38] sm:$0xff]  ;;  %v7965_v48 = vld [vmem:[#allocation13 + $0x8] sm:$0xff] }
0x10eb   :  { %8958 = vtanh.f32 %v13443_v33 }
0x10f8   :  { %v8959_v39 = vpop.eup %8958 }
0x10f9   :  { %v7725_v26 = vmul.f32 %v8959_v39, %v8957_v35  ;;  %v7967_v35 = vld [vmem:[#allocation13 + $0x18] sm:$0xff]  ;;  %v7964_v39 = vld [vmem:[#allocation13] sm:$0xff] }
0x10fb   :  { %7795 = vmatmul.mubr.f32.vlgmr.msra.gmra.mxu0 %v7725_v26  ;;  %7866 = vmatmul.mubr.f32.vlgmr.msra.gmra.mxu1 %v7725_v26  ;;  %v7966_v26 = vld [vmem:[#allocation13 + $0x10] sm:$0xff] }
0x10fc   :  { %8029 = vmatpush1.msra.mxu0 %v8024_v58  ;;  %8100 = vmatpush1.msra.mxu1 %v8026_v32  ;;  %v7961_v58 = vld [vmem:[#allocation11 + $0x1e8] sm:$0xff]  ;;  %v7963_v32 = vld [vmem:[#allocation11 + $0x1f8] sm:$0xff] }
0x10fd   :  { %8030 = vmatprep.subr.mxu0 %v8021_v55  ;;  %8101 = vmatprep.subr.mxu1 %v8023_v43  ;;  %v7960_v55 = vld [vmem:[#allocation11 + $0x1e0] sm:$0xff]  ;;  %v7962_v43 = vld [vmem:[#allocation11 + $0x1f0] sm:$0xff] }
0x10fe   :  { %8031 = vmatpush1.msra.mxu0 %v8020_v37  ;;  %8102 = vmatpush1.msra.mxu1 %v8022_v23  ;;  %v14418_v37 = vld [vmem:[#allocation85_spill] sm:$0xff] }
0x10ff   :  { %8032 = vmatprep.subr.mxu0 %v8017_v16  ;;  %8103 = vmatprep.subr.mxu1 %v8019_v38  ;;  %v7957_v23 = vld [vmem:[#allocation11 + $0x1c8] sm:$0xff]  ;;  %v7959_v16 = vld [vmem:[#allocation11 + $0x1d8] sm:$0xff]  ;;  %v7956_v38 = vld [vmem:[#allocation11 + $0x1c0] sm:$0xff] }
0x1100   :  { %8033 = vmatpush1.msra.mxu0 %v8016_v2  ;;  %8104 = vmatpush1.msra.mxu1 %v8018_v31  ;;  %v7958_v2 = vld [vmem:[#allocation11 + $0x1d0] sm:$0xff]  ;;  %v7953_v31 = vld [vmem:[#allocation11 + $0x1a8] sm:$0xff] }
0x1101   :  { %8034 = vmatprep.subr.mxu0 %v8013_v52  ;;  %8105 = vmatprep.subr.mxu1 %v8015_v56  ;;  %v7955_v52 = vld [vmem:[#allocation11 + $0x1b8] sm:$0xff]  ;;  %v7952_v56 = vld [vmem:[#allocation11 + $0x1a0] sm:$0xff] }
0x1102   :  { %8035 = vmatpush1.msra.mxu0 %v8012_v46  ;;  %8106 = vmatpush1.msra.mxu1 %v8014_v30  ;;  %v7954_v46 = vld [vmem:[#allocation11 + $0x1b0] sm:$0xff]  ;;  %v7949_v30 = vld [vmem:[#allocation11 + $0x188] sm:$0xff] }
0x1103   :  { %8036 = vmatprep.subr.mxu0 %v8009_v54  ;;  %8107 = vmatprep.subr.mxu1 %v8011_v50  ;;  %v7951_v54 = vld [vmem:[#allocation11 + $0x198] sm:$0xff]  ;;  %v7948_v50 = vld [vmem:[#allocation11 + $0x180] sm:$0xff] }
0x1104   :  { %8037 = vmatpush1.msra.mxu0 %v8008_v27  ;;  %8108 = vmatpush1.msra.mxu1 %v8010_v10  ;;  %v7950_v27 = vld [vmem:[#allocation11 + $0x190] sm:$0xff]  ;;  %v7945_v10 = vld [vmem:[#allocation11 + $0x168] sm:$0xff] }
0x1105   :  { %8038 = vmatprep.subr.mxu0 %v8005_v19  ;;  %8109 = vmatprep.subr.mxu1 %v8007_v24  ;;  %v7947_v19 = vld [vmem:[#allocation11 + $0x178] sm:$0xff]  ;;  %v7944_v24 = vld [vmem:[#allocation11 + $0x160] sm:$0xff] }
0x1106   :  { %8039 = vmatpush1.msra.mxu0 %v8004_v47  ;;  %8110 = vmatpush1.msra.mxu1 %v8006_v62  ;;  %v7946_v47 = vld [vmem:[#allocation11 + $0x170] sm:$0xff]  ;;  %v7941_v62 = vld [vmem:[#allocation11 + $0x148] sm:$0xff] }
0x1107   :  { %8040 = vmatprep.subr.mxu0 %v8001_v11  ;;  %8111 = vmatprep.subr.mxu1 %v8003_v44  ;;  %v7943_v11 = vld [vmem:[#allocation11 + $0x158] sm:$0xff]  ;;  %v7940_v44 = vld [vmem:[#allocation11 + $0x140] sm:$0xff] }
0x1108   :  { %8041 = vmatpush1.msra.mxu0 %v8000_v14  ;;  %8112 = vmatpush1.msra.mxu1 %v8002_v9  ;;  %v7942_v14 = vld [vmem:[#allocation11 + $0x150] sm:$0xff]  ;;  %v7937_v9 = vld [vmem:[#allocation11 + $0x128] sm:$0xff] }
0x1109   :  { %8042 = vmatprep.subr.mxu0 %v7997_v7  ;;  %8113 = vmatprep.subr.mxu1 %v7999_v21  ;;  %v7939_v7 = vld [vmem:[#allocation11 + $0x138] sm:$0xff]  ;;  %v7936_v21 = vld [vmem:[#allocation11 + $0x120] sm:$0xff] }
0x110a   :  { %8043 = vmatpush1.msra.mxu0 %v7996_v8  ;;  %8114 = vmatpush1.msra.mxu1 %v7998_v41  ;;  %v7938_v8 = vld [vmem:[#allocation11 + $0x130] sm:$0xff]  ;;  %v7933_v41 = vld [vmem:[#allocation11 + $0x108] sm:$0xff] }
0x110b   :  { %8044 = vmatprep.subr.mxu0 %v7993_v15  ;;  %8115 = vmatprep.subr.mxu1 %v7995_v3  ;;  %v7935_v15 = vld [vmem:[#allocation11 + $0x118] sm:$0xff]  ;;  %v7932_v3 = vld [vmem:[#allocation11 + $0x100] sm:$0xff] }
0x110c   :  { %8045 = vmatpush1.msra.mxu0 %v7992_v17  ;;  %8116 = vmatpush1.msra.mxu1 %v7994_v29  ;;  %v7934_v17 = vld [vmem:[#allocation11 + $0x110] sm:$0xff]  ;;  %v7929_v29 = vld [vmem:[#allocation11 + $0xe8] sm:$0xff] }
0x110d   :  { %8046 = vmatprep.subr.mxu0 %v7989_v63  ;;  %8117 = vmatprep.subr.mxu1 %v7991_v53  ;;  %v7931_v63 = vld [vmem:[#allocation11 + $0xf8] sm:$0xff]  ;;  %v7928_v53 = vld [vmem:[#allocation11 + $0xe0] sm:$0xff] }
0x110e   :  { %8047 = vmatpush1.msra.mxu0 %v7988_v25  ;;  %8118 = vmatpush1.msra.mxu1 %v7990_v13  ;;  %v7930_v25 = vld [vmem:[#allocation11 + $0xf0] sm:$0xff]  ;;  %v7925_v13 = vld [vmem:[#allocation11 + $0xc8] sm:$0xff] }
0x110f   :  { %8048 = vmatprep.subr.mxu0 %v7985_v18  ;;  %8119 = vmatprep.subr.mxu1 %v7987_v5  ;;  %v7927_v18 = vld [vmem:[#allocation11 + $0xd8] sm:$0xff]  ;;  %v7924_v5 = vld [vmem:[#allocation11 + $0xc0] sm:$0xff] }
0x1110   :  { %8049 = vmatpush1.msra.mxu0 %v7984_v59  ;;  %8120 = vmatpush1.msra.mxu1 %v7986_v36  ;;  %v7926_v59 = vld [vmem:[#allocation11 + $0xd0] sm:$0xff]  ;;  %v7921_v36 = vld [vmem:[#allocation11 + $0xa8] sm:$0xff] }
0x1111   :  { %8050 = vmatprep.subr.mxu0 %v7981_v22  ;;  %8121 = vmatprep.subr.mxu1 %v7983_v28  ;;  %v7923_v22 = vld [vmem:[#allocation11 + $0xb8] sm:$0xff]  ;;  %v7920_v28 = vld [vmem:[#allocation11 + $0xa0] sm:$0xff] }
0x1112   :  { %8051 = vmatpush1.msra.mxu0 %v7980_v51  ;;  %8122 = vmatpush1.msra.mxu1 %v7982_v42  ;;  %v7922_v51 = vld [vmem:[#allocation11 + $0xb0] sm:$0xff]  ;;  %v7917_v42 = vld [vmem:[#allocation11 + $0x88] sm:$0xff] }
0x1113   :  { %8052 = vmatprep.subr.mxu0 %v7977_v12  ;;  %8123 = vmatprep.subr.mxu1 %v7979_v60  ;;  %v7919_v12 = vld [vmem:[#allocation11 + $0x98] sm:$0xff]  ;;  %v7916_v60 = vld [vmem:[#allocation11 + $0x80] sm:$0xff] }
0x1114   :  { %8053 = vmatpush1.msra.mxu0 %v7976_v1  ;;  %8124 = vmatpush1.msra.mxu1 %v7978_v57  ;;  %v7918_v1 = vld [vmem:[#allocation11 + $0x90] sm:$0xff]  ;;  %v7913_v57 = vld [vmem:[#allocation11 + $0x68] sm:$0xff] }
0x1115   :  { %8054 = vmatprep.subr.mxu0 %v7973_v49  ;;  %8125 = vmatprep.subr.mxu1 %v7975_v61  ;;  %v7915_v49 = vld [vmem:[#allocation11 + $0x78] sm:$0xff]  ;;  %v7912_v61 = vld [vmem:[#allocation11 + $0x60] sm:$0xff] }
0x1116   :  { %8055 = vmatpush1.msra.mxu0 %v7972_v45  ;;  %8126 = vmatpush1.msra.mxu1 %v7974_v40  ;;  %v7914_v45 = vld [vmem:[#allocation11 + $0x70] sm:$0xff]  ;;  %v7909_v40 = vld [vmem:[#allocation11 + $0x48] sm:$0xff] }
0x1117   :  { %8056 = vmatprep.subr.mxu0 %v7969_v6  ;;  %8127 = vmatprep.subr.mxu1 %v7971_v20  ;;  %v7911_v6 = vld [vmem:[#allocation11 + $0x58] sm:$0xff]  ;;  %v7908_v20 = vld [vmem:[#allocation11 + $0x40] sm:$0xff] }
0x1118   :  { %8057 = vmatpush1.msra.mxu0 %v7968_v34  ;;  %8128 = vmatpush1.msra.mxu1 %v7970_v4  ;;  %v7910_v34 = vld [vmem:[#allocation11 + $0x50] sm:$0xff]  ;;  %v7905_v4 = vld [vmem:[#allocation11 + $0x28] sm:$0xff] }
0x1119   :  { %8058 = vmatprep.subr.mxu0 %v7965_v48  ;;  %8129 = vmatprep.subr.mxu1 %v7967_v35  ;;  %v7907_v48 = vld [vmem:[#allocation11 + $0x38] sm:$0xff]  ;;  %v7904_v35 = vld [vmem:[#allocation11 + $0x20] sm:$0xff] }
0x111a   :  { %8059 = vmatpush1.msra.mxu0 %v7964_v39  ;;  %8092 = vmatprep.mubr.f32.mxu0 %v14413_v0  ;;  %v7906_v39 = vld [vmem:[#allocation11 + $0x30] sm:$0xff] }
0x111b   :  { %8130 = vmatpush1.msra.mxu1 %v7966_v26  ;;  %8163 = vmatprep.mubr.f32.mxu1 %v14413_v0  ;;  %v7901_v26 = vld [vmem:[#allocation11 + $0x8] sm:$0xff] }
0x111c   :  { %8093 = vmatmul.mubr.f32.vlgmr.msra.gmra.mxu0 %v14418_v37  ;;  %8164 = vmatmul.mubr.f32.vlgmr.msra.gmra.mxu1 %v14418_v37  ;;  %v8378_v37 = vld [vmem:[%s13562_s13 + $0x78] sm:$0xff] }
0x111d   :  { %8170 = vmatprep.subr.mxu0 %v7961_v58  ;;  %8241 = vmatprep.subr.mxu1 %v7963_v32  ;;  %v7903_v58 = vld [vmem:[#allocation11 + $0x18] sm:$0xff]  ;;  %v7900_v32 = vld [vmem:[#allocation11] sm:$0xff] }
0x111e   :  { %8171 = vmatpush1.msra.mxu0 %v7960_v55  ;;  %8242 = vmatpush1.msra.mxu1 %v7962_v43  ;;  %v7902_v55 = vld [vmem:[#allocation11 + $0x10] sm:$0xff]  ;;  %v14419_v43 = vld [vmem:[#allocation63_spill] sm:$0xff] }
0x111f   :  { %8172 = vmatprep.subr.mxu0 %v7957_v23  ;;  %8243 = vmatprep.subr.mxu1 %v7959_v16  ;;  %v8377_v23 = vld [vmem:[%s13562_s13 + $0x70] sm:$0xff]  ;;  %v8376_v16 = vld [vmem:[%s13562_s13 + $0x68] sm:$0xff] }
0x1120   :  { %8173 = vmatpush1.msra.mxu0 %v7956_v38  ;;  %8244 = vmatpush1.msra.mxu1 %v7958_v2  ;;  %v8375_v38 = vld [vmem:[%s13562_s13 + $0x60] sm:$0xff]  ;;  %v8374_v2 = vld [vmem:[%s13562_s13 + $0x58] sm:$0xff] }
0x1121   :  { %8174 = vmatprep.subr.mxu0 %v7953_v31  ;;  %8245 = vmatprep.subr.mxu1 %v7955_v52  ;;  %v8373_v31 = vld [vmem:[%s13562_s13 + $0x50] sm:$0xff]  ;;  %v8372_v52 = vld [vmem:[%s13562_s13 + $0x48] sm:$0xff] }
0x1122   :  { %8175 = vmatpush1.msra.mxu0 %v7952_v56  ;;  %8246 = vmatpush1.msra.mxu1 %v7954_v46  ;;  %v8371_v56 = vld [vmem:[%s13562_s13 + $0x40] sm:$0xff]  ;;  %v8370_v46 = vld [vmem:[%s13562_s13 + $0x38] sm:$0xff] }
0x1123   :  { %8176 = vmatprep.subr.mxu0 %v7949_v30  ;;  %8247 = vmatprep.subr.mxu1 %v7951_v54  ;;  %v8369_v30 = vld [vmem:[%s13562_s13 + $0x30] sm:$0xff]  ;;  %v8368_v54 = vld [vmem:[%s13562_s13 + $0x28] sm:$0xff] }
0x1124   :  { %8177 = vmatpush1.msra.mxu0 %v7948_v50  ;;  %8248 = vmatpush1.msra.mxu1 %v7950_v27  ;;  %v8367_v50 = vld [vmem:[%s13562_s13 + $0x20] sm:$0xff]  ;;  %v8366_v27 = vld [vmem:[%s13562_s13 + $0x18] sm:$0xff] }
0x1125   :  { %8178 = vmatprep.subr.mxu0 %v7945_v10  ;;  %8249 = vmatprep.subr.mxu1 %v7947_v19  ;;  %v8365_v10 = vld [vmem:[%s13562_s13 + $0x10] sm:$0xff]  ;;  %v8364_v19 = vld [vmem:[%s13562_s13 + $0x8] sm:$0xff] }
0x1126   :  { %8179 = vmatpush1.msra.mxu0 %v7944_v24  ;;  %8250 = vmatpush1.msra.mxu1 %v7946_v47  ;;  %v8363_v24 = vld [vmem:[%s13562_s13] sm:$0xff] }
0x1127   :  { %8180 = vmatprep.subr.mxu0 %v7941_v62  ;;  %8251 = vmatprep.subr.mxu1 %v7943_v11  ;;  %v14420_v62 = vld [vmem:[#allocation30_spill] sm:$0xff] }
0x1128   :  { %8181 = vmatpush1.msra.mxu0 %v7940_v44  ;;  %8252 = vmatpush1.msra.mxu1 %v7942_v14 }
0x1129   :  { %8182 = vmatprep.subr.mxu0 %v7937_v9  ;;  %8253 = vmatprep.subr.mxu1 %v7939_v7  ;;  %v14421_v9 = vld [vmem:[#allocation53_spill] sm:$0xff] }
0x112a   :  { %8183 = vmatpush1.msra.mxu0 %v7936_v21  ;;  %8254 = vmatpush1.msra.mxu1 %v7938_v8 }
0x112b   :  { %8184 = vmatprep.subr.mxu0 %v7933_v41  ;;  %8255 = vmatprep.subr.mxu1 %v7935_v15  ;;  %v14422_v41 = vld [vmem:[#allocation47_spill] sm:$0xff] }
0x112c   :  { %8185 = vmatpush1.msra.mxu0 %v7932_v3  ;;  %8256 = vmatpush1.msra.mxu1 %v7934_v17 }
0x112d   :  { %8186 = vmatprep.subr.mxu0 %v7929_v29  ;;  %8257 = vmatprep.subr.mxu1 %v7931_v63  ;;  %v14423_v29 = vld [vmem:[#allocation69_spill] sm:$0xff] }
0x112e   :  { %8187 = vmatpush1.msra.mxu0 %v7928_v53  ;;  %8258 = vmatpush1.msra.mxu1 %v7930_v25 }
0x112f   :  { %8188 = vmatprep.subr.mxu0 %v7925_v13  ;;  %8259 = vmatprep.subr.mxu1 %v7927_v18 }
0x1130   :  { %8189 = vmatpush1.msra.mxu0 %v7924_v5  ;;  %8260 = vmatpush1.msra.mxu1 %v7926_v59 }
0x1131   :  { %8190 = vmatprep.subr.mxu0 %v7921_v36  ;;  %8261 = vmatprep.subr.mxu1 %v7923_v22 }
0x1132   :  { %8191 = vmatpush1.msra.mxu0 %v7920_v28  ;;  %8262 = vmatpush1.msra.mxu1 %v7922_v51 }
0x1133   :  { %8192 = vmatprep.subr.mxu0 %v7917_v42  ;;  %8263 = vmatprep.subr.mxu1 %v7919_v12 }
0x1134   :  { %8193 = vmatpush1.msra.mxu0 %v7916_v60  ;;  %8264 = vmatpush1.msra.mxu1 %v7918_v1 }
0x1135   :  { %8194 = vmatprep.subr.mxu0 %v7913_v57  ;;  %8265 = vmatprep.subr.mxu1 %v7915_v49 }
0x1136   :  { %8195 = vmatpush1.msra.mxu0 %v7912_v61  ;;  %8266 = vmatpush1.msra.mxu1 %v7914_v45  ;;  %v8312_v61 = vld [vmem:[%s13561_s12] sm:$0xf] }
0x1137   :  { %8196 = vmatprep.subr.mxu0 %v7909_v40  ;;  %8267 = vmatprep.subr.mxu1 %v7911_v6  ;;  %v14424_v40 = vld [vmem:[#allocation58_spill] sm:$0xff] }
0x1138   :  { %8197 = vmatpush1.msra.mxu0 %v7908_v20  ;;  %8268 = vmatpush1.msra.mxu1 %v7910_v34  ;;  %v8317_v6 = vrot.slane %v8312_v61, %v14424_v40 }
0x1139   :  { %8198 = vmatprep.subr.mxu0 %v7905_v4  ;;  %8269 = vmatprep.subr.mxu1 %v7907_v48  ;;  %v14425_v48 = vld [vmem:[#allocation61_spill] sm:$0xff] }
0x113a   :  { %8199 = vmatpush1.msra.mxu0 %v7904_v35  ;;  %8270 = vmatpush1.msra.mxu1 %v7906_v39  ;;  %v8321_v35 = vrot.slane %v8312_v61, %v14425_v48 }
0x113b   :  { %8200 = vmatprep.subr.mxu0 %v7901_v26  ;;  %8271 = vmatprep.subr.mxu1 %v7903_v58 }
0x113c   :  { %8201 = vmatpush1.msra.mxu0 %v7900_v32  ;;  %8234 = vmatprep.mubr.f32.mxu0 %v14413_v0 }
0x113d   :  { %8272 = vmatpush1.msra.mxu1 %v7902_v55  ;;  %8305 = vmatprep.mubr.f32.mxu1 %v14413_v0 }
0x113e   :  { %8235 = vmatmul.mubr.f32.vlgmr.msra.gmra.mxu0 %v14419_v43  ;;  %8306 = vmatmul.mubr.f32.vlgmr.msra.gmra.mxu1 %v14419_v43 }
0x113f   :  { %8666 = vmatprep.subr.mxu0 %v14413_v0  ;;  %8701 = vmatprep.subr.mxu1 %v14413_v0 }
0x1140   :  { %8667 = vmatpush3.msra.mxu0 %v8378_v37  ;;  %8698 = vmatprep.mubr.msk.f32.mxu0 %vm9428_vm2, %v14413_v0 }
0x1141   :  { %8668 = vmatprep.subr.mxu0 %v14413_v0  ;;  %8705 = vmatprep.mubr.msk.f32.mxu1 %vm9428_vm2, %v14413_v0 }
0x1142   :  { %8669 = vmatpush3.msra.mxu0 %v8377_v23 }
0x1143   :  { %8670 = vmatprep.subr.mxu0 %v14413_v0 }
0x1144   :  { %8671 = vmatpush3.msra.mxu0 %v8376_v16  ;;  %v14426_v16 = vld [vmem:[#allocation74_spill] sm:$0xff] }
0x1145   :  { %8672 = vmatprep.subr.mxu0 %v14413_v0 }
0x1146   :  { %8673 = vmatpush3.msra.mxu0 %v8375_v38  ;;  %v8325_v38 = vrot.slane %v8312_v61, %v14426_v16 }
0x1147   :  { %8674 = vmatprep.subr.mxu0 %v14413_v0 }
0x1148   :  { %8675 = vmatpush3.msra.mxu0 %v8374_v2 }
0x1149   :  { %8676 = vmatprep.subr.mxu0 %v14413_v0 }
0x114a   :  { %8677 = vmatpush3.msra.mxu0 %v8373_v31 }
0x114b   :  { %8678 = vmatprep.subr.mxu0 %v14413_v0 }
0x114c   :  { %8679 = vmatpush3.msra.mxu0 %v8372_v52 }
0x114d   :  { %8680 = vmatprep.subr.mxu0 %v14413_v0 }
0x114e   :  { %8681 = vmatpush3.msra.mxu0 %v8371_v56  ;;  %v14427_v56 = vld [vmem:[#allocation76_spill] sm:$0xff] }
0x114f   :  { %8682 = vmatprep.subr.mxu0 %v14413_v0 }
0x1150   :  { %8683 = vmatpush3.msra.mxu0 %v8370_v46  ;;  %v8329_v46 = vrot.slane %v8312_v61, %v14427_v56 }
0x1151   :  { %8684 = vmatprep.subr.mxu0 %v14413_v0 }
0x1152   :  { %8685 = vmatpush3.msra.mxu0 %v8369_v30 }
0x1153   :  { %8686 = vmatprep.subr.mxu0 %v14413_v0 }
0x1154   :  { %8687 = vmatpush3.msra.mxu0 %v8368_v54 }
0x1155   :  { %8688 = vmatprep.subr.mxu0 %v14413_v0 }
0x1156   :  { %8689 = vmatpush3.msra.mxu0 %v8367_v50 }
0x1157   :  { %8690 = vmatprep.subr.mxu0 %v14413_v0 }
0x1158   :  { %8691 = vmatpush3.msra.mxu0 %v8366_v27 }
0x1159   :  { %8692 = vmatprep.subr.mxu0 %v14413_v0 }
0x115a   :  { %8693 = vmatpush3.msra.mxu0 %v8365_v10 }
0x115b   :  { %8694 = vmatprep.subr.mxu0 %v14413_v0 }
0x115c   :  { %8695 = vmatpush3.msra.mxu0 %v8364_v19 }
0x115d   :  { %8696 = vmatprep.subr.mxu0 %v14413_v0 }
0x115e   :  { %8697 = vmatpush3.msra.mxu0 %v8363_v24 }
0x11bb   :  { %v7796_v47 = vpop.f32.mrf.mxu0  ;;  %v7867_v8 = vpop.f32.mrf.mxu1 }
0x11bc   :  { %v7872_v11 = vadd.f32 %v7796_v47, %v14420_v62  ;;  %v7874_v15 = vadd.f32 %v7867_v8, %v14422_v41 }
0x11bd   :  { %v7798_v44 = vpop.f32.mrf.mxu0  ;;  %v7869_v3 = vpop.f32.mrf.mxu1 }
0x11be   :  { %v8637_v14 = vmul.f32 -1.442695, %v7872_v11  ;;  %v7873_v7 = vadd.f32 %v7798_v44, %v14421_v9  ;;  %v8639_v17 = vmul.f32 -1.442695, %v7874_v15  ;;  %v7875_v63 = vadd.f32 %v7869_v3, %v14423_v29  ;;  %v8458_v3 = vld [vmem:[%s13564_s15 + $0x8] sm:$0xff] }
0x11bf   :  { %8702 = vmatpush3.msra.mxu1 %v8458_v3  ;;  %v8643_v29 = vld [vmem:[%s13563_s14] ss:$0 sm:$0xff] }
0x11c0   :  { %8960 = vpow2.f32 %v8637_v14  ;;  %v8638_v21 = vmul.f32 -1.442695, %v7873_v7  ;;  %8703 = vmatprep.subr.mxu1 %v14413_v0 }
0x11c2   :  { %8962 = vpow2.f32 %v8638_v21 }
0x11c3   :  { %8964 = vpow2.f32 %v8639_v17  ;;  %v8457_v17 = vld [vmem:[%s13564_s15] sm:$0xff]  ;;  %s8548_s15 = sshll.u32 %s9429_s26, 4  ;;  %s8549_s15 = int_to_ptr.vmem [resolvable:$true] %s8548_s15 }
0x11c4   :  { %8966 = vtanh.f32 %v7875_v63  ;;  %8704 = vmatpush3.msra.mxu1 %v8457_v17  ;;  %s9388_s9 = scalar_lea.vmem %s8549_s15, 32  ;;  %p9393_p8 = scmp.lt.s32.totalorder %s8549_s15, %s8549_s15 }
0x11c5   :  { %p9389_p7 = scmp.ne.s32.totalorder %s8549_s15, %s9388_s9  ;;  %p9394_p9 = scmp.lt.s32.totalorder %s9388_s9, %s9388_s9 }
0x11c7   :  { %p9395_p10 = por %p9394_p9, %p9393_p8 }
0x11c9   :  { %p9396_p11 = pnand %p9395_p10, %p9389_p7 }
0x11cd   :  { %v8961_v53 = vpop.eup %8960 }
0x11ce   :  { %v7885_v25 = vadd.f32 1.0, %v8961_v53 }
0x11cf   :  { %v8963_v13 = vpop.eup %8962 }
0x11d0   :  { %8968 = vrcp.f32 %v7885_v25  ;;  %v7886_v18 = vadd.f32 1.0, %v8963_v13  ;;  %v8965_v5 = vpop.eup %8964 }
0x11d1   :  { %v8967_v59 = vpop.eup %8966  ;;  %v7887_v51 = vadd.f32 1.0, %v8965_v5 }
0x11d2   :  { %8970 = vrcp.f32 %v7886_v18  ;;  %v8644_v18 = vld [vmem:[%s13565_s16] ss:$0 sm:$0xff] }
0x11d3   :  { %8972 = vrcp.f32 %v7887_v51 }
0x11dc   :  { %v8094_v49 = vpop.f32.mrf.mxu0  ;;  %v8165_v34 = vpop.f32.mrf.mxu1 }
0x11dd   :  { %v8969_v36 = vpop.eup %8968 }
0x11de   :  { %v7896_v22 = vmul.f32 %v8969_v36, %v8967_v59  ;;  %v8096_v45 = vpop.f32.mrf.mxu0  ;;  %v8167_v58 = vpop.f32.mrf.mxu1 }
0x11df   :  { %v8971_v28 = vpop.eup %8970 }
0x11e0   :  { %v7895_v42 = vmul.f32 %v8971_v28, %v13443_v33  ;;  %v8973_v60 = vpop.eup %8972 }
0x11e2   :  { %v7897_v12 = vadd.f32 %v7896_v22, %v7895_v42 }
0x11e4   :  { %8974 = vtanh.f32 %v7897_v12 }
0x11f1   :  { %v8975_v1 = vpop.eup %8974 }
0x11f2   :  { %v7899_v57 = vmul.f32 %v8975_v1, %v8973_v60 }
0x11fe   :  { %v8236_v20 = vpop.f32.mrf.mxu0  ;;  %v8307_v43 = vpop.f32.mrf.mxu1 }
0x11ff   :  { %v8237_v4 = vadd.f32 %v8236_v20, %v8094_v49  ;;  %v8308_v23 = vadd.f32 %v8307_v43, %v8165_v34 }
0x1200   :  { %v8238_v33 = vpop.f32.mrf.mxu0  ;;  %v8309_v2 = vpop.f32.mrf.mxu1 }
0x1201   :  { %v8334_v39 = vadd.f32 %v8317_v6, %v8237_v4  ;;  %v8239_v26 = vadd.f32 %v8238_v33, %v8096_v45  ;;  %v8336_v31 = vadd.f32 %v8325_v38, %v8308_v23  ;;  %v8310_v52 = vadd.f32 %v8309_v2, %v8167_v58 }
0x1203   :  { %v8640_v32 = vmul.f32 -1.442695, %v8334_v39  ;;  %v8335_v55 = vadd.f32 %v8321_v35, %v8239_v26  ;;  %v8642_v30 = vmul.f32 -1.442695, %v8336_v31  ;;  %v8337_v50 = vadd.f32 %v8329_v46, %v8310_v52 }
0x1205   :  { %8976 = vpow2.f32 %v8640_v32  ;;  %v8641_v37 = vmul.f32 -1.442695, %v8335_v55 }
0x1207   :  { %8978 = vpow2.f32 %v8641_v37 }
0x1208   :  { %8980 = vpow2.f32 %v8642_v30 }
0x1212   :  { %v8977_v54 = vpop.eup %8976 }
0x1213   :  { %v8347_v27 = vadd.f32 1.0, %v8977_v54 }
0x1214   :  { %v8979_v10 = vpop.eup %8978 }
0x1215   :  { %8982 = vrcp.f32 %v8347_v27  ;;  %v8348_v19 = vadd.f32 1.0, %v8979_v10  ;;  %v8981_v24 = vpop.eup %8980 }
0x1216   :  { %8984 = vtanh.f32 %v8337_v50  ;;  %v8349_v44 = vadd.f32 1.0, %v8981_v24 }
0x1217   :  { %8986 = vrcp.f32 %v8348_v19 }
0x1218   :  { %8988 = vrcp.f32 %v8349_v44 }
0x1222   :  { %v8983_v47 = vpop.eup %8982 }
0x1223   :  { %v8985_v62 = vpop.eup %8984 }
0x1224   :  { %v8987_v11 = vpop.eup %8986  ;;  %v8358_v9 = vmul.f32 %v8985_v62, %v8983_v47 }
0x1225   :  { %v8357_v14 = vmul.f32 0.0, %v8987_v11  ;;  %v8989_v21 = vpop.eup %8988 }
0x1227   :  { %v8359_v7 = vadd.f32 %v8358_v9, %v8357_v14 }
0x1229   :  { %8990 = vtanh.f32 %v8359_v7 }
0x1236   :  { %v8991_v8 = vpop.eup %8990 }
0x1237   :  { %v8361_v41 = vmul.f32 %v8991_v8, %v8989_v21 }
0x1239   :  { %v8362_v15 = vadd.f32 %v8361_v41, %v7899_v57 }
0x123b   :  { %8699 = vmatmul.mubr.f32.vlgmr.msra.gmra.mxu0 %v8362_v15 }
0x12fb   :  { %v8452_v63 = vpop.f32.mrf.mxu0 }
0x12fc   :  { %v8453_v53 = vadd.f32 %v8643_v29, %v8452_v63 }
0x12fd   :  { %v8700_v25 = vpop.f32.mrf.mxu0 }
0x12fe   :  { %v8456_v13 = vmax.f32 %v8453_v53, 0.0 }
0x1300   :  { %8706 = vmatmul.mubr.msk.f32.vlgmr.msra.gmra.mxu1 %vm8466_vm3, %v8456_v13 }
0x13c0   :  { %v8536_v5 = vpop.f32.mrf.mxu1 }
0x13c1   :  { %v8537_v0 = vadd.f32 %v8644_v18, %v8536_v5 }
0x13c2   :  { %v8707_v59 = vpop.f32.mrf.mxu1 }
0x13c3   :  { %8541 = vst.msk [vmem:[#allocation14] sm:$0x3] %vm8540_vm4, %v8537_v0 }
0x13c4   :  { %9399 = shalt.err (!%p9396_p11)
}
0x13c5   :  { %8551 = dma.vmem_to_hbm [thread:$0]  %s8549_s15, 32, %s13566_s17, [#allocation4]  }
0x13c6   :  { %9416 = dma.done.wait [#allocation4], 32  }
0x13c7   :  { %9417 = vsyncadd [#allocation4], 4294967264 }
0x13c8   :  { %8555 = vsyncpa [#allocation3], 1 }
0x13c9   :  { %8556 = vsyncpa [#allocation6], 1 }
0x13ca   :  { %8557 = vsyncpa [#allocation9], 1 }
0x13cb   :  { %8558 = vsyncpa [#allocation12], 1 }
0x13cc   :  { %8559 = vsyncpa [#allocation4], 1 }

</bundles_post_ra>
